<compile_context>
chip_gen: v6e
topology: v6e:2x2x1
jax: 0.10.0
libtpu: 0.0.40
codegen_flags: <defaults>
</compile_context>

<pallas_src>
import functools

import jax
import jax.numpy as jnp
from jax.experimental import pallas as pl
from jax.experimental.pallas import tpu as pltpu

EPS = 1e-5


def _basic_block_kernel(xq_ref, xs_ref, w1_ref, g1_ref, b1_ref,
                        w2_ref, g2_ref, b2_ref, o_ref, pad_ref,
                        *, stride, N, Ho, Wo, Cin, Cout, pad_lo, identity):
    f32 = jnp.float32
    HW = Ho * Wo
    inv_cnt = 1.0 / float(N * HW)

    # ------------------------------------------------------------------ conv1
    # xq_ref is the spatially padded input, channel-major.  For stride==2 the
    # wrapper already stacked the 4 (row,col)-parity sub-grids along the
    # channel axis, so every tap below is a plain unit-stride window.
    taps = []
    for ky in range(3):
        for kx in range(3):
            if stride == 1:
                blk, oy, ox = 0, ky, kx
            else:
                blk = (ky % 2) * 2 + (kx % 2)
                oy, ox = ky // 2, kx // 2
            taps.append(xq_ref[:, blk * Cin:(blk + 1) * Cin,
                               oy:oy + Ho, ox:ox + Wo])          # (N, Cin, Ho, Wo)
    # Fused im2col slab: contraction axis k = tap*Cin + ci, lane axis = Ho*Wo.
    slab1 = jnp.concatenate(taps, axis=1).reshape(N, 9 * Cin, HW)

    # One MXU matmul per sample (N is tiny & static here); operands stay in
    # their input dtype, accumulation in f32.
    w1 = w1_ref[...]                                             # (Cout, 9*Cin)
    y1 = jnp.stack(
        [jnp.dot(w1, slab1[n], preferred_element_type=f32) for n in range(N)],
        axis=0)                                                  # (N, Cout, HW) f32

    # -------------------------------------------------- bn1 (one pass) + relu
    s1 = jnp.sum(y1, axis=(0, 2), keepdims=True)                 # (1, Cout, 1)
    ss1 = jnp.sum(y1 * y1, axis=(0, 2), keepdims=True)
    mean1 = s1 * inv_cnt
    var1 = ss1 * inv_cnt - mean1 * mean1
    scale1 = g1_ref[...].astype(f32) * jax.lax.rsqrt(var1 + EPS)
    shift1 = b1_ref[...].astype(f32) - mean1 * scale1
    y1 = jnp.maximum(y1 * scale1 + shift1, 0.0)                  # (N, Cout, HW)

    # ---------------------------------- spatial zero-pad via VMEM scratch ----
    # (NOTE: only the 1-pixel halo strictly needs zeroing; a single immediate
    #  zero-fill of the scratch keeps the store pattern simple and robust.)
    Hpad, Wpad = Ho + 2, Wo + 2
    cdt = pad_ref.dtype
    pad_ref[...] = jnp.zeros((N, Cout, Hpad, Wpad), cdt)
    pad_ref[:, :, 1:Ho + 1, 1:Wo + 1] = y1.reshape(N, Cout, Ho, Wo).astype(cdt)

    # ------------------------------------------------------------------ conv2
    taps2 = [pad_ref[:, :, ky:ky + Ho, kx:kx + Wo]
             for ky in range(3) for kx in range(3)]
    slab2 = jnp.concatenate(taps2, axis=1).reshape(N, 9 * Cout, HW)
    w2 = w2_ref[...]                                             # (Cout, 9*Cout)
    y2 = jnp.stack(
        [jnp.dot(w2, slab2[n], preferred_element_type=f32) for n in range(N)],
        axis=0)                                                  # (N, Cout, HW) f32

    # ---------------------------------------------- bn2 + shortcut add + relu
    s2 = jnp.sum(y2, axis=(0, 2), keepdims=True)
    ss2 = jnp.sum(y2 * y2, axis=(0, 2), keepdims=True)
    mean2 = s2 * inv_cnt
    var2 = ss2 * inv_cnt - mean2 * mean2
    scale2 = g2_ref[...].astype(f32) * jax.lax.rsqrt(var2 + EPS)
    shift2 = b2_ref[...].astype(f32) - mean2 * scale2
    y2 = y2 * scale2 + shift2

    sc = xs_ref[...].astype(f32)                                 # (N, Cs, HW)
    if identity:
        out = y2 + sc
    else:
        # Option-A shortcut: the (unpadded) subsampled input is added into the
        # middle Cin channels; the zero channel-padding never leaves the wrapper.
        mid = y2[:, pad_lo:pad_lo + Cin, :] + sc
        out = jax.lax.dynamic_update_slice(y2, mid, (0, pad_lo, 0))

    o_ref[...] = jnp.maximum(out, 0.0).astype(o_ref.dtype)


def basic_block_cifar(x_nchw, params, *, stride=1):
    """Forward of BasicBlockCifar. x_nchw: (N, Cin, H, W) -> (N, Cout, Ho, Wo)."""
    if stride not in (1, 2):
        raise ValueError("only stride 1 or 2 is supported")
    N, Cin, H, W = x_nchw.shape
    w1, g1, b1 = params["w1"], params["g1"], params["b1"]
    w2, g2, b2 = params["w2"], params["g2"], params["b2"]
    Cout = w1.shape[-1]
    Ho = (H - 1) // stride + 1
    Wo = (W - 1) // stride + 1
    HW = Ho * Wo
    Hp, Wp = H + 2, W + 2
    itemsize = x_nchw.dtype.itemsize

    # Spatial pad for conv1; keep NCHW (channel-major) so the spatial axis stays
    # the dense lane axis inside the kernel.
    xp = jnp.pad(x_nchw, ((0, 0), (0, 0), (1, 1), (1, 1)))        # (N, Cin, Hp, Wp)
    if stride == 1:
        xq = xp
    else:
        assert Hp % 2 == 0 and Wp % 2 == 0, "stride-2 path assumes even H, W"
        Hq, Wq = Hp // 2, Wp // 2
        # Extract the 4 stride-2 parity sub-grids ONCE (wrapper side, cheap XLA)
        # so that the kernel only does unit-stride slices per tap.
        xq = (xp.reshape(N, Cin, Hq, 2, Wq, 2)
                .transpose(0, 3, 5, 1, 2, 4)
                .reshape(N, 4 * Cin, Hq, Wq))

    downsample = (stride != 1) or (Cin != Cout)
    if downsample:
        pad_lo = Cout // 4
        assert 2 * pad_lo + Cin == Cout, "option-A shortcut channel mismatch"
        xs = x_nchw[:, :, ::2, ::2]
        assert xs.shape[2] == Ho and xs.shape[3] == Wo
        xs = xs.reshape(N, Cin, HW)         # unpadded; kernel adds into mid channels
    else:
        pad_lo = 0
        xs = x_nchw.reshape(N, Cin, HW)

    # Weights as a single im2col matrix per conv (Cout, 9*C); BN params as
    # broadcast-ready (1, Cout, 1).
    w1m = jnp.transpose(w1.reshape(9 * Cin, Cout))                # (Cout, 9*Cin)
    w2m = jnp.transpose(w2.reshape(9 * Cout, Cout))               # (Cout, 9*Cout)
    g1c = g1.reshape(1, Cout, 1)
    b1c = b1.reshape(1, Cout, 1)
    g2c = g2.reshape(1, Cout, 1)
    b2c = b2.reshape(1, Cout, 1)

    kernel = functools.partial(
        _basic_block_kernel, stride=stride, N=N, Ho=Ho, Wo=Wo,
        Cin=Cin, Cout=Cout, pad_lo=pad_lo, identity=not downsample)

    flops = int(2 * N * HW * 9 * Cin * Cout        # conv1
                + 2 * N * HW * 9 * Cout * Cout     # conv2
                + 14 * N * HW * Cout)              # BN / relu / shortcut elementwise
    bytes_accessed = int((xq.size + xs.size + w1m.size + w2m.size
                          + 4 * Cout + N * Cout * HW) * itemsize)

    vmem = pl.BlockSpec(memory_space=pltpu.MemorySpace.VMEM)
    out = pl.pallas_call(
        kernel,
        out_shape=jax.ShapeDtypeStruct((N, Cout, HW), x_nchw.dtype),
        in_specs=[vmem] * 8,
        out_specs=vmem,
        scratch_shapes=[pltpu.VMEM((N, Cout, Ho + 2, Wo + 2), x_nchw.dtype)],
        compiler_params=pltpu.CompilerParams(vmem_limit_bytes=32 * 1024 * 1024),
        cost_estimate=pl.CostEstimate(flops=flops, transcendentals=2 * Cout,
                                      bytes_accessed=bytes_accessed),
    )(xq, xs, w1m, g1c, b1c, w2m, g2c, b2c)

    # Already channel-major: a free reshape yields NCHW (no transpose needed).
    return out.reshape(N, Cout, Ho, Wo)


def reference_forward(x_nchw, params, *, stride=1):
    """Pure-JAX reference mirroring the PyTorch forward (training-mode BN)."""
    x = jnp.transpose(x_nchw, (0, 2, 3, 1))
    Cin = x.shape[-1]
    Cout = params["w1"].shape[-1]
    w1 = params["w1"].reshape(3, 3, Cin, Cout)
    w2 = params["w2"].reshape(3, 3, Cout, Cout)
    dn = ("NHWC", "HWIO", "NHWC")

    def bn(y, g, b):
        m = jnp.mean(y, axis=(0, 1, 2), keepdims=True)
        v = jnp.mean((y - m) ** 2, axis=(0, 1, 2), keepdims=True)
        return ((y - m) * jax.lax.rsqrt(v + EPS) * g.reshape(1, 1, 1, -1)
                + b.reshape(1, 1, 1, -1))

    y = jax.lax.conv_general_dilated(x, w1, (stride, stride), ((1, 1), (1, 1)),
                                     dimension_numbers=dn)
    y = jnp.maximum(bn(y, params["g1"], params["b1"]), 0.0)
    y = jax.lax.conv_general_dilated(y, w2, (1, 1), ((1, 1), (1, 1)),
                                     dimension_numbers=dn)
    y = bn(y, params["g2"], params["b2"])
    if stride != 1 or Cin != Cout:
        xs = x[:, ::2, ::2, :]
        pc = Cout // 4
        xs = jnp.pad(xs, ((0, 0), (0, 0), (0, 0), (pc, pc)))
    else:
        xs = x
    y = jnp.maximum(y + xs, 0.0)
    return jnp.transpose(y, (0, 3, 1, 2))


if __name__ == "__main__":
    def make_params(key, cin, planes):
        ks = jax.random.split(key, 6)
        return dict(
            w1=0.1 * jax.random.normal(ks[0], (9, cin, planes), jnp.float32),
            g1=1.0 + 0.1 * jax.random.normal(ks[1], (planes,), jnp.float32),
            b1=0.1 * jax.random.normal(ks[2], (planes,), jnp.float32),
            w2=0.1 * jax.random.normal(ks[3], (9, planes, planes), jnp.float32),
            g2=1.0 + 0.1 * jax.random.normal(ks[4], (planes,), jnp.float32),
            b2=0.1 * jax.random.normal(ks[5], (planes,), jnp.float32),
        )

    k1, k2, k3, k4 = jax.random.split(jax.random.PRNGKey(0), 4)

    # Case 1: identity shortcut (in_planes == planes, stride == 1).
    N, Cin, H, W, planes, stride = 2, 4, 16, 16, 4, 1
    x = jax.random.normal(k1, (N, Cin, H, W), jnp.float32)
    params = make_params(k2, Cin, planes)
    out = jax.block_until_ready(basic_block_cifar(x, params, stride=stride))
    ref = reference_forward(x, params, stride=stride)
    assert out.shape == ref.shape, (out.shape, ref.shape)
    err = float(jnp.max(jnp.abs(out - ref)))
    assert jnp.allclose(out, ref, atol=1e-4, rtol=1e-4), f"identity max_err={err}"

    # Case 2: option-A downsampling shortcut (stride 2, channels 4 -> 8).
    N2, Cin2, H2, W2, planes2, stride2 = 2, 4, 16, 16, 8, 2
    x2 = jax.random.normal(k3, (N2, Cin2, H2, W2), jnp.float32)
    params2 = make_params(k4, Cin2, planes2)
    out2 = jax.block_until_ready(basic_block_cifar(x2, params2, stride=stride2))
    ref2 = reference_forward(x2, params2, stride=stride2)
    assert out2.shape == ref2.shape, (out2.shape, ref2.shape)
    err2 = float(jnp.max(jnp.abs(out2 - ref2)))
    assert jnp.allclose(out2, ref2, atol=1e-4, rtol=1e-4), f"downsample max_err={err2}"

    print("KERNEL_OK")
</pallas_src>

<mosaic_0001>
module attributes {stable_mosaic.version = 11 : i64} {
  func.func @_basic_block_kernel(%arg0: memref<2x4x18x18xf32, #tpu.memory_space<vmem>>, %arg1: memref<2x4x256xf32, #tpu.memory_space<vmem>>, %arg2: memref<4x36xf32, #tpu.memory_space<vmem>>, %arg3: memref<1x4x1xf32, #tpu.memory_space<vmem>>, %arg4: memref<1x4x1xf32, #tpu.memory_space<vmem>>, %arg5: memref<4x36xf32, #tpu.memory_space<vmem>>, %arg6: memref<1x4x1xf32, #tpu.memory_space<vmem>>, %arg7: memref<1x4x1xf32, #tpu.memory_space<vmem>>, %arg8: memref<2x4x256xf32, #tpu.memory_space<vmem>>, %arg9: memref<2x4x18x18xf32, #tpu.memory_space<vmem>>) attributes {dimension_semantics = [], scalar_prefetch = 0 : i64, scratch_operands = 1 : i64, tpu.core_type = #tpu.core_type<tc>} {
    %c0 = arith.constant 0 : index
    %c0_0 = arith.constant 0 : index
    %c0_1 = arith.constant 0 : index
    %c0_2 = arith.constant 0 : index
    %0 = vector.load %arg0[%c0, %c0_0, %c0_1, %c0_2] : memref<2x4x18x18xf32, #tpu.memory_space<vmem>>, vector<2x4x16x16xf32>
    %c0_3 = arith.constant 0 : index
    %c0_4 = arith.constant 0 : index
    %c0_5 = arith.constant 0 : index
    %c1 = arith.constant 1 : index
    %1 = vector.load %arg0[%c0_3, %c0_4, %c0_5, %c1] : memref<2x4x18x18xf32, #tpu.memory_space<vmem>>, vector<2x4x16x16xf32>
    %c0_6 = arith.constant 0 : index
    %c0_7 = arith.constant 0 : index
    %c0_8 = arith.constant 0 : index
    %c2 = arith.constant 2 : index
    %2 = vector.load %arg0[%c0_6, %c0_7, %c0_8, %c2] : memref<2x4x18x18xf32, #tpu.memory_space<vmem>>, vector<2x4x16x16xf32>
    %c0_9 = arith.constant 0 : index
    %c0_10 = arith.constant 0 : index
    %c1_11 = arith.constant 1 : index
    %c0_12 = arith.constant 0 : index
    %3 = vector.load %arg0[%c0_9, %c0_10, %c1_11, %c0_12] : memref<2x4x18x18xf32, #tpu.memory_space<vmem>>, vector<2x4x16x16xf32>
    %c0_13 = arith.constant 0 : index
    %c0_14 = arith.constant 0 : index
    %c1_15 = arith.constant 1 : index
    %c1_16 = arith.constant 1 : index
    %4 = vector.load %arg0[%c0_13, %c0_14, %c1_15, %c1_16] : memref<2x4x18x18xf32, #tpu.memory_space<vmem>>, vector<2x4x16x16xf32>
    %c0_17 = arith.constant 0 : index
    %c0_18 = arith.constant 0 : index
    %c1_19 = arith.constant 1 : index
    %c2_20 = arith.constant 2 : index
    %5 = vector.load %arg0[%c0_17, %c0_18, %c1_19, %c2_20] : memref<2x4x18x18xf32, #tpu.memory_space<vmem>>, vector<2x4x16x16xf32>
    %c0_21 = arith.constant 0 : index
    %c0_22 = arith.constant 0 : index
    %c2_23 = arith.constant 2 : index
    %c0_24 = arith.constant 0 : index
    %6 = vector.load %arg0[%c0_21, %c0_22, %c2_23, %c0_24] : memref<2x4x18x18xf32, #tpu.memory_space<vmem>>, vector<2x4x16x16xf32>
    %c0_25 = arith.constant 0 : index
    %c0_26 = arith.constant 0 : index
    %c2_27 = arith.constant 2 : index
    %c1_28 = arith.constant 1 : index
    %7 = vector.load %arg0[%c0_25, %c0_26, %c2_27, %c1_28] : memref<2x4x18x18xf32, #tpu.memory_space<vmem>>, vector<2x4x16x16xf32>
    %c0_29 = arith.constant 0 : index
    %c0_30 = arith.constant 0 : index
    %c2_31 = arith.constant 2 : index
    %c2_32 = arith.constant 2 : index
    %8 = vector.load %arg0[%c0_29, %c0_30, %c2_31, %c2_32] : memref<2x4x18x18xf32, #tpu.memory_space<vmem>>, vector<2x4x16x16xf32>
    %9 = tpu.concatenate %0, %1, %2, %3, %4, %5, %6, %7, %8 in 1 : vector<2x4x16x16xf32>, vector<2x4x16x16xf32>, vector<2x4x16x16xf32>, vector<2x4x16x16xf32>, vector<2x4x16x16xf32>, vector<2x4x16x16xf32>, vector<2x4x16x16xf32>, vector<2x4x16x16xf32>, vector<2x4x16x16xf32> -> vector<2x36x16x16xf32>
    %10 = vector.shape_cast %9 : vector<2x36x16x16xf32> to vector<2x36x256xf32>
    %c0_33 = arith.constant 0 : index
    %c0_34 = arith.constant 0 : index
    %11 = vector.load %arg2[%c0_33, %c0_34] : memref<4x36xf32, #tpu.memory_space<vmem>>, vector<4x36xf32>
    %12 = vector.extract_strided_slice %10 {offsets = [0, 0, 0], sizes = [1, 36, 256], strides = [1, 1, 1]} : vector<2x36x256xf32> to vector<1x36x256xf32>
    %13 = vector.shape_cast %12 : vector<1x36x256xf32> to vector<36x256xf32>
    %cst = arith.constant dense<0.000000e+00> : vector<4x256xf32>
    %14 = tpu.matmul %11, %13, %cst {dimension_numbers = #tpu.dot_dimension_numbers<[1], [0], [0], [1], [0, 0, 1, 1], [], []>} : vector<4x36xf32>, vector<36x256xf32>, vector<4x256xf32> -> vector<4x256xf32>
    %15 = vector.extract_strided_slice %10 {offsets = [1, 0, 0], sizes = [1, 36, 256], strides = [1, 1, 1]} : vector<2x36x256xf32> to vector<1x36x256xf32>
    %16 = vector.shape_cast %15 : vector<1x36x256xf32> to vector<36x256xf32>
    %cst_35 = arith.constant dense<0.000000e+00> : vector<4x256xf32>
    %17 = tpu.matmul %11, %16, %cst_35 {dimension_numbers = #tpu.dot_dimension_numbers<[1], [0], [0], [1], [0, 0, 1, 1], [], []>} : vector<4x36xf32>, vector<36x256xf32>, vector<4x256xf32> -> vector<4x256xf32>
    %18 = vector.shape_cast %14 : vector<4x256xf32> to vector<1x4x256xf32>
    %19 = vector.shape_cast %17 : vector<4x256xf32> to vector<1x4x256xf32>
    %20 = tpu.concatenate %18, %19 in 0 : vector<1x4x256xf32>, vector<1x4x256xf32> -> vector<2x4x256xf32>
    %cst_36 = arith.constant dense<0.000000e+00> : vector<4xf32>
    %21 = vector.multi_reduction <add>, %20, %cst_36 [0, 2] : vector<2x4x256xf32> to vector<4xf32>
    %22 = vector.shape_cast %21 : vector<4xf32> to vector<1x4x1xf32>
    %23 = arith.mulf %20, %20 : vector<2x4x256xf32>
    %cst_37 = arith.constant dense<0.000000e+00> : vector<4xf32>
    %24 = vector.multi_reduction <add>, %23, %cst_37 [0, 2] : vector<2x4x256xf32> to vector<4xf32>
    %25 = vector.shape_cast %24 : vector<4xf32> to vector<1x4x1xf32>
    %cst_38 = arith.constant 0.001953125 : f32
    %26 = vector.broadcast %cst_38 : f32 to vector<1x4x1xf32>
    %27 = arith.mulf %22, %26 : vector<1x4x1xf32>
    %cst_39 = arith.constant 0.001953125 : f32
    %28 = vector.broadcast %cst_39 : f32 to vector<1x4x1xf32>
    %29 = arith.mulf %25, %28 : vector<1x4x1xf32>
    %30 = arith.mulf %27, %27 : vector<1x4x1xf32>
    %31 = arith.subf %29, %30 : vector<1x4x1xf32>
    %c0_40 = arith.constant 0 : index
    %c0_41 = arith.constant 0 : index
    %c0_42 = arith.constant 0 : index
    %32 = vector.load %arg3[%c0_40, %c0_41, %c0_42] : memref<1x4x1xf32, #tpu.memory_space<vmem>>, vector<1x4x1xf32>
    %cst_43 = arith.constant 9.99999974E-6 : f32
    %33 = vector.broadcast %cst_43 : f32 to vector<1x4x1xf32>
    %34 = arith.addf %31, %33 : vector<1x4x1xf32>
    %35 = math.rsqrt %34 : vector<1x4x1xf32>
    %36 = arith.mulf %32, %35 : vector<1x4x1xf32>
    %c0_44 = arith.constant 0 : index
    %c0_45 = arith.constant 0 : index
    %c0_46 = arith.constant 0 : index
    %37 = vector.load %arg4[%c0_44, %c0_45, %c0_46] : memref<1x4x1xf32, #tpu.memory_space<vmem>>, vector<1x4x1xf32>
    %38 = arith.mulf %27, %36 : vector<1x4x1xf32>
    %39 = arith.subf %37, %38 : vector<1x4x1xf32>
    %40 = vector.broadcast %36 : vector<1x4x1xf32> to vector<2x4x256xf32>
    %41 = arith.mulf %20, %40 : vector<2x4x256xf32>
    %42 = vector.broadcast %39 : vector<1x4x1xf32> to vector<2x4x256xf32>
    %43 = arith.addf %41, %42 : vector<2x4x256xf32>
    %cst_47 = arith.constant 0.000000e+00 : f32
    %44 = vector.broadcast %cst_47 : f32 to vector<2x4x256xf32>
    %45 = arith.maximumf %43, %44 : vector<2x4x256xf32>
    %cst_48 = arith.constant 0.000000e+00 : f32
    %46 = vector.broadcast %cst_48 : f32 to vector<2x4x18x18xf32>
    %c0_49 = arith.constant 0 : index
    %c0_50 = arith.constant 0 : index
    %c0_51 = arith.constant 0 : index
    %c0_52 = arith.constant 0 : index
    %47 = vector.load %arg9[%c0_49, %c0_50, %c0_51, %c0_52] : memref<2x4x18x18xf32, #tpu.memory_space<vmem>>, vector<2x4x18x18xf32>
    tpu.vector_store %arg9[%c0_49, %c0_50, %c0_51, %c0_52], %46 {strides = array<i32>} : memref<2x4x18x18xf32, #tpu.memory_space<vmem>>, vector<2x4x18x18xf32>,
    %48 = vector.shape_cast %45 : vector<2x4x256xf32> to vector<2x4x16x16xf32>
    %c0_53 = arith.constant 0 : index
    %c0_54 = arith.constant 0 : index
    %c1_55 = arith.constant 1 : index
    %c1_56 = arith.constant 1 : index
    %49 = vector.load %arg9[%c0_53, %c0_54, %c1_55, %c1_56] : memref<2x4x18x18xf32, #tpu.memory_space<vmem>>, vector<2x4x16x16xf32>
    tpu.vector_store %arg9[%c0_53, %c0_54, %c1_55, %c1_56], %48 {strides = array<i32>} : memref<2x4x18x18xf32, #tpu.memory_space<vmem>>, vector<2x4x16x16xf32>,
    %c0_57 = arith.constant 0 : index
    %c0_58 = arith.constant 0 : index
    %c0_59 = arith.constant 0 : index
    %c0_60 = arith.constant 0 : index
    %50 = vector.load %arg9[%c0_57, %c0_58, %c0_59, %c0_60] : memref<2x4x18x18xf32, #tpu.memory_space<vmem>>, vector<2x4x16x16xf32>
    %c0_61 = arith.constant 0 : index
    %c0_62 = arith.constant 0 : index
    %c0_63 = arith.constant 0 : index
    %c1_64 = arith.constant 1 : index
    %51 = vector.load %arg9[%c0_61, %c0_62, %c0_63, %c1_64] : memref<2x4x18x18xf32, #tpu.memory_space<vmem>>, vector<2x4x16x16xf32>
    %c0_65 = arith.constant 0 : index
    %c0_66 = arith.constant 0 : index
    %c0_67 = arith.constant 0 : index
    %c2_68 = arith.constant 2 : index
    %52 = vector.load %arg9[%c0_65, %c0_66, %c0_67, %c2_68] : memref<2x4x18x18xf32, #tpu.memory_space<vmem>>, vector<2x4x16x16xf32>
    %c0_69 = arith.constant 0 : index
    %c0_70 = arith.constant 0 : index
    %c1_71 = arith.constant 1 : index
    %c0_72 = arith.constant 0 : index
    %53 = vector.load %arg9[%c0_69, %c0_70, %c1_71, %c0_72] : memref<2x4x18x18xf32, #tpu.memory_space<vmem>>, vector<2x4x16x16xf32>
    %c0_73 = arith.constant 0 : index
    %c0_74 = arith.constant 0 : index
    %c1_75 = arith.constant 1 : index
    %c1_76 = arith.constant 1 : index
    %54 = vector.load %arg9[%c0_73, %c0_74, %c1_75, %c1_76] : memref<2x4x18x18xf32, #tpu.memory_space<vmem>>, vector<2x4x16x16xf32>
    %c0_77 = arith.constant 0 : index
    %c0_78 = arith.constant 0 : index
    %c1_79 = arith.constant 1 : index
    %c2_80 = arith.constant 2 : index
    %55 = vector.load %arg9[%c0_77, %c0_78, %c1_79, %c2_80] : memref<2x4x18x18xf32, #tpu.memory_space<vmem>>, vector<2x4x16x16xf32>
    %c0_81 = arith.constant 0 : index
    %c0_82 = arith.constant 0 : index
    %c2_83 = arith.constant 2 : index
    %c0_84 = arith.constant 0 : index
    %56 = vector.load %arg9[%c0_81, %c0_82, %c2_83, %c0_84] : memref<2x4x18x18xf32, #tpu.memory_space<vmem>>, vector<2x4x16x16xf32>
    %c0_85 = arith.constant 0 : index
    %c0_86 = arith.constant 0 : index
    %c2_87 = arith.constant 2 : index
    %c1_88 = arith.constant 1 : index
    %57 = vector.load %arg9[%c0_85, %c0_86, %c2_87, %c1_88] : memref<2x4x18x18xf32, #tpu.memory_space<vmem>>, vector<2x4x16x16xf32>
    %c0_89 = arith.constant 0 : index
    %c0_90 = arith.constant 0 : index
    %c2_91 = arith.constant 2 : index
    %c2_92 = arith.constant 2 : index
    %58 = vector.load %arg9[%c0_89, %c0_90, %c2_91, %c2_92] : memref<2x4x18x18xf32, #tpu.memory_space<vmem>>, vector<2x4x16x16xf32>
    %59 = tpu.concatenate %50, %51, %52, %53, %54, %55, %56, %57, %58 in 1 : vector<2x4x16x16xf32>, vector<2x4x16x16xf32>, vector<2x4x16x16xf32>, vector<2x4x16x16xf32>, vector<2x4x16x16xf32>, vector<2x4x16x16xf32>, vector<2x4x16x16xf32>, vector<2x4x16x16xf32>, vector<2x4x16x16xf32> -> vector<2x36x16x16xf32>
    %60 = vector.shape_cast %59 : vector<2x36x16x16xf32> to vector<2x36x256xf32>
    %c0_93 = arith.constant 0 : index
    %c0_94 = arith.constant 0 : index
    %61 = vector.load %arg5[%c0_93, %c0_94] : memref<4x36xf32, #tpu.memory_space<vmem>>, vector<4x36xf32>
    %62 = vector.extract_strided_slice %60 {offsets = [0, 0, 0], sizes = [1, 36, 256], strides = [1, 1, 1]} : vector<2x36x256xf32> to vector<1x36x256xf32>
    %63 = vector.shape_cast %62 : vector<1x36x256xf32> to vector<36x256xf32>
    %cst_95 = arith.constant dense<0.000000e+00> : vector<4x256xf32>
    %64 = tpu.matmul %61, %63, %cst_95 {dimension_numbers = #tpu.dot_dimension_numbers<[1], [0], [0], [1], [0, 0, 1, 1], [], []>} : vector<4x36xf32>, vector<36x256xf32>, vector<4x256xf32> -> vector<4x256xf32>
    %65 = vector.extract_strided_slice %60 {offsets = [1, 0, 0], sizes = [1, 36, 256], strides = [1, 1, 1]} : vector<2x36x256xf32> to vector<1x36x256xf32>
    %66 = vector.shape_cast %65 : vector<1x36x256xf32> to vector<36x256xf32>
    %cst_96 = arith.constant dense<0.000000e+00> : vector<4x256xf32>
    %67 = tpu.matmul %61, %66, %cst_96 {dimension_numbers = #tpu.dot_dimension_numbers<[1], [0], [0], [1], [0, 0, 1, 1], [], []>} : vector<4x36xf32>, vector<36x256xf32>, vector<4x256xf32> -> vector<4x256xf32>
    %68 = vector.shape_cast %64 : vector<4x256xf32> to vector<1x4x256xf32>
    %69 = vector.shape_cast %67 : vector<4x256xf32> to vector<1x4x256xf32>
    %70 = tpu.concatenate %68, %69 in 0 : vector<1x4x256xf32>, vector<1x4x256xf32> -> vector<2x4x256xf32>
    %cst_97 = arith.constant dense<0.000000e+00> : vector<4xf32>
    %71 = vector.multi_reduction <add>, %70, %cst_97 [0, 2] : vector<2x4x256xf32> to vector<4xf32>
    %72 = vector.shape_cast %71 : vector<4xf32> to vector<1x4x1xf32>
    %73 = arith.mulf %70, %70 : vector<2x4x256xf32>
    %cst_98 = arith.constant dense<0.000000e+00> : vector<4xf32>
    %74 = vector.multi_reduction <add>, %73, %cst_98 [0, 2] : vector<2x4x256xf32> to vector<4xf32>
    %75 = vector.shape_cast %74 : vector<4xf32> to vector<1x4x1xf32>
    %cst_99 = arith.constant 0.001953125 : f32
    %76 = vector.broadcast %cst_99 : f32 to vector<1x4x1xf32>
    %77 = arith.mulf %72, %76 : vector<1x4x1xf32>
    %cst_100 = arith.constant 0.001953125 : f32
    %78 = vector.broadcast %cst_100 : f32 to vector<1x4x1xf32>
    %79 = arith.mulf %75, %78 : vector<1x4x1xf32>
    %80 = arith.mulf %77, %77 : vector<1x4x1xf32>
    %81 = arith.subf %79, %80 : vector<1x4x1xf32>
    %c0_101 = arith.constant 0 : index
    %c0_102 = arith.constant 0 : index
    %c0_103 = arith.constant 0 : index
    %82 = vector.load %arg6[%c0_101, %c0_102, %c0_103] : memref<1x4x1xf32, #tpu.memory_space<vmem>>, vector<1x4x1xf32>
    %cst_104 = arith.constant 9.99999974E-6 : f32
    %83 = vector.broadcast %cst_104 : f32 to vector<1x4x1xf32>
    %84 = arith.addf %81, %83 : vector<1x4x1xf32>
    %85 = math.rsqrt %84 : vector<1x4x1xf32>
    %86 = arith.mulf %82, %85 : vector<1x4x1xf32>
    %c0_105 = arith.constant 0 : index
    %c0_106 = arith.constant 0 : index
    %c0_107 = arith.constant 0 : index
    %87 = vector.load %arg7[%c0_105, %c0_106, %c0_107] : memref<1x4x1xf32, #tpu.memory_space<vmem>>, vector<1x4x1xf32>
    %88 = arith.mulf %77, %86 : vector<1x4x1xf32>
    %89 = arith.subf %87, %88 : vector<1x4x1xf32>
    %90 = vector.broadcast %86 : vector<1x4x1xf32> to vector<2x4x256xf32>
    %91 = arith.mulf %70, %90 : vector<2x4x256xf32>
    %92 = vector.broadcast %89 : vector<1x4x1xf32> to vector<2x4x256xf32>
    %93 = arith.addf %91, %92 : vector<2x4x256xf32>
    %c0_108 = arith.constant 0 : index
    %c0_109 = arith.constant 0 : index
    %c0_110 = arith.constant 0 : index
    %94 = vector.load %arg1[%c0_108, %c0_109, %c0_110] : memref<2x4x256xf32, #tpu.memory_space<vmem>>, vector<2x4x256xf32>
    %95 = arith.addf %93, %94 : vector<2x4x256xf32>
    %cst_111 = arith.constant 0.000000e+00 : f32
    %96 = vector.broadcast %cst_111 : f32 to vector<2x4x256xf32>
    %97 = arith.maximumf %95, %96 : vector<2x4x256xf32>
    %c0_112 = arith.constant 0 : index
    %c0_113 = arith.constant 0 : index
    %c0_114 = arith.constant 0 : index
    %98 = vector.load %arg8[%c0_112, %c0_113, %c0_114] : memref<2x4x256xf32, #tpu.memory_space<vmem>>, vector<2x4x256xf32>
    tpu.vector_store %arg8[%c0_112, %c0_113, %c0_114], %97 {strides = array<i32>} : memref<2x4x256xf32, #tpu.memory_space<vmem>>, vector<2x4x256xf32>,
    return
  }
}

</mosaic_0001>

<bundles_post_ra>
// kernel: tpu_custom_call.1
= control target key start
LH: loop header
LB: loop body
LE: loop exit
PB: predicated region body
PF: predicated region fallthrough
CT: control target
= control target key end

     0   :  { %s8239_s11 = smov 126   ;;  %v8240_v24 = vmov 1983009808   ;;  %v419_v26 = vlaneseq  ;;  %v14141_v27 = vmov 0.0   ;;  %s14132_s0 = inlined_call_operand.vmem [shape: f32[2,4,18,18], index: 0, kind: input, shape index: {}]   ;;  %s14133_s1 = inlined_call_operand.vmem [shape: f32[2,4,256], index: 1, kind: input, shape index: {}]   ;;  %s14134_s2 = inlined_call_operand.vmem [shape: f32[4,36], index: 2, kind: input, shape index: {}]   ;;  %s14135_s3 = inlined_call_operand.vmem [shape: f32[1,4,1], index: 3, kind: input, shape index: {}]   ;;  %s14136_s4 = inlined_call_operand.vmem [shape: f32[1,4,1], index: 4, kind: input, shape index: {}]   ;;  %s14137_s5 = inlined_call_operand.vmem [shape: f32[4,36], index: 5, kind: input, shape index: {}]   ;;  %s14138_s6 = inlined_call_operand.vmem [shape: f32[1,4,1], index: 6, kind: input, shape index: {}]   ;;  %s14139_s7 = inlined_call_operand.vmem [shape: f32[1,4,1], index: 7, kind: input, shape index: {}]   ;;  %s14140_s8 = inlined_call_operand.hbm [shape: f32[2,4,256], index: 8, kind: output, shape index: {}]  }
   0x1   :  { %v67_v0 = vld [vmem:[%s14132_s0 + $0x3a] sm:$0xff]  ;;  %v63_v1 = vld [vmem:[%s14132_s0 + $0xa] sm:$0xff]  ;;  %v69_v2 = vld [vmem:[%s14132_s0 + $0x52] sm:$0xff]  ;;  %v417_v25 = vunpack.c.l.s4 %v8240_v24  ;;  %3645 = vmatprep.mubr.f32.mxu0 %v14141_v27  ;;  %3722 = vmatprep.mubr.f32.mxu1 %v14141_v27 }
   0x2   :  { %376 = vrot.lane.b32.xlu1 %v67_v0, %s8239_s11  ;;  %368 = vrot.lane.b32.xlu0 %v63_v1, %s8239_s11  ;;  %v1434_v3 = vcombine.low %v63_v1, %v67_v0  ;;  %v1435_v4 = vcombine.high %v63_v1, %v67_v0  ;;  %v65_v5 = vld [vmem:[%s14132_s0 + $0x22] sm:$0xff]  ;;  %v64_v6 = vld [vmem:[%s14132_s0 + $0x1a] sm:$0xff]  ;;  %v8366_v30 = vshrl.u32 %v419_v26, 7 }
   0x3   :  { %v1450_v7 = vcombine.low %v65_v5, %v69_v2  ;;  %v1451_v8 = vcombine.high %v65_v5, %v69_v2  ;;  %v62_v9 = vld [vmem:[%s14132_s0 + $0x2] sm:$0xff]  ;;  %v68_v10 = vld [vmem:[%s14132_s0 + $0x4a] sm:$0xff]  ;;  %v66_v11 = vld [vmem:[%s14132_s0 + $0x32] sm:$0xff]  ;;  %v418_v29 = vunpack.c.0.s8 %v417_v25 }
   0x4   :  { %v838_v12 = vcombine.low %v64_v6, %v68_v10  ;;  %v839_v13 = vcombine.high %v64_v6, %v68_v10  ;;  %v822_v14 = vcombine.low %v62_v9, %v66_v11  ;;  %v8330_v15 = vld [vmem:[%s14132_s0 + $0x21] sm:$0xff]  ;;  %v8335_v16 = vld [vmem:[%s14132_s0 + $0x51] sm:$0xff]  ;;  %v823_v17 = vcombine.high %v62_v9, %v66_v11  ;;  %v8340_v18 = vld [vmem:[%s14132_s0 + $0x9] sm:$0xff] }
   0x5   :  { %v1210_v19 = vcombine.low %v8330_v15, %v8335_v16  ;;  %v1211_v20 = vcombine.high %v8330_v15, %v8335_v16  ;;  %v8349_v21 = vld [vmem:[%s14132_s0 + $0x39] sm:$0xff]  ;;  %v8371_v31 = vld [vmem:[%s14132_s0 + $0x1] sm:$0xff]  ;;  %v8376_v32 = vld [vmem:[%s14132_s0 + $0x49] sm:$0xff] }
   0x6   :  { %380 = vrot.lane.b32.xlu1 %v69_v2, %s8239_s11  ;;  %372 = vrot.lane.b32.xlu0 %v65_v5, %s8239_s11  ;;  %v1194_v22 = vcombine.low %v8340_v18, %v8349_v21  ;;  %v1195_v23 = vcombine.high %v8340_v18, %v8349_v21  ;;  %v8364_v28 = vld [vmem:[%s14132_s0 + $0x19] sm:$0xff]  ;;  %v8381_v33 = vld [vmem:[%s14132_s0 + $0x31] sm:$0xff] }
   0x7   :  { %v598_v34 = vcombine.low %v8364_v28, %v8376_v32  ;;  %v599_v35 = vcombine.high %v8364_v28, %v8376_v32  ;;  %v582_v36 = vcombine.low %v8371_v31, %v8381_v33  ;;  %v583_v37 = vcombine.high %v8371_v31, %v8381_v33 }
   0xa   :  { %370 = vrot.lane.b32.xlu1 %v64_v6, %s8239_s11  ;;  %366 = vrot.lane.b32.xlu0 %v62_v9, %s8239_s11 }
   0xe   :  { %378 = vrot.lane.b32.xlu1 %v68_v10, %s8239_s11  ;;  %374 = vrot.lane.b32.xlu0 %v66_v11, %s8239_s11 }
   0xf   :  { %13 = vsyncpa [#allocation4], 0  ;;  %v8394_v38 = vsub.s32 %v418_v29, %v8366_v30  ;;  %s8242_s17 = smov 127   ;;  %v8463_v55 = vld [vmem:[%s14132_s0 + $0x82] sm:$0xff]  ;;  %v8468_v56 = vld [vmem:[%s14132_s0 + $0x6a] sm:$0xff]  ;;  %s8244_s22 = smov 16  }
  0x10   :  { %v8477_v57 = vld [vmem:[%s14132_s0 + $0xb2] sm:$0xff]  ;;  %v8482_v58 = vld [vmem:[%s14132_s0 + $0x9a] sm:$0xff]  ;;  %v8512_v60 = vld [vmem:[%s14132_s0 + $0x62] sm:$0xff]  ;;  %s8245_s23 = smov 32   ;;  %s8246_s24 = smov 48   ;;  %vm3422_vm0 = vcmask 130048  }
  0x11   :  { %v8397_v39 = vrot.slane %v1434_v3, %v8394_v38  ;;  %v8400_v40 = vrot.slane %v1450_v7, %v8394_v38  ;;  %v8405_v41 = vrot.slane %v838_v12, %v8394_v38  ;;  %v8408_v42 = vrot.slane %v822_v14, %v8394_v38  ;;  %v8507_v59 = vld [vmem:[%s14132_s0 + $0x7a] sm:$0xff]  ;;  %v8521_v61 = vld [vmem:[%s14132_s0 + $0xaa] sm:$0xff]  ;;  %v8526_v62 = vld [vmem:[%s14132_s0 + $0x92] sm:$0xff]  ;;  %s8247_s25 = smov 64   ;;  %s8248_s26 = smov 80  }
  0x12   :  { %324 = vrot.lane.b32.xlu1 %v65_v5, %s8242_s17  ;;  %320 = vrot.lane.b32.xlu0 %v63_v1, %s8242_s17  ;;  %v8415_v44 = vrot.slane %v1435_v4, %v8394_v38  ;;  %v8418_v45 = vrot.slane %v1451_v8, %v8394_v38  ;;  %v8421_v46 = vrot.slane %v839_v13, %v8394_v38  ;;  %v8559_v3 = vld [vmem:[%s14132_s0 + $0x20] sm:$0xff]  ;;  %v8564_v4 = vld [vmem:[%s14132_s0 + $0x8] sm:$0xff]  ;;  %v8243_v7 = vmov 1934713408   ;;  %s8249_s27 = smov 96   ;;  %s8250_s28 = smov 112  }
  0x13   :  { %v1498_v43 = vcombine.low %v8397_v39, %v8400_v40  ;;  %v8424_v47 = vrot.slane %v823_v17, %v8394_v38  ;;  %v8532_v63 = vrot.slane %v1210_v19, %v8394_v38  ;;  %v8544_v1 = vrot.slane %v1211_v20, %v8394_v38  ;;  %14548 = vst [vmem:[#allocation12_spill] sm:$0xff] %v8559_v3  ;;  %v8579_v8 = vld [vmem:[%s14132_s0 + $0x50] sm:$0xff]  ;;  %v8647_v20 = vld [vmem:[%s14132_s0 + $0x48] sm:$0xff] }
  0x14   :  { %14542 = vst [vmem:[#allocation6_spill] sm:$0xff] %v8415_v44  ;;  %14543 = vst [vmem:[#allocation7_spill] sm:$0xff] %v8418_v45  ;;  %v8606_v12 = vrot.slane %v582_v36, %v8394_v38  ;;  %v8612_v13 = vrot.slane %v599_v35, %v8394_v38  ;;  %v8618_v14 = vrot.slane %v583_v37, %v8394_v38  ;;  %v8683_v25 = vld [vmem:[%s14132_s0 + $0x81] sm:$0xff]  ;;  %v8688_v26 = vld [vmem:[%s14132_s0 + $0x69] sm:$0xff]  ;;  %v481_v54 = vunpack.c.l.s4 %v8243_v7 }
  0x15   :  { %14544 = vst [vmem:[#allocation8_spill] sm:$0xff] %v8421_v46  ;;  %14545 = vst [vmem:[#allocation9_spill] sm:$0xff] %v8424_v47  ;;  %vm3433_vm1 = vcmask 261120   ;;  %vm3444_vm2 = vcmask 392192   ;;  %vm3455_vm3 = vcmask 523264   ;;  %vm3466_vm4 = vcmask 654336  }
  0x16   :  { %332 = vrot.lane.b32.xlu1 %v69_v2, %s8242_s17  ;;  %328 = vrot.lane.b32.xlu0 %v67_v0, %s8242_s17  ;;  %v8538_v0 = vrot.slane %v1194_v22, %v8394_v38  ;;  %14546 = vst [vmem:[#allocation10_spill] sm:$0xff] %v8544_v1  ;;  %v8550_v2 = vrot.slane %v1195_v23, %v8394_v38  ;;  %14549 = vst [vmem:[#allocation13_spill] sm:$0xff] %v8564_v4  ;;  %v482_v17 = vunpack.c.0.s8 %v481_v54  ;;  %v8803_v1 = vld [vmem:[%s14132_s0 + $0xa9] sm:$0xff]  ;;  %vm3477_vm5 = vcmask 785408  }
  0x17   :  { %14550 = vst [vmem:[#allocation14_spill] sm:$0xff] %v8579_v8  ;;  %14553 = vst [vmem:[#allocation17_spill] sm:$0xff] %v8606_v12  ;;  %vm3488_vm6 = vcmask 916480   ;;  %vm3574_vm7 = vcmask 1043456   ;;  %vm3570_vm8 = vcmask 293888   ;;  %vm3784_vm9 = vcmask 146432  }
  0x18   :  { %14547 = vst [vmem:[#allocation11_spill] sm:$0xff] %v8550_v2  ;;  %14554 = vst [vmem:[#allocation18_spill] sm:$0xff] %v8612_v13  ;;  %v8775_v49 = vsub.s32 %v482_v17, %v8366_v30  ;;  %v8808_v2 = vld [vmem:[%s14132_s0 + $0x91] sm:$0xff]  ;;  %vm3787_vm10 = vcmask 140288   ;;  %vm4234_vm11 = vcmask 138248  }
  0x19   :  { %14555 = vst [vmem:[#allocation19_spill] sm:$0xff] %v8618_v14  ;;  %14558 = vst [vmem:[#allocation22_spill] sm:$0xff] %v8647_v20 }
  0x1a   :  { %322 = vrot.lane.b32.xlu1 %v64_v6, %s8242_s17  ;;  %318 = vrot.lane.b32.xlu0 %v62_v9, %s8242_s17  ;;  %v8584_v9 = vld [vmem:[%s14132_s0 + $0x38] sm:$0xff]  ;;  %14560 = vst [vmem:[#allocation24_spill] sm:$0xff] %v8683_v25  ;;  %14561 = vst [vmem:[#allocation25_spill] sm:$0xff] %v8688_v26  ;;  %v8789_v13 = vrot.slane %v1498_v43, %v8775_v49 }
  0x1b   :  { %14551 = vst [vmem:[#allocation15_spill] sm:$0xff] %v8584_v9  ;;  %14573 = vst [vmem:[#allocation37_spill] sm:$0xff] %v8803_v1 }
  0x1c   :  { %14571 = vst [vmem:[#allocation35_spill] sm:$0xff] %v8789_v13  ;;  %14574 = vst [vmem:[#allocation38_spill] sm:$0xff] %v8808_v2 }
  0x1e   :  { %330 = vrot.lane.b32.xlu1 %v68_v10, %s8242_s17  ;;  %326 = vrot.lane.b32.xlu0 %v66_v11, %s8242_s17  ;;  %v8600_v11 = vrot.slane %v598_v34, %v8394_v38 }
  0x20   :  { %14552 = vst [vmem:[#allocation16_spill] sm:$0xff] %v8600_v11 }
  0x22   :  { %212 = vrot.lane.b32.xlu1 %v8330_v15, %s8242_s17  ;;  %208 = vrot.lane.b32.xlu0 %v8340_v18, %s8242_s17 }
  0x26   :  { %220 = vrot.lane.b32.xlu1 %v8335_v16, %s8242_s17  ;;  %216 = vrot.lane.b32.xlu0 %v8349_v21, %s8242_s17 }
  0x2a   :  { %260 = vrot.lane.b32.xlu1 %v8330_v15, %s8239_s11  ;;  %256 = vrot.lane.b32.xlu0 %v8340_v18, %s8239_s11  ;;  %v8627_v15 = vld [vmem:[%s14132_s0 + $0x18] sm:$0xff] }
  0x2b   :  { %14556 = vst [vmem:[#allocation20_spill] sm:$0xff] %v8627_v15 }
  0x2e   :  { %268 = vrot.lane.b32.xlu1 %v8335_v16, %s8239_s11  ;;  %264 = vrot.lane.b32.xlu0 %v8349_v21, %s8239_s11  ;;  %v8632_v16 = vld [vmem:[%s14132_s0] sm:$0xff]  ;;  %v8652_v21 = vld [vmem:[%s14132_s0 + $0x30] sm:$0xff] }
  0x2f   :  { %14557 = vst [vmem:[#allocation21_spill] sm:$0xff] %v8632_v16  ;;  %14559 = vst [vmem:[#allocation23_spill] sm:$0xff] %v8652_v21 }
  0x32   :  { %388 = vrot.lane.b32.xlu1 %v8463_v55, %s8239_s11  ;;  %384 = vrot.lane.b32.xlu0 %v8468_v56, %s8239_s11 }
  0x36   :  { %396 = vrot.lane.b32.xlu1 %v8477_v57, %s8239_s11  ;;  %392 = vrot.lane.b32.xlu0 %v8482_v58, %s8239_s11 }
  0x3a   :  { %210 = vrot.lane.b32.xlu1 %v8364_v28, %s8242_s17  ;;  %206 = vrot.lane.b32.xlu0 %v8371_v31, %s8242_s17 }
  0x3e   :  { %218 = vrot.lane.b32.xlu1 %v8376_v32, %s8242_s17  ;;  %214 = vrot.lane.b32.xlu0 %v8381_v33, %s8242_s17 }
  0x42   :  { %258 = vrot.lane.b32.xlu1 %v8364_v28, %s8239_s11  ;;  %254 = vrot.lane.b32.xlu0 %v8371_v31, %s8239_s11  ;;  %v8701_v31 = vld [vmem:[%s14132_s0 + $0xb1] sm:$0xff] }
  0x43   :  { %14562 = vst [vmem:[#allocation26_spill] sm:$0xff] %v8701_v31 }
  0x46   :  { %266 = vrot.lane.b32.xlu1 %v8376_v32, %s8239_s11  ;;  %262 = vrot.lane.b32.xlu0 %v8381_v33, %s8239_s11  ;;  %v8706_v32 = vld [vmem:[%s14132_s0 + $0x99] sm:$0xff] }
  0x47   :  { %14563 = vst [vmem:[#allocation27_spill] sm:$0xff] %v8706_v32 }
  0x4a   :  { %386 = vrot.lane.b32.xlu1 %v8507_v59, %s8239_s11  ;;  %382 = vrot.lane.b32.xlu0 %v8512_v60, %s8239_s11 }
  0x4e   :  { %394 = vrot.lane.b32.xlu1 %v8521_v61, %s8239_s11  ;;  %390 = vrot.lane.b32.xlu0 %v8526_v62, %s8239_s11 }
  0x52   :  { %148 = vrot.lane.b32.xlu1 %v8559_v3, %s8239_s11  ;;  %144 = vrot.lane.b32.xlu0 %v8564_v4, %s8239_s11 }
  0x56   :  { %156 = vrot.lane.b32.xlu1 %v8579_v8, %s8239_s11  ;;  %152 = vrot.lane.b32.xlu0 %v8584_v9, %s8239_s11 }
  0x5a   :  { %340 = vrot.lane.b32.xlu1 %v8463_v55, %s8242_s17  ;;  %336 = vrot.lane.b32.xlu0 %v8468_v56, %s8242_s17 }
  0x5e   :  { %348 = vrot.lane.b32.xlu1 %v8477_v57, %s8242_s17  ;;  %344 = vrot.lane.b32.xlu0 %v8482_v58, %s8242_s17 }
  0x62   :  { %146 = vrot.lane.b32.xlu1 %v8627_v15, %s8239_s11  ;;  %142 = vrot.lane.b32.xlu0 %v8632_v16, %s8239_s11 }
  0x66   :  { %154 = vrot.lane.b32.xlu1 %v8647_v20, %s8239_s11  ;;  %150 = vrot.lane.b32.xlu0 %v8652_v21, %s8239_s11 }
  0x6a   :  { %338 = vrot.lane.b32.xlu1 %v8507_v59, %s8242_s17  ;;  %334 = vrot.lane.b32.xlu0 %v8512_v60, %s8242_s17 }
  0x6e   :  { %346 = vrot.lane.b32.xlu1 %v8521_v61, %s8242_s17  ;;  %342 = vrot.lane.b32.xlu0 %v8526_v62, %s8242_s17 }
  0x72   :  { %100 = vrot.lane.b32.xlu1 %v8559_v3, %s8242_s17  ;;  %96 = vrot.lane.b32.xlu0 %v8564_v4, %s8242_s17 }
  0x74   :  { %v8672_v23 = vpop.permute.xlu1 %376  ;;  %v8674_v24 = vpop.permute.xlu0 %368 }
  0x76   :  { %108 = vrot.lane.b32.xlu1 %v8579_v8, %s8242_s17  ;;  %104 = vrot.lane.b32.xlu0 %v8584_v9, %s8242_s17 }
  0x78   :  { %v8690_v28 = vpop.permute.xlu1 %380  ;;  %v8692_v29 = vpop.permute.xlu0 %372 }
  0x7a   :  { %228 = vrot.lane.b32.xlu1 %v8683_v25, %s8242_s17  ;;  %224 = vrot.lane.b32.xlu0 %v8688_v26, %s8242_s17 }
  0x7c   :  { %v8708_v33 = vpop.permute.xlu1 %370  ;;  %v8710_v34 = vpop.permute.xlu0 %366 }
  0x7e   :  { %236 = vrot.lane.b32.xlu1 %v8701_v31, %s8242_s17  ;;  %232 = vrot.lane.b32.xlu0 %v8706_v32, %s8242_s17 }
  0x80   :  { %v8716_v35 = vpop.permute.xlu1 %378  ;;  %v8718_v36 = vpop.permute.xlu0 %374 }
  0x82   :  { %276 = vrot.lane.b32.xlu1 %v8683_v25, %s8239_s11  ;;  %272 = vrot.lane.b32.xlu0 %v8688_v26, %s8239_s11  ;;  %v14579_v25 = vcombine.low %v8408_v42, %v8405_v41 }
  0x84   :  { %v8724_v37 = vpop.permute.xlu1 %324  ;;  %v8726_v22 = vpop.permute.xlu0 %320 }
  0x85   :  { %14564 = vst [vmem:[#allocation28_spill] sm:$0xff] %v8726_v22 }
  0x86   :  { %284 = vrot.lane.b32.xlu1 %v8701_v31, %s8239_s11  ;;  %280 = vrot.lane.b32.xlu0 %v8706_v32, %s8239_s11  ;;  %v8834_v31 = vrot.slane %v14579_v25, %v8775_v49 }
  0x88   :  { %v8732_v10 = vpop.permute.xlu1 %332  ;;  %v8734_v19 = vpop.permute.xlu0 %328  ;;  %14580 = vst [vmem:[#allocation43_spill] sm:$0xff] %v8834_v31 }
  0x89   :  { %v1482_v18 = vcombine.low %v8724_v37, %v8732_v10  ;;  %v1466_v53 = vcombine.low %v8726_v22, %v8734_v19 }
  0x8a   :  { %98 = vrot.lane.b32.xlu1 %v8627_v15, %s8242_s17  ;;  %94 = vrot.lane.b32.xlu0 %v8632_v16, %s8242_s17 }
  0x8b   :  { %v8745_v6 = vrot.slane %v1482_v18, %v8394_v38  ;;  %v8748_v52 = vrot.slane %v1466_v53, %v8394_v38  ;;  %v8763_v18 = vld [vmem:[%s14132_s0 + $0x79] sm:$0xff]  ;;  %v8768_v53 = vld [vmem:[%s14132_s0 + $0x61] sm:$0xff] }
  0x8c   :  { %v8750_v51 = vpop.permute.xlu1 %322  ;;  %v8752_v7 = vpop.permute.xlu0 %318  ;;  %14567 = vst [vmem:[#allocation31_spill] sm:$0xff] %v8763_v18  ;;  %14568 = vst [vmem:[#allocation32_spill] sm:$0xff] %v8768_v53 }
  0x8d   :  { %14565 = vst [vmem:[#allocation29_spill] sm:$0xff] %v8750_v51  ;;  %14566 = vst [vmem:[#allocation30_spill] sm:$0xff] %v8752_v7  ;;  %v1530_v5 = vcombine.low %v8748_v52, %v8745_v6 }
  0x8e   :  { %106 = vrot.lane.b32.xlu1 %v8647_v20, %s8242_s17  ;;  %102 = vrot.lane.b32.xlu0 %v8652_v21, %s8242_s17  ;;  %v8917_v20 = vld [vmem:[%s14132_s0 + $0x60] sm:$0xff] }
  0x8f   :  { %v8792_v30 = vrot.slane %v1530_v5, %v8775_v49  ;;  %14595 = vst [vmem:[#allocation58_spill] sm:$0xff] %v8917_v20 }
  0x90   :  { %v8770_v54 = vpop.permute.xlu1 %330  ;;  %v8772_v50 = vpop.permute.xlu0 %326 }
  0x91   :  { %14569 = vst [vmem:[#allocation33_spill] sm:$0xff] %v8770_v54  ;;  %14570 = vst [vmem:[#allocation34_spill] sm:$0xff] %v8772_v50  ;;  %v870_v27 = vcombine.low %v8750_v51, %v8770_v54  ;;  %v854_v48 = vcombine.low %v8752_v7, %v8772_v50  ;;  %v8936_v7 = vld [vmem:[%s14132_s0 + $0xa8] sm:$0xff]  ;;  %v8941_v50 = vld [vmem:[%s14132_s0 + $0x90] sm:$0xff]  ;;  %v1570_v54 = vcombine.low %v8674_v24, %v8672_v23 }
  0x92   :  { %226 = vrot.lane.b32.xlu1 %v8763_v18, %s8242_s17  ;;  %222 = vrot.lane.b32.xlu0 %v8768_v53, %s8242_s17  ;;  %14572 = vst [vmem:[#allocation36_spill] sm:$0xff] %v8792_v30  ;;  %14598 = vst [vmem:[#allocation61_spill] sm:$0xff] %v8936_v7 }
  0x93   :  { %v8795_v17 = vrot.slane %v870_v27, %v8394_v38  ;;  %v8798_v14 = vrot.slane %v854_v48, %v8394_v38  ;;  %14599 = vst [vmem:[#allocation62_spill] sm:$0xff] %v8941_v50  ;;  %v1578_v8 = vrot.slane %v1570_v54, %v8394_v38 }
  0x94   :  { %v8810_v43 = vpop.permute.xlu1 %212  ;;  %v8812_v5 = vpop.permute.xlu0 %208 }
  0x95   :  { %14575 = vst [vmem:[#allocation39_spill] sm:$0xff] %v8810_v43  ;;  %14576 = vst [vmem:[#allocation40_spill] sm:$0xff] %v8812_v5  ;;  %v918_v27 = vcombine.low %v8798_v14, %v8795_v17 }
  0x96   :  { %234 = vrot.lane.b32.xlu1 %v8803_v1, %s8242_s17  ;;  %230 = vrot.lane.b32.xlu0 %v8808_v2, %s8242_s17 }
  0x97   :  { %v8837_v16 = vrot.slane %v918_v27, %v8775_v49  ;;  %v8856_v27 = vld [vmem:[%s14132_s0 + $0x80] sm:$0xff] }
  0x98   :  { %v8822_v26 = vpop.permute.xlu1 %220  ;;  %v8824_v32 = vpop.permute.xlu0 %216  ;;  %14584 = vst [vmem:[#allocation47_spill] sm:$0xff] %v8856_v27 }
  0x99   :  { %14577 = vst [vmem:[#allocation41_spill] sm:$0xff] %v8822_v26  ;;  %14578 = vst [vmem:[#allocation42_spill] sm:$0xff] %v8824_v32  ;;  %v1314_v15 = vcombine.low %v8810_v43, %v8822_v26 }
  0x9a   :  { %274 = vrot.lane.b32.xlu1 %v8763_v18, %s8239_s11  ;;  %270 = vrot.lane.b32.xlu0 %v8768_v53, %s8239_s11  ;;  %14581 = vst [vmem:[#allocation44_spill] sm:$0xff] %v8837_v16  ;;  %v1298_v18 = vcombine.low %v8812_v5, %v8824_v32  ;;  %v8861_v53 = vld [vmem:[%s14132_s0 + $0x68] sm:$0xff] }
  0x9b   :  { %14585 = vst [vmem:[#allocation48_spill] sm:$0xff] %v8861_v53 }
  0x9c   :  { %v8839_v48 = vpop.permute.xlu1 %260  ;;  %v8841_v21 = vpop.permute.xlu0 %256  ;;  %v8875_v43 = vrot.slane %v1298_v18, %v8394_v38  ;;  %v8895_v18 = vld [vmem:[%s14132_s0 + $0x98] sm:$0xff] }
  0x9d   :  { %14582 = vst [vmem:[#allocation45_spill] sm:$0xff] %v8839_v48  ;;  %14583 = vst [vmem:[#allocation46_spill] sm:$0xff] %v8841_v21 }
  0x9e   :  { %282 = vrot.lane.b32.xlu1 %v8803_v1, %s8239_s11  ;;  %278 = vrot.lane.b32.xlu0 %v8808_v2, %s8239_s11  ;;  %v8872_v1 = vrot.slane %v1314_v15, %v8394_v38  ;;  %14589 = vst [vmem:[#allocation52_spill] sm:$0xff] %v8875_v43  ;;  %v8890_v15 = vld [vmem:[%s14132_s0 + $0xb0] sm:$0xff]  ;;  %14593 = vst [vmem:[#allocation56_spill] sm:$0xff] %v8895_v18 }
  0x9f   :  { %14592 = vst [vmem:[#allocation55_spill] sm:$0xff] %v8890_v15 }
  0xa0   :  { %v8863_v5 = vpop.permute.xlu1 %268  ;;  %v8865_v32 = vpop.permute.xlu0 %264  ;;  %14588 = vst [vmem:[#allocation51_spill] sm:$0xff] %v8872_v1 }
  0xa1   :  { %14586 = vst [vmem:[#allocation49_spill] sm:$0xff] %v8863_v5  ;;  %14587 = vst [vmem:[#allocation50_spill] sm:$0xff] %v8865_v32  ;;  %v1346_v2 = vcombine.low %v8839_v48, %v8863_v5  ;;  %v1330_v25 = vcombine.low %v8841_v21, %v8865_v32  ;;  %v8912_v5 = vld [vmem:[%s14132_s0 + $0x78] sm:$0xff] }
  0xa2   :  { %164 = vrot.lane.b32.xlu1 %v8856_v27, %s8239_s11  ;;  %160 = vrot.lane.b32.xlu0 %v8861_v53, %s8239_s11  ;;  %14594 = vst [vmem:[#allocation57_spill] sm:$0xff] %v8912_v5 }
  0xa3   :  { %v8882_v26 = vrot.slane %v1346_v2, %v8394_v38  ;;  %v8885_v48 = vrot.slane %v1330_v25, %v8394_v38  ;;  %v1362_v25 = vcombine.low %v8875_v43, %v8872_v1  ;;  %v974_v43 = vcombine.low %v8708_v33, %v8716_v35 }
  0xa4   :  { %v8897_v21 = vpop.permute.xlu1 %388  ;;  %v8899_v32 = vpop.permute.xlu0 %384  ;;  %v958_v1 = vcombine.low %v8710_v34, %v8718_v36 }
  0xa5   :  { %14590 = vst [vmem:[#allocation53_spill] sm:$0xff] %v8882_v26  ;;  %14591 = vst [vmem:[#allocation54_spill] sm:$0xff] %v8885_v48  ;;  %v1394_v2 = vcombine.low %v8885_v48, %v8882_v26  ;;  %v8931_v44 = vrot.slane %v1362_v25, %v8775_v49  ;;  %v1586_v25 = vcombine.low %v8692_v29, %v8690_v28 }
  0xa6   :  { %172 = vrot.lane.b32.xlu1 %v8890_v15, %s8239_s11  ;;  %168 = vrot.lane.b32.xlu0 %v8895_v18, %s8239_s11  ;;  %v982_v26 = vrot.slane %v974_v43, %v8394_v38  ;;  %v966_v11 = vrot.slane %v958_v1, %v8394_v38 }
  0xa7   :  { %v8924_v45 = vrot.slane %v1394_v2, %v8775_v49  ;;  %14597 = vst [vmem:[#allocation60_spill] sm:$0xff] %v8931_v44  ;;  %v1594_v48 = vrot.slane %v1586_v25, %v8394_v38 }
  0xa8   :  { %v8919_v46 = vpop.permute.xlu1 %396  ;;  %v8921_v47 = vpop.permute.xlu0 %392  ;;  %v990_v1 = vcombine.low %v966_v11, %v982_v26 }
  0xa9   :  { %14596 = vst [vmem:[#allocation59_spill] sm:$0xff] %v8924_v45  ;;  %v1602_v43 = vcombine.low %v1578_v8, %v1594_v48 }
  0xaa   :  { %162 = vrot.lane.b32.xlu1 %v8912_v5, %s8239_s11  ;;  %158 = vrot.lane.b32.xlu0 %v8917_v20, %s8239_s11 }
  0xac   :  { %v8943_v2 = vpop.permute.xlu1 %210  ;;  %v8945_v51 = vpop.permute.xlu0 %206 }
  0xad   :  { %14600 = vst [vmem:[#allocation63_spill] sm:$0xff] %v8943_v2  ;;  %14601 = vst [vmem:[#allocation64_spill] sm:$0xff] %v8945_v51 }
  0xae   :  { %170 = vrot.lane.b32.xlu1 %v8936_v7, %s8239_s11  ;;  %166 = vrot.lane.b32.xlu0 %v8941_v50, %s8239_s11 }
  0xb0   :  { %v8959_v4 = vpop.permute.xlu1 %218  ;;  %v8961_v9 = vpop.permute.xlu0 %214 }
  0xb1   :  { %14602 = vst [vmem:[#allocation65_spill] sm:$0xff] %v8959_v4  ;;  %14603 = vst [vmem:[#allocation66_spill] sm:$0xff] %v8961_v9  ;;  %v702_v22 = vcombine.low %v8943_v2, %v8959_v4 }
  0xb2   :  { %116 = vrot.lane.b32.xlu1 %v8856_v27, %s8242_s17  ;;  %112 = vrot.lane.b32.xlu0 %v8861_v53, %s8242_s17  ;;  %v686_v27 = vcombine.low %v8945_v51, %v8961_v9 }
  0xb3   :  { %v8994_v51 = vrot.slane %v702_v22, %v8394_v38  ;;  %v9014_v22 = vrot.slane %v990_v1, %v8775_v49 }
  0xb4   :  { %v8972_v12 = vpop.permute.xlu1 %258  ;;  %v8974_v3 = vpop.permute.xlu0 %254 }
  0xb5   :  { %14604 = vst [vmem:[#allocation67_spill] sm:$0xff] %v8972_v12  ;;  %14605 = vst [vmem:[#allocation68_spill] sm:$0xff] %v8974_v3 }
  0xb6   :  { %124 = vrot.lane.b32.xlu1 %v8890_v15, %s8242_s17  ;;  %120 = vrot.lane.b32.xlu0 %v8895_v18, %s8242_s17  ;;  %v8997_v15 = vrot.slane %v686_v27, %v8394_v38  ;;  %14611 = vst [vmem:[#allocation74_spill] sm:$0xff] %v9014_v22  ;;  %v9017_v27 = vrot.slane %v1602_v43, %v8775_v49  ;;  %v14615_v43 = vmov 0.0  }
  0xb8   :  { %v8985_v25 = vpop.permute.xlu1 %266  ;;  %v8987_v53 = vpop.permute.xlu0 %262  ;;  %14608 = vst [vmem:[#allocation71_spill] sm:$0xff] %v8997_v15  ;;  %14612 = vst [vmem:[#allocation75_spill] sm:$0xff] %v9017_v27 }
  0xb9   :  { %14606 = vst [vmem:[#allocation69_spill] sm:$0xff] %v8985_v25  ;;  %14607 = vst [vmem:[#allocation70_spill] sm:$0xff] %v8987_v53  ;;  %v734_v54 = vcombine.low %v8972_v12, %v8985_v25  ;;  %v718_v2 = vcombine.low %v8974_v3, %v8987_v53  ;;  %v1022_v12 = vcombine.high %v9014_v22, %v14615_v43 }
  0xba   :  { %114 = vrot.lane.b32.xlu1 %v8912_v5, %s8242_s17  ;;  %110 = vrot.lane.b32.xlu0 %v8917_v20, %s8242_s17  ;;  %v991_v20 = vcombine.high %v966_v11, %v982_v26  ;;  %v1634_v25 = vcombine.high %v9017_v27, %v14615_v43  ;;  %v1571_v11 = vcombine.high %v8674_v24, %v8672_v23 }
  0xbb   :  { %v9004_v18 = vrot.slane %v734_v54, %v8394_v38  ;;  %v9007_v9 = vrot.slane %v718_v2, %v8394_v38  ;;  %v750_v54 = vcombine.low %v8997_v15, %v8994_v51  ;;  %v1603_v2 = vcombine.high %v1578_v8, %v1594_v48 }
  0xbc   :  { %v9009_v4 = vpop.permute.xlu1 %386  ;;  %v9011_v3 = vpop.permute.xlu0 %382  ;;  %v959_v23 = vcombine.high %v8710_v34, %v8718_v36  ;;  %v9067_v24 = vrot.slane %v1571_v11, %v8394_v38  ;;  %v2794_v34 = vcombine.low %v8899_v32, %v8921_v47 }
  0xbd   :  { %14609 = vst [vmem:[#allocation72_spill] sm:$0xff] %v9009_v4  ;;  %14610 = vst [vmem:[#allocation73_spill] sm:$0xff] %v9011_v3  ;;  %v782_v5 = vcombine.low %v9007_v9, %v9004_v18  ;;  %v9043_v8 = vrot.slane %v750_v54, %v8775_v49  ;;  %v1617_v22 = vrot.slane %v1603_v2, %v8775_v49 }
  0xbe   :  { %122 = vrot.lane.b32.xlu1 %v8936_v7, %s8242_s17  ;;  %118 = vrot.lane.b32.xlu0 %v8941_v50, %s8242_s17  ;;  %v1587_v7 = vcombine.high %v8692_v29, %v8690_v28  ;;  %v975_v29 = vcombine.high %v8708_v33, %v8716_v35  ;;  %v2810_v33 = vcombine.low %v8897_v21, %v8919_v46 }
  0xbf   :  { %v9036_v15 = vrot.slane %v782_v5, %v8775_v49  ;;  %14617 = vst [vmem:[#allocation79_spill] sm:$0xff] %v9043_v8  ;;  %v1005_v5 = vrot.slane %v991_v20, %v8775_v49  ;;  %v2674_v20 = vcombine.low %v8463_v55, %v8477_v57  ;;  %v1563_v55 = vcombine.high %v8789_v13, %v8792_v30 }
  0xc0   :  { %v9027_v53 = vpop.permute.xlu1 %394  ;;  %v9029_v1 = vpop.permute.xlu0 %390  ;;  %v2658_v57 = vcombine.low %v8468_v56, %v8482_v58  ;;  %v14622_v54 = vcombine.high %v8397_v39, %v8400_v40  ;;  %v9097_v11 = vrot.slane %v975_v29, %v8394_v38  ;;  %v9100_v56 = vrot.slane %v959_v23, %v8394_v38 }
  0xc1   :  { %14613 = vst [vmem:[#allocation76_spill] sm:$0xff] %v9027_v53  ;;  %14614 = vst [vmem:[#allocation77_spill] sm:$0xff] %v9029_v1  ;;  %v919_v58 = vcombine.high %v8798_v14, %v8795_v17  ;;  %v9116_v23 = vrot.slane %v2810_v33, %v8394_v38  ;;  %v1023_v14 = vcombine.high %v1005_v5, %v14615_v43 }
  0xc2   :  { %14616 = vst [vmem:[#allocation78_spill] sm:$0xff] %v9036_v15  ;;  %2880 = vrot.lane.b32.xlu1 %v1022_v12, %s8244_s22  ;;  %3160 = vrot.lane.b32.xlu0 %v1634_v25, %s8244_s22  ;;  %v9056_v12 = vrot.slane %v1587_v7, %v8394_v38  ;;  %v1531_v7 = vcombine.high %v8748_v52, %v8745_v6 }
  0xc3   :  { %v1635_v25 = vcombine.high %v1617_v22, %v14615_v43  ;;  %v9092_v2 = vrot.slane %v14622_v54, %v8775_v49  ;;  %v9119_v54 = vrot.slane %v2794_v34, %v8394_v38  ;;  %v951_v17 = vcombine.high %v8834_v31, %v8837_v16 }
  0xc4   :  { %v9047_v26 = vpop.permute.xlu1 %148  ;;  %v9049_v48 = vpop.permute.xlu0 %144  ;;  %v9113_v29 = vrot.slane %v1531_v7, %v8775_v49  ;;  %v9134_v33 = vrot.slane %v2658_v57, %v8394_v38  ;;  %v1006_v57 = vcombine.low %v9100_v56, %v9097_v11 }
  0xc5   :  { %14618 = vst [vmem:[#allocation80_spill] sm:$0xff] %v9047_v26  ;;  %14619 = vst [vmem:[#allocation81_spill] sm:$0xff] %v9049_v48 }
  0xc6   :  { %2920 = vrot.lane.b32.xlu1 %v1005_v5, %s8245_s23  ;;  %3200 = vrot.lane.b32.xlu0 %v1617_v22, %s8245_s23  ;;  %v1618_v22 = vcombine.low %v9067_v24, %v9056_v12  ;;  %v14625_v5 = vcombine.high %v8408_v42, %v8405_v41  ;;  %v2826_v41 = vcombine.low %v9119_v54, %v9116_v23 }
  0xc7   :  { %v2198_v42 = vcombine.low %v9009_v4, %v9027_v53  ;;  %v1014_v27 = vrot.slane %v1006_v57, %v8775_v49 }
  0xc8   :  { %v9075_v35 = vpop.permute.xlu1 %156  ;;  %v9077_v36 = vpop.permute.xlu0 %152  ;;  %v9142_v34 = vrot.slane %v14625_v5, %v8775_v49  ;;  %v1626_v28 = vrot.slane %v1618_v22, %v8775_v49  ;;  %v2182_v5 = vcombine.low %v9011_v3, %v9029_v1  ;;  %v14655_v1 = vld [vmem:[#allocation51_spill] sm:$0xff] }
  0xc9   :  { %14620 = vst [vmem:[#allocation82_spill] sm:$0xff] %v9075_v35  ;;  %14621 = vst [vmem:[#allocation83_spill] sm:$0xff] %v9077_v36  ;;  %v1178_v52 = vcombine.low %v9047_v26, %v9075_v35  ;;  %v1162_v6 = vcombine.low %v9049_v48, %v9077_v36  ;;  %v1427_v36 = vcombine.high %v8931_v44, %v8924_v45  ;;  %v14638_v45 = vld [vmem:[#allocation28_spill] sm:$0xff] }
  0xca   :  { %3240 = vrot.lane.b32.xlu1 %v1635_v25, %s8246_s24  ;;  %3158 = vrot.lane.b32.xlu0 %v1563_v55, %s8244_s22  ;;  %v1467_v44 = vcombine.high %v14638_v45, %v8734_v19 }
  0xcb   :  { %v9107_v39 = vrot.slane %v1178_v52, %v8394_v38  ;;  %v9110_v40 = vrot.slane %v1162_v6, %v8394_v38  ;;  %v9129_v52 = vrot.slane %v2674_v20, %v8394_v38  ;;  %v14626_v20 = vcombine.low %v8538_v0, %v8532_v63 }
  0xcc   :  { %v9121_v25 = vpop.permute.xlu1 %340  ;;  %v9123_v55 = vpop.permute.xlu0 %336 }
  0xcd   :  { %14623 = vst [vmem:[#allocation84_spill] sm:$0xff] %v9121_v25  ;;  %14624 = vst [vmem:[#allocation85_spill] sm:$0xff] %v9123_v55  ;;  %v1226_v7 = vcombine.low %v9110_v40, %v9107_v39  ;;  %v9148_v6 = vrot.slane %v14626_v20, %v8775_v49  ;;  %v2722_v30 = vcombine.low %v9134_v33, %v9129_v52 }
  0xce   :  { %2960 = vrot.lane.b32.xlu1 %v1023_v14, %s8246_s24  ;;  %2878 = vrot.lane.b32.xlu0 %v951_v17, %s8244_s22  ;;  %v1564_v14 = vcombine.low %v9092_v2, %v9113_v29  ;;  %v9156_v17 = vrot.slane %v919_v58, %v8775_v49 }
  0xcf   :  { %14627 = vst [vmem:[#allocation86_spill] sm:$0xff] %v9148_v6  ;;  %v9169_v22 = vrot.slane %v1226_v7, %v8775_v49 }
  0xd0   :  { %v9164_v20 = vpop.permute.xlu1 %348  ;;  %v9166_v16 = vpop.permute.xlu0 %344 }
  0xd1   :  { %14628 = vst [vmem:[#allocation87_spill] sm:$0xff] %v9164_v20  ;;  %14629 = vst [vmem:[#allocation88_spill] sm:$0xff] %v9166_v16  ;;  %v2706_v58 = vcombine.low %v9121_v25, %v9164_v20  ;;  %v2690_v31 = vcombine.low %v9123_v55, %v9166_v16  ;;  %v952_v25 = vcombine.low %v9142_v34, %v9156_v17 }
  0xd2   :  { %14630 = vst [vmem:[#allocation89_spill] sm:$0xff] %v9169_v22  ;;  %3280 = vrot.lane.b32.xlu1 %v1626_v28, %s8247_s25  ;;  %3198 = vrot.lane.b32.xlu0 %v1564_v14, %s8245_s23  ;;  %v9189_v55 = vrot.slane %v2198_v42, %v8394_v38  ;;  %v9192_v16 = vrot.slane %v2182_v5, %v8394_v38 }
  0xd3   :  { %v9180_v13 = vrot.slane %v2706_v58, %v8394_v38  ;;  %v9183_v7 = vrot.slane %v2690_v31, %v8394_v38  ;;  %v9199_v58 = vrot.slane %v2826_v41, %v8775_v49  ;;  %v9208_v42 = vrot.slane %v2722_v30, %v8775_v49 }
  0xd4   :  { %v9194_v14 = vpop.permute.xlu1 %146  ;;  %v9196_v20 = vpop.permute.xlu0 %142  ;;  %v2214_v5 = vcombine.low %v9192_v16, %v9189_v55  ;;  %v2062_v30 = vcombine.low %v8507_v59, %v8521_v61 }
  0xd5   :  { %14631 = vst [vmem:[#allocation90_spill] sm:$0xff] %v9194_v14  ;;  %14632 = vst [vmem:[#allocation91_spill] sm:$0xff] %v9196_v20  ;;  %v2754_v57 = vcombine.low %v9183_v7, %v9180_v13  ;;  %v2858_v31 = vcombine.high %v9199_v58, %v14615_v43 }
  0xd6   :  { %14633 = vst [vmem:[#allocation92_spill] sm:$0xff] %v9199_v58  ;;  %3000 = vrot.lane.b32.xlu1 %v1014_v27, %s8247_s25  ;;  %2918 = vrot.lane.b32.xlu0 %v952_v25, %s8245_s23  ;;  %14634 = vst [vmem:[#allocation93_spill] sm:$0xff] %v9208_v42  ;;  %v2046_v25 = vcombine.low %v8512_v60, %v8526_v62  ;;  %v1483_v58 = vcombine.high %v8724_v37, %v8732_v10 }
  0xd7   :  { %v9221_v26 = vrot.slane %v2754_v57, %v8775_v49  ;;  %v1636_v57 = vcombine.high %v1626_v28, %v14615_v43  ;;  %v1565_v10 = vcombine.high %v9092_v2, %v9113_v29  ;;  %v9251_v45 = vrot.slane %v2214_v5, %v8775_v49  ;;  %v14642_v2 = vld [vmem:[#allocation14_spill] sm:$0xff]  ;;  %v14643_v29 = vld [vmem:[#allocation12_spill] sm:$0xff]  ;;  %v14644_v5 = vld [vmem:[#allocation17_spill] sm:$0xff] }
  0xd8   :  { %v9212_v48 = vpop.permute.xlu1 %154  ;;  %v9214_v41 = vpop.permute.xlu0 %150  ;;  %v9256_v37 = vrot.slane %v2062_v30, %v8394_v38  ;;  %v9264_v28 = vrot.slane %v1483_v58, %v8394_v38  ;;  %v14645_v30 = vld [vmem:[#allocation16_spill] sm:$0xff]  ;;  %v14649_v58 = vld [vmem:[#allocation54_spill] sm:$0xff] }
  0xd9   :  { %14635 = vst [vmem:[#allocation94_spill] sm:$0xff] %v9212_v48  ;;  %14636 = vst [vmem:[#allocation95_spill] sm:$0xff] %v9214_v41  ;;  %v566_v35 = vcombine.low %v9194_v14, %v9212_v48  ;;  %v550_v50 = vcombine.low %v9196_v20, %v9214_v41  ;;  %v14648_v20 = vld [vmem:[#allocation53_spill] sm:$0xff] }
  0xda   :  { %14637 = vst [vmem:[#allocation96_spill] sm:$0xff] %v9221_v26  ;;  %3170 = vrot.lane.b32.xlu1 %v2858_v31, %s8244_s22  ;;  %3156 = vrot.lane.b32.xlu0 %v1427_v36, %s8244_s22  ;;  %14641 = vst [vmem:[#allocation98_spill] sm:$0xff] %v9251_v45  ;;  %v9267_v36 = vrot.slane %v1467_v44, %v8394_v38  ;;  %v1042_v31 = vcombine.low %v14643_v29, %v14642_v2  ;;  %v14653_v29 = vld [vmem:[#allocation15_spill] sm:$0xff]  ;;  %v14654_v48 = vld [vmem:[#allocation13_spill] sm:$0xff] }
  0xdb   :  { %v9238_v59 = vrot.slane %v566_v35, %v8394_v38  ;;  %v9241_v60 = vrot.slane %v550_v50, %v8394_v38  ;;  %v9259_v50 = vrot.slane %v2046_v25, %v8394_v38  ;;  %v14646_v25 = vcombine.low %v14644_v5, %v14645_v30 }
  0xdc   :  { %v9243_v61 = vpop.permute.xlu1 %338  ;;  %v9245_v62 = vpop.permute.xlu0 %334  ;;  %v1395_v41 = vcombine.high %v14649_v58, %v14648_v20 }
  0xdd   :  { %14639 = vst [vmem:[#allocation28_spill] sm:$0xff] %v9243_v61  ;;  %14640 = vst [vmem:[#allocation97_spill] sm:$0xff] %v9245_v62  ;;  %v614_v35 = vcombine.low %v9241_v60, %v9238_v59  ;;  %v9277_v19 = vrot.slane %v14646_v25, %v8775_v49  ;;  %v1026_v25 = vcombine.low %v14654_v48, %v14653_v29  ;;  %v14658_v29 = vld [vmem:[#allocation29_spill] sm:$0xff] }
  0xde   :  { %3320 = vrot.lane.b32.xlu1 %v1636_v57, %s8248_s26  ;;  %3238 = vrot.lane.b32.xlu0 %v1565_v10, %s8246_s24  ;;  %v2246_v57 = vcombine.high %v9251_v45, %v14615_v43  ;;  %v815_v10 = vcombine.high %v9043_v8, %v9036_v15  ;;  %v2110_v58 = vcombine.low %v9259_v50, %v9256_v37  ;;  %v14656_v15 = vld [vmem:[#allocation52_spill] sm:$0xff] }
  0xdf   :  { %14647 = vst [vmem:[#allocation14_spill] sm:$0xff] %v9277_v19  ;;  %v9290_v2 = vrot.slane %v614_v35, %v8775_v49  ;;  %v1546_v45 = vcombine.low %v9267_v36, %v9264_v28  ;;  %v1363_v8 = vcombine.high %v14656_v15, %v14655_v1  ;;  %v1024_v48 = vcombine.high %v1014_v27, %v14615_v43  ;;  %v14657_v35 = vld [vmem:[#allocation33_spill] sm:$0xff] }
  0xe0   :  { %v9281_v14 = vpop.permute.xlu1 %346  ;;  %v9283_v44 = vpop.permute.xlu0 %342  ;;  %v2827_v15 = vcombine.high %v9119_v54, %v9116_v23  ;;  %v953_v27 = vcombine.high %v9142_v34, %v9156_v17  ;;  %v14665_v34 = vld [vmem:[#allocation6_spill] sm:$0xff]  ;;  %v14666_v17 = vld [vmem:[#allocation7_spill] sm:$0xff] }
  0xe1   :  { %14650 = vst [vmem:[#allocation12_spill] sm:$0xff] %v9281_v14  ;;  %14651 = vst [vmem:[#allocation17_spill] sm:$0xff] %v9283_v44  ;;  %v2094_v3 = vcombine.low %v9243_v61, %v9281_v14  ;;  %v2078_v20 = vcombine.low %v9245_v62, %v9283_v44  ;;  %v871_v61 = vcombine.high %v14658_v29, %v14657_v35  ;;  %v14659_v14 = vld [vmem:[#allocation34_spill] sm:$0xff] }
  0xe2   :  { %14652 = vst [vmem:[#allocation16_spill] sm:$0xff] %v9290_v2  ;;  %2890 = vrot.lane.b32.xlu1 %v2246_v57, %s8244_s22  ;;  %2876 = vrot.lane.b32.xlu0 %v815_v10, %s8244_s22  ;;  %v14660_v62 = vld [vmem:[#allocation30_spill] sm:$0xff]  ;;  %v9326_v10 = vrot.slane %v1395_v41, %v8775_v49  ;;  %v9341_v54 = vrot.slane %v1363_v8, %v8775_v49 }
  0xe3   :  { %v855_v44 = vcombine.high %v14660_v62, %v14659_v14  ;;  %v9312_v4 = vrot.slane %v2094_v3, %v8394_v38  ;;  %v9315_v53 = vrot.slane %v2078_v20, %v8394_v38  ;;  %v9331_v14 = vrot.slane %v1042_v31, %v8394_v38 }
  0xe4   :  { %v9319_v1 = vpop.permute.xlu1 %100  ;;  %v9321_v57 = vpop.permute.xlu0 %96  ;;  %v9334_v62 = vrot.slane %v1026_v25, %v8394_v38  ;;  %v14667_v41 = vcombine.low %v14665_v34, %v14666_v17  ;;  %v9350_v31 = vrot.slane %v2110_v58, %v8775_v49  ;;  %v1619_v25 = vcombine.high %v9067_v24, %v9056_v12 }
  0xe5   :  { %14661 = vst [vmem:[#allocation53_spill] sm:$0xff] %v9319_v1  ;;  %14662 = vst [vmem:[#allocation54_spill] sm:$0xff] %v9321_v57  ;;  %v2142_v23 = vcombine.low %v9315_v53, %v9312_v4  ;;  %v9355_v35 = vrot.slane %v871_v61, %v8394_v38  ;;  %v9361_v8 = vrot.slane %v1546_v45, %v8775_v49 }
  0xe6   :  { %14663 = vst [vmem:[#allocation15_spill] sm:$0xff] %v9331_v14  ;;  %14664 = vst [vmem:[#allocation13_spill] sm:$0xff] %v9334_v62  ;;  %3040 = vrot.lane.b32.xlu1 %v1024_v48, %s8248_s26  ;;  %2958 = vrot.lane.b32.xlu0 %v953_v27, %s8246_s24  ;;  %v9347_v20 = vrot.slane %v14667_v41, %v8775_v49  ;;  %v9358_v48 = vrot.slane %v855_v44, %v8394_v38 }
  0xe7   :  { %14668 = vst [vmem:[#allocation51_spill] sm:$0xff] %v9350_v31  ;;  %14669 = vst [vmem:[#allocation52_spill] sm:$0xff] %v9355_v35  ;;  %v783_v29 = vcombine.high %v9007_v9, %v9004_v18  ;;  %v2841_v58 = vrot.slane %v2827_v15, %v8775_v49  ;;  %v1428_v12 = vcombine.low %v9341_v54, %v9326_v10  ;;  %v14674_v9 = vld [vmem:[#allocation71_spill] sm:$0xff] }
  0xe8   :  { %14670 = vst [vmem:[#allocation33_spill] sm:$0xff] %v9358_v48  ;;  %v9365_v27 = vpop.permute.xlu1 %108  ;;  %v9367_v41 = vpop.permute.xlu0 %104  ;;  %v9373_v24 = vrot.slane %v2142_v23, %v8775_v49  ;;  %v751_v18 = vcombine.high %v14674_v9, %v8994_v51  ;;  %v1090_v44 = vcombine.low %v9334_v62, %v9331_v14  ;;  %v1633_v3 = vrot.slane %v1619_v25, %v8775_v49 }
  0xe9   :  { %14671 = vst [vmem:[#allocation29_spill] sm:$0xff] %v9365_v27  ;;  %14672 = vst [vmem:[#allocation34_spill] sm:$0xff] %v9367_v41  ;;  %v1074_v61 = vcombine.low %v9319_v1, %v9365_v27  ;;  %v1058_v45 = vcombine.low %v9321_v57, %v9367_v41  ;;  %v1566_v57 = vcombine.low %v9347_v20, %v9361_v8  ;;  %v14680_v1 = vld [vmem:[#allocation8_spill] sm:$0xff] }
  0xea   :  { %14673 = vst [vmem:[#allocation30_spill] sm:$0xff] %v9373_v24  ;;  %3210 = vrot.lane.b32.xlu1 %v2841_v58, %s8245_s23  ;;  %3196 = vrot.lane.b32.xlu0 %v1428_v12, %s8245_s23  ;;  %v934_v51 = vcombine.low %v9358_v48, %v9355_v35  ;;  %v2215_v12 = vcombine.high %v9192_v16, %v9189_v55 }
  0xeb   :  { %v9386_v15 = vrot.slane %v1074_v61, %v8394_v38  ;;  %v9389_v23 = vrot.slane %v1058_v45, %v8394_v38  ;;  %v9403_v61 = vrot.slane %v783_v29, %v8775_v49  ;;  %v9412_v16 = vrot.slane %v751_v18, %v8775_v49  ;;  %v14679_v29 = vld [vmem:[#allocation9_spill] sm:$0xff] }
  0xec   :  { %v9398_v9 = vpop.permute.xlu1 %228  ;;  %v9400_v41 = vpop.permute.xlu0 %224  ;;  %v1007_v55 = vcombine.high %v9100_v56, %v9097_v11  ;;  %v14681_v27 = vcombine.low %v14679_v29, %v14680_v1  ;;  %v9423_v45 = vrot.slane %v1090_v44, %v8775_v49  ;;  %v9435_v11 = vrot.slane %v934_v51, %v8775_v49 }
  0xed   :  { %14675 = vst [vmem:[#allocation6_spill] sm:$0xff] %v9386_v15  ;;  %14676 = vst [vmem:[#allocation7_spill] sm:$0xff] %v9389_v23  ;;  %v1122_v25 = vcombine.low %v9389_v23, %v9386_v15  ;;  %v816_v18 = vcombine.low %v9412_v16, %v9403_v61  ;;  %v2787_v29 = vcombine.high %v9208_v42, %v9221_v26 }
  0xee   :  { %14677 = vst [vmem:[#allocation71_spill] sm:$0xff] %v9398_v9  ;;  %14678 = vst [vmem:[#allocation99_spill] sm:$0xff] %v9400_v41  ;;  %3360 = vrot.lane.b32.xlu1 %v1633_v3, %s8249_s27  ;;  %3278 = vrot.lane.b32.xlu0 %v1566_v57, %s8247_s25  ;;  %v9420_v62 = vrot.slane %v14681_v27, %v8775_v49  ;;  %v9430_v57 = vrot.slane %v2215_v12, %v8775_v49 }
  0xef   :  { %14682 = vst [vmem:[#allocation100_spill] sm:$0xff] %v9423_v45  ;;  %v9438_v56 = vrot.slane %v1122_v25, %v8775_v49  ;;  %v9448_v12 = vrot.slane %v1007_v55, %v8775_v49  ;;  %v1291_v51 = vcombine.high %v9169_v22, %v9148_v6  ;;  %v14690_v45 = vld [vmem:[#allocation22_spill] sm:$0xff] }
  0xf0   :  { %v9425_v23 = vpop.permute.xlu1 %236  ;;  %v9427_v15 = vpop.permute.xlu0 %232  ;;  %v954_v14 = vcombine.low %v9420_v62, %v9435_v11 }
  0xf1   :  { %14683 = vst [vmem:[#allocation101_spill] sm:$0xff] %v9425_v23  ;;  %14684 = vst [vmem:[#allocation102_spill] sm:$0xff] %v9427_v15  ;;  %v2538_v25 = vcombine.low %v9398_v9, %v9425_v23  ;;  %v2522_v1 = vcombine.low %v9400_v41, %v9427_v15  ;;  %v14691_v9 = vld [vmem:[#allocation20_spill] sm:$0xff] }
  0xf2   :  { %14685 = vst [vmem:[#allocation103_spill] sm:$0xff] %v9438_v56  ;;  %2930 = vrot.lane.b32.xlu1 %v9430_v57, %s8245_s23  ;;  %2916 = vrot.lane.b32.xlu0 %v816_v18, %s8245_s23  ;;  %v430_v23 = vcombine.low %v14691_v9, %v14690_v45  ;;  %v14693_v56 = vld [vmem:[#allocation21_spill] sm:$0xff] }
  0xf3   :  { %v9478_v35 = vrot.slane %v2538_v25, %v8394_v38  ;;  %v9481_v26 = vrot.slane %v2522_v1, %v8394_v38  ;;  %v1429_v1 = vcombine.high %v9341_v54, %v9326_v10  ;;  %v1637_v10 = vcombine.high %v1633_v3, %v14615_v43  ;;  %v14705_v3 = vld [vmem:[#allocation39_spill] sm:$0xff] }
  0xf4   :  { %v9443_v27 = vpop.permute.xlu1 %276  ;;  %v9445_v44 = vpop.permute.xlu0 %272  ;;  %v1567_v54 = vcombine.high %v9347_v20, %v9361_v8 }
  0xf5   :  { %14686 = vst [vmem:[#allocation104_spill] sm:$0xff] %v9443_v27  ;;  %14687 = vst [vmem:[#allocation105_spill] sm:$0xff] %v9445_v44 }
  0xf6   :  { %3080 = vrot.lane.b32.xlu1 %v9448_v12, %s8249_s27  ;;  %2998 = vrot.lane.b32.xlu0 %v954_v14, %s8247_s25  ;;  %v14692_v14 = vld [vmem:[#allocation23_spill] sm:$0xff]  ;;  %14694 = vst [vmem:[#allocation22_spill] sm:$0xff] %v9481_v26 }
  0xf7   :  { %v414_v48 = vcombine.low %v14693_v56, %v14692_v14  ;;  %v2859_v56 = vcombine.high %v2841_v58, %v14615_v43  ;;  %v14701_v14 = vld [vmem:[#allocation45_spill] sm:$0xff] }
  0xf8   :  { %v9461_v18 = vpop.permute.xlu1 %284  ;;  %v9463_v55 = vpop.permute.xlu0 %280 }
  0xf9   :  { %14688 = vst [vmem:[#allocation106_spill] sm:$0xff] %v9461_v18  ;;  %14689 = vst [vmem:[#allocation107_spill] sm:$0xff] %v9463_v55  ;;  %v2570_v41 = vcombine.low %v9443_v27, %v9461_v18  ;;  %v2554_v15 = vcombine.low %v9445_v44, %v9463_v55  ;;  %v14702_v44 = vld [vmem:[#allocation50_spill] sm:$0xff]  ;;  %v14704_v18 = vld [vmem:[#allocation41_spill] sm:$0xff] }
  0xfa   :  { %3168 = vrot.lane.b32.xlu1 %v2787_v29, %s8244_s22  ;;  %3154 = vrot.lane.b32.xlu0 %v1291_v51, %s8244_s22  ;;  %v9501_v51 = vrot.slane %v430_v23, %v8394_v38  ;;  %v14703_v55 = vld [vmem:[#allocation46_spill] sm:$0xff] }
  0xfb   :  { %v9486_v9 = vrot.slane %v2570_v41, %v8394_v38  ;;  %v9489_v45 = vrot.slane %v2554_v15, %v8394_v38  ;;  %v9504_v41 = vrot.slane %v414_v48, %v8394_v38  ;;  %v2586_v15 = vcombine.low %v9481_v26, %v9478_v35  ;;  %v14700_v48 = vld [vmem:[#allocation49_spill] sm:$0xff] }
  0xfc   :  { %v9491_v42 = vpop.permute.xlu1 %98  ;;  %v9493_v6 = vpop.permute.xlu0 %94  ;;  %v1347_v22 = vcombine.high %v14701_v14, %v14700_v48  ;;  %v1315_v26 = vcombine.high %v14705_v3, %v14704_v18 }
  0xfd   :  { %14695 = vst [vmem:[#allocation20_spill] sm:$0xff] %v9491_v42  ;;  %14696 = vst [vmem:[#allocation23_spill] sm:$0xff] %v9493_v6  ;;  %v2618_v29 = vcombine.low %v9489_v45, %v9486_v9  ;;  %v9533_v20 = vrot.slane %v2586_v15, %v8775_v49  ;;  %v478_v8 = vcombine.low %v9504_v41, %v9501_v51 }
  0xfe   :  { %3250 = vrot.lane.b32.xlu1 %v2859_v56, %s8246_s24  ;;  %3236 = vrot.lane.b32.xlu0 %v1429_v1, %s8246_s24  ;;  %v1331_v56 = vcombine.high %v14703_v55, %v14702_v44  ;;  %v14707_v44 = vld [vmem:[#allocation42_spill] sm:$0xff]  ;;  %v14708_v55 = vld [vmem:[#allocation40_spill] sm:$0xff]  ;;  %v679_v15 = vcombine.high %v9290_v2, %v9277_v19  ;;  %v9566_v19 = vrot.slane %v1315_v26, %v8394_v38 }
  0xff   :  { %v9518_v23 = vrot.slane %v2618_v29, %v8775_v49  ;;  %14706 = vst [vmem:[#allocation49_spill] sm:$0xff] %v9533_v20  ;;  %v1299_v29 = vcombine.high %v14708_v55, %v14707_v44  ;;  %v9556_v44 = vrot.slane %v1347_v22, %v8394_v38  ;;  %v2723_v55 = vcombine.high %v9134_v33, %v9129_v52 }
 0x100   :  { %v9510_v58 = vpop.permute.xlu1 %106  ;;  %v9512_v25 = vpop.permute.xlu0 %102  ;;  %v9571_v3 = vrot.slane %v478_v8, %v8775_v49  ;;  %v817_v26 = vcombine.high %v9412_v16, %v9403_v61  ;;  %v1227_v52 = vcombine.high %v9110_v40, %v9107_v39  ;;  %v2755_v33 = vcombine.high %v9183_v7, %v9180_v13  ;;  %v14718_v16 = vld [vmem:[#allocation67_spill] sm:$0xff] }
 0x101   :  { %14697 = vst [vmem:[#allocation21_spill] sm:$0xff] %v9510_v58  ;;  %14698 = vst [vmem:[#allocation108_spill] sm:$0xff] %v9512_v25  ;;  %v462_v1 = vcombine.low %v9491_v42, %v9510_v58  ;;  %v446_v27 = vcombine.low %v9493_v6, %v9512_v25  ;;  %v9574_v22 = vrot.slane %v1299_v29, %v8394_v38  ;;  %v14762_v42 = vld [vmem:[#allocation38_spill] sm:$0xff]  ;;  %v14763_v58 = vld [vmem:[#allocation32_spill] sm:$0xff] }
 0x102   :  { %14699 = vst [vmem:[#allocation109_spill] sm:$0xff] %v9518_v23  ;;  %3400 = vrot.lane.b32.xlu1 %v1637_v10, %s8250_s28  ;;  %3318 = vrot.lane.b32.xlu0 %v1567_v54, %s8248_s26  ;;  %v2175_v54 = vcombine.high %v9350_v31, %v9373_v24  ;;  %14711 = vst [vmem:[#allocation46_spill] sm:$0xff] %v9571_v3  ;;  %v2795_v24 = vcombine.high %v8899_v32, %v8921_v47  ;;  %v14734_v31 = vld [vmem:[#allocation72_spill] sm:$0xff] }
 0x103   :  { %v9540_v48 = vrot.slane %v462_v1, %v8394_v38  ;;  %v9543_v14 = vrot.slane %v446_v27, %v8394_v38  ;;  %v9559_v1 = vrot.slane %v1331_v56, %v8394_v38  ;;  %v2811_v56 = vcombine.high %v8897_v21, %v8919_v46 }
 0x104   :  { %v9545_v18 = vpop.permute.xlu1 %226  ;;  %v9547_v10 = vpop.permute.xlu0 %222  ;;  %v2247_v29 = vcombine.high %v9430_v57, %v14615_v43  ;;  %v14715_v21 = vcombine.high %v8538_v0, %v8532_v63  ;;  %v9604_v13 = vrot.slane %v2723_v55, %v8775_v49  ;;  %v14716_v39 = vcombine.high %v14665_v34, %v14666_v17  ;;  %v14717_v17 = vld [vmem:[#allocation69_spill] sm:$0xff] }
 0x105   :  { %14709 = vst [vmem:[#allocation45_spill] sm:$0xff] %v9545_v18  ;;  %14710 = vst [vmem:[#allocation50_spill] sm:$0xff] %v9547_v10  ;;  %v510_v27 = vcombine.low %v9543_v14, %v9540_v48  ;;  %v1410_v47 = vcombine.low %v9559_v1, %v9556_v44  ;;  %v1547_v7 = vcombine.high %v9267_v36, %v9264_v28  ;;  %v14719_v28 = vld [vmem:[#allocation70_spill] sm:$0xff]  ;;  %v14720_v36 = vld [vmem:[#allocation68_spill] sm:$0xff] }
 0x106   :  { %2874 = vrot.lane.b32.xlu0 %v679_v15, %s8244_s22  ;;  %2888 = vrot.lane.b32.xlu1 %v2175_v54, %s8244_s22  ;;  %v9601_v32 = vrot.slane %v14715_v21, %v8775_v49  ;;  %v9610_v40 = vrot.slane %v14716_v39, %v8775_v49  ;;  %v955_v63 = vcombine.high %v9420_v62, %v9435_v11 }
 0x107   :  { %v9593_v46 = vrot.slane %v510_v27, %v8775_v49  ;;  %v1025_v0 = vcombine.high %v9448_v12, %v14615_v43  ;;  %v1378_v61 = vcombine.low %v9574_v22, %v9566_v19  ;;  %v9623_v34 = vrot.slane %v2811_v56, %v8394_v38  ;;  %v14733_v56 = vld [vmem:[#allocation76_spill] sm:$0xff] }
 0x108   :  { %v9586_v8 = vpop.permute.xlu1 %234  ;;  %v9588_v15 = vpop.permute.xlu0 %230  ;;  %v735_v57 = vcombine.high %v14718_v16, %v14717_v17  ;;  %v719_v54 = vcombine.high %v14720_v36, %v14719_v28  ;;  %v9630_v27 = vrot.slane %v2795_v24, %v8394_v38  ;;  %v9637_v11 = vrot.slane %v1227_v52, %v8775_v49  ;;  %v14727_v16 = vld [vmem:[#allocation64_spill] sm:$0xff] }
 0x109   :  { %14712 = vst [vmem:[#allocation41_spill] sm:$0xff] %v9586_v8  ;;  %14713 = vst [vmem:[#allocation39_spill] sm:$0xff] %v9588_v15  ;;  %v9640_v12 = vrot.slane %v2755_v33, %v8775_v49  ;;  %v9647_v39 = vrot.slane %v1410_v47, %v8775_v49  ;;  %v14725_v24 = vcombine.high %v14644_v5, %v14645_v30  ;;  %v14726_v33 = vld [vmem:[#allocation66_spill] sm:$0xff] }
 0x10a   :  { %14714 = vst [vmem:[#allocation42_spill] sm:$0xff] %v9593_v46  ;;  %2956 = vrot.lane.b32.xlu0 %v817_v26, %s8246_s24  ;;  %2970 = vrot.lane.b32.xlu1 %v2247_v29, %s8246_s24  ;;  %v14723_v26 = vld [vmem:[#allocation65_spill] sm:$0xff]  ;;  %v14724_v29 = vld [vmem:[#allocation63_spill] sm:$0xff]  ;;  %v2111_v52 = vcombine.high %v9259_v50, %v9256_v37  ;;  %v687_v28 = vcombine.high %v14727_v16, %v14726_v33 }
 0x10b   :  { %v703_v21 = vcombine.high %v14724_v29, %v14723_v26  ;;  %v9653_v17 = vrot.slane %v14725_v24, %v8775_v49  ;;  %v1926_v36 = vcombine.low %v9545_v18, %v9586_v8  ;;  %v1910_v26 = vcombine.low %v9547_v10, %v9588_v15  ;;  %v14736_v15 = vld [vmem:[#allocation73_spill] sm:$0xff] }
 0x10c   :  { %v9632_v55 = vpop.permute.xlu1 %274  ;;  %v9634_v62 = vpop.permute.xlu0 %270  ;;  %v9666_v5 = vrot.slane %v735_v57, %v8394_v38  ;;  %v9669_v30 = vrot.slane %v719_v54, %v8394_v38  ;;  %v9672_v37 = vrot.slane %v1378_v61, %v8775_v49  ;;  %v9675_v50 = vrot.slane %v1547_v7, %v8775_v49 }
 0x10d   :  { %14721 = vst [vmem:[#allocation40_spill] sm:$0xff] %v9632_v55  ;;  %14722 = vst [vmem:[#allocation69_spill] sm:$0xff] %v9634_v62  ;;  %v2842_v47 = vcombine.low %v9630_v27, %v9623_v34  ;;  %v1292_v57 = vcombine.low %v9637_v11, %v9601_v32  ;;  %v2788_v61 = vcombine.low %v9604_v13, %v9640_v12 }
 0x10e   :  { %3038 = vrot.lane.b32.xlu0 %v955_v63, %s8248_s26  ;;  %3120 = vrot.lane.b32.xlu1 %v1025_v0, %s8250_s28  ;;  %14728 = vst [vmem:[#allocation67_spill] sm:$0xff] %v9669_v30  ;;  %v615_v63 = vcombine.high %v9241_v60, %v9238_v59  ;;  %v9690_v54 = vrot.slane %v703_v21, %v8394_v38 }
 0x10f   :  { %v1430_v59 = vcombine.low %v9672_v37, %v9647_v39  ;;  %v9699_v60 = vrot.slane %v687_v28, %v8394_v38  ;;  %v9702_v33 = vrot.slane %v1926_v36, %v8394_v38  ;;  %v9705_v16 = vrot.slane %v1910_v26, %v8394_v38  ;;  %v14735_v36 = vld [vmem:[#allocation77_spill] sm:$0xff] }
 0x110   :  { %v9681_v29 = vpop.permute.xlu1 %282  ;;  %v9683_v0 = vpop.permute.xlu0 %278  ;;  %14731 = vst [vmem:[#allocation65_spill] sm:$0xff] %v9690_v54  ;;  %v798_v21 = vcombine.low %v9669_v30, %v9666_v5  ;;  %v2199_v2 = vcombine.high %v14734_v31, %v14733_v56  ;;  %v2183_v26 = vcombine.high %v14736_v15, %v14735_v36  ;;  %v9728_v8 = vrot.slane %v2842_v47, %v8775_v49  ;;  %v14739_v56 = vld [vmem:[#allocation26_spill] sm:$0xff]  ;;  %v14744_v36 = vld [vmem:[#allocation33_spill] sm:$0xff] }
 0x111   :  { %14729 = vst [vmem:[#allocation70_spill] sm:$0xff] %v9681_v29  ;;  %14730 = vst [vmem:[#allocation68_spill] sm:$0xff] %v9683_v0  ;;  %v1958_v7 = vcombine.low %v9632_v55, %v9681_v29  ;;  %v1942_v24 = vcombine.low %v9634_v62, %v9683_v0  ;;  %v9731_v31 = vrot.slane %v615_v63, %v8775_v49  ;;  %v14741_v62 = vld [vmem:[#allocation27_spill] sm:$0xff]  ;;  %v14742_v0 = vld [vmem:[#allocation25_spill] sm:$0xff] }
 0x112   :  { %14732 = vst [vmem:[#allocation63_spill] sm:$0xff] %v9699_v60  ;;  %3194 = vrot.lane.b32.xlu0 %v1292_v57, %s8245_s23  ;;  %3208 = vrot.lane.b32.xlu1 %v2788_v61, %s8245_s23  ;;  %v2143_v57 = vcombine.high %v9315_v53, %v9312_v4  ;;  %v2418_v55 = vcombine.low %v14742_v0, %v14741_v62  ;;  %v14743_v63 = vld [vmem:[#allocation52_spill] sm:$0xff] }
 0x113   :  { %v9714_v10 = vrot.slane %v1958_v7, %v8394_v38  ;;  %v9717_v28 = vrot.slane %v1942_v24, %v8394_v38  ;;  %v14740_v7 = vld [vmem:[#allocation24_spill] sm:$0xff]  ;;  %v766_v4 = vcombine.low %v9699_v60, %v9690_v54  ;;  %v1974_v53 = vcombine.low %v9705_v16, %v9702_v33 }
 0x114   :  { %v9723_v18 = vpop.permute.xlu1 %164  ;;  %v9725_v61 = vpop.permute.xlu0 %160  ;;  %v2434_v24 = vcombine.low %v14740_v7, %v14739_v56  ;;  %v9747_v47 = vrot.slane %v2111_v52, %v8775_v49  ;;  %v935_v62 = vcombine.high %v14744_v36, %v14743_v63  ;;  %v9752_v0 = vrot.slane %v2199_v2, %v8394_v38 }
 0x115   :  { %14737 = vst [vmem:[#allocation66_spill] sm:$0xff] %v9723_v18  ;;  %14738 = vst [vmem:[#allocation64_spill] sm:$0xff] %v9725_v61  ;;  %v2006_v15 = vcombine.low %v9717_v28, %v9714_v10  ;;  %v1568_v56 = vcombine.low %v9610_v40, %v9675_v50  ;;  %v9757_v7 = vrot.slane %v798_v21, %v8775_v49 }
 0x116   :  { %3276 = vrot.lane.b32.xlu0 %v1430_v59, %s8247_s25  ;;  %3290 = vrot.lane.b32.xlu1 %v9728_v8, %s8247_s25  ;;  %14745 = vst [vmem:[#allocation76_spill] sm:$0xff] %v9752_v0  ;;  %v9760_v59 = vrot.slane %v2183_v26, %v8394_v38  ;;  %v680_v52 = vcombine.low %v9731_v31, %v9653_v17 }
 0x117   :  { %v9769_v63 = vrot.slane %v2143_v57, %v8775_v49  ;;  %v9772_v2 = vrot.slane %v2006_v15, %v8775_v49  ;;  %v9775_v36 = vrot.slane %v2434_v24, %v8394_v38  ;;  %v9782_v25 = vrot.slane %v2418_v55, %v8394_v38  ;;  %v14756_v55 = vld [vmem:[#allocation8_spill] sm:$0xff] }
 0x118   :  { %14746 = vst [vmem:[#allocation72_spill] sm:$0xff] %v9760_v59  ;;  %v9762_v29 = vpop.permute.xlu1 %172  ;;  %v9764_v6 = vpop.permute.xlu0 %168  ;;  %v9787_v57 = vrot.slane %v766_v4, %v8775_v49  ;;  %v9790_v15 = vrot.slane %v1974_v53, %v8775_v49  ;;  %v2230_v4 = vcombine.low %v9760_v59, %v9752_v0  ;;  %v1806_v60 = vcombine.low %v14763_v58, %v14762_v42 }
 0x119   :  { %14747 = vst [vmem:[#allocation77_spill] sm:$0xff] %v9762_v29  ;;  %14748 = vst [vmem:[#allocation73_spill] sm:$0xff] %v9764_v6  ;;  %v2402_v21 = vcombine.low %v9723_v18, %v9762_v29  ;;  %v2386_v26 = vcombine.low %v9725_v61, %v9764_v6  ;;  %v14755_v61 = vld [vmem:[#allocation9_spill] sm:$0xff]  ;;  %v2482_v0 = vcombine.low %v9782_v25, %v9775_v36 }
 0x11a   :  { %14749 = vst [vmem:[#allocation26_spill] sm:$0xff] %v9772_v2  ;;  %14750 = vst [vmem:[#allocation24_spill] sm:$0xff] %v9775_v36  ;;  %3358 = vrot.lane.b32.xlu0 %v1568_v56, %s8249_s27  ;;  %2914 = vrot.lane.b32.xlu1 %v680_v52, %s8245_s23  ;;  %v14757_v6 = vcombine.high %v14755_v61, %v14756_v55  ;;  %v9805_v56 = vrot.slane %v935_v62, %v8775_v49  ;;  %v14760_v61 = vld [vmem:[#allocation37_spill] sm:$0xff]  ;;  %v14761_v55 = vld [vmem:[#allocation31_spill] sm:$0xff] }
 0x11b   :  { %14751 = vst [vmem:[#allocation27_spill] sm:$0xff] %v9782_v25  ;;  %14752 = vst [vmem:[#allocation25_spill] sm:$0xff] %v9790_v15  ;;  %v9793_v24 = vrot.slane %v2402_v21, %v8394_v38  ;;  %v9796_v18 = vrot.slane %v2386_v26, %v8394_v38  ;;  %v2176_v21 = vcombine.low %v9747_v47, %v9769_v63  ;;  %v14778_v36 = vld [vmem:[#allocation100_spill] sm:$0xff] }
 0x11c   :  { %v9802_v29 = vrot.slane %v14757_v6, %v8775_v49  ;;  %v9809_v53 = vpop.permute.xlu1 %162  ;;  %v9811_v52 = vpop.permute.xlu0 %158  ;;  %v818_v26 = vcombine.low %v9787_v57, %v9757_v7  ;;  %v1822_v62 = vcombine.low %v14761_v55, %v14760_v61  ;;  %v9834_v6 = vrot.slane %v2230_v4, %v8775_v49 }
 0x11d   :  { %14753 = vst [vmem:[#allocation52_spill] sm:$0xff] %v9793_v24  ;;  %14754 = vst [vmem:[#allocation33_spill] sm:$0xff] %v9796_v18  ;;  %v2450_v59 = vcombine.low %v9796_v18, %v9793_v24  ;;  %v9846_v61 = vrot.slane %v1806_v60, %v8394_v38  ;;  %v9855_v55 = vrot.slane %v2482_v0, %v8775_v49  ;;  %v14772_v60 = vld [vmem:[#allocation47_spill] sm:$0xff]  ;;  %v14774_v18 = vld [vmem:[#allocation48_spill] sm:$0xff] }
 0x11e   :  { %14758 = vst [vmem:[#allocation9_spill] sm:$0xff] %v9809_v53  ;;  %14759 = vst [vmem:[#allocation8_spill] sm:$0xff] %v9811_v52  ;;  %2928 = vrot.lane.b32.xlu0 %v2176_v21, %s8245_s23  ;;  %2996 = vrot.lane.b32.xlu1 %v818_v26, %s8247_s25  ;;  %v956_v42 = vcombine.low %v9802_v29, %v9805_v56  ;;  %v9839_v58 = vrot.slane %v1822_v62, %v8394_v38 }
 0x11f   :  { %14766 = vst [vmem:[#allocation38_spill] sm:$0xff] %v9846_v61  ;;  %v9852_v4 = vrot.slane %v2450_v59, %v8775_v49  ;;  %14768 = vst [vmem:[#allocation110_spill] sm:$0xff] %v9855_v55  ;;  %v14777_v59 = vld [vmem:[#allocation103_spill] sm:$0xff] }
 0x120   :  { %v9829_v54 = vpop.permute.xlu1 %170  ;;  %v9831_v30 = vpop.permute.xlu0 %166  ;;  %v1155_v0 = vcombine.high %v14778_v36, %v14777_v59  ;;  %v14783_v59 = vld [vmem:[#allocation61_spill] sm:$0xff] }
 0x121   :  { %14764 = vst [vmem:[#allocation37_spill] sm:$0xff] %v9829_v54  ;;  %14765 = vst [vmem:[#allocation31_spill] sm:$0xff] %v9831_v30  ;;  %v1790_v21 = vcombine.low %v9809_v53, %v9829_v54  ;;  %v1774_v26 = vcombine.low %v9811_v52, %v9831_v30  ;;  %v14771_v52 = vld [vmem:[#allocation55_spill] sm:$0xff]  ;;  %v14773_v54 = vld [vmem:[#allocation56_spill] sm:$0xff] }
 0x122   :  { %3010 = vrot.lane.b32.xlu0 %v9834_v6, %s8247_s25  ;;  %3078 = vrot.lane.b32.xlu1 %v956_v42, %s8249_s27  ;;  %14767 = vst [vmem:[#allocation32_spill] sm:$0xff] %v9852_v4  ;;  %v2266_v30 = vcombine.low %v14772_v60, %v14771_v52  ;;  %v2250_v24 = vcombine.low %v14774_v18, %v14773_v54  ;;  %v14784_v36 = vld [vmem:[#allocation57_spill] sm:$0xff]  ;;  %v14785_v54 = vld [vmem:[#allocation62_spill] sm:$0xff] }
 0x123   :  { %v9858_v62 = vrot.slane %v1790_v21, %v8394_v38  ;;  %v9861_v53 = vrot.slane %v1774_v26, %v8394_v38  ;;  %v2651_v21 = vcombine.high %v9533_v20, %v9518_v23  ;;  %v1870_v18 = vcombine.low %v9846_v61, %v9839_v58 }
 0x124   :  { %v9867_v25 = vpop.permute.xlu1 %116  ;;  %v9869_v42 = vpop.permute.xlu0 %112  ;;  %v9884_v52 = vrot.slane %v2266_v30, %v8394_v38  ;;  %v9887_v60 = vrot.slane %v2250_v24, %v8394_v38 }
 0x125   :  { %14769 = vst [vmem:[#allocation111_spill] sm:$0xff] %v9858_v62  ;;  %14770 = vst [vmem:[#allocation112_spill] sm:$0xff] %v9861_v53  ;;  %v1838_v26 = vcombine.low %v9861_v53, %v9858_v62  ;;  %v1654_v53 = vcombine.low %v14784_v36, %v14783_v59  ;;  %v14786_v62 = vld [vmem:[#allocation58_spill] sm:$0xff]  ;;  %v1431_v59 = vcombine.high %v9672_v37, %v9647_v39 }
 0x126   :  { %14775 = vst [vmem:[#allocation55_spill] sm:$0xff] %v9867_v25  ;;  %14776 = vst [vmem:[#allocation47_spill] sm:$0xff] %v9869_v42  ;;  %3152 = vrot.lane.b32.xlu0 %v1155_v0, %s8244_s22  ;;  %3166 = vrot.lane.b32.xlu1 %v2651_v21, %s8244_s22  ;;  %v1293_v0 = vcombine.high %v9637_v11, %v9601_v32  ;;  %v2789_v21 = vcombine.high %v9604_v13, %v9640_v12  ;;  %v8162_v37 = vld [vmem:[%s14132_s0 + $0xb2] sm:$0xff] }
 0x127   :  { %14779 = vst [vmem:[#allocation56_spill] sm:$0xff] %v9884_v52  ;;  %14780 = vst [vmem:[#allocation48_spill] sm:$0xff] %v9887_v60  ;;  %v1638_v30 = vcombine.low %v14786_v62, %v14785_v54  ;;  %v9908_v32 = vrot.slane %v1838_v26, %v8775_v49  ;;  %v9911_v13 = vrot.slane %v1870_v18, %v8775_v49 }
 0x128   :  { %v9889_v23 = vpop.permute.xlu1 %124  ;;  %v9891_v20 = vpop.permute.xlu0 %120  ;;  %v2860_v26 = vcombine.high %v9728_v8, %v14615_v43  ;;  %v9928_v54 = vrot.slane %v1654_v53, %v8394_v38  ;;  %v8161_v8 = vld [vmem:[%s14132_s0 + $0x82] sm:$0xff]  ;;  %v1569_v39 = vcombine.high %v9610_v40, %v9675_v50 }
 0x129   :  { %14781 = vst [vmem:[#allocation113_spill] sm:$0xff] %v9889_v23  ;;  %14782 = vst [vmem:[#allocation114_spill] sm:$0xff] %v9891_v20  ;;  %v2298_v24 = vcombine.low %v9867_v25, %v9889_v23  ;;  %v2282_v61 = vcombine.low %v9869_v42, %v9891_v20  ;;  %v9931_v18 = vrot.slane %v1638_v30, %v8394_v38  ;;  %v8164_v30 = vld [vmem:[%s14132_s0 + $0x9a] sm:$0xff]  ;;  %v14801_v40 = vld [vmem:[#allocation81_spill] sm:$0xff] }
 0x12a   :  { %3234 = vrot.lane.b32.xlu0 %v1293_v0, %s8246_s24  ;;  %3248 = vrot.lane.b32.xlu1 %v2789_v21, %s8246_s24  ;;  %14787 = vst [vmem:[#allocation61_spill] sm:$0xff] %v9908_v32  ;;  %14788 = vst [vmem:[#allocation57_spill] sm:$0xff] %v9911_v13  ;;  %v2675_v53 = vcombine.high %v8161_v8, %v8162_v37  ;;  %v8163_v21 = vld [vmem:[%s14132_s0 + $0x6a] sm:$0xff]  ;;  %v543_v42 = vcombine.high %v9571_v3, %v9593_v46  ;;  %v14799_v25 = vld [vmem:[#allocation80_spill] sm:$0xff] }
 0x12b   :  { %v9914_v11 = vrot.slane %v2298_v24, %v8394_v38  ;;  %v9917_v12 = vrot.slane %v2282_v61, %v8394_v38  ;;  %14793 = vst [vmem:[#allocation117_spill] sm:$0xff] %v9928_v54  ;;  %14794 = vst [vmem:[#allocation118_spill] sm:$0xff] %v9931_v18  ;;  %v2314_v61 = vcombine.low %v9887_v60, %v9884_v52  ;;  %v14803_v3 = vld [vmem:[#allocation87_spill] sm:$0xff]  ;;  %v14827_v60 = vld [vmem:[#allocation97_spill] sm:$0xff] }
 0x12c   :  { %v9919_v36 = vpop.permute.xlu1 %114  ;;  %v9921_v62 = vpop.permute.xlu0 %110  ;;  %v2659_v24 = vcombine.high %v8163_v21, %v8164_v30  ;;  %v1702_v21 = vcombine.low %v9931_v18, %v9928_v54  ;;  %v14798_v30 = vld [vmem:[#allocation82_spill] sm:$0xff]  ;;  %v14822_v54 = vld [vmem:[#allocation95_spill] sm:$0xff] }
 0x12d   :  { %14789 = vst [vmem:[#allocation62_spill] sm:$0xff] %v9914_v11  ;;  %14790 = vst [vmem:[#allocation58_spill] sm:$0xff] %v9917_v12  ;;  %v2346_v0 = vcombine.low %v9917_v12, %v9914_v11  ;;  %v9966_v20 = vrot.slane %v2314_v61, %v8775_v49  ;;  %v1179_v23 = vcombine.high %v14799_v25, %v14798_v30  ;;  %v14800_v12 = vld [vmem:[#allocation83_spill] sm:$0xff] }
 0x12e   :  { %14791 = vst [vmem:[#allocation115_spill] sm:$0xff] %v9919_v36  ;;  %14792 = vst [vmem:[#allocation116_spill] sm:$0xff] %v9921_v62  ;;  %3316 = vrot.lane.b32.xlu0 %v1431_v59, %s8248_s26  ;;  %3330 = vrot.lane.b32.xlu1 %v2860_v26, %s8248_s26  ;;  %v1163_v50 = vcombine.high %v14801_v40, %v14800_v12 }
 0x12f   :  { %14797 = vst [vmem:[#allocation121_spill] sm:$0xff] %v9966_v20  ;;  %v9977_v46 = vrot.slane %v2346_v0, %v8775_v49  ;;  %v681_v0 = vcombine.high %v9731_v31, %v9653_v17  ;;  %v10008_v30 = vrot.slane %v1179_v23, %v8394_v38  ;;  %v10013_v17 = vrot.slane %v1702_v21, %v8775_v49 }
 0x130   :  { %v9953_v59 = vpop.permute.xlu1 %122  ;;  %v9955_v26 = vpop.permute.xlu0 %118  ;;  %v2619_v21 = vcombine.high %v9489_v45, %v9486_v9 }
 0x131   :  { %14795 = vst [vmem:[#allocation119_spill] sm:$0xff] %v9953_v59  ;;  %14796 = vst [vmem:[#allocation120_spill] sm:$0xff] %v9955_v26  ;;  %v1686_v8 = vcombine.low %v9919_v36, %v9953_v59  ;;  %v1670_v37 = vcombine.low %v9921_v62, %v9955_v26  ;;  %v14804_v62 = vld [vmem:[#allocation84_spill] sm:$0xff]  ;;  %v14806_v36 = vld [vmem:[#allocation85_spill] sm:$0xff] }
 0x132   :  { %3398 = vrot.lane.b32.xlu0 %v1569_v39, %s8250_s28  ;;  %2872 = vrot.lane.b32.xlu1 %v543_v42, %s8244_s22  ;;  %14802 = vst [vmem:[#allocation82_spill] sm:$0xff] %v9977_v46  ;;  %v2707_v61 = vcombine.high %v14804_v62, %v14803_v3  ;;  %v14805_v26 = vld [vmem:[#allocation88_spill] sm:$0xff]  ;;  %v2039_v42 = vcombine.high %v9790_v15, %v9772_v2  ;;  %14811 = vst [vmem:[#allocation81_spill] sm:$0xff] %v10013_v17 }
 0x133   :  { %v2691_v59 = vcombine.high %v14806_v36, %v14805_v26  ;;  %v9984_v18 = vrot.slane %v1686_v8, %v8394_v38  ;;  %v9987_v25 = vrot.slane %v1670_v37, %v8394_v38  ;;  %v9998_v3 = vrot.slane %v2675_v53, %v8394_v38  ;;  %v14809_v26 = vld [vmem:[#allocation15_spill] sm:$0xff]  ;;  %v14810_v8 = vld [vmem:[#allocation13_spill] sm:$0xff] }
 0x134   :  { %v9989_v12 = vpop.permute.xlu1 %2880  ;;  %v9991_v39 = vpop.permute.xlu0 %3160  ;;  %v10001_v36 = vrot.slane %v2659_v24, %v8394_v38  ;;  %v1091_v37 = vcombine.high %v14810_v8, %v14809_v26  ;;  %v10018_v53 = vrot.slane %v1163_v50, %v8394_v38  ;;  %v10021_v24 = vrot.slane %v2707_v61, %v8394_v38  ;;  %v14815_v61 = vld [vmem:[#allocation22_spill] sm:$0xff] }
 0x135   :  { %14807 = vst [vmem:[#allocation80_spill] sm:$0xff] %v9984_v18  ;;  %14808 = vst [vmem:[#allocation83_spill] sm:$0xff] %v9987_v25  ;;  %v1734_v62 = vcombine.low %v9987_v25, %v9984_v18  ;;  %v10024_v40 = vrot.slane %v2691_v59, %v8394_v38  ;;  %v2177_v50 = vcombine.high %v9747_v47, %v9769_v63 }
 0x136   :  { %2886 = vrot.lane.b32.xlu0 %v2039_v42, %s8244_s22  ;;  %2954 = vrot.lane.b32.xlu1 %v681_v0, %s8246_s24  ;;  %v14813_v42 = vld [vmem:[#allocation6_spill] sm:$0xff]  ;;  %v14814_v0 = vld [vmem:[#allocation7_spill] sm:$0xff]  ;;  %v819_v59 = vcombine.high %v9787_v57, %v9757_v7  ;;  %v2738_v9 = vcombine.low %v10001_v36, %v9998_v3  ;;  %v1242_v45 = vcombine.low %v10018_v53, %v10008_v30 }
 0x137   :  { %v10027_v23 = vrot.slane %v1734_v62, %v8775_v49  ;;  %v1123_v26 = vcombine.high %v14814_v0, %v14813_v42  ;;  %v2587_v62 = vcombine.high %v14815_v61, %v9478_v35  ;;  %v2770_v42 = vcombine.low %v10024_v40, %v10021_v24  ;;  %v8166_v61 = vld [vmem:[%s14132_s0 + $0xaa] sm:$0xff] }
 0x138   :  { %v10033_v8 = vpop.permute.xlu1 %2920  ;;  %v10035_v31 = vpop.permute.xlu0 %3200  ;;  %v10052_v47 = vrot.slane %v1091_v37, %v8775_v49  ;;  %v2248_v57 = vcombine.high %v9834_v6, %v14615_v43  ;;  %v957_v0 = vcombine.high %v9802_v29, %v9805_v56  ;;  %v8165_v37 = vld [vmem:[%s14132_s0 + $0x7a] sm:$0xff]  ;;  %v8167_v6 = vld [vmem:[%s14132_s0 + $0x62] sm:$0xff]  ;;  %v8168_v29 = vld [vmem:[%s14132_s0 + $0x92] sm:$0xff]  ;;  %v1411_v25 = vcombine.high %v9559_v1, %v9556_v44 }
 0x139   :  { %14812 = vst [vmem:[#allocation87_spill] sm:$0xff] %v10027_v23  ;;  %v2063_v7 = vcombine.high %v8165_v37, %v8166_v61  ;;  %v2047_v56 = vcombine.high %v8167_v6, %v8168_v29  ;;  %v10093_v37 = vrot.slane %v2587_v62, %v8775_v49  ;;  %v10096_v61 = vrot.slane %v2738_v9, %v8775_v49  ;;  %v14820_v6 = vld [vmem:[#allocation94_spill] sm:$0xff]  ;;  %v14824_v1 = vld [vmem:[#allocation12_spill] sm:$0xff]  ;;  %v14826_v62 = vld [vmem:[#allocation17_spill] sm:$0xff] }
 0x13a   :  { %2968 = vrot.lane.b32.xlu0 %v2177_v50, %s8246_s24  ;;  %3036 = vrot.lane.b32.xlu1 %v819_v59, %s8248_s26  ;;  %v10065_v50 = vrot.slane %v1123_v26, %v8775_v49  ;;  %v10068_v59 = vrot.slane %v2619_v21, %v8775_v49  ;;  %v14817_v26 = vld [vmem:[#allocation11_spill] sm:$0xff]  ;;  %v14818_v21 = vld [vmem:[#allocation10_spill] sm:$0xff]  ;;  %v10103_v11 = vrot.slane %v1242_v45, %v8775_v49 }
 0x13b   :  { %v14819_v2 = vcombine.low %v14817_v26, %v14818_v21  ;;  %v14821_v29 = vld [vmem:[#allocation90_spill] sm:$0xff]  ;;  %v10106_v44 = vrot.slane %v2770_v42, %v8775_v49  ;;  %v2079_v52 = vcombine.high %v14827_v60, %v14826_v62  ;;  %v10121_v45 = vrot.slane %v2063_v7, %v8394_v38 }
 0x13c   :  { %v10056_v35 = vpop.permute.xlu1 %3240  ;;  %v10058_v63 = vpop.permute.xlu0 %3158  ;;  %v567_v18 = vcombine.high %v14821_v29, %v14820_v6  ;;  %v1156_v6 = vcombine.low %v10052_v47, %v10065_v50  ;;  %v10124_v42 = vrot.slane %v2047_v56, %v8394_v38  ;;  %v2843_v60 = vcombine.high %v9630_v27, %v9623_v34 }
 0x13d   :  { %14816 = vst [vmem:[#allocation84_spill] sm:$0xff] %v10058_v63  ;;  %v10086_v15 = vrot.slane %v14819_v2, %v8775_v49  ;;  %v14823_v63 = vld [vmem:[#allocation91_spill] sm:$0xff]  ;;  %v10133_v29 = vrot.slane %v1411_v25, %v8775_v49  ;;  %v479_v7 = vcombine.high %v9504_v41, %v9501_v51  ;;  %v10151_v27 = vrot.slane %v2079_v52, %v8394_v38 }
 0x13e   :  { %3050 = vrot.lane.b32.xlu0 %v2248_v57, %s8248_s26  ;;  %3118 = vrot.lane.b32.xlu1 %v957_v0, %s8250_s28  ;;  %v551_v2 = vcombine.high %v14823_v63, %v14822_v54  ;;  %v14825_v57 = vld [vmem:[#allocation28_spill] sm:$0xff]  ;;  %v2652_v54 = vcombine.low %v10093_v37, %v10068_v59  ;;  %v1379_v63 = vcombine.high %v9574_v22, %v9566_v19 }
 0x13f   :  { %v2095_v0 = vcombine.high %v14825_v57, %v14824_v1  ;;  %v10138_v1 = vrot.slane %v567_v18, %v8394_v38  ;;  %v1294_v19 = vcombine.low %v10103_v11, %v10086_v15  ;;  %v2790_v22 = vcombine.low %v10096_v61, %v10106_v44 }
 0x140   :  { %v10112_v9 = vpop.permute.xlu1 %2960  ;;  %v10114_v17 = vpop.permute.xlu0 %2878  ;;  %v10141_v56 = vrot.slane %v551_v2, %v8394_v38  ;;  %v511_v51 = vcombine.high %v9543_v14, %v9540_v48  ;;  %v2007_v41 = vcombine.high %v9717_v28, %v9714_v10  ;;  %v10162_v2 = vrot.slane %v1379_v63, %v8775_v49  ;;  %v14831_v63 = vld [vmem:[#allocation67_spill] sm:$0xff] }
 0x141   :  { %14828 = vst [vmem:[#allocation88_spill] sm:$0xff] %v10114_v17  ;;  %v10148_v34 = vrot.slane %v2095_v0, %v8394_v38  ;;  %v1975_v57 = vcombine.high %v9705_v16, %v9702_v33  ;;  %v10171_v14 = vrot.slane %v2843_v60, %v8775_v49  ;;  %v10174_v10 = vrot.slane %v479_v7, %v8775_v49  ;;  %v14832_v7 = vld [vmem:[#allocation19_spill] sm:$0xff] }
 0x142   :  { %3192 = vrot.lane.b32.xlu0 %v1156_v6, %s8245_s23  ;;  %3206 = vrot.lane.b32.xlu1 %v2652_v54, %s8245_s23  ;;  %v1432_v48 = vcombine.low %v10162_v2, %v10133_v29  ;;  %v2126_v28 = vcombine.low %v10124_v42, %v10121_v45  ;;  %v630_v52 = vcombine.low %v10141_v56, %v10138_v1 }
 0x143   :  { %v2158_v33 = vcombine.low %v10151_v27, %v10148_v34  ;;  %v10187_v62 = vrot.slane %v511_v51, %v8775_v49  ;;  %v10190_v6 = vrot.slane %v2007_v41, %v8775_v49  ;;  %v10196_v54 = vrot.slane %v1975_v57, %v8775_v49 }
 0x144   :  { %v10157_v18 = vpop.permute.xlu1 %3280  ;;  %v10159_v25 = vpop.permute.xlu0 %3198  ;;  %v799_v60 = vcombine.high %v14831_v63, %v9666_v5  ;;  %v10207_v41 = vrot.slane %v2126_v28, %v8775_v49  ;;  %v10218_v5 = vrot.slane %v630_v52, %v8775_v49 }
 0x145   :  { %14829 = vst [vmem:[#allocation85_spill] sm:$0xff] %v10159_v25  ;;  %v544_v57 = vcombine.low %v10174_v10, %v10187_v62  ;;  %v2040_v17 = vcombine.low %v10196_v54, %v10190_v6  ;;  %v10221_v63 = vrot.slane %v2158_v33, %v8775_v49  ;;  %v14838_v25 = vld [vmem:[#allocation63_spill] sm:$0xff] }
 0x146   :  { %3274 = vrot.lane.b32.xlu0 %v1294_v19, %s8247_s25  ;;  %3288 = vrot.lane.b32.xlu1 %v2790_v22, %s8247_s25  ;;  %v14833_v19 = vld [vmem:[#allocation18_spill] sm:$0xff] }
 0x147   :  { %v14834_v22 = vcombine.low %v14832_v7, %v14833_v19  ;;  %v2178_v33 = vcombine.low %v10207_v41, %v10221_v63  ;;  %v10238_v19 = vrot.slane %v799_v60, %v8775_v49 }
 0x148   :  { %v10182_v16 = vpop.permute.xlu1 %3000  ;;  %v10184_v0 = vpop.permute.xlu0 %2918 }
 0x149   :  { %14830 = vst [vmem:[#allocation15_spill] sm:$0xff] %v10184_v0  ;;  %v10204_v51 = vrot.slane %v14834_v22, %v8775_v49  ;;  %v14837_v22 = vld [vmem:[#allocation65_spill] sm:$0xff] }
 0x14a   :  { %3356 = vrot.lane.b32.xlu0 %v1432_v48, %s8249_s27  ;;  %3370 = vrot.lane.b32.xlu1 %v10171_v14, %s8249_s27  ;;  %v767_v28 = vcombine.high %v14838_v25, %v14837_v22 }
 0x14b   :  { %v682_v52 = vcombine.low %v10218_v5, %v10204_v51 }
 0x14c   :  { %v10209_v0 = vpop.permute.xlu1 %3170  ;;  %v10211_v48 = vpop.permute.xlu0 %3156 }
 0x14d   :  { %14835 = vst [vmem:[#allocation13_spill] sm:$0xff] %v10209_v0  ;;  %14836 = vst [vmem:[#allocation6_spill] sm:$0xff] %v10211_v48  ;;  %v14839_v0 = vld [vmem:[#allocation76_spill] sm:$0xff] }
 0x14e   :  { %2912 = vrot.lane.b32.xlu0 %v544_v57, %s8245_s23  ;;  %2926 = vrot.lane.b32.xlu1 %v2040_v17, %s8245_s23  ;;  %v14840_v48 = vld [vmem:[#allocation72_spill] sm:$0xff]  ;;  %v10243_v17 = vrot.slane %v767_v28, %v8775_v49  ;;  %v2515_v28 = vcombine.high %v9852_v4, %v9855_v55 }
 0x14f   :  { %v2231_v23 = vcombine.high %v14840_v48, %v14839_v0  ;;  %v8169_v55 = vld [vmem:[%s14132_s0 + $0x20] sm:$0xff] }
 0x150   :  { %v10229_v20 = vpop.permute.xlu1 %3320  ;;  %v10231_v46 = vpop.permute.xlu0 %3238  ;;  %v820_v48 = vcombine.low %v10243_v17, %v10238_v19 }
 0x151   :  { %v10252_v57 = vrot.slane %v2231_v23, %v8775_v49 }
 0x152   :  { %2994 = vrot.lane.b32.xlu0 %v682_v52, %s8247_s25  ;;  %3008 = vrot.lane.b32.xlu1 %v2178_v33, %s8247_s25  ;;  %v1157_v52 = vcombine.high %v10052_v47, %v10065_v50  ;;  %v8170_v47 = vld [vmem:[%s14132_s0 + $0x50] sm:$0xff] }
 0x153   :  { %v1043_v50 = vcombine.high %v8169_v55, %v8170_v47  ;;  %v2791_v55 = vcombine.high %v10096_v61, %v10106_v44  ;;  %v8173_v61 = vld [vmem:[%s14132_s0 + $0x18] sm:$0xff]  ;;  %v8174_v44 = vld [vmem:[%s14132_s0 + $0x48] sm:$0xff] }
 0x154   :  { %v10245_v25 = vpop.permute.xlu1 %2890  ;;  %v10247_v0 = vpop.permute.xlu0 %2876 }
 0x155   :  { %14841 = vst [vmem:[#allocation7_spill] sm:$0xff] %v10245_v25  ;;  %14842 = vst [vmem:[#allocation22_spill] sm:$0xff] %v10247_v0  ;;  %v1295_v0 = vcombine.high %v10103_v11, %v10086_v15  ;;  %v10298_v47 = vrot.slane %v1043_v50, %v8394_v38  ;;  %v14848_v25 = vld [vmem:[#allocation54_spill] sm:$0xff] }
 0x156   :  { %3076 = vrot.lane.b32.xlu0 %v820_v48, %s8249_s27  ;;  %3090 = vrot.lane.b32.xlu1 %v10252_v57, %s8249_s27  ;;  %v2653_v48 = vcombine.high %v10093_v37, %v10068_v59  ;;  %v8172_v59 = vld [vmem:[%s14132_s0 + $0x38] sm:$0xff] }
 0x158   :  { %v10257_v60 = vpop.permute.xlu1 %3040  ;;  %v10259_v22 = vpop.permute.xlu0 %2958 }
 0x15a   :  { %3164 = vrot.lane.b32.xlu0 %v2515_v28, %s8244_s22  ;;  %3232 = vrot.lane.b32.xlu1 %v1157_v52, %s8246_s24  ;;  %v8171_v28 = vld [vmem:[%s14132_s0 + $0x8] sm:$0xff]  ;;  %v1433_v52 = vcombine.high %v10162_v2, %v10133_v29  ;;  %v431_v29 = vcombine.high %v8173_v61, %v8174_v44  ;;  %v8175_v2 = vld [vmem:[%s14132_s0] sm:$0xff]  ;;  %v14852_v44 = vld [vmem:[#allocation27_spill] sm:$0xff] }
 0x15b   :  { %v1027_v37 = vcombine.high %v8171_v28, %v8172_v59  ;;  %v14845_v28 = vld [vmem:[#allocation29_spill] sm:$0xff]  ;;  %v14851_v61 = vld [vmem:[#allocation24_spill] sm:$0xff] }
 0x15c   :  { %v10267_v23 = vpop.permute.xlu1 %3210  ;;  %v10269_v33 = vpop.permute.xlu0 %3196 }
 0x15d   :  { %14843 = vst [vmem:[#allocation11_spill] sm:$0xff] %v10267_v23  ;;  %14844 = vst [vmem:[#allocation10_spill] sm:$0xff] %v10269_v33  ;;  %v10301_v4 = vrot.slane %v1027_v37, %v8394_v38  ;;  %v2483_v33 = vcombine.high %v14852_v44, %v14851_v61 }
 0x15e   :  { %3246 = vrot.lane.b32.xlu0 %v2653_v48, %s8246_s24  ;;  %3314 = vrot.lane.b32.xlu1 %v1295_v0, %s8248_s26  ;;  %v14846_v48 = vld [vmem:[#allocation53_spill] sm:$0xff]  ;;  %v14847_v0 = vld [vmem:[#allocation34_spill] sm:$0xff] }
 0x15f   :  { %v1075_v59 = vcombine.high %v14846_v48, %v14845_v28  ;;  %v1059_v23 = vcombine.high %v14848_v25, %v14847_v0  ;;  %v8176_v25 = vld [vmem:[%s14132_s0 + $0x30] sm:$0xff]  ;;  %v1903_v28 = vcombine.high %v9908_v32, %v9911_v13  ;;  %v14854_v13 = vld [vmem:[#allocation104_spill] sm:$0xff]  ;;  %v14855_v32 = vld [vmem:[#allocation107_spill] sm:$0xff] }
 0x160   :  { %v10289_v15 = vpop.permute.xlu1 %3360  ;;  %v10291_v11 = vpop.permute.xlu0 %3278  ;;  %v415_v50 = vcombine.high %v8175_v2, %v8176_v25  ;;  %v1106_v2 = vcombine.low %v10301_v4, %v10298_v47 }
 0x161   :  { %v10330_v48 = vrot.slane %v1075_v59, %v8394_v38  ;;  %v10333_v0 = vrot.slane %v1059_v23, %v8394_v38  ;;  %v14853_v59 = vld [vmem:[#allocation106_spill] sm:$0xff] }
 0x162   :  { %3328 = vrot.lane.b32.xlu0 %v2791_v55, %s8248_s26  ;;  %3396 = vrot.lane.b32.xlu1 %v1433_v52, %s8250_s28  ;;  %v2861_v52 = vcombine.high %v10171_v14, %v14615_v43  ;;  %v10342_v14 = vrot.slane %v431_v29, %v8394_v38  ;;  %v10345_v25 = vrot.slane %v415_v50, %v8394_v38 }
 0x163   :  { %v2571_v23 = vcombine.high %v14854_v13, %v14853_v59  ;;  %v2041_v29 = vcombine.high %v10196_v54, %v10190_v6  ;;  %v14858_v50 = vcombine.high %v14817_v26, %v14818_v21  ;;  %v1243_v26 = vcombine.high %v10018_v53, %v10008_v30  ;;  %v14860_v21 = vld [vmem:[#allocation101_spill] sm:$0xff]  ;;  %v14861_v54 = vld [vmem:[#allocation71_spill] sm:$0xff]  ;;  %v14864_v6 = vld [vmem:[#allocation52_spill] sm:$0xff] }
 0x164   :  { %v10321_v37 = vpop.permute.xlu1 %2930  ;;  %v10323_v55 = vpop.permute.xlu0 %2916  ;;  %v2539_v59 = vcombine.high %v14861_v54, %v14860_v21  ;;  %v14863_v13 = vld [vmem:[#allocation99_spill] sm:$0xff]  ;;  %v14865_v30 = vld [vmem:[#allocation33_spill] sm:$0xff] }
 0x165   :  { %14849 = vst [vmem:[#allocation94_spill] sm:$0xff] %v10321_v37  ;;  %14850 = vst [vmem:[#allocation90_spill] sm:$0xff] %v10323_v55  ;;  %v14856_v55 = vld [vmem:[#allocation105_spill] sm:$0xff]  ;;  %v2451_v53 = vcombine.high %v14865_v30, %v14864_v6 }
 0x166   :  { %3410 = vrot.lane.b32.xlu0 %v2861_v52, %s8250_s28  ;;  %2884 = vrot.lane.b32.xlu1 %v1903_v28, %s8244_s22  ;;  %v2555_v37 = vcombine.high %v14856_v55, %v14855_v32  ;;  %v545_v52 = vcombine.high %v10174_v10, %v10187_v62  ;;  %v10363_v28 = vrot.slane %v14858_v50, %v8775_v49  ;;  %v14859_v62 = vld [vmem:[#allocation38_spill] sm:$0xff] }
 0x167   :  { %v1138_v32 = vcombine.low %v10333_v0, %v10330_v48  ;;  %v10370_v55 = vrot.slane %v2483_v33, %v8775_v49  ;;  %v10373_v10 = vrot.slane %v1106_v2, %v8775_v49  ;;  %v14862_v50 = vld [vmem:[#allocation102_spill] sm:$0xff]  ;;  %v10386_v33 = vrot.slane %v2571_v23, %v8394_v38 }
 0x168   :  { %v10351_v61 = vpop.permute.xlu1 %3080  ;;  %v10353_v44 = vpop.permute.xlu0 %2998  ;;  %v10389_v2 = vrot.slane %v2555_v37, %v8394_v38  ;;  %v2179_v23 = vcombine.high %v10207_v41, %v10221_v63  ;;  %v821_v37 = vcombine.high %v10243_v17, %v10238_v19  ;;  %v10409_v6 = vrot.slane %v2539_v59, %v8394_v38  ;;  %v14869_v17 = vld [vmem:[#allocation21_spill] sm:$0xff]  ;;  %v14872_v59 = vld [vmem:[#allocation23_spill] sm:$0xff] }
 0x169   :  { %14857 = vst [vmem:[#allocation95_spill] sm:$0xff] %v10353_v44  ;;  %v2523_v44 = vcombine.high %v14863_v13, %v14862_v50  ;;  %v10406_v13 = vrot.slane %v1138_v32, %v8775_v49  ;;  %v2771_v19 = vcombine.high %v10024_v40, %v10021_v24  ;;  %v14871_v32 = vld [vmem:[#allocation108_spill] sm:$0xff]  ;;  %v10437_v40 = vrot.slane %v2451_v53, %v8775_v49  ;;  %v14878_v53 = vld [vmem:[#allocation45_spill] sm:$0xff] }
 0x16a   :  { %2952 = vrot.lane.b32.xlu0 %v545_v52, %s8246_s24  ;;  %2966 = vrot.lane.b32.xlu1 %v2041_v29, %s8246_s24  ;;  %v683_v52 = vcombine.high %v10218_v5, %v10204_v51  ;;  %v2249_v29 = vcombine.high %v10252_v57, %v14615_v43  ;;  %v10417_v51 = vrot.slane %v1243_v26, %v8775_v49  ;;  %v14868_v5 = vld [vmem:[#allocation75_spill] sm:$0xff]  ;;  %v14870_v57 = vld [vmem:[#allocation20_spill] sm:$0xff] }
 0x16b   :  { %v10412_v50 = vrot.slane %v2523_v44, %v8394_v38  ;;  %v2634_v41 = vcombine.low %v10389_v2, %v10386_v33  ;;  %v3503_v63 = vsel %vm3422_vm0, %v14868_v5, %v9991_v39  ;;  %v463_v44 = vcombine.high %v14870_v57, %v14869_v17  ;;  %v14874_v43 = vld [vmem:[#allocation40_spill] sm:$0xff] }
 0x16c   :  { %v10393_v21 = vpop.permute.xlu1 %3168  ;;  %v10395_v54 = vpop.permute.xlu0 %3154  ;;  %v447_v30 = vcombine.high %v14872_v59, %v14871_v32  ;;  %v3513_v26 = vsel %vm3433_vm1, %v3503_v63, %v10035_v31  ;;  %v14875_v5 = vld [vmem:[#allocation68_spill] sm:$0xff]  ;;  %v1158_v57 = vcombine.low %v10373_v10, %v10406_v13  ;;  %v14879_v32 = vld [vmem:[#allocation39_spill] sm:$0xff] }
 0x16d   :  { %14866 = vst [vmem:[#allocation91_spill] sm:$0xff] %v10393_v21  ;;  %14867 = vst [vmem:[#allocation12_spill] sm:$0xff] %v10395_v54  ;;  %v14876_v21 = vld [vmem:[#allocation69_spill] sm:$0xff]  ;;  %v3523_v17 = vsel %vm3444_vm2, %v3513_v26, %v10056_v35  ;;  %v2602_v31 = vcombine.low %v10412_v50, %v10409_v6  ;;  %v14880_v35 = vld [vmem:[#allocation50_spill] sm:$0xff] }
 0x16e   :  { %3034 = vrot.lane.b32.xlu0 %v683_v52, %s8248_s26  ;;  %3048 = vrot.lane.b32.xlu1 %v2179_v23, %s8248_s26  ;;  %v14873_v23 = vld [vmem:[#allocation70_spill] sm:$0xff]  ;;  %v1943_v54 = vcombine.high %v14876_v21, %v14875_v5  ;;  %v3533_v63 = vsel %vm3455_vm3, %v3523_v17, %v10157_v18  ;;  %v1911_v59 = vcombine.high %v14880_v35, %v14879_v32 }
 0x16f   :  { %v1959_v39 = vcombine.high %v14874_v43, %v14873_v23  ;;  %v14877_v43 = vld [vmem:[#allocation41_spill] sm:$0xff]  ;;  %v3543_v26 = vsel %vm3466_vm4, %v3533_v63, %v10229_v20  ;;  %v10460_v23 = vrot.slane %v2634_v41, %v8775_v49  ;;  %v10463_v18 = vrot.slane %v463_v44, %v8394_v38  ;;  %v14881_v44 = vld [vmem:[#allocation111_spill] sm:$0xff]  ;;  %v14882_v63 = vld [vmem:[#allocation112_spill] sm:$0xff] }
 0x170   :  { %v10432_v52 = vpop.permute.xlu1 %3250  ;;  %v10434_v24 = vpop.permute.xlu0 %3236  ;;  %v1927_v21 = vcombine.high %v14878_v53, %v14877_v43  ;;  %v2516_v43 = vcombine.low %v10437_v40, %v10370_v55  ;;  %v10478_v41 = vrot.slane %v1943_v54, %v8394_v38  ;;  %v1839_v53 = vcombine.high %v14882_v63, %v14881_v44 }
 0x171   :  { %v10475_v20 = vrot.slane %v1959_v39, %v8394_v38  ;;  %v10492_v39 = vrot.slane %v1911_v59, %v8394_v38  ;;  %v494_v54 = vcombine.low %v10345_v25, %v10342_v14  ;;  %v14886_v63 = vcombine.high %v14859_v62, %v9839_v58 }
 0x172   :  { %3116 = vrot.lane.b32.xlu0 %v821_v37, %s8250_s28  ;;  %3130 = vrot.lane.b32.xlu1 %v2249_v29, %s8250_s28  ;;  %v10466_v37 = vrot.slane %v447_v30, %v8394_v38  ;;  %v3553_v29 = vsel %vm3477_vm5, %v3543_v26, %v10289_v15  ;;  %v10486_v15 = vrot.slane %v2602_v31, %v8775_v49 }
 0x173   :  { %v10489_v32 = vrot.slane %v1927_v21, %v8394_v38  ;;  %v14885_v21 = vcombine.high %v10001_v36, %v9998_v3  ;;  %v10519_v44 = vrot.slane %v1839_v53, %v8775_v49  ;;  %v14887_v36 = vld [vmem:[#allocation74_spill] sm:$0xff]  ;;  %v10535_v53 = vrot.slane %v494_v54, %v8775_v49 }
 0x174   :  { %v3401_v5 = vpop.permute.xlu1 %3400  ;;  %v10470_v17 = vpop.permute.xlu0 %3318  ;;  %v526_v35 = vcombine.low %v10466_v37, %v10463_v18  ;;  %v2654_v31 = vcombine.low %v10486_v15, %v10460_v23  ;;  %v631_v58 = vcombine.high %v10141_v56, %v10138_v1  ;;  %v2159_v54 = vcombine.high %v10151_v27, %v10148_v34 }
 0x175   :  { %v3563_v30 = vsel %vm3488_vm6, %v3553_v29, %v3401_v5  ;;  %v10509_v59 = vrot.slane %v14885_v21, %v8775_v49  ;;  %v2022_v5 = vcombine.low %v10478_v41, %v10475_v20  ;;  %v1990_v3 = vcombine.low %v10492_v39, %v10489_v32 }
 0x176   :  { %8034 = vmatprep.subr.msk.mxu0 %vm3574_vm7, %v3563_v30  ;;  %3204 = vrot.lane.b32.xlu0 %v2516_v43, %s8245_s23  ;;  %v1296_v43 = vcombine.low %v10417_v51, %v10363_v28  ;;  %v10525_v30 = vrot.slane %v14886_v63, %v8775_v49  ;;  %v2127_v21 = vcombine.high %v10124_v42, %v10121_v45 }
 0x177   :  { %3272 = vrot.lane.b32.xlu1 %v1158_v57, %s8247_s25  ;;  %v10512_v57 = vrot.slane %v2771_v19, %v8775_v49  ;;  %v3427_v19 = vsel %vm3422_vm0, %v14887_v36, %v9989_v12  ;;  %v10568_v34 = vrot.slane %v1990_v3, %v8775_v49 }
 0x178   :  { %v10499_v26 = vpop.permute.xlu1 %2888  ;;  %v10501_v29 = vpop.permute.xlu0 %2874  ;;  %v3438_v62 = vsel %vm3433_vm1, %v3427_v19, %v10033_v8  ;;  %v1904_v42 = vcombine.low %v10519_v44, %v10525_v30  ;;  %v10559_v8 = vrot.slane %v2022_v5, %v8775_v49 }
 0x179   :  { %14883 = vst [vmem:[#allocation28_spill] sm:$0xff] %v10499_v26  ;;  %14884 = vst [vmem:[#allocation17_spill] sm:$0xff] %v10501_v29  ;;  %v2792_v12 = vcombine.low %v10509_v59, %v10512_v57  ;;  %v3449_v45 = vsel %vm3444_vm2, %v3438_v62, %v10112_v9  ;;  %v10589_v62 = vrot.slane %v2127_v21, %v8775_v49 }
 0x17a   :  { %3286 = vrot.lane.b32.xlu0 %v2654_v31, %s8247_s25  ;;  %v3460_v1 = vsel %vm3455_vm3, %v3449_v45, %v10182_v16  ;;  %v10577_v16 = vrot.slane %v631_v58, %v8775_v49 }
 0x17b   :  { %3354 = vrot.lane.b32.xlu1 %v1296_v43, %s8249_s27  ;;  %v10550_v43 = vrot.slane %v526_v35, %v8775_v49  ;;  %v3471_v56 = vsel %vm3466_vm4, %v3460_v1, %v10257_v60  ;;  %v14888_v60 = vld [vmem:[#allocation18_spill] sm:$0xff] }
 0x17c   :  { %v10543_v31 = vpop.permute.xlu1 %2970  ;;  %v10545_v63 = vpop.permute.xlu0 %2956  ;;  %v3482_v9 = vsel %vm3477_vm5, %v3471_v56, %v10351_v61  ;;  %v14889_v36 = vcombine.high %v14832_v7, %v14888_v60  ;;  %v2042_v61 = vcombine.low %v10568_v34, %v10559_v8  ;;  %v14891_v1 = vld [vmem:[#allocation82_spill] sm:$0xff]  ;;  %v14892_v56 = vld [vmem:[#allocation121_spill] sm:$0xff] }
 0x17d   :  { %v546_v5 = vcombine.low %v10535_v53, %v10550_v43 }
 0x17e   :  { %3368 = vrot.lane.b32.xlu0 %v2792_v12, %s8249_s27  ;;  %v10583_v19 = vrot.slane %v14889_v36, %v8775_v49  ;;  %v10592_v12 = vrot.slane %v2159_v54, %v8775_v49  ;;  %v1159_v36 = vcombine.high %v10373_v10, %v10406_v13  ;;  %v8180_v10 = vld [vmem:[%s14132_s0 + $0x99] sm:$0xff] }
 0x17f   :  { %2924 = vrot.lane.b32.xlu1 %v1904_v42, %s8245_s23 }
 0x180   :  { %v3121_v27 = vpop.permute.xlu1 %3120  ;;  %v10572_v35 = vpop.permute.xlu0 %3038  ;;  %v684_v45 = vcombine.low %v10577_v16, %v10583_v19  ;;  %v2180_v21 = vcombine.low %v10589_v62, %v10592_v12 }
 0x181   :  { %v3493_v3 = vsel %vm3488_vm6, %v3482_v9, %v3121_v27  ;;  %v2379_v9 = vcombine.high %v14892_v56, %v14891_v1  ;;  %v2517_v27 = vcombine.high %v10437_v40, %v10370_v55  ;;  %v8177_v55 = vld [vmem:[%s14132_s0 + $0x81] sm:$0xff]  ;;  %v8178_v40 = vld [vmem:[%s14132_s0 + $0xb1] sm:$0xff]  ;;  %v2793_v56 = vcombine.high %v10509_v59, %v10512_v57 }
 0x182   :  { %8035 = vmatpush1.msk.msra.mxu0 %vm3574_vm7, %v3493_v3  ;;  %2992 = vrot.lane.b32.xlu0 %v546_v5, %s8247_s25  ;;  %v2655_v3 = vcombine.high %v10486_v15, %v10460_v23  ;;  %v1905_v57 = vcombine.high %v10519_v44, %v10525_v30  ;;  %v14901_v30 = vld [vmem:[#allocation56_spill] sm:$0xff] }
 0x183   :  { %3006 = vrot.lane.b32.xlu1 %v2042_v61, %s8247_s25  ;;  %v2435_v61 = vcombine.high %v8177_v55, %v8178_v40  ;;  %v14897_v55 = vld [vmem:[#allocation73_spill] sm:$0xff]  ;;  %v14898_v40 = vld [vmem:[#allocation64_spill] sm:$0xff] }
 0x184   :  { %v10597_v7 = vpop.permute.xlu1 %3208  ;;  %v10599_v58 = vpop.permute.xlu0 %3194  ;;  %v2387_v1 = vcombine.high %v14898_v40, %v14897_v55 }
 0x185   :  { %14890 = vst [vmem:[#allocation97_spill] sm:$0xff] %v10597_v7  ;;  %v2043_v7 = vcombine.high %v10568_v34, %v10559_v8  ;;  %v1139_v8 = vcombine.high %v10333_v0, %v10330_v48 }
 0x186   :  { %3074 = vrot.lane.b32.xlu0 %v684_v45, %s8249_s27  ;;  %v8179_v45 = vld [vmem:[%s14132_s0 + $0x69] sm:$0xff]  ;;  %v10669_v59 = vrot.slane %v2387_v1, %v8394_v38  ;;  %v8184_v1 = vld [vmem:[%s14132_s0 + $0x91] sm:$0xff] }
 0x187   :  { %3088 = vrot.lane.b32.xlu1 %v2180_v21, %s8249_s27  ;;  %v2419_v13 = vcombine.high %v8179_v45, %v8180_v10  ;;  %v1297_v21 = vcombine.high %v10417_v51, %v10363_v28  ;;  %v14899_v10 = vld [vmem:[#allocation87_spill] sm:$0xff] }
 0x188   :  { %v10607_v54 = vpop.permute.xlu1 %3290  ;;  %v10609_v42 = vpop.permute.xlu0 %3276 }
 0x189   :  { %v10656_v45 = vrot.slane %v2419_v13, %v8394_v38 }
 0x18a   :  { %3162 = vrot.lane.b32.xlu0 %v2379_v9, %s8244_s22  ;;  %v14895_v9 = vld [vmem:[#allocation77_spill] sm:$0xff] }
 0x18b   :  { %3244 = vrot.lane.b32.xlu1 %v2517_v27, %s8246_s24  ;;  %v14896_v27 = vld [vmem:[#allocation66_spill] sm:$0xff] }
 0x18c   :  { %v10617_v5 = vpop.permute.xlu1 %2914  ;;  %v10619_v60 = vpop.permute.xlu0 %3358 }
 0x18d   :  { %14893 = vst [vmem:[#allocation67_spill] sm:$0xff] %v10617_v5  ;;  %v547_v5 = vcombine.high %v10535_v53, %v10550_v43 }
 0x18e   :  { %3312 = vrot.lane.b32.xlu0 %v1159_v36, %s8248_s26  ;;  %v2403_v36 = vcombine.high %v14896_v27, %v14895_v9  ;;  %v14900_v9 = vld [vmem:[#allocation81_spill] sm:$0xff] }
 0x18f   :  { %3326 = vrot.lane.b32.xlu1 %v2655_v3, %s8248_s26  ;;  %v10653_v3 = vrot.slane %v2435_v61, %v8394_v38  ;;  %v1767_v27 = vcombine.high %v14900_v9, %v14899_v10  ;;  %v8182_v61 = vld [vmem:[%s14132_s0 + $0xa9] sm:$0xff] }
 0x190   :  { %v10639_v23 = vpop.permute.xlu1 %2996  ;;  %v10641_v15 = vpop.permute.xlu0 %2928  ;;  %v10666_v55 = vrot.slane %v2403_v36, %v8394_v38  ;;  %v14902_v36 = vld [vmem:[#allocation48_spill] sm:$0xff]  ;;  %v14903_v10 = vld [vmem:[#allocation62_spill] sm:$0xff] }
 0x191   :  { %14894 = vst [vmem:[#allocation19_spill] sm:$0xff] %v10641_v15  ;;  %v2315_v40 = vcombine.high %v14902_v36, %v14901_v30  ;;  %v14904_v9 = vld [vmem:[#allocation58_spill] sm:$0xff]  ;;  %v14907_v30 = vld [vmem:[#allocation31_spill] sm:$0xff]  ;;  %v14908_v36 = vld [vmem:[#allocation8_spill] sm:$0xff] }
 0x192   :  { %3394 = vrot.lane.b32.xlu0 %v1297_v21, %s8250_s28  ;;  %v8183_v21 = vld [vmem:[%s14132_s0 + $0x61] sm:$0xff]  ;;  %v1775_v29 = vcombine.high %v14908_v36, %v14907_v30 }
 0x193   :  { %3408 = vrot.lane.b32.xlu1 %v2793_v56, %s8250_s28  ;;  %v8181_v56 = vld [vmem:[%s14132_s0 + $0x79] sm:$0xff]  ;;  %v1807_v44 = vcombine.high %v8183_v21, %v8184_v1  ;;  %v2466_v21 = vcombine.low %v10669_v59, %v10666_v55  ;;  %v14906_v1 = vld [vmem:[#allocation9_spill] sm:$0xff]  ;;  %v10718_v43 = vrot.slane %v2315_v40, %v8775_v49  ;;  %v14914_v40 = vld [vmem:[#allocation118_spill] sm:$0xff] }
 0x194   :  { %v10659_v28 = vpop.permute.xlu1 %3078  ;;  %v10661_v51 = vpop.permute.xlu0 %3010  ;;  %v1823_v13 = vcombine.high %v8181_v56, %v8182_v61  ;;  %v2347_v56 = vcombine.high %v14904_v9, %v14903_v10  ;;  %v1107_v10 = vcombine.high %v10301_v4, %v10298_v47  ;;  %v685_v47 = vcombine.high %v10577_v16, %v10583_v19  ;;  %v14917_v36 = vld [vmem:[#allocation85_spill] sm:$0xff] }
 0x195   :  { %v10714_v53 = vrot.slane %v1807_v44, %v8394_v38  ;;  %v10742_v48 = vrot.slane %v1775_v29, %v8394_v38  ;;  %v10745_v0 = vrot.slane %v2466_v21, %v8775_v49  ;;  %v2603_v19 = vcombine.high %v10412_v50, %v10409_v6  ;;  %v14913_v29 = vld [vmem:[#allocation117_spill] sm:$0xff]  ;;  %v14915_v21 = vld [vmem:[#allocation80_spill] sm:$0xff] }
 0x196   :  { %2882 = vrot.lane.b32.xlu0 %v1767_v27, %s8244_s22  ;;  %v2498_v27 = vcombine.low %v10656_v45, %v10653_v3  ;;  %v10711_v9 = vrot.slane %v1823_v13, %v8394_v38  ;;  %v2635_v13 = vcombine.high %v10389_v2, %v10386_v33  ;;  %v10749_v16 = vrot.slane %v1107_v10, %v8775_v49  ;;  %v14911_v33 = vld [vmem:[#allocation36_spill] sm:$0xff] }
 0x197   :  { %2964 = vrot.lane.b32.xlu1 %v1905_v57, %s8246_s24  ;;  %v14905_v57 = vld [vmem:[#allocation37_spill] sm:$0xff] }
 0x198   :  { %v10693_v61 = vpop.permute.xlu1 %3166  ;;  %v10695_v15 = vpop.permute.xlu0 %3152  ;;  %v1791_v26 = vcombine.high %v14906_v1, %v14905_v57  ;;  %v10721_v57 = vrot.slane %v2498_v27, %v8775_v49  ;;  %v1703_v27 = vcombine.high %v14914_v40, %v14913_v29  ;;  %v14916_v1 = vld [vmem:[#allocation83_spill] sm:$0xff] }
 0x199   :  { %v1735_v30 = vcombine.high %v14916_v1, %v14915_v21 }
 0x19a   :  { %3032 = vrot.lane.b32.xlu0 %v547_v5, %s8248_s26  ;;  %v2181_v5 = vcombine.high %v10589_v62, %v10592_v12  ;;  %v10739_v44 = vrot.slane %v1791_v26, %v8394_v38  ;;  %v14909_v62 = vld [vmem:[#allocation84_spill] sm:$0xff]  ;;  %v14910_v12 = vld [vmem:[#allocation35_spill] sm:$0xff]  ;;  %v10797_v40 = vrot.slane %v1703_v27, %v8775_v49  ;;  %v2023_v27 = vcombine.high %v10478_v41, %v10475_v20 }
 0x19b   :  { %3046 = vrot.lane.b32.xlu1 %v2043_v7, %s8248_s26  ;;  %v10734_v7 = vrot.slane %v2347_v56, %v8775_v49  ;;  %v14912_v2 = vcombine.low %v14910_v12, %v14911_v33  ;;  %v1886_v56 = vcombine.low %v10714_v53, %v10711_v9  ;;  %v2518_v33 = vcombine.low %v10745_v0, %v10721_v57 }
 0x19c   :  { %v10725_v34 = vpop.permute.xlu1 %3248  ;;  %v10727_v4 = vpop.permute.xlu0 %3234 }
 0x19d   :  { %v3502_v26 = vsel %vm3422_vm0, %v14912_v2, %v14909_v62  ;;  %v1854_v62 = vcombine.low %v10742_v48, %v10739_v44  ;;  %v10783_v2 = vrot.slane %v2635_v13, %v8775_v49  ;;  %v10800_v13 = vrot.slane %v1886_v56, %v8775_v49 }
 0x19e   :  { %3114 = vrot.lane.b32.xlu0 %v685_v47, %s8250_s28  ;;  %v3512_v6 = vsel %vm3433_vm1, %v3502_v26, %v14917_v36  ;;  %v2380_v47 = vcombine.low %v10718_v43, %v10734_v7 }
 0x19f   :  { %3128 = vrot.lane.b32.xlu1 %v2181_v5, %s8250_s28  ;;  %v10774_v5 = vrot.slane %v1139_v8, %v8775_v49  ;;  %v3522_v12 = vsel %vm3444_vm2, %v3512_v6, %v10231_v46  ;;  %v495_v8 = vcombine.high %v10345_v25, %v10342_v14  ;;  %v10794_v46 = vrot.slane %v2603_v19, %v8775_v49 }
 0x1a0   :  { %v10767_v50 = vpop.permute.xlu1 %3330  ;;  %v10769_v10 = vpop.permute.xlu0 %3316  ;;  %v3532_v26 = vsel %vm3455_vm3, %v3522_v12, %v10291_v11  ;;  %v527_v11 = vcombine.high %v10466_v37, %v10463_v18  ;;  %v10811_v19 = vrot.slane %v1735_v30, %v8775_v49  ;;  %v10819_v37 = vrot.slane %v1854_v62, %v8775_v49  ;;  %v14920_v62 = vld [vmem:[#allocation44_spill] sm:$0xff] }
 0x1a1   :  { %v3542_v29 = vsel %vm3466_vm4, %v3532_v26, %v10470_v17  ;;  %v1160_v17 = vcombine.low %v10749_v16, %v10774_v5  ;;  %v2656_v18 = vcombine.low %v10794_v46, %v10783_v2  ;;  %v10832_v41 = vrot.slane %v495_v8, %v8775_v49  ;;  %v14922_v8 = vld [vmem:[#allocation15_spill] sm:$0xff] }
 0x1a2   :  { %3202 = vrot.lane.b32.xlu0 %v2380_v47, %s8245_s23  ;;  %v3552_v14 = vsel %vm3477_vm5, %v3542_v29, %v10619_v60  ;;  %v1991_v60 = vcombine.high %v10492_v39, %v10489_v32  ;;  %v1768_v20 = vcombine.low %v10797_v40, %v10811_v19  ;;  %v10835_v36 = vrot.slane %v527_v11, %v8775_v49  ;;  %v14918_v39 = vld [vmem:[#allocation88_spill] sm:$0xff]  ;;  %v14919_v47 = vld [vmem:[#allocation43_spill] sm:$0xff] }
 0x1a3   :  { %3284 = vrot.lane.b32.xlu1 %v2518_v33, %s8247_s25  ;;  %v1906_v6 = vcombine.low %v10819_v37, %v10800_v13  ;;  %v10840_v32 = vrot.slane %v2023_v27, %v8775_v49  ;;  %v14921_v12 = vcombine.low %v14919_v47, %v14920_v62 }
 0x1a4   :  { %v3399_v25 = vpop.permute.xlu0 %3398  ;;  %v10806_v21 = vpop.permute.xlu1 %2872  ;;  %v10850_v26 = vrot.slane %v1991_v60, %v8775_v49 }
 0x1a5   :  { %v3562_v56 = vsel %vm3488_vm6, %v3552_v14, %v3399_v25  ;;  %v3426_v33 = vsel %vm3422_vm0, %v14921_v12, %v14918_v39  ;;  %v548_v25 = vcombine.low %v10832_v41, %v10835_v36  ;;  %v8188_v39 = vld [vmem:[%s14132_s0 + $0x98] sm:$0xff]  ;;  %v14924_v12 = vld [vmem:[#allocation113_spill] sm:$0xff] }
 0x1a6   :  { %3605 = vmatprep.subr.mxu0 %v3562_v56  ;;  %3352 = vrot.lane.b32.xlu0 %v1160_v17, %s8249_s27  ;;  %v3437_v29 = vsel %vm3433_vm1, %v3426_v33, %v14922_v8  ;;  %v2044_v27 = vcombine.low %v10850_v26, %v10840_v32  ;;  %v8185_v56 = vld [vmem:[%s14132_s0 + $0x80] sm:$0xff]  ;;  %v14925_v33 = vld [vmem:[#allocation55_spill] sm:$0xff] }
 0x1a7   :  { %3366 = vrot.lane.b32.xlu1 %v2656_v18, %s8249_s27  ;;  %v3448_v17 = vsel %vm3444_vm2, %v3437_v29, %v10259_v22  ;;  %v8186_v18 = vld [vmem:[%s14132_s0 + $0xb0] sm:$0xff]  ;;  %v8187_v22 = vld [vmem:[%s14132_s0 + $0x68] sm:$0xff]  ;;  %v2299_v8 = vcombine.high %v14925_v33, %v14924_v12  ;;  %v14928_v33 = vld [vmem:[#allocation119_spill] sm:$0xff] }
 0x1a8   :  { %v10825_v1 = vpop.permute.xlu0 %2886  ;;  %v10827_v30 = vpop.permute.xlu1 %2954  ;;  %v2267_v60 = vcombine.high %v8185_v56, %v8186_v18  ;;  %v2251_v47 = vcombine.high %v8187_v22, %v8188_v39  ;;  %v14926_v29 = vld [vmem:[#allocation114_spill] sm:$0xff]  ;;  %v2381_v22 = vcombine.high %v10718_v43, %v10734_v7  ;;  %v8190_v43 = vld [vmem:[%s14132_s0 + $0xa8] sm:$0xff]  ;;  %v8191_v7 = vld [vmem:[%s14132_s0 + $0x60] sm:$0xff] }
 0x1aa   :  { %2922 = vrot.lane.b32.xlu0 %v1768_v20, %s8245_s23  ;;  %v14923_v20 = vld [vmem:[#allocation95_spill] sm:$0xff]  ;;  %v10900_v39 = vrot.slane %v2251_v47, %v8394_v38  ;;  %v1161_v47 = vcombine.high %v10749_v16, %v10774_v5 }
 0x1ab   :  { %3004 = vrot.lane.b32.xlu1 %v1906_v6, %s8247_s25  ;;  %v3459_v6 = vsel %vm3455_vm3, %v3448_v17, %v14923_v20  ;;  %v14927_v17 = vld [vmem:[#allocation47_spill] sm:$0xff] }
 0x1ac   :  { %v10854_v11 = vpop.permute.xlu0 %2968  ;;  %v10856_v14 = vpop.permute.xlu1 %3036  ;;  %v3470_v62 = vsel %vm3466_vm4, %v3459_v6, %v10572_v35  ;;  %v2519_v35 = vcombine.high %v10745_v0, %v10721_v57  ;;  %v10896_v6 = vrot.slane %v2267_v60, %v8394_v38  ;;  %v8192_v0 = vld [vmem:[%s14132_s0 + $0x90] sm:$0xff] }
 0x1ad   :  { %v3481_v56 = vsel %vm3477_vm5, %v3470_v62, %v10659_v28  ;;  %v8189_v28 = vld [vmem:[%s14132_s0 + $0x78] sm:$0xff]  ;;  %v1639_v60 = vcombine.high %v8191_v7, %v8192_v0  ;;  %v10918_v62 = vrot.slane %v2299_v8, %v8394_v38  ;;  %v1769_v0 = vcombine.high %v10797_v40, %v10811_v19 }
 0x1ae   :  { %3072 = vrot.lane.b32.xlu0 %v548_v25, %s8249_s27  ;;  %v2283_v25 = vcombine.high %v14927_v17, %v14926_v29  ;;  %v1655_v57 = vcombine.high %v8189_v28, %v8190_v43  ;;  %v14929_v29 = vld [vmem:[#allocation115_spill] sm:$0xff]  ;;  %v2330_v8 = vcombine.low %v10900_v39, %v10896_v6  ;;  %v549_v40 = vcombine.high %v10832_v41, %v10835_v36 }
 0x1af   :  { %3086 = vrot.lane.b32.xlu1 %v2044_v27, %s8249_s27  ;;  %v1687_v17 = vcombine.high %v14929_v29, %v14928_v33  ;;  %v1653_v5 = vrot.slane %v1639_v60, %v8394_v38  ;;  %v2467_v60 = vcombine.high %v10669_v59, %v10666_v55  ;;  %v2045_v19 = vcombine.high %v10850_v26, %v10840_v32 }
 0x1b0   :  { %v10888_v18 = vpop.permute.xlu0 %3050  ;;  %v3119_v20 = vpop.permute.xlu1 %3118  ;;  %v10921_v12 = vrot.slane %v2283_v25, %v8394_v38  ;;  %v1669_v16 = vrot.slane %v1655_v57, %v8394_v38  ;;  %v2499_v25 = vcombine.high %v10656_v45, %v10653_v3  ;;  %v1907_v3 = vcombine.high %v10819_v37, %v10800_v13 }
 0x1b1   :  { %v3492_v27 = vsel %vm3488_vm6, %v3481_v56, %v3119_v20  ;;  %v14930_v56 = vld [vmem:[#allocation120_spill] sm:$0xff]  ;;  %v1701_v7 = vrot.slane %v1687_v17, %v8394_v38  ;;  %v2338_v45 = vrot.slane %v2330_v8, %v8775_v49  ;;  %v1855_v13 = vcombine.high %v10742_v48, %v10739_v44 }
 0x1b2   :  { %3242 = vrot.lane.b32.xlu0 %v2381_v22, %s8246_s24  ;;  %3606 = vmatpush1.msra.mxu0 %v3492_v27  ;;  %v14931_v20 = vld [vmem:[#allocation116_spill] sm:$0xff]  ;;  %v2362_v43 = vcombine.low %v10921_v12, %v10918_v62  ;;  %v1718_v59 = vcombine.low %v1653_v5, %v1669_v16  ;;  %v2481_v37 = vrot.slane %v2467_v60, %v8775_v49 }
 0x1b3   :  { %3324 = vrot.lane.b32.xlu1 %v2519_v35, %s8248_s26  ;;  %v1671_v22 = vcombine.high %v14931_v20, %v14930_v56  ;;  %v2657_v35 = vcombine.high %v10794_v46, %v10783_v2  ;;  %v1887_v56 = vcombine.high %v10714_v53, %v10711_v9  ;;  %v1869_v32 = vrot.slane %v1855_v13, %v8775_v49 }
 0x1b4   :  { %v10927_v27 = vpop.permute.xlu0 %3192  ;;  %v10929_v28 = vpop.permute.xlu1 %3206  ;;  %v2370_v55 = vrot.slane %v2362_v43, %v8775_v49 }
 0x1b5   :  { %v1685_v2 = vrot.slane %v1671_v22, %v8394_v38  ;;  %v1726_v22 = vrot.slane %v1718_v59, %v8775_v49  ;;  %v1901_v26 = vrot.slane %v1887_v56, %v8775_v49  ;;  %v1719_v59 = vcombine.high %v1653_v5, %v1669_v16  ;;  %v14933_v16 = vld [vmem:[#allocation60_spill] sm:$0xff]  ;;  %v14934_v5 = vld [vmem:[#allocation59_spill] sm:$0xff] }
 0x1b6   :  { %3392 = vrot.lane.b32.xlu0 %v1161_v47, %s8250_s28  ;;  %v2513_v47 = vrot.slane %v2499_v25, %v8775_v49  ;;  %v2382_v36 = vcombine.low %v2338_v45, %v2370_v55  ;;  %v2363_v25 = vcombine.high %v10921_v12, %v10918_v62  ;;  %v2383_v60 = vcombine.high %v2338_v45, %v2370_v55 }
 0x1b7   :  { %3406 = vrot.lane.b32.xlu1 %v2657_v35, %s8250_s28  ;;  %v1750_v33 = vcombine.low %v1685_v2, %v1701_v7  ;;  %v1908_v8 = vcombine.low %v1869_v32, %v1901_v26  ;;  %v1909_v45 = vcombine.high %v1869_v32, %v1901_v26  ;;  %v1733_v55 = vrot.slane %v1719_v59, %v8775_v49 }
 0x1b8   :  { %v10945_v46 = vpop.permute.xlu0 %3274  ;;  %v10947_v57 = vpop.permute.xlu1 %3288  ;;  %v2520_v48 = vcombine.low %v2481_v37, %v2513_v47  ;;  %v2377_v56 = vrot.slane %v2363_v25, %v8775_v49 }
 0x1b9   :  { %v1758_v44 = vrot.slane %v1750_v33, %v8775_v49  ;;  %v1751_v33 = vcombine.high %v1685_v2, %v1701_v7  ;;  %v14935_v7 = vcombine.low %v14933_v16, %v14934_v5  ;;  %v14941_v5 = vld [vmem:[#allocation98_spill] sm:$0xff] }
 0x1ba   :  { %2962 = vrot.lane.b32.xlu0 %v1769_v0, %s8246_s24 }
 0x1bb   :  { %3044 = vrot.lane.b32.xlu1 %v1907_v3, %s8248_s26  ;;  %v1770_v35 = vcombine.low %v1726_v22, %v1758_v44  ;;  %v2331_v3 = vcombine.high %v10900_v39, %v10896_v6  ;;  %v1771_v62 = vcombine.high %v1726_v22, %v1758_v44  ;;  %v1765_v6 = vrot.slane %v1751_v33, %v8775_v49  ;;  %v14932_v39 = vld [vmem:[#allocation6_spill] sm:$0xff] }
 0x1bc   :  { %v3357_v29 = vpop.permute.xlu0 %3356  ;;  %v10959_v17 = vpop.permute.xlu1 %3370  ;;  %v3501_v2 = vsel %vm3422_vm0, %v14935_v7, %v14932_v39  ;;  %v14942_v7 = vld [vmem:[#allocation22_spill] sm:$0xff] }
 0x1bd   :  { %v2345_v12 = vrot.slane %v2331_v3, %v8775_v49  ;;  %v1772_v32 = vcombine.low %v1733_v55, %v1765_v6  ;;  %v14939_v3 = vld [vmem:[#allocation11_spill] sm:$0xff] }
 0x1be   :  { %3112 = vrot.lane.b32.xlu0 %v549_v40, %s8250_s28  ;;  %v2521_v40 = vcombine.high %v2481_v37, %v2513_v47  ;;  %v14936_v47 = vld [vmem:[#allocation10_spill] sm:$0xff] }
 0x1bf   :  { %3126 = vrot.lane.b32.xlu1 %v2045_v19, %s8250_s28  ;;  %v3511_v37 = vsel %vm3433_vm1, %v3501_v2, %v14936_v47  ;;  %v2384_v44 = vcombine.low %v2345_v12, %v2377_v56  ;;  %v14943_v2 = vld [vmem:[#allocation79_spill] sm:$0xff]  ;;  %v14944_v47 = vld [vmem:[#allocation78_spill] sm:$0xff] }
 0x1c0   :  { %v10973_v20 = vpop.permute.xlu0 %2912  ;;  %v10975_v41 = vpop.permute.xlu1 %2926 }
 0x1c2   :  { %3282 = vrot.lane.b32.xlu0 %v2382_v36, %s8247_s25 }
 0x1c3   :  { %3364 = vrot.lane.b32.xlu1 %v2520_v48, %s8249_s27  ;;  %v3521_v48 = vsel %vm3444_vm2, %v3511_v37, %v10434_v24  ;;  %v14945_v37 = vcombine.low %v14943_v2, %v14944_v47 }
 0x1c4   :  { %v10983_v9 = vpop.permute.xlu0 %2994  ;;  %v10985_v53 = vpop.permute.xlu1 %3008  ;;  %v3531_v26 = vsel %vm3455_vm3, %v3521_v48, %v10609_v42 }
 0x1c6   :  { %3002 = vrot.lane.b32.xlu0 %v1770_v35, %s8247_s25  ;;  %v14937_v35 = vld [vmem:[#allocation13_spill] sm:$0xff] }
 0x1c7   :  { %3084 = vrot.lane.b32.xlu1 %v1908_v8, %s8249_s27  ;;  %v14938_v8 = vld [vmem:[#allocation92_spill] sm:$0xff] }
 0x1c8   :  { %v10991_v43 = vpop.permute.xlu0 %3076  ;;  %v10993_v0 = vpop.permute.xlu1 %3090  ;;  %v3508_v25 = vsel %vm3422_vm0, %v14938_v8, %v14937_v35 }
 0x1c9   :  { %v3518_v33 = vsel %vm3433_vm1, %v3508_v25, %v14939_v3 }
 0x1ca   :  { %3322 = vrot.lane.b32.xlu0 %v2383_v60, %s8248_s26  ;;  %v3541_v60 = vsel %vm3466_vm4, %v3531_v26, %v10769_v10  ;;  %v3528_v42 = vsel %vm3444_vm2, %v3518_v33, %v10432_v52 }
 0x1cb   :  { %3404 = vrot.lane.b32.xlu1 %v2521_v40, %s8250_s28  ;;  %v3551_v24 = vsel %vm3477_vm5, %v3541_v60, %v3357_v29  ;;  %v3538_v16 = vsel %vm3455_vm3, %v3528_v42, %v10607_v54 }
 0x1cc   :  { %v10999_v13 = vpop.permute.xlu0 %3164  ;;  %v11001_v19 = vpop.permute.xlu1 %3232  ;;  %v3548_v10 = vsel %vm3466_vm4, %v3538_v16, %v10767_v50 }
 0x1cd   :  { %v3558_v29 = vsel %vm3477_vm5, %v3548_v10, %v10959_v17  ;;  %v3425_v17 = vsel %vm3422_vm0, %v14945_v37, %v14942_v7  ;;  %v14950_v7 = vld [vmem:[#allocation86_spill] sm:$0xff]  ;;  %v14952_v37 = vld [vmem:[#allocation91_spill] sm:$0xff] }
 0x1ce   :  { %3042 = vrot.lane.b32.xlu0 %v1771_v62, %s8248_s26  ;;  %v2385_v62 = vcombine.high %v2345_v12, %v2377_v56 }
 0x1cf   :  { %3124 = vrot.lane.b32.xlu1 %v1909_v45, %s8250_s28  ;;  %v1773_v45 = vcombine.high %v1733_v55, %v1765_v6  ;;  %v14940_v6 = vld [vmem:[#allocation7_spill] sm:$0xff] }
 0x1d0   :  { %v11016_v36 = vpop.permute.xlu0 %3246  ;;  %v11018_v22 = vpop.permute.xlu1 %3314  ;;  %v3432_v50 = vsel %vm3422_vm0, %v14941_v5, %v14940_v6  ;;  %v14948_v5 = vld [vmem:[#allocation12_spill] sm:$0xff] }
 0x1d2   :  { %3362 = vrot.lane.b32.xlu0 %v2384_v44, %s8249_s27  ;;  %v14946_v44 = vld [vmem:[#allocation94_spill] sm:$0xff] }
 0x1d3   :  { %3082 = vrot.lane.b32.xlu1 %v1772_v32, %s8249_s27  ;;  %v3443_v48 = vsel %vm3433_vm1, %v3432_v50, %v14946_v44  ;;  %v14947_v32 = vld [vmem:[#allocation90_spill] sm:$0xff]  ;;  %v14949_v50 = vld [vmem:[#allocation89_spill] sm:$0xff]  ;;  %v14954_v44 = vld [vmem:[#allocation96_spill] sm:$0xff] }
 0x1d4   :  { %v3329_v40 = vpop.permute.xlu0 %3328  ;;  %v3397_v59 = vpop.permute.xlu1 %3396  ;;  %v3436_v26 = vsel %vm3433_vm1, %v3425_v17, %v14947_v32  ;;  %v3454_v25 = vsel %vm3444_vm2, %v3443_v48, %v10543_v31  ;;  %v14951_v2 = vcombine.low %v14949_v50, %v14950_v7  ;;  %v14953_v17 = vld [vmem:[#allocation93_spill] sm:$0xff]  ;;  %v14959_v7 = vld [vmem:[#allocation14_spill] sm:$0xff] }
 0x1d5   :  { %v3561_v39 = vsel %vm3488_vm6, %v3551_v24, %v3397_v59  ;;  %v3447_v60 = vsel %vm3444_vm2, %v3436_v26, %v10545_v63  ;;  %v3465_v33 = vsel %vm3455_vm3, %v3454_v25, %v10661_v51  ;;  %v14955_v48 = vcombine.low %v14953_v17, %v14954_v44  ;;  %v14957_v50 = vld [vmem:[#allocation17_spill] sm:$0xff]  ;;  %v14965_v44 = vld [vmem:[#allocation67_spill] sm:$0xff] }
 0x1d6   :  { %3402 = vrot.lane.b32.xlu0 %v2385_v62, %s8250_s28  ;;  %3607 = vmatprep.subr.mxu0 %v3561_v39  ;;  %v3458_v3 = vsel %vm3455_vm3, %v3447_v60, %v10639_v23  ;;  %v3476_v59 = vsel %vm3466_vm4, %v3465_v33, %v10888_v18  ;;  %v3500_v47 = vsel %vm3422_vm0, %v14951_v2, %v14948_v5  ;;  %v14956_v60 = vld [vmem:[#allocation97_spill] sm:$0xff]  ;;  %v14961_v2 = vld [vmem:[#allocation28_spill] sm:$0xff] }
 0x1d7   :  { %3122 = vrot.lane.b32.xlu1 %v1773_v45, %s8250_s28  ;;  %v3469_v24 = vsel %vm3466_vm4, %v3458_v3, %v10856_v14  ;;  %v3487_v31 = vsel %vm3477_vm5, %v3476_v59, %v10993_v0  ;;  %v3507_v32 = vsel %vm3422_vm0, %v14955_v48, %v14952_v37  ;;  %v3510_v26 = vsel %vm3433_vm1, %v3500_v47, %v10599_v58  ;;  %v14962_v47 = vld [vmem:[#allocation51_spill] sm:$0xff] }
 0x1d8   :  { %v3411_v12 = vpop.permute.xlu0 %3410  ;;  %v11045_v56 = vpop.permute.xlu1 %2884  ;;  %v3480_v62 = vsel %vm3477_vm5, %v3469_v24, %v10991_v43  ;;  %v3517_v3 = vsel %vm3433_vm1, %v3507_v32, %v14956_v60  ;;  %v3520_v33 = vsel %vm3444_vm2, %v3510_v26, %v10727_v4  ;;  %v14966_v26 = vld [vmem:[#allocation19_spill] sm:$0xff] }
 0x1d9   :  { %v3568_v52 = vsel %vm3488_vm6, %v3558_v29, %v3411_v12  ;;  %v3527_v59 = vsel %vm3444_vm2, %v3517_v3, %v10725_v34 }
 0x1da   :  { %8037 = vmatprep.subr.msk.mxu1 %vm3574_vm7, %v3568_v52 }
 0x1dc   :  { %v11049_v55 = vpop.permute.xlu0 %2952  ;;  %v11051_v54 = vpop.permute.xlu1 %2966 }
 0x1e0   :  { %v3035_v35 = vpop.permute.xlu0 %3034  ;;  %v3049_v8 = vpop.permute.xlu1 %3048 }
 0x1e4   :  { %v3117_v42 = vpop.permute.xlu0 %3116  ;;  %v3131_v63 = vpop.permute.xlu1 %3130 }
 0x1e5   :  { %v3491_v45 = vsel %vm3488_vm6, %v3480_v62, %v3117_v42  ;;  %v3498_v23 = vsel %vm3488_vm6, %v3487_v31, %v3131_v63  ;;  %v3530_v62 = vsel %vm3455_vm3, %v3520_v33, %v10945_v46  ;;  %v3537_v31 = vsel %vm3455_vm3, %v3527_v59, %v10947_v57 }
 0x1e6   :  { %3608 = vmatpush1.msra.mxu0 %v3491_v45  ;;  %8038 = vmatpush1.msk.msra.mxu1 %vm3574_vm7, %v3498_v23  ;;  %v3540_v58 = vsel %vm3466_vm4, %v3530_v62, %v11018_v22  ;;  %v3547_v42 = vsel %vm3466_vm4, %v3537_v31, %v3329_v40  ;;  %v14958_v22 = vld [vmem:[#allocation16_spill] sm:$0xff] }
 0x1e7   :  { %v14960_v40 = vcombine.low %v14958_v22, %v14959_v7  ;;  %v14968_v22 = vld [vmem:[#allocation103_spill] sm:$0xff] }
 0x1e8   :  { %v11084_v51 = vpop.permute.xlu0 %3204 }
 0x1e9   :  { %v11086_v14 = vpop.permute.xlu1 %3272 }
 0x1ec   :  { %v11088_v18 = vpop.permute.xlu0 %3286 }
 0x1ed   :  { %v3355_v39 = vpop.permute.xlu1 %3354 }
 0x1ee   :  { %v3550_v63 = vsel %vm3477_vm5, %v3540_v58, %v3355_v39  ;;  %v3424_v39 = vsel %vm3422_vm0, %v14960_v40, %v14957_v50 }
 0x1ef   :  { %v3435_v48 = vsel %vm3433_vm1, %v3424_v39, %v14965_v44  ;;  %v14970_v39 = vld [vmem:[#allocation49_spill] sm:$0xff] }
 0x1f0   :  { %v3369_v43 = vpop.permute.xlu0 %3368  ;;  %v3446_v3 = vsel %vm3444_vm2, %v3435_v48, %v10827_v30 }
 0x1f1   :  { %v11090_v16 = vpop.permute.xlu1 %2924  ;;  %v3557_v4 = vsel %vm3477_vm5, %v3547_v42, %v3369_v43  ;;  %v14963_v43 = vld [vmem:[#allocation30_spill] sm:$0xff]  ;;  %v3457_v62 = vsel %vm3455_vm3, %v3446_v3, %v10983_v9 }
 0x1f2   :  { %v14964_v37 = vcombine.low %v14962_v47, %v14963_v43  ;;  %v3468_v58 = vsel %vm3466_vm4, %v3457_v62, %v3035_v35 }
 0x1f4   :  { %v11092_v0 = vpop.permute.xlu0 %2992  ;;  %v3431_v17 = vsel %vm3422_vm0, %v14964_v37, %v14961_v2  ;;  %v14971_v2 = vld [vmem:[#allocation109_spill] sm:$0xff] }
 0x1f5   :  { %v11094_v10 = vpop.permute.xlu1 %3006  ;;  %v3442_v60 = vsel %vm3433_vm1, %v3431_v17, %v14966_v26  ;;  %v14972_v47 = vcombine.low %v14970_v39, %v14971_v2  ;;  %v14981_v39 = vld [vmem:[#allocation110_spill] sm:$0xff] }
 0x1f6   :  { %v3453_v59 = vsel %vm3444_vm2, %v3442_v60, %v10854_v11 }
 0x1f7   :  { %v3464_v31 = vsel %vm3455_vm3, %v3453_v59, %v10985_v53  ;;  %v3506_v43 = vsel %vm3422_vm0, %v14972_v47, %v10693_v61 }
 0x1f8   :  { %v3075_v29 = vpop.permute.xlu0 %3074  ;;  %v3475_v42 = vsel %vm3466_vm4, %v3464_v31, %v3049_v8  ;;  %v3516_v44 = vsel %vm3433_vm1, %v3506_v43, %v10929_v28 }
 0x1f9   :  { %v3089_v12 = vpop.permute.xlu1 %3088 }
 0x1fc   :  { %v11096_v52 = vpop.permute.xlu0 %3162 }
 0x1fd   :  { %v11098_v6 = vpop.permute.xlu1 %3244 }
 0x200   :  { %v3313_v25 = vpop.permute.xlu0 %3312 }
 0x201   :  { %v3327_v24 = vpop.permute.xlu1 %3326 }
 0x204   :  { %v3395_v45 = vpop.permute.xlu0 %3394 }
 0x205   :  { %v3409_v23 = vpop.permute.xlu1 %3408  ;;  %v3560_v5 = vsel %vm3488_vm6, %v3550_v63, %v3395_v45  ;;  %v3479_v63 = vsel %vm3477_vm5, %v3468_v58, %v3075_v29  ;;  %v14974_v58 = vld [vmem:[#allocation42_spill] sm:$0xff] }
 0x206   :  { %3609 = vmatprep.subr.mxu0 %v3560_v5  ;;  %v3567_v34 = vsel %vm3488_vm6, %v3557_v4, %v3409_v23  ;;  %v3486_v4 = vsel %vm3477_vm5, %v3475_v42, %v3089_v12  ;;  %v14967_v12 = vld [vmem:[#allocation100_spill] sm:$0xff] }
 0x207   :  { %3682 = vmatprep.subr.mxu1 %v3567_v34  ;;  %v14969_v7 = vcombine.low %v14967_v12, %v14968_v22 }
 0x208   :  { %v11129_v46 = vpop.permute.xlu0 %2882 }
 0x209   :  { %v11131_v57 = vpop.permute.xlu1 %2964  ;;  %v3499_v40 = vsel %vm3422_vm0, %v14969_v7, %v10695_v15  ;;  %v3526_v15 = vsel %vm3444_vm2, %v3516_v44, %v11016_v36 }
 0x20a   :  { %v3509_v37 = vsel %vm3433_vm1, %v3499_v40, %v10927_v27  ;;  %v3536_v61 = vsel %vm3455_vm3, %v3526_v15, %v11088_v18  ;;  %v14980_v40 = vld [vmem:[#allocation32_spill] sm:$0xff]  ;;  %v14983_v15 = vld [vmem:[#allocation61_spill] sm:$0xff] }
 0x20b   :  { %v3519_v48 = vsel %vm3444_vm2, %v3509_v37, %v11001_v19  ;;  %v3546_v3 = vsel %vm3466_vm4, %v3536_v61, %v3327_v24  ;;  %v14977_v24 = vld [vmem:[#allocation26_spill] sm:$0xff]  ;;  %v14982_v2 = vcombine.low %v14980_v40, %v14981_v39 }
 0x20c   :  { %v3033_v32 = vpop.permute.xlu0 %3032  ;;  %v3529_v60 = vsel %vm3455_vm3, %v3519_v48, %v11086_v14  ;;  %v14973_v14 = vld [vmem:[#allocation46_spill] sm:$0xff] }
 0x20d   :  { %v3047_v33 = vpop.permute.xlu1 %3046  ;;  %v3539_v27 = vsel %vm3466_vm4, %v3529_v60, %v3313_v25  ;;  %v14975_v42 = vcombine.low %v14973_v14, %v14974_v58  ;;  %v14976_v25 = vld [vmem:[#allocation25_spill] sm:$0xff]  ;;  %v3505_v47 = vsel %vm3422_vm0, %v14982_v2, %v10999_v13  ;;  %v14987_v14 = vld [vmem:[#allocation82_spill] sm:$0xff] }
 0x20e   :  { %v3515_v43 = vsel %vm3433_vm1, %v3505_v47, %v11084_v51  ;;  %v14984_v60 = vld [vmem:[#allocation57_spill] sm:$0xff] }
 0x20f   :  { %v3423_v18 = vsel %vm3422_vm0, %v14975_v42, %v10806_v21  ;;  %v3525_v44 = vsel %vm3444_vm2, %v3515_v43, %v11098_v6  ;;  %v14985_v61 = vcombine.low %v14983_v15, %v14984_v60  ;;  %v14989_v42 = vld [vmem:[#allocation81_spill] sm:$0xff] }
 0x210   :  { %v3115_v45 = vpop.permute.xlu0 %3114 }
 0x211   :  { %v3129_v30 = vpop.permute.xlu1 %3128  ;;  %v3490_v23 = vsel %vm3488_vm6, %v3479_v63, %v3115_v45  ;;  %v14978_v63 = vcombine.low %v14976_v25, %v14977_v24 }
 0x212   :  { %3610 = vmatpush1.msra.mxu0 %v3490_v23  ;;  %v3497_v11 = vsel %vm3488_vm6, %v3486_v4, %v3129_v30  ;;  %v3434_v4 = vsel %vm3433_vm1, %v3423_v18, %v10973_v20  ;;  %v14990_v18 = vld [vmem:[#allocation87_spill] sm:$0xff] }
 0x213   :  { %3683 = vmatpush1.msra.mxu1 %v3497_v11  ;;  %v3430_v45 = vsel %vm3422_vm0, %v14978_v63, %v10825_v1  ;;  %v3445_v11 = vsel %vm3444_vm2, %v3434_v4, %v11049_v55  ;;  %v3569_v55 = vld [vmem:[%s14134_s2] sm:$0xf] }
 0x214   :  { %v11161_v9 = vpop.permute.xlu0 %3202  ;;  %v3441_v23 = vsel %vm3433_vm1, %v3430_v45, %v10975_v41 }
 0x215   :  { %v3285_v5 = vpop.permute.xlu1 %3284  ;;  %v3452_v21 = vsel %vm3444_vm2, %v3441_v23, %v11051_v54 }
 0x216   :  { %v3463_v1 = vsel %vm3455_vm3, %v3452_v21, %v11094_v10  ;;  %v3535_v48 = vsel %vm3455_vm3, %v3525_v44, %v3285_v5 }
 0x217   :  { %v3474_v20 = vsel %vm3466_vm4, %v3463_v1, %v3047_v33  ;;  %v14979_v33 = vmov 0.0  }
 0x218   :  { %v3353_v53 = vpop.permute.xlu0 %3352  ;;  %3786 = vst.msk [vmem:[#allocation2 + $0x8] sm:$0xff] %vm3784_vm9, %v14979_v33  ;;  %3785 = vst.msk [vmem:[#allocation2] sm:$0xff] %vm3784_vm9, %v14979_v33 }
 0x219   :  { %v3367_v34 = vpop.permute.xlu1 %3366  ;;  %v3549_v59 = vsel %vm3477_vm5, %v3539_v27, %v3353_v53  ;;  %v3429_v27 = vsel %vm3422_vm0, %v14985_v61, %v11045_v56  ;;  %v8251_v61 = vmov 0   ;;  %3788 = vst.msk [vmem:[#allocation2 + $0x10] sm:$0x3] %vm3787_vm10, %v14979_v33  ;;  %3791 = vst.msk [vmem:[#allocation2 + $0x28] sm:$0x3] %vm3787_vm10, %v14979_v33 }
 0x21a   :  { %v3556_v62 = vsel %vm3477_vm5, %v3546_v3, %v3367_v34  ;;  %v3456_v34 = vsel %vm3455_vm3, %v3445_v11, %v11092_v0  ;;  %v3440_v13 = vsel %vm3433_vm1, %v3429_v27, %v11090_v16  ;;  %8063 = vset.pattern.permute.xlu0 %v8251_v61  ;;  %8064 = vset.pattern.permute.xlu1 %v8251_v61 }
 0x21b   :  { %v3467_v12 = vsel %vm3466_vm4, %v3456_v34, %v3033_v32  ;;  %v3451_v6 = vsel %vm3444_vm2, %v3440_v13, %v11131_v57  ;;  %3789 = vst.msk [vmem:[#allocation2 + $0x18] sm:$0xff] %vm3784_vm9, %v14979_v33  ;;  %3790 = vst.msk [vmem:[#allocation2 + $0x20] sm:$0xff] %vm3784_vm9, %v14979_v33 }
 0x21c   :  { %v11163_v35 = vpop.permute.xlu0 %2922  ;;  %3792 = vst.msk [vmem:[#allocation2 + $0x30] sm:$0xff] %vm3784_vm9, %v14979_v33  ;;  %3793 = vst.msk [vmem:[#allocation2 + $0x38] sm:$0xff] %vm3784_vm9, %v14979_v33 }
 0x21d   :  { %v11165_v8 = vpop.permute.xlu1 %3004  ;;  %3794 = vst.msk [vmem:[#allocation2 + $0x40] sm:$0x3] %vm3787_vm10, %v14979_v33  ;;  %3797 = vst.msk [vmem:[#allocation2 + $0x58] sm:$0x3] %vm3787_vm10, %v14979_v33 }
 0x21e   :  { %3795 = vst.msk [vmem:[#allocation2 + $0x48] sm:$0xff] %vm3784_vm9, %v14979_v33  ;;  %3796 = vst.msk [vmem:[#allocation2 + $0x50] sm:$0xff] %vm3784_vm9, %v14979_v33 }
 0x21f   :  { %3798 = vst.msk [vmem:[#allocation2 + $0x60] sm:$0xff] %vm3784_vm9, %v14979_v33  ;;  %3799 = vst.msk [vmem:[#allocation2 + $0x68] sm:$0xff] %vm3784_vm9, %v14979_v33 }
 0x220   :  { %v3073_v29 = vpop.permute.xlu0 %3072  ;;  %3800 = vst.msk [vmem:[#allocation2 + $0x70] sm:$0x3] %vm3787_vm10, %v14979_v33  ;;  %3803 = vst.msk [vmem:[#allocation2 + $0x88] sm:$0x3] %vm3787_vm10, %v14979_v33 }
 0x221   :  { %v3087_v50 = vpop.permute.xlu1 %3086  ;;  %v3478_v22 = vsel %vm3477_vm5, %v3467_v12, %v3073_v29  ;;  %3801 = vst.msk [vmem:[#allocation2 + $0x78] sm:$0xff] %vm3784_vm9, %v14979_v33  ;;  %3802 = vst.msk [vmem:[#allocation2 + $0x80] sm:$0xff] %vm3784_vm9, %v14979_v33 }
 0x222   :  { %v3485_v54 = vsel %vm3477_vm5, %v3474_v20, %v3087_v50  ;;  %3804 = vst.msk [vmem:[#allocation2 + $0x90] sm:$0xff] %vm3784_vm9, %v14979_v33  ;;  %3805 = vst.msk [vmem:[#allocation2 + $0x98] sm:$0xff] %vm3784_vm9, %v14979_v33 }
 0x223   :  { %3806 = vst.msk [vmem:[#allocation2 + $0xa0] sm:$0x3] %vm3787_vm10, %v14979_v33  ;;  %3809 = vst.msk [vmem:[#allocation2 + $0xb8] sm:$0x3] %vm3787_vm10, %v14979_v33 }
 0x224   :  { %v11179_v17 = vpop.permute.xlu0 %3242  ;;  %3807 = vst.msk [vmem:[#allocation2 + $0xa8] sm:$0xff] %vm3784_vm9, %v14979_v33  ;;  %3808 = vst.msk [vmem:[#allocation2 + $0xb0] sm:$0xff] %vm3784_vm9, %v14979_v33 }
 0x225   :  { %v3325_v26 = vpop.permute.xlu1 %3324 }
 0x226   :  { %v3545_v3 = vsel %vm3466_vm4, %v3535_v48, %v3325_v26 }
 0x228   :  { %v3393_v28 = vpop.permute.xlu0 %3392 }
 0x229   :  { %v3407_v19 = vpop.permute.xlu1 %3406  ;;  %v3559_v31 = vsel %vm3488_vm6, %v3549_v59, %v3393_v28 }
 0x22a   :  { %3611 = vmatprep.subr.mxu0 %v3559_v31  ;;  %v3566_v36 = vsel %vm3488_vm6, %v3556_v62, %v3407_v19  ;;  %v3462_v62 = vsel %vm3455_vm3, %v3451_v6, %v11165_v8  ;;  %v14991_v8 = vcombine.low %v14989_v42, %v14990_v18 }
 0x22b   :  { %3684 = vmatprep.subr.mxu1 %v3566_v36  ;;  %v14986_v36 = vld [vmem:[#allocation121_spill] sm:$0xff] }
 0x22c   :  { %v2963_v30 = vpop.permute.xlu0 %2962  ;;  %v14988_v58 = vcombine.low %v14986_v36, %v14987_v14  ;;  %v3428_v25 = vsel %vm3422_vm0, %v14991_v8, %v11129_v46 }
 0x22d   :  { %v3045_v53 = vpop.permute.xlu1 %3044  ;;  %v3439_v45 = vsel %vm3433_vm1, %v3428_v25, %v11163_v35 }
 0x22e   :  { %v3473_v56 = vsel %vm3466_vm4, %v3462_v62, %v3045_v53  ;;  %v3504_v57 = vsel %vm3422_vm0, %v14988_v58, %v11096_v52  ;;  %v3450_v52 = vsel %vm3444_vm2, %v3439_v45, %v2963_v30 }
 0x22f   :  { %v3514_v24 = vsel %vm3433_vm1, %v3504_v57, %v11161_v9 }
 0x230   :  { %v3113_v41 = vpop.permute.xlu0 %3112  ;;  %v3524_v4 = vsel %vm3444_vm2, %v3514_v24, %v11179_v17 }
 0x231   :  { %v3127_v7 = vpop.permute.xlu1 %3126  ;;  %v3489_v0 = vsel %vm3488_vm6, %v3478_v22, %v3113_v41 }
 0x232   :  { %3612 = vmatpush1.msra.mxu0 %v3489_v0  ;;  %v3496_v10 = vsel %vm3488_vm6, %v3485_v54, %v3127_v7 }
 0x233   :  { %3685 = vmatpush1.msra.mxu1 %v3496_v10  ;;  %8036 = vmatmul.mubr.msk.f32.vlgmr.msra.gmra.mxu0 %vm3570_vm8, %v3569_v55 }
 0x234   :  { %v3283_v32 = vpop.permute.xlu0 %3282  ;;  %7857 = vmatprep.mubr.f32.mxu0 %v14979_v33 }
 0x235   :  { %v3365_v29 = vpop.permute.xlu1 %3364  ;;  %v3534_v11 = vsel %vm3455_vm3, %v3524_v4, %v3283_v32 }
 0x236   :  { %v3555_v51 = vsel %vm3477_vm5, %v3545_v3, %v3365_v29 }
 0x238   :  { %v3003_v50 = vpop.permute.xlu0 %3002 }
 0x239   :  { %v3085_v37 = vpop.permute.xlu1 %3084  ;;  %v3461_v53 = vsel %vm3455_vm3, %v3450_v52, %v3003_v50 }
 0x23a   :  { %v3484_v26 = vsel %vm3477_vm5, %v3473_v56, %v3085_v37 }
 0x23c   :  { %v3323_v59 = vpop.permute.xlu0 %3322 }
 0x23d   :  { %v3405_v28 = vpop.permute.xlu1 %3404  ;;  %v3544_v21 = vsel %vm3466_vm4, %v3534_v11, %v3323_v59 }
 0x23e   :  { %v3565_v5 = vsel %vm3488_vm6, %v3555_v51, %v3405_v28 }
 0x23f   :  { %3686 = vmatprep.subr.mxu1 %v3565_v5  ;;  %v3755_v5 = vld [vmem:[%s14135_s3] sm:$0xf]  ;;  %s8252_s3 = smov 1  }
 0x240   :  { %v3043_v19 = vpop.permute.xlu0 %3042 }
 0x241   :  { %v3125_v31 = vpop.permute.xlu1 %3124  ;;  %v3472_v46 = vsel %vm3466_vm4, %v3461_v53, %v3043_v19  ;;  %v3759_v19 = vld [vmem:[%s14136_s4] sm:$0xf] }
 0x242   :  { %v3495_v16 = vsel %vm3488_vm6, %v3484_v26, %v3125_v31 }
 0x243   :  { %3687 = vmatpush1.msra.mxu1 %v3495_v16 }
 0x244   :  { %v3363_v63 = vpop.permute.xlu0 %3362 }
 0x245   :  { %v3083_v23 = vpop.permute.xlu1 %3082  ;;  %v3554_v9 = vsel %vm3477_vm5, %v3544_v21, %v3363_v63 }
 0x246   :  { %v3483_v1 = vsel %vm3477_vm5, %v3472_v46, %v3083_v23 }
 0x248   :  { %v3403_v34 = vpop.permute.xlu0 %3402 }
 0x249   :  { %v3123_v35 = vpop.permute.xlu1 %3122  ;;  %v3564_v12 = vsel %vm3488_vm6, %v3554_v9, %v3403_v34 }
 0x24a   :  { %3688 = vmatprep.subr.mxu1 %v3564_v12  ;;  %v3494_v17 = vsel %vm3488_vm6, %v3483_v1, %v3123_v35 }
 0x24b   :  { %3689 = vmatpush1.msra.mxu1 %v3494_v17 }
 0x24c   :  { %8039 = vmatmul.mubr.msk.f32.vlgmr.msra.gmra.mxu1 %vm3570_vm8, %v3569_v55 }
 0x24d   :  { %7934 = vmatprep.mubr.f32.mxu1 %v14979_v33 }
 0x2f3   :  { %v3647_v30 = vpop.f32.mrf.mxu0 }
 0x2f4   :  { %v3738_v22 = vmul.f32 %v3647_v30, %v3647_v30  ;;  %v3729_v54 = vsel %vm3574_vm7, %v3647_v30, 0.0 }
 0x2f5   :  { %v3649_v20 = vpop.f32.mrf.mxu0 }
 0x2f6   :  { %v3739_v41 = vmul.f32 %v3649_v20, %v3649_v20  ;;  %v3730_v7 = vsel %vm3574_vm7, %v3649_v20, 0.0  ;;  %v3742_v0 = vsel %vm3574_vm7, %v3738_v22, 0.0 }
 0x2f7   :  { %v3731_v32 = vadd.f32 %v3730_v7, %v3729_v54 }
 0x2f8   :  { %v3743_v10 = vsel %vm3574_vm7, %v3739_v41, 0.0 }
 0x2f9   :  { %v3744_v55 = vadd.f32 %v3743_v10, %v3742_v0 }
 0x30c   :  { %v3724_v29 = vpop.f32.mrf.mxu1 }
 0x30d   :  { %v3732_v40 = vsel %vm3574_vm7, %v3724_v29, 0.0  ;;  %v3740_v39 = vmul.f32 %v3724_v29, %v3724_v29 }
 0x30e   :  { %v3733_v2 = vadd.f32 %v3732_v40, %v3731_v32  ;;  %v3726_v47 = vpop.f32.mrf.mxu1 }
 0x30f   :  { %v3745_v50 = vsel %vm3574_vm7, %v3740_v39, 0.0  ;;  %v3734_v43 = vsel %vm3574_vm7, %v3726_v47, 0.0  ;;  %v3741_v37 = vmul.f32 %v3726_v47, %v3726_v47 }
 0x310   :  { %v3735_v44 = vadd.f32 %v3734_v43, %v3733_v2  ;;  %v3746_v48 = vadd.f32 %v3745_v50, %v3744_v55 }
 0x311   :  { %v3747_v15 = vsel %vm3574_vm7, %v3741_v37, 0.0 }
 0x312   :  { %3736 = vadd.xlane.f32.xlu0 %v3735_v44  ;;  %v3748_v60 = vadd.f32 %v3747_v15, %v3746_v48 }
 0x314   :  { %3749 = vadd.xlane.f32.xlu1 %v3748_v60 }
 0x39b   :  { %v3737_v27 = vpop.xlane.xlu0 %3736 }
 0x39c   :  { %v3751_v3 = vmul.f32 0.001953125, %v3737_v27 }
 0x39d   :  { %v3750_v59 = vpop.xlane.xlu1 %3749 }
 0x39e   :  { %v3753_v13 = vmul.f32 %v3751_v3, %v3751_v3  ;;  %v3752_v51 = vmul.f32 0.001953125, %v3750_v59 }
 0x3a0   :  { %v3754_v28 = vsub.f32 %v3752_v51, %v3753_v13 }
 0x3a2   :  { %v3756_v6 = vadd.f32 1e-05, %v3754_v28 }
 0x3a4   :  { %8157 = vrsqrt.f32 %v3756_v6 }
 0x3b1   :  { %v8158_v62 = vpop.eup %8157 }
 0x3b2   :  { %v3758_v56 = vmul.f32 %v8158_v62, %v3755_v5 }
 0x3b4   :  { %3764 = vperm.xlu0 %8063, %v3758_v56   ;;  %v3760_v26 = vmul.f32 %v3758_v56, %v3751_v3 }
 0x3b6   :  { %v3761_v31 = vsub.f32 %v3759_v19, %v3760_v26 }
 0x3b8   :  { %3773 = vperm.xlu1 %8064, %v3761_v31  }
 0x42f   :  { %v3765_v16 = vpop.permute.xlu0 %3764 }
 0x430   :  { %v3768_v36 = vmul.f32 %v3765_v16, %v3649_v20  ;;  %v3767_v58 = vmul.f32 %v3765_v16, %v3647_v30  ;;  %v3770_v25 = vmul.f32 %v3765_v16, %v3726_v47  ;;  %v3769_v45 = vmul.f32 %v3765_v16, %v3724_v29 }
 0x433   :  { %v3774_v14 = vpop.permute.xlu1 %3773 }
 0x434   :  { %v3777_v57 = vadd.f32 %v3774_v14, %v3768_v36  ;;  %v3776_v42 = vadd.f32 %v3774_v14, %v3767_v58  ;;  %v3779_v24 = vadd.f32 %v3774_v14, %v3770_v25  ;;  %v3778_v4 = vadd.f32 %v3774_v14, %v3769_v45 }
 0x436   :  { %v11298_v18 = vmax.f32 %v3777_v57, 0.0  ;;  %v11304_v8 = vmax.f32 %v3776_v42, 0.0  ;;  %v11318_v63 = vmax.f32 %v3779_v24, 0.0  ;;  %v11336_v23 = vmax.f32 %v3778_v4, 0.0 }
 0x438   :  { %3892 = vrot.lane.b32.xlu0 %v11298_v18, %s8244_s22  ;;  %3856 = vrot.lane.b32.xlu1 %v11298_v18, %s8250_s28 }
 0x43c   :  { %3862 = vrot.lane.b32.xlu1 %v11298_v18, %s8249_s27  ;;  %3818 = vrot.lane.b32.xlu0 %v11304_v8, %s8249_s27 }
 0x440   :  { %3868 = vrot.lane.b32.xlu1 %v11298_v18, %s8248_s26  ;;  %3830 = vrot.lane.b32.xlu0 %v11304_v8, %s8247_s25 }
 0x444   :  { %3874 = vrot.lane.b32.xlu1 %v11298_v18, %s8247_s25  ;;  %3842 = vrot.lane.b32.xlu0 %v11304_v8, %s8245_s23 }
 0x448   :  { %3880 = vrot.lane.b32.xlu1 %v11298_v18, %s8246_s24  ;;  %3858 = vrot.lane.b32.xlu0 %v11318_v63, %s8250_s28 }
 0x44c   :  { %3886 = vrot.lane.b32.xlu1 %v11298_v18, %s8245_s23  ;;  %3870 = vrot.lane.b32.xlu0 %v11318_v63, %s8248_s26 }
 0x450   :  { %3882 = vrot.lane.b32.xlu0 %v11318_v63, %s8246_s24  ;;  %3812 = vrot.lane.b32.xlu1 %v11304_v8, %s8250_s28 }
 0x454   :  { %3894 = vrot.lane.b32.xlu0 %v11318_v63, %s8244_s22  ;;  %3824 = vrot.lane.b32.xlu1 %v11304_v8, %s8248_s26 }
 0x458   :  { %3820 = vrot.lane.b32.xlu0 %v11336_v23, %s8249_s27  ;;  %3836 = vrot.lane.b32.xlu1 %v11304_v8, %s8246_s24 }
 0x45c   :  { %3832 = vrot.lane.b32.xlu0 %v11336_v23, %s8247_s25  ;;  %3848 = vrot.lane.b32.xlu1 %v11304_v8, %s8244_s22 }
 0x460   :  { %3844 = vrot.lane.b32.xlu0 %v11336_v23, %s8245_s23  ;;  %3864 = vrot.lane.b32.xlu1 %v11318_v63, %s8249_s27 }
 0x464   :  { %3876 = vrot.lane.b32.xlu1 %v11318_v63, %s8247_s25 }
 0x468   :  { %3888 = vrot.lane.b32.xlu1 %v11318_v63, %s8245_s23 }
 0x46c   :  { %3814 = vrot.lane.b32.xlu1 %v11336_v23, %s8250_s28 }
 0x470   :  { %3826 = vrot.lane.b32.xlu1 %v11336_v23, %s8248_s26 }
 0x474   :  { %3838 = vrot.lane.b32.xlu1 %v11336_v23, %s8246_s24 }
 0x478   :  { %3850 = vrot.lane.b32.xlu1 %v11336_v23, %s8244_s22 }
 0x4aa   :  { %v3893_v52 = vpop.permute.xlu0 %3892  ;;  %v3857_v11 = vpop.permute.xlu1 %3856 }
 0x4ae   :  { %v3863_v53 = vpop.permute.xlu1 %3862  ;;  %v3819_v21 = vpop.permute.xlu0 %3818 }
 0x4af   :  { %v3966_v12 = vcombine.low %v11298_v18, %v3863_v53  ;;  %v3898_v27 = vcombine.low %v11304_v8, %v3819_v21 }
 0x4b1   :  { %v3973_v41 = vrot.slane %v3966_v12, %v8394_v38  ;;  %v3905_v5 = vrot.slane %v3898_v27, %v8394_v38 }
 0x4b2   :  { %v3869_v46 = vpop.permute.xlu1 %3868  ;;  %v3831_v9 = vpop.permute.xlu0 %3830 }
 0x4b3   :  { %v3974_v1 = vcombine.low %v3857_v11, %v3869_v46 }
 0x4b5   :  { %v3981_v30 = vrot.slane %v3974_v1, %v8394_v38 }
 0x4b6   :  { %v3875_v34 = vpop.permute.xlu1 %3874  ;;  %v3843_v17 = vpop.permute.xlu0 %3842 }
 0x4b7   :  { %v3998_v7 = vcombine.low %v3973_v41, %v3981_v30  ;;  %v3999_v55 = vcombine.high %v3973_v41, %v3981_v30  ;;  %v3914_v13 = vcombine.low %v3831_v9, %v3843_v17 }
 0x4b9   :  { %v4006_v2 = vrot.slane %v3998_v7, %v8775_v49  ;;  %v4013_v15 = vrot.slane %v3999_v55, %v8775_v49  ;;  %v3921_v56 = vrot.slane %v3914_v13, %v8394_v38 }
 0x4ba   :  { %v3881_v35 = vpop.permute.xlu1 %3880  ;;  %v3859_v32 = vpop.permute.xlu0 %3858 }
 0x4bb   :  { %v3990_v20 = vcombine.low %v3881_v35, %v3893_v52 }
 0x4bd   :  { %v3997_v0 = vrot.slane %v3990_v20, %v8394_v38 }
 0x4be   :  { %v3887_v22 = vpop.permute.xlu1 %3886  ;;  %v3871_v48 = vpop.permute.xlu0 %3870 }
 0x4bf   :  { %v3982_v54 = vcombine.low %v3875_v34, %v3887_v22  ;;  %v4110_v25 = vcombine.low %v3859_v32, %v3871_v48 }
 0x4c1   :  { %v3989_v10 = vrot.slane %v3982_v54, %v8394_v38  ;;  %v4117_v9 = vrot.slane %v4110_v25, %v8394_v38 }
 0x4c2   :  { %v3813_v29 = vpop.permute.xlu1 %3812  ;;  %v3883_v28 = vpop.permute.xlu0 %3882 }
 0x4c3   :  { %v4014_v40 = vcombine.low %v3989_v10, %v3997_v0  ;;  %v4015_v39 = vcombine.high %v3989_v10, %v3997_v0 }
 0x4c5   :  { %v4022_v47 = vrot.slane %v4014_v40, %v8775_v49  ;;  %v4029_v43 = vrot.slane %v4015_v39, %v8775_v49 }
 0x4c6   :  { %v3825_v50 = vpop.permute.xlu1 %3824  ;;  %v3895_v14 = vpop.permute.xlu0 %3894 }
 0x4c7   :  { %v4030_v37 = vcombine.low %v4006_v2, %v4022_v47  ;;  %v4031_v44 = vcombine.high %v4006_v2, %v4022_v47  ;;  %v3906_v60 = vcombine.low %v3813_v29, %v3825_v50  ;;  %v4032_v3 = vcombine.low %v4013_v15, %v4029_v43 }
 0x4c8   :  { %v4033_v59 = vcombine.high %v4013_v15, %v4029_v43  ;;  %v4126_v52 = vcombine.low %v3883_v28, %v3895_v14 }
 0x4c9   :  { %4188 = vrot.lane.b32.xlu0 %v4030_v37, %s8252_s3  ;;  %4192 = vrot.lane.b32.xlu1 %v4031_v44, %s8252_s3  ;;  %v3913_v51 = vrot.slane %v3906_v60, %v8394_v38 }
 0x4ca   :  { %v3837_v61 = vpop.permute.xlu1 %3836  ;;  %v3821_v21 = vpop.permute.xlu0 %3820  ;;  %v4133_v35 = vrot.slane %v4126_v52, %v8394_v38 }
 0x4cb   :  { %v3930_v19 = vcombine.low %v3905_v5, %v3913_v51  ;;  %v3931_v58 = vcombine.high %v3905_v5, %v3913_v51  ;;  %v4034_v50 = vcombine.low %v11336_v23, %v3821_v21 }
 0x4cd   :  { %4196 = vrot.lane.b32.xlu0 %v4032_v3, %s8252_s3  ;;  %4200 = vrot.lane.b32.xlu1 %v4033_v59, %s8252_s3  ;;  %v3938_v57 = vrot.slane %v3930_v19, %v8775_v49  ;;  %v3945_v11 = vrot.slane %v3931_v58, %v8775_v49  ;;  %v4041_v60 = vrot.slane %v4034_v50, %v8394_v38 }
 0x4ce   :  { %v3849_v6 = vpop.permute.xlu1 %3848  ;;  %v3833_v41 = vpop.permute.xlu0 %3832 }
 0x4cf   :  { %v3922_v62 = vcombine.low %v3837_v61, %v3849_v6 }
 0x4d1   :  { %v3929_v26 = vrot.slane %v3922_v62, %v8394_v38 }
 0x4d2   :  { %v3865_v31 = vpop.permute.xlu1 %3864  ;;  %v3845_v2 = vpop.permute.xlu0 %3844 }
 0x4d3   :  { %v3946_v16 = vcombine.low %v3921_v56, %v3929_v26  ;;  %v3947_v36 = vcombine.high %v3921_v56, %v3929_v26  ;;  %v4102_v18 = vcombine.low %v11318_v63, %v3865_v31  ;;  %v4050_v44 = vcombine.low %v3833_v41, %v3845_v2 }
 0x4d5   :  { %v3954_v42 = vrot.slane %v3946_v16, %v8775_v49  ;;  %v3961_v24 = vrot.slane %v3947_v36, %v8775_v49  ;;  %v4109_v53 = vrot.slane %v4102_v18, %v8394_v38  ;;  %v4057_v27 = vrot.slane %v4050_v44, %v8394_v38 }
 0x4d6   :  { %v3877_v8 = vpop.permute.xlu1 %3876 }
 0x4d7   :  { %v3963_v45 = vcombine.high %v3938_v57, %v3954_v42  ;;  %v3962_v4 = vcombine.low %v3938_v57, %v3954_v42  ;;  %v3965_v34 = vcombine.high %v3945_v11, %v3961_v24  ;;  %v3964_v1 = vcombine.low %v3945_v11, %v3961_v24 }
 0x4d8   :  { %v4134_v12 = vcombine.low %v4109_v53, %v4117_v9  ;;  %v4135_v54 = vcombine.high %v4109_v53, %v4117_v9 }
 0x4d9   :  { %4190 = vrot.lane.b32.xlu1 %v3963_v45, %s8252_s3  ;;  %4186 = vrot.lane.b32.xlu0 %v3962_v4, %s8252_s3 }
 0x4da   :  { %v3889_v46 = vpop.permute.xlu1 %3888  ;;  %v4142_v7 = vrot.slane %v4134_v12, %v8775_v49  ;;  %v4149_v39 = vrot.slane %v4135_v54, %v8775_v49 }
 0x4db   :  { %v4118_v63 = vcombine.low %v3877_v8, %v3889_v46 }
 0x4dd   :  { %v4125_v17 = vrot.slane %v4118_v63, %v8394_v38  ;;  %4198 = vrot.lane.b32.xlu1 %v3965_v34, %s8252_s3  ;;  %4194 = vrot.lane.b32.xlu0 %v3964_v1, %s8252_s3 }
 0x4de   :  { %v3815_v30 = vpop.permute.xlu1 %3814 }
 0x4df   :  { %v4150_v20 = vcombine.low %v4125_v17, %v4133_v35  ;;  %v4151_v22 = vcombine.high %v4125_v17, %v4133_v35 }
 0x4e1   :  { %v4158_v0 = vrot.slane %v4150_v20, %v8775_v49  ;;  %v4165_v32 = vrot.slane %v4151_v22, %v8775_v49 }
 0x4e2   :  { %v3827_v10 = vpop.permute.xlu1 %3826 }
 0x4e3   :  { %v4167_v29 = vcombine.high %v4142_v7, %v4158_v0  ;;  %v4166_v40 = vcombine.low %v4142_v7, %v4158_v0  ;;  %v4042_v55 = vcombine.low %v3815_v30, %v3827_v10  ;;  %v4169_v43 = vcombine.high %v4149_v39, %v4165_v32 }
 0x4e4   :  { %v4168_v37 = vcombine.low %v4149_v39, %v4165_v32 }
 0x4e5   :  { %4208 = vrot.lane.b32.xlu1 %v4167_v29, %s8252_s3  ;;  %4204 = vrot.lane.b32.xlu0 %v4166_v40, %s8252_s3  ;;  %v4049_v48 = vrot.slane %v4042_v55, %v8394_v38 }
 0x4e6   :  { %v3839_v47 = vpop.permute.xlu1 %3838 }
 0x4e7   :  { %v4066_v3 = vcombine.low %v4041_v60, %v4049_v48  ;;  %v4067_v51 = vcombine.high %v4041_v60, %v4049_v48 }
 0x4e9   :  { %4216 = vrot.lane.b32.xlu1 %v4169_v43, %s8252_s3  ;;  %4212 = vrot.lane.b32.xlu0 %v4168_v37, %s8252_s3  ;;  %v4074_v28 = vrot.slane %v4066_v3, %v8775_v49  ;;  %v4081_v19 = vrot.slane %v4067_v51, %v8775_v49 }
 0x4ea   :  { %v3851_v15 = vpop.permute.xlu1 %3850 }
 0x4eb   :  { %v4058_v61 = vcombine.low %v3839_v47, %v3851_v15 }
 0x4ed   :  { %v4065_v59 = vrot.slane %v4058_v61, %v8394_v38 }
 0x4ef   :  { %v4082_v13 = vcombine.low %v4057_v27, %v4065_v59  ;;  %v4083_v23 = vcombine.high %v4057_v27, %v4065_v59 }
 0x4f1   :  { %v4090_v6 = vrot.slane %v4082_v13, %v8775_v49  ;;  %v4097_v5 = vrot.slane %v4083_v23, %v8775_v49 }
 0x4f3   :  { %v4099_v62 = vcombine.high %v4074_v28, %v4090_v6  ;;  %v4098_v56 = vcombine.low %v4074_v28, %v4090_v6  ;;  %v4101_v26 = vcombine.high %v4081_v19, %v4097_v5  ;;  %v4100_v31 = vcombine.low %v4081_v19, %v4097_v5 }
 0x4f5   :  { %4206 = vrot.lane.b32.xlu1 %v4099_v62, %s8252_s3  ;;  %4202 = vrot.lane.b32.xlu0 %v4098_v56, %s8252_s3 }
 0x4f9   :  { %4214 = vrot.lane.b32.xlu1 %v4101_v26, %s8252_s3  ;;  %4210 = vrot.lane.b32.xlu0 %v4100_v31, %s8252_s3 }
 0x53b   :  { %v4189_v16 = vpop.permute.xlu0 %4188  ;;  %v4193_v36 = vpop.permute.xlu1 %4192 }
 0x53c   :  { %4236 = vst.msk [vmem:[#allocation2 + $0x9] sm:$0xff] %vm4234_vm11, %v4189_v16  ;;  %4238 = vst.msk [vmem:[#allocation2 + $0x21] sm:$0xff] %vm4234_vm11, %v4193_v36 }
 0x53f   :  { %v4197_v14 = vpop.permute.xlu0 %4196  ;;  %v4201_v58 = vpop.permute.xlu1 %4200 }
 0x540   :  { %4240 = vst.msk [vmem:[#allocation2 + $0x39] sm:$0xff] %vm4234_vm11, %v4197_v14  ;;  %4242 = vst.msk [vmem:[#allocation2 + $0x51] sm:$0xff] %vm4234_vm11, %v4201_v58 }
 0x543   :  { %v11466_v57 = vld [vmem:[#allocation2 + $0xa] sm:$0xff]  ;;  %v11470_v42 = vld [vmem:[#allocation2 + $0x22] sm:$0xff] }
 0x544   :  { %4589 = vrot.lane.b32.xlu1 %v11466_v57, %s8239_s11  ;;  %v11488_v11 = vld [vmem:[#allocation2 + $0x9] sm:$0xff]  ;;  %v11490_v53 = vld [vmem:[#allocation2 + $0x21] sm:$0xff] }
 0x547   :  { %v11472_v18 = vld [vmem:[#allocation2 + $0x3a] sm:$0xff]  ;;  %v11474_v8 = vld [vmem:[#allocation2 + $0x52] sm:$0xff] }
 0x548   :  { %v11476_v25 = vld [vmem:[#allocation2 + $0x39] sm:$0xff]  ;;  %v5655_v24 = vcombine.low %v11466_v57, %v11472_v18  ;;  %v5656_v45 = vcombine.high %v11466_v57, %v11472_v18  ;;  %4597 = vrot.lane.b32.xlu1 %v11472_v18, %s8239_s11  ;;  %v5671_v4 = vcombine.low %v11470_v42, %v11474_v8  ;;  %v5672_v52 = vcombine.high %v11470_v42, %v11474_v8  ;;  %v11492_v21 = vld [vmem:[#allocation2 + $0x51] sm:$0xff] }
 0x549   :  { %v5415_v46 = vcombine.low %v11488_v11, %v11476_v25  ;;  %v5416_v9 = vcombine.high %v11488_v11, %v11476_v25  ;;  %v5431_v63 = vcombine.low %v11490_v53, %v11492_v21  ;;  %v5432_v34 = vcombine.high %v11490_v53, %v11492_v21 }
 0x54a   :  { %v11503_v1 = vrot.slane %v5655_v24, %v8394_v38  ;;  %v11506_v35 = vrot.slane %v5656_v45, %v8394_v38  ;;  %v11509_v12 = vrot.slane %v5671_v4, %v8394_v38  ;;  %v11512_v17 = vrot.slane %v5672_v52, %v8394_v38 }
 0x54b   :  { %v4187_v30 = vpop.permute.xlu0 %4186  ;;  %v4191_v20 = vpop.permute.xlu1 %4190  ;;  %v11515_v22 = vrot.slane %v5415_v46, %v8394_v38  ;;  %v11518_v41 = vrot.slane %v5416_v9, %v8394_v38  ;;  %v11521_v54 = vrot.slane %v5431_v63, %v8394_v38  ;;  %v11524_v7 = vrot.slane %v5432_v34, %v8394_v38 }
 0x54c   :  { %14992 = vst [vmem:[#allocation65_spill] sm:$0xff] %v11506_v35  ;;  %14993 = vst [vmem:[#allocation63_spill] sm:$0xff] %v11512_v17 }
 0x54d   :  { %14994 = vst [vmem:[#allocation76_spill] sm:$0xff] %v11518_v41  ;;  %14995 = vst [vmem:[#allocation72_spill] sm:$0xff] %v11524_v7 }
 0x54e   :  { %4235 = vst.msk [vmem:[#allocation2 + $0x1] sm:$0xff] %vm4234_vm11, %v4187_v30  ;;  %4237 = vst.msk [vmem:[#allocation2 + $0x19] sm:$0xff] %vm4234_vm11, %v4191_v20 }
 0x54f   :  { %v4195_v47 = vpop.permute.xlu0 %4194  ;;  %v4199_v50 = vpop.permute.xlu1 %4198 }
 0x550   :  { %4239 = vst.msk [vmem:[#allocation2 + $0x31] sm:$0xff] %vm4234_vm11, %v4195_v47  ;;  %4241 = vst.msk [vmem:[#allocation2 + $0x49] sm:$0xff] %vm4234_vm11, %v4199_v50 }
 0x555   :  { %v4283_v43 = vld [vmem:[#allocation2 + $0x2] sm:$0xff]  ;;  %v11551_v44 = vld [vmem:[#allocation2 + $0x1a] sm:$0xff] }
 0x556   :  { %v11546_v37 = vld [vmem:[#allocation2] sm:$0xff]  ;;  %4587 = vrot.lane.b32.xlu1 %v4283_v43, %s8239_s11 }
 0x557   :  { %4315 = vrot.lane.b32.xlu0 %v11546_v37, %s8242_s17  ;;  %v4205_v48 = vpop.permute.xlu0 %4204  ;;  %v4209_v15 = vpop.permute.xlu1 %4208  ;;  %v4287_v60 = vld [vmem:[#allocation2 + $0x32] sm:$0xff]  ;;  %v11553_v61 = vld [vmem:[#allocation2 + $0x4a] sm:$0xff]  ;;  %v11564_v23 = vld [vmem:[#allocation2 + $0x1] sm:$0xff] }
 0x558   :  { %v11555_v27 = vld [vmem:[#allocation2 + $0x31] sm:$0xff]  ;;  %4244 = vst.msk [vmem:[#allocation2 + $0x69] sm:$0xff] %vm4234_vm11, %v4205_v48  ;;  %4246 = vst.msk [vmem:[#allocation2 + $0x81] sm:$0xff] %vm4234_vm11, %v4209_v15  ;;  %v5043_v3 = vcombine.low %v4283_v43, %v4287_v60  ;;  %v5044_v59 = vcombine.high %v4283_v43, %v4287_v60  ;;  %v5059_v13 = vcombine.low %v11551_v44, %v11553_v61  ;;  %v11566_v51 = vld [vmem:[#allocation2 + $0x19] sm:$0xff] }
 0x559   :  { %v11568_v28 = vld [vmem:[#allocation2 + $0x49] sm:$0xff]  ;;  %v5060_v6 = vcombine.high %v11551_v44, %v11553_v61  ;;  %v4803_v5 = vcombine.low %v11564_v23, %v11555_v27  ;;  %v4804_v62 = vcombine.high %v11564_v23, %v11555_v27  ;;  %v11624_v30 = vld [vmem:[#allocation2 + $0x38] sm:$0xff] }
 0x55a   :  { %4595 = vrot.lane.b32.xlu1 %v4287_v60, %s8239_s11  ;;  %v4819_v56 = vcombine.low %v11566_v51, %v11568_v28  ;;  %v11579_v31 = vrot.slane %v5043_v3, %v8394_v38  ;;  %v11588_v16 = vrot.slane %v5059_v13, %v8394_v38  ;;  %v11591_v36 = vrot.slane %v5044_v59, %v8394_v38  ;;  %v11633_v50 = vld [vmem:[#allocation2 + $0x50] sm:$0xff]  ;;  %v11639_v3 = vld [vmem:[#allocation2 + $0x8] sm:$0xff]  ;;  %v11641_v59 = vld [vmem:[#allocation2 + $0x20] sm:$0xff] }
 0x55b   :  { %4593 = vrot.lane.b32.xlu0 %v11470_v42, %s8239_s11  ;;  %v4213_v19 = vpop.permute.xlu0 %4212  ;;  %v4217_v26 = vpop.permute.xlu1 %4216  ;;  %v11594_v14 = vrot.slane %v5060_v6, %v8394_v38  ;;  %v11597_v58 = vrot.slane %v4803_v5, %v8394_v38  ;;  %v4820_v34 = vcombine.high %v11566_v51, %v11568_v28  ;;  %15000 = vst [vmem:[#allocation24_spill] sm:$0xff] %v11624_v30  ;;  %15001 = vst [vmem:[#allocation27_spill] sm:$0xff] %v11633_v50 }
 0x55c   :  { %4248 = vst.msk [vmem:[#allocation2 + $0x99] sm:$0xff] %vm4234_vm11, %v4213_v19  ;;  %4250 = vst.msk [vmem:[#allocation2 + $0xb1] sm:$0xff] %vm4234_vm11, %v4217_v26  ;;  %v11600_v24 = vrot.slane %v4819_v56, %v8394_v38  ;;  %v11644_v6 = vrot.slane %v4804_v62, %v8394_v38  ;;  %v5248_v56 = vcombine.high %v11639_v3, %v11624_v30 }
 0x55d   :  { %14996 = vst [vmem:[#allocation29_spill] sm:$0xff] %v11591_v36  ;;  %14997 = vst [vmem:[#allocation53_spill] sm:$0xff] %v11594_v14  ;;  %v11647_v5 = vrot.slane %v4820_v34, %v8394_v38  ;;  %v5264_v19 = vcombine.high %v11641_v59, %v11633_v50  ;;  %v15042_v14 = vcombine.low %v11579_v31, %v11588_v16 }
 0x55e   :  { %4541 = vrot.lane.b32.xlu1 %v11466_v57, %s8242_s17  ;;  %14998 = vst [vmem:[#allocation34_spill] sm:$0xff] %v11597_v58  ;;  %14999 = vst [vmem:[#allocation54_spill] sm:$0xff] %v11600_v24  ;;  %v11665_v55 = vrot.slane %v5248_v56, %v8394_v38 }
 0x55f   :  { %4601 = vrot.lane.b32.xlu0 %v11474_v8, %s8239_s11  ;;  %v11629_v20 = vld [vmem:[#allocation2 + $0x6a] sm:$0xff]  ;;  %v11631_v47 = vld [vmem:[#allocation2 + $0x82] sm:$0xff]  ;;  %15002 = vst [vmem:[#allocation106_spill] sm:$0xff] %v11639_v3  ;;  %15003 = vst [vmem:[#allocation104_spill] sm:$0xff] %v11641_v59 }
 0x560   :  { %15004 = vst [vmem:[#allocation107_spill] sm:$0xff] %v11644_v6  ;;  %15005 = vst [vmem:[#allocation105_spill] sm:$0xff] %v11647_v5 }
 0x561   :  { %15008 = vst [vmem:[#allocation71_spill] sm:$0xff] %v11665_v55 }
 0x562   :  { %4549 = vrot.lane.b32.xlu1 %v11472_v18, %s8242_s17 }
 0x563   :  { %4591 = vrot.lane.b32.xlu0 %v11551_v44, %s8239_s11  ;;  %v11618_v9 = vld [vmem:[#allocation2 + $0x9a] sm:$0xff]  ;;  %v11620_v63 = vld [vmem:[#allocation2 + $0xb2] sm:$0xff] }
 0x564   :  { %v6880_v48 = vcombine.high %v11629_v20, %v11618_v9  ;;  %v6896_v15 = vcombine.high %v11631_v47, %v11620_v63  ;;  %v11824_v18 = vld [vmem:[#allocation2 + $0xb1] sm:$0xff] }
 0x565   :  { %15019 = vst [vmem:[#allocation40_spill] sm:$0xff] %v11824_v18 }
 0x566   :  { %4539 = vrot.lane.b32.xlu1 %v4283_v43, %s8242_s17  ;;  %v11659_v62 = vrot.slane %v6880_v48, %v8394_v38  ;;  %v11662_v26 = vrot.slane %v6896_v15, %v8394_v38  ;;  %v11814_v48 = vld [vmem:[#allocation2 + $0x81] sm:$0xff] }
 0x567   :  { %4599 = vrot.lane.b32.xlu0 %v11553_v61, %s8239_s11  ;;  %v4203_v43 = vpop.permute.xlu0 %4202  ;;  %v4207_v13 = vpop.permute.xlu1 %4206  ;;  %15017 = vst [vmem:[#allocation23_spill] sm:$0xff] %v11814_v48 }
 0x568   :  { %4243 = vst.msk [vmem:[#allocation2 + $0x61] sm:$0xff] %vm4234_vm11, %v4203_v43  ;;  %4245 = vst.msk [vmem:[#allocation2 + $0x79] sm:$0xff] %vm4234_vm11, %v4207_v13  ;;  %v11668_v43 = vrot.slane %v5264_v19, %v8394_v38 }
 0x569   :  { %15006 = vst [vmem:[#allocation38_spill] sm:$0xff] %v11659_v62  ;;  %15007 = vst [vmem:[#allocation101_spill] sm:$0xff] %v11662_v26 }
 0x56a   :  { %4547 = vrot.lane.b32.xlu1 %v4287_v60, %s8242_s17  ;;  %15009 = vst [vmem:[#allocation102_spill] sm:$0xff] %v11668_v43 }
 0x56b   :  { %4545 = vrot.lane.b32.xlu0 %v11470_v42, %s8242_s17  ;;  %v4211_v34 = vpop.permute.xlu0 %4210  ;;  %v4215_v2 = vpop.permute.xlu1 %4214 }
 0x56c   :  { %4247 = vst.msk [vmem:[#allocation2 + $0x91] sm:$0xff] %vm4234_vm11, %v4211_v34  ;;  %4249 = vst.msk [vmem:[#allocation2 + $0xa9] sm:$0xff] %vm4234_vm11, %v4215_v2  ;;  %v11766_v2 = vld [vmem:[#allocation2 + $0x18] sm:$0xff] }
 0x56d   :  { %15011 = vst [vmem:[#allocation52_spill] sm:$0xff] %v11766_v2 }
 0x56e   :  { %4429 = vrot.lane.b32.xlu1 %v11488_v11, %s8242_s17 }
 0x56f   :  { %4553 = vrot.lane.b32.xlu0 %v11474_v8, %s8242_s17  ;;  %v11720_v8 = vld [vmem:[#allocation2 + $0x62] sm:$0xff]  ;;  %v11842_v32 = vld [vmem:[#allocation2 + $0x79] sm:$0xff] }
 0x570   :  { %15023 = vst [vmem:[#allocation45_spill] sm:$0xff] %v11842_v32  ;;  %v11874_v41 = vld [vmem:[#allocation2 + $0x61] sm:$0xff] }
 0x571   :  { %15029 = vst [vmem:[#allocation18_spill] sm:$0xff] %v11874_v41  ;;  %v11917_v36 = vld [vmem:[#allocation2 + $0x80] sm:$0xff] }
 0x572   :  { %4437 = vrot.lane.b32.xlu1 %v11476_v25, %s8242_s17  ;;  %15038 = vst [vmem:[#allocation58_spill] sm:$0xff] %v11917_v36 }
 0x573   :  { %4543 = vrot.lane.b32.xlu0 %v11551_v44, %s8242_s17  ;;  %v11856_v40 = vld [vmem:[#allocation2 + $0xa9] sm:$0xff] }
 0x574   :  { %15026 = vst [vmem:[#allocation111_spill] sm:$0xff] %v11856_v40  ;;  %v11930_v43 = vld [vmem:[#allocation2 + $0xb0] sm:$0xff] }
 0x575   :  { %15041 = vst [vmem:[#allocation31_spill] sm:$0xff] %v11930_v43 }
 0x576   :  { %4477 = vrot.lane.b32.xlu1 %v11488_v11, %s8239_s11  ;;  %v11736_v11 = vld [vmem:[#allocation2 + $0x7a] sm:$0xff] }
 0x577   :  { %4551 = vrot.lane.b32.xlu0 %v11553_v61, %s8242_s17 }
 0x57a   :  { %4485 = vrot.lane.b32.xlu1 %v11476_v25, %s8239_s11  ;;  %v11726_v25 = vld [vmem:[#allocation2 + $0x92] sm:$0xff] }
 0x57b   :  { %4433 = vrot.lane.b32.xlu0 %v11490_v53, %s8242_s17 }
 0x57e   :  { %4605 = vrot.lane.b32.xlu1 %v11629_v20, %s8239_s11 }
 0x57f   :  { %4441 = vrot.lane.b32.xlu0 %v11492_v21, %s8242_s17 }
 0x582   :  { %4613 = vrot.lane.b32.xlu1 %v11618_v9, %s8239_s11 }
 0x583   :  { %4481 = vrot.lane.b32.xlu0 %v11490_v53, %s8239_s11  ;;  %v11742_v53 = vld [vmem:[#allocation2 + $0xaa] sm:$0xff] }
 0x586   :  { %4427 = vrot.lane.b32.xlu1 %v11564_v23, %s8242_s17 }
 0x587   :  { %4489 = vrot.lane.b32.xlu0 %v11492_v21, %s8239_s11  ;;  %v11756_v21 = vld [vmem:[#allocation2 + $0x30] sm:$0xff] }
 0x588   :  { %15010 = vst [vmem:[#allocation99_spill] sm:$0xff] %v11756_v21 }
 0x58a   :  { %4435 = vrot.lane.b32.xlu1 %v11555_v27, %s8242_s17 }
 0x58b   :  { %4609 = vrot.lane.b32.xlu0 %v11631_v47, %s8239_s11 }
 0x58e   :  { %4475 = vrot.lane.b32.xlu1 %v11564_v23, %s8239_s11 }
 0x58f   :  { %4617 = vrot.lane.b32.xlu0 %v11620_v63, %s8239_s11 }
 0x592   :  { %4483 = vrot.lane.b32.xlu1 %v11555_v27, %s8239_s11  ;;  %v11786_v27 = vld [vmem:[#allocation2 + $0x69] sm:$0xff] }
 0x593   :  { %4431 = vrot.lane.b32.xlu0 %v11566_v51, %s8242_s17  ;;  %15013 = vst [vmem:[#allocation75_spill] sm:$0xff] %v11786_v27 }
 0x596   :  { %4603 = vrot.lane.b32.xlu1 %v11720_v8, %s8239_s11 }
 0x597   :  { %4439 = vrot.lane.b32.xlu0 %v11568_v28, %s8242_s17 }
 0x59a   :  { %4611 = vrot.lane.b32.xlu1 %v11726_v25, %s8239_s11 }
 0x59b   :  { %4479 = vrot.lane.b32.xlu0 %v11566_v51, %s8239_s11 }
 0x59e   :  { %4365 = vrot.lane.b32.xlu1 %v11639_v3, %s8239_s11 }
 0x59f   :  { %4487 = vrot.lane.b32.xlu0 %v11568_v28, %s8239_s11  ;;  %v11796_v28 = vld [vmem:[#allocation2 + $0x99] sm:$0xff] }
 0x5a0   :  { %15015 = vst [vmem:[#allocation20_spill] sm:$0xff] %v11796_v28 }
 0x5a2   :  { %4373 = vrot.lane.b32.xlu1 %v11624_v30, %s8239_s11 }
 0x5a3   :  { %4607 = vrot.lane.b32.xlu0 %v11736_v11, %s8239_s11 }
 0x5a6   :  { %4557 = vrot.lane.b32.xlu1 %v11629_v20, %s8242_s17 }
 0x5a7   :  { %4615 = vrot.lane.b32.xlu0 %v11742_v53, %s8239_s11 }
 0x5aa   :  { %4565 = vrot.lane.b32.xlu1 %v11618_v9, %s8242_s17 }
 0x5ab   :  { %4369 = vrot.lane.b32.xlu0 %v11641_v59, %s8239_s11 }
 0x5ae   :  { %4363 = vrot.lane.b32.xlu1 %v11546_v37, %s8239_s11  ;;  %v11772_v37 = vld [vmem:[#allocation2 + $0x48] sm:$0xff] }
 0x5af   :  { %4377 = vrot.lane.b32.xlu0 %v11633_v50, %s8239_s11  ;;  %15012 = vst [vmem:[#allocation33_spill] sm:$0xff] %v11772_v37 }
 0x5b2   :  { %4371 = vrot.lane.b32.xlu1 %v11756_v21, %s8239_s11 }
 0x5b3   :  { %4561 = vrot.lane.b32.xlu0 %v11631_v47, %s8242_s17 }
 0x5b6   :  { %4555 = vrot.lane.b32.xlu1 %v11720_v8, %s8242_s17  ;;  %v11774_v44 = vpop.permute.xlu1 %4589 }
 0x5b7   :  { %4569 = vrot.lane.b32.xlu0 %v11620_v63, %s8242_s17 }
 0x5ba   :  { %4563 = vrot.lane.b32.xlu1 %v11726_v25, %s8242_s17  ;;  %v11784_v61 = vpop.permute.xlu1 %4597 }
 0x5bb   :  { %4367 = vrot.lane.b32.xlu0 %v11766_v2, %s8239_s11 }
 0x5be   :  { %4317 = vrot.lane.b32.xlu1 %v11639_v3, %s8242_s17  ;;  %v5792_v3 = vcombine.high %v11774_v44, %v11784_v61 }
 0x5bf   :  { %4375 = vrot.lane.b32.xlu0 %v11772_v37, %s8239_s11 }
 0x5c2   :  { %4325 = vrot.lane.b32.xlu1 %v11624_v30, %s8242_s17 }
 0x5c3   :  { %4559 = vrot.lane.b32.xlu0 %v11736_v11, %s8242_s17 }
 0x5c6   :  { %4445 = vrot.lane.b32.xlu1 %v11786_v27, %s8242_s17 }
 0x5c7   :  { %4567 = vrot.lane.b32.xlu0 %v11742_v53, %s8242_s17 }
 0x5c8   :  { %v11794_v51 = vpop.permute.xlu1 %4587 }
 0x5c9   :  { %v11792_v23 = vpop.permute.xlu0 %4315 }
 0x5ca   :  { %15014 = vst [vmem:[#allocation21_spill] sm:$0xff] %v11792_v23  ;;  %4453 = vrot.lane.b32.xlu1 %v11796_v28, %s8242_s17 }
 0x5cb   :  { %4321 = vrot.lane.b32.xlu0 %v11641_v59, %s8242_s17  ;;  %v11973_v59 = vld [vmem:[#allocation2 + $0xa8] sm:$0xff] }
 0x5cc   :  { %v11804_v56 = vpop.permute.xlu1 %4595  ;;  %15050 = vst [vmem:[#allocation83_spill] sm:$0xff] %v11973_v59 }
 0x5cd   :  { %v11802_v13 = vpop.permute.xlu0 %4593 }
 0x5ce   :  { %4493 = vrot.lane.b32.xlu1 %v11786_v27, %s8239_s11 }
 0x5cf   :  { %4329 = vrot.lane.b32.xlu0 %v11633_v50, %s8242_s17  ;;  %v11996_v50 = vld [vmem:[#allocation2 + $0x60] sm:$0xff] }
 0x5d0   :  { %v11812_v34 = vpop.permute.xlu1 %4541  ;;  %15054 = vst [vmem:[#allocation44_spill] sm:$0xff] %v11996_v50 }
 0x5d1   :  { %v11810_v19 = vpop.permute.xlu0 %4601  ;;  %15016 = vst [vmem:[#allocation108_spill] sm:$0xff] %v11812_v34 }
 0x5d2   :  { %4501 = vrot.lane.b32.xlu1 %v11796_v28, %s8239_s11  ;;  %v11891_v28 = vld [vmem:[#allocation2 + $0x91] sm:$0xff] }
 0x5d3   :  { %4449 = vrot.lane.b32.xlu0 %v11814_v48, %s8242_s17  ;;  %15033 = vst [vmem:[#allocation64_spill] sm:$0xff] %v11891_v28 }
 0x5d4   :  { %v11822_v29 = vpop.permute.xlu1 %4549 }
 0x5d5   :  { %v11820_v60 = vpop.permute.xlu0 %4591  ;;  %15018 = vst [vmem:[#allocation70_spill] sm:$0xff] %v11822_v29  ;;  %v5687_v52 = vcombine.low %v11812_v34, %v11822_v29 }
 0x5d6   :  { %4319 = vrot.lane.b32.xlu1 %v11766_v2, %s8242_s17 }
 0x5d7   :  { %4457 = vrot.lane.b32.xlu0 %v11824_v18, %s8242_s17  ;;  %v11863_v57 = vrot.slane %v5687_v52, %v8394_v38 }
 0x5d8   :  { %v11832_v46 = vpop.permute.xlu1 %4539 }
 0x5d9   :  { %v11830_v39 = vpop.permute.xlu0 %4599  ;;  %15020 = vst [vmem:[#allocation68_spill] sm:$0xff] %v11832_v46 }
 0x5da   :  { %4327 = vrot.lane.b32.xlu1 %v11772_v37, %s8242_s17 }
 0x5db   :  { %4497 = vrot.lane.b32.xlu0 %v11814_v48, %s8239_s11 }
 0x5dc   :  { %v11840_v15 = vpop.permute.xlu1 %4547 }
 0x5dd   :  { %v11838_v4 = vpop.permute.xlu0 %4545  ;;  %15022 = vst [vmem:[#allocation41_spill] sm:$0xff] %v11840_v15  ;;  %v5075_v52 = vcombine.low %v11832_v46, %v11840_v15  ;;  %v11952_v46 = vld [vmem:[#allocation2 + $0x78] sm:$0xff] }
 0x5de   :  { %15021 = vst [vmem:[#allocation69_spill] sm:$0xff] %v11838_v4  ;;  %4447 = vrot.lane.b32.xlu1 %v11842_v32, %s8242_s17  ;;  %15046 = vst [vmem:[#allocation36_spill] sm:$0xff] %v11952_v46 }
 0x5df   :  { %4505 = vrot.lane.b32.xlu0 %v11824_v18, %s8239_s11 }
 0x5e0   :  { %v11852_v45 = vpop.permute.xlu1 %4429 }
 0x5e1   :  { %v11850_v42 = vpop.permute.xlu0 %4553  ;;  %15025 = vst [vmem:[#allocation50_spill] sm:$0xff] %v11852_v45 }
 0x5e2   :  { %15024 = vst [vmem:[#allocation39_spill] sm:$0xff] %v11850_v42  ;;  %v5703_v10 = vcombine.low %v11838_v4, %v11850_v42  ;;  %4455 = vrot.lane.b32.xlu1 %v11856_v40, %s8242_s17  ;;  %v5196_v4 = vcombine.high %v11820_v60, %v11830_v39 }
 0x5e3   :  { %4323 = vrot.lane.b32.xlu0 %v11756_v21, %s8242_s17 }
 0x5e4   :  { %v11866_v0 = vrot.slane %v5703_v10, %v8394_v38  ;;  %v11870_v6 = vpop.permute.xlu1 %4437 }
 0x5e5   :  { %v11868_v5 = vpop.permute.xlu0 %4543  ;;  %15028 = vst [vmem:[#allocation74_spill] sm:$0xff] %v11870_v6 }
 0x5e6   :  { %15027 = vst [vmem:[#allocation112_spill] sm:$0xff] %v11868_v5  ;;  %v5751_v7 = vcombine.low %v11863_v57, %v11866_v0  ;;  %4495 = vrot.lane.b32.xlu1 %v11842_v32, %s8239_s11  ;;  %v15034_v32 = vcombine.low %v11503_v1, %v11509_v12 }
 0x5e7   :  { %4443 = vrot.lane.b32.xlu0 %v11874_v41, %s8242_s17 }
 0x5e8   :  { %v11884_v48 = vpop.permute.xlu1 %4477  ;;  %v11887_v18 = vrot.slane %v5751_v7, %v8775_v49  ;;  %v11901_v23 = vrot.slane %v15034_v32, %v8775_v49  ;;  %v11904_v7 = vrot.slane %v5075_v52, %v8394_v38 }
 0x5e9   :  { %v11882_v10 = vpop.permute.xlu0 %4551  ;;  %15031 = vst [vmem:[#allocation66_spill] sm:$0xff] %v11884_v48 }
 0x5ea   :  { %15030 = vst [vmem:[#allocation77_spill] sm:$0xff] %v11882_v10  ;;  %15032 = vst [vmem:[#allocation73_spill] sm:$0xff] %v11887_v18  ;;  %v5091_v27 = vcombine.low %v11868_v5, %v11882_v10  ;;  %4503 = vrot.lane.b32.xlu1 %v11856_v40, %s8239_s11  ;;  %v11971_v10 = vld [vmem:[#allocation2 + $0x98] sm:$0xff] }
 0x5eb   :  { %4451 = vrot.lane.b32.xlu0 %v11891_v28, %s8242_s17  ;;  %15035 = vst [vmem:[#allocation56_spill] sm:$0xff] %v11901_v23  ;;  %15049 = vst [vmem:[#allocation80_spill] sm:$0xff] %v11971_v10 }
 0x5ec   :  { %v11907_v2 = vrot.slane %v5091_v27, %v8394_v38  ;;  %v11911_v21 = vpop.permute.xlu1 %4485 }
 0x5ed   :  { %v11909_v37 = vpop.permute.xlu0 %4433  ;;  %15037 = vst [vmem:[#allocation62_spill] sm:$0xff] %v11911_v21  ;;  %v5551_v15 = vcombine.low %v11884_v48, %v11911_v21 }
 0x5ee   :  { %15036 = vst [vmem:[#allocation48_spill] sm:$0xff] %v11909_v37  ;;  %v5139_v40 = vcombine.low %v11904_v7, %v11907_v2  ;;  %4385 = vrot.lane.b32.xlu1 %v11917_v36, %s8239_s11 }
 0x5ef   :  { %4491 = vrot.lane.b32.xlu0 %v11874_v41, %s8239_s11  ;;  %v11940_v41 = vrot.slane %v15042_v14, %v8775_v49  ;;  %v5519_v14 = vcombine.low %v11852_v45, %v11870_v6  ;;  %v11983_v6 = vrot.slane %v5551_v15, %v8394_v38 }
 0x5f0   :  { %v11925_v27 = vpop.permute.xlu1 %4605  ;;  %v11928_v52 = vrot.slane %v5139_v40, %v8775_v49 }
 0x5f1   :  { %v11923_v32 = vpop.permute.xlu0 %4441  ;;  %15043 = vst [vmem:[#allocation8_spill] sm:$0xff] %v11940_v41  ;;  %v11980_v45 = vrot.slane %v5519_v14, %v8394_v38  ;;  %15052 = vst [vmem:[#allocation88_spill] sm:$0xff] %v11983_v6 }
 0x5f2   :  { %15039 = vst [vmem:[#allocation37_spill] sm:$0xff] %v11923_v32  ;;  %15040 = vst [vmem:[#allocation9_spill] sm:$0xff] %v11928_v52  ;;  %4393 = vrot.lane.b32.xlu1 %v11930_v43, %s8239_s11  ;;  %v5535_v35 = vcombine.low %v11909_v37, %v11923_v32 }
 0x5f3   :  { %4499 = vrot.lane.b32.xlu0 %v11891_v28, %s8239_s11  ;;  %v11950_v28 = vld [vmem:[#allocation2 + $0x68] sm:$0xff]  ;;  %15051 = vst [vmem:[#allocation85_spill] sm:$0xff] %v11980_v45 }
 0x5f4   :  { %v11944_v17 = vpop.permute.xlu1 %4613  ;;  %15045 = vst [vmem:[#allocation35_spill] sm:$0xff] %v11950_v28  ;;  %v11967_v37 = vrot.slane %v5535_v35, %v8394_v38 }
 0x5f5   :  { %v11942_v55 = vpop.permute.xlu0 %4481 }
 0x5f6   :  { %15044 = vst [vmem:[#allocation84_spill] sm:$0xff] %v11942_v55  ;;  %4383 = vrot.lane.b32.xlu1 %v11952_v46, %s8239_s11  ;;  %15048 = vst [vmem:[#allocation118_spill] sm:$0xff] %v11967_v37 }
 0x5f7   :  { %4381 = vrot.lane.b32.xlu0 %v11950_v28, %s8239_s11 }
 0x5f8   :  { %v11964_v5 = vpop.permute.xlu1 %4427 }
 0x5f9   :  { %v11962_v40 = vpop.permute.xlu0 %4489 }
 0x5fa   :  { %15047 = vst [vmem:[#allocation117_spill] sm:$0xff] %v11962_v40  ;;  %v5567_v32 = vcombine.low %v11942_v55, %v11962_v40  ;;  %4391 = vrot.lane.b32.xlu1 %v11973_v59, %s8239_s11  ;;  %v5583_v55 = vcombine.low %v11980_v45, %v11967_v37  ;;  %v12009_v37 = vld [vmem:[#allocation2 + $0x90] sm:$0xff] }
 0x5fb   :  { %4389 = vrot.lane.b32.xlu0 %v11971_v10, %s8239_s11  ;;  %15056 = vst [vmem:[#allocation95_spill] sm:$0xff] %v12009_v37 }
 0x5fc   :  { %v11986_v35 = vrot.slane %v5567_v32, %v8394_v38  ;;  %v11990_v21 = vpop.permute.xlu1 %4435  ;;  %v5195_v32 = vcombine.low %v11820_v60, %v11830_v39 }
 0x5fd   :  { %v11988_v48 = vpop.permute.xlu0 %4609  ;;  %v4907_v58 = vcombine.low %v11964_v5, %v11990_v21 }
 0x5fe   :  { %15053 = vst [vmem:[#allocation43_spill] sm:$0xff] %v11986_v35  ;;  %v5615_v40 = vcombine.low %v11983_v6, %v11986_v35  ;;  %4337 = vrot.lane.b32.xlu1 %v11917_v36, %s8242_s17  ;;  %v12012_v6 = vrot.slane %v5583_v55, %v8775_v49  ;;  %v5179_v35 = vcombine.low %v11794_v51, %v11804_v56 }
 0x5ff   :  { %4379 = vrot.lane.b32.xlu0 %v11996_v50, %s8239_s11  ;;  %v5808_v36 = vcombine.high %v11802_v13, %v11810_v19  ;;  %v12025_v34 = vrot.slane %v5195_v32, %v8394_v38  ;;  %v4908_v32 = vcombine.high %v11964_v5, %v11990_v21 }
 0x600   :  { %v12003_v15 = vrot.slane %v5615_v40, %v8775_v49  ;;  %v4476_v45 = vpop.permute.xlu1 %4475  ;;  %15057 = vst [vmem:[#allocation113_spill] sm:$0xff] %v12012_v6  ;;  %v12030_v30 = vrot.slane %v5179_v35, %v8394_v38  ;;  %v5807_v40 = vcombine.low %v11802_v13, %v11810_v19  ;;  %v12052_v13 = vrot.slane %v5792_v3, %v8394_v38 }
 0x601   :  { %v12007_v14 = vpop.permute.xlu0 %4617  ;;  %v12064_v60 = vrot.slane %v4908_v32, %v8394_v38 }
 0x602   :  { %15055 = vst [vmem:[#allocation15_spill] sm:$0xff] %v12003_v15  ;;  %4345 = vrot.lane.b32.xlu1 %v11930_v43, %s8242_s17  ;;  %v12041_v43 = vrot.slane %v5808_v36, %v8394_v38  ;;  %v5212_v35 = vcombine.high %v12030_v30, %v12025_v34  ;;  %v5180_v36 = vcombine.high %v11794_v51, %v11804_v56 }
 0x603   :  { %4387 = vrot.lane.b32.xlu0 %v12009_v37, %s8239_s11  ;;  %v12061_v39 = vrot.slane %v5807_v40, %v8394_v38  ;;  %15058 = vst [vmem:[#allocation55_spill] sm:$0xff] %v12064_v60  ;;  %v7031_v51 = vcombine.low %v11988_v48, %v12007_v14 }
 0x604   :  { %v4484_v29 = vpop.permute.xlu1 %4483  ;;  %v5839_v3 = vcombine.low %v12052_v13, %v12041_v43  ;;  %v12077_v40 = vrot.slane %v5212_v35, %v8775_v49 }
 0x605   :  { %v4432_v55 = vpop.permute.xlu0 %4431 }
 0x606   :  { %4335 = vrot.lane.b32.xlu1 %v11952_v46, %s8242_s17  ;;  %v5791_v46 = vcombine.low %v11774_v44, %v11784_v61  ;;  %v12072_v61 = vrot.slane %v5196_v4, %v8394_v38  ;;  %15060 = vst [vmem:[#allocation47_spill] sm:$0xff] %v12077_v40  ;;  %v7015_v4 = vcombine.low %v11925_v27, %v11944_v17 }
 0x607   :  { %4333 = vrot.lane.b32.xlu0 %v11950_v28, %s8242_s17  ;;  %v12105_v5 = vrot.slane %v5839_v3, %v8775_v49 }
 0x608   :  { %v12047_v28 = vpop.permute.xlu1 %4603  ;;  %v12080_v32 = vrot.slane %v5791_v46, %v8394_v38  ;;  %v4939_v46 = vcombine.low %v4476_v45, %v4484_v29 }
 0x609   :  { %v4440_v42 = vpop.permute.xlu0 %4439  ;;  %15062 = vst [vmem:[#allocation115_spill] sm:$0xff] %v12105_v5 }
 0x60a   :  { %v4924_v24 = vcombine.high %v4432_v55, %v4440_v42  ;;  %4343 = vrot.lane.b32.xlu1 %v11973_v59, %s8242_s17  ;;  %v4923_v59 = vcombine.low %v4432_v55, %v4440_v42  ;;  %v4940_v42 = vcombine.high %v4476_v45, %v4484_v29  ;;  %v5824_v55 = vcombine.high %v12080_v32, %v12061_v39 }
 0x60b   :  { %4341 = vrot.lane.b32.xlu0 %v11971_v10, %s8242_s17  ;;  %v12085_v10 = vrot.slane %v5180_v36, %v8394_v38  ;;  %v12100_v36 = vrot.slane %v7031_v51, %v8394_v38  ;;  %v12111_v45 = vrot.slane %v7015_v4, %v8394_v38  ;;  %v12121_v3 = vrot.slane %v4939_v46, %v8394_v38 }
 0x60c   :  { %v12067_v44 = vrot.slane %v4924_v24, %v8394_v38  ;;  %v4612_v19 = vpop.permute.xlu1 %4611  ;;  %v12108_v21 = vrot.slane %v4923_v59, %v8394_v38  ;;  %v12124_v59 = vrot.slane %v4940_v42, %v8394_v38 }
 0x60d   :  { %v4480_v56 = vpop.permute.xlu0 %4479  ;;  %v5227_v35 = vcombine.low %v12085_v10, %v12072_v61  ;;  %15064 = vst [vmem:[#allocation116_spill] sm:$0xff] %v12111_v45  ;;  %15066 = vst [vmem:[#allocation60_spill] sm:$0xff] %v12121_v3 }
 0x60e   :  { %15059 = vst [vmem:[#allocation114_spill] sm:$0xff] %v12067_v44  ;;  %v4988_v24 = vcombine.high %v12064_v60, %v12067_v44  ;;  %7141 = vrot.lane.b32.xlu1 %v12077_v40, %s8245_s23  ;;  %15063 = vst [vmem:[#allocation120_spill] sm:$0xff] %v12108_v21  ;;  %v12114_v40 = vrot.slane %v4907_v58, %v8394_v38  ;;  %v7048_v58 = vcombine.high %v12111_v45, %v12100_v36 }
 0x60f   :  { %4331 = vrot.lane.b32.xlu0 %v11996_v50, %s8242_s17  ;;  %15067 = vst [vmem:[#allocation59_spill] sm:$0xff] %v12124_v59  ;;  %v12140_v46 = vrot.slane %v5227_v35, %v8775_v49  ;;  %v6404_v45 = vcombine.high %v12047_v28, %v4612_v19 }
 0x610   :  { %v12102_v44 = vpop.permute.xlu1 %4365  ;;  %15065 = vst [vmem:[#allocation6_spill] sm:$0xff] %v12114_v40  ;;  %v4971_v42 = vcombine.low %v12114_v40, %v12108_v21  ;;  %v5840_v40 = vcombine.high %v12052_v13, %v12041_v43 }
 0x611   :  { %v4488_v60 = vpop.permute.xlu0 %4487  ;;  %15061 = vst [vmem:[#allocation119_spill] sm:$0xff] %v12102_v44  ;;  %15070 = vst [vmem:[#allocation92_spill] sm:$0xff] %v12140_v46  ;;  %v12179_v43 = vrot.slane %v6404_v45, %v8394_v38 }
 0x612   :  { %v4955_v50 = vcombine.low %v4480_v56, %v4488_v60  ;;  %v4956_v29 = vcombine.high %v4480_v56, %v4488_v60  ;;  %7501 = vrot.lane.b32.xlu1 %v12105_v5, %s8247_s25  ;;  %v6403_v5 = vcombine.low %v12047_v28, %v4612_v19  ;;  %v12165_v28 = vrot.slane %v7048_v58, %v8775_v49 }
 0x613   :  { %4339 = vrot.lane.b32.xlu0 %v12009_v37, %s8242_s17  ;;  %v12137_v37 = vrot.slane %v5824_v55, %v8775_v49  ;;  %v12168_v19 = vrot.slane %v4988_v24, %v8775_v49 }
 0x614   :  { %v12127_v60 = vrot.slane %v4955_v50, %v8394_v38  ;;  %v12130_v51 = vrot.slane %v4956_v29, %v8394_v38  ;;  %v12134_v4 = vpop.permute.xlu1 %4373 }
 0x615   :  { %v4608_v56 = vpop.permute.xlu0 %4607  ;;  %15069 = vst [vmem:[#allocation13_spill] sm:$0xff] %v12134_v4  ;;  %15073 = vst [vmem:[#allocation98_spill] sm:$0xff] %v12168_v19 }
 0x616   :  { %15068 = vst [vmem:[#allocation10_spill] sm:$0xff] %v12130_v51  ;;  %v5003_v50 = vcombine.low %v12121_v3, %v12127_v60  ;;  %v5020_v29 = vcombine.high %v12124_v59, %v12130_v51  ;;  %7221 = vrot.lane.b32.xlu1 %v12140_v46, %s8247_s25  ;;  %v12176_v3 = vrot.slane %v6403_v5, %v8394_v38 }
 0x617   :  { %7421 = vrot.lane.b32.xlu0 %v12137_v37, %s8245_s23  ;;  %v7032_v5 = vcombine.high %v11988_v48, %v12007_v14  ;;  %v5383_v48 = vcombine.low %v12102_v44, %v12134_v4 }
 0x618   :  { %v12155_v55 = vrot.slane %v5003_v50, %v8775_v49  ;;  %v12158_v35 = vrot.slane %v5020_v29, %v8775_v49  ;;  %v12162_v51 = vpop.permute.xlu1 %4557  ;;  %v12171_v50 = vrot.slane %v4971_v42, %v8775_v49  ;;  %v5823_v29 = vcombine.low %v12080_v32, %v12061_v39 }
 0x619   :  { %v4616_v59 = vpop.permute.xlu0 %4615  ;;  %v7016_v42 = vcombine.high %v11925_v27, %v11944_v17  ;;  %v5228_v32 = vcombine.high %v12085_v10, %v12072_v61  ;;  %v7046_v17 = vrot.slane %v7032_v5, %v8394_v38  ;;  %v6879_v5 = vcombine.low %v11629_v20, %v11618_v9 }
 0x61a   :  { %15071 = vst [vmem:[#allocation11_spill] sm:$0xff] %v12155_v55  ;;  %15072 = vst [vmem:[#allocation7_spill] sm:$0xff] %v12158_v35  ;;  %v6419_v21 = vcombine.low %v4608_v56, %v4616_v59  ;;  %v6420_v46 = vcombine.high %v4608_v56, %v4616_v59  ;;  %7431 = vrot.lane.b32.xlu1 %v12165_v28, %s8245_s23  ;;  %v12200_v56 = vrot.slane %v5840_v40, %v8775_v49 }
 0x61b   :  { %15074 = vst [vmem:[#allocation22_spill] sm:$0xff] %v12171_v50  ;;  %v12219_v39 = vrot.slane %v5823_v29, %v8775_v49  ;;  %v12236_v29 = vrot.slane %v5383_v48, %v8394_v38  ;;  %v12250_v44 = vrot.slane %v5228_v32, %v8775_v49  ;;  %v5752_v48 = vcombine.high %v11863_v57, %v11866_v0 }
 0x61c   :  { %v12186_v24 = vrot.slane %v6419_v21, %v8394_v38  ;;  %v12189_v59 = vrot.slane %v6420_v46, %v8394_v38  ;;  %v4566_v58 = vpop.permute.xlu1 %4565  ;;  %v5784_v20 = vcombine.high %v11901_v23, %v11887_v18  ;;  %v12267_v32 = vrot.slane %v6879_v5, %v8394_v38 }
 0x61d   :  { %v12197_v45 = vpop.permute.xlu0 %4369  ;;  %15077 = vst [vmem:[#allocation94_spill] sm:$0xff] %v12219_v39  ;;  %v5855_v61 = vcombine.high %v12219_v39, %v14979_v33  ;;  %v6911_v9 = vcombine.low %v12162_v51, %v4566_v58 }
 0x61e   :  { %15075 = vst [vmem:[#allocation79_spill] sm:$0xff] %v12197_v45  ;;  %v6436_v21 = vcombine.high %v12176_v3, %v12186_v24  ;;  %v6451_v46 = vcombine.low %v12179_v43, %v12189_v59  ;;  %7581 = vrot.lane.b32.xlu1 %v12200_v56, %s8249_s27 }
 0x620   :  { %v12213_v14 = vrot.slane %v6451_v46, %v8775_v49  ;;  %v12216_v40 = vrot.slane %v6436_v21, %v8775_v49  ;;  %v12226_v13 = vpop.permute.xlu1 %4363  ;;  %v7030_v21 = vrot.slane %v7016_v42, %v8394_v38  ;;  %v6895_v46 = vcombine.low %v11631_v47, %v11620_v63 }
 0x621   :  { %v12224_v27 = vpop.permute.xlu0 %4377  ;;  %15079 = vst [vmem:[#allocation12_spill] sm:$0xff] %v12226_v13  ;;  %v6912_v63 = vcombine.high %v12162_v51, %v4566_v58 }
 0x622   :  { %15076 = vst [vmem:[#allocation78_spill] sm:$0xff] %v12213_v14  ;;  %15078 = vst [vmem:[#allocation90_spill] sm:$0xff] %v12224_v27  ;;  %v5399_v35 = vcombine.low %v12197_v45, %v12224_v27  ;;  %7231 = vrot.lane.b32.xlu0 %v12213_v14, %s8247_s25  ;;  %7151 = vrot.lane.b32.xlu1 %v12216_v40, %s8245_s23  ;;  %v7063_v19 = vcombine.low %v7030_v21, %v7046_v17  ;;  %v15152_v45 = vld [vmem:[#allocation71_spill] sm:$0xff] }
 0x623   :  { %v7064_v0 = vcombine.high %v7030_v21, %v7046_v17  ;;  %v12287_v17 = vrot.slane %v6911_v9, %v8394_v38  ;;  %v12294_v21 = vrot.slane %v5752_v48, %v8775_v49  ;;  %v5211_v9 = vcombine.low %v12030_v30, %v12025_v34 }
 0x624   :  { %v12239_v10 = vrot.slane %v5399_v35, %v8394_v38  ;;  %v12247_v14 = vpop.permute.xlu1 %4371  ;;  %v12275_v4 = vrot.slane %v7063_v19, %v8775_v49  ;;  %v5172_v19 = vcombine.high %v11940_v41, %v11928_v52  ;;  %v15091_v30 = vcombine.high %v11503_v1, %v11509_v12 }
 0x625   :  { %v4562_v42 = vpop.permute.xlu0 %4561  ;;  %15080 = vst [vmem:[#allocation89_spill] sm:$0xff] %v12247_v14  ;;  %v12357_v18 = vrot.slane %v5211_v9, %v8775_v49 }
 0x626   :  { %v5447_v35 = vcombine.low %v12236_v29, %v12239_v10  ;;  %7381 = vrot.lane.b32.xlu0 %v5855_v61, %s8244_s22  ;;  %7301 = vrot.lane.b32.xlu1 %v12250_v44, %s8249_s27  ;;  %v12270_v61 = vrot.slane %v6895_v46, %v8394_v38  ;;  %15083 = vst [vmem:[#allocation93_spill] sm:$0xff] %v12275_v4 }
 0x627   :  { %v5140_v46 = vcombine.high %v11904_v7, %v11907_v2  ;;  %v5734_v34 = vrot.slane %v15091_v30, %v8775_v49  ;;  %15097 = vst [vmem:[#allocation100_spill] sm:$0xff] %v12357_v18 }
 0x628   :  { %v12264_v47 = vrot.slane %v5447_v35, %v8775_v49  ;;  %v12272_v39 = vpop.permute.xlu1 %4555  ;;  %v15084_v35 = vcombine.low %v11515_v22, %v11521_v54 }
 0x629   :  { %v4570_v57 = vpop.permute.xlu0 %4569  ;;  %15082 = vst [vmem:[#allocation91_spill] sm:$0xff] %v12272_v39 }
 0x62a   :  { %15081 = vst [vmem:[#allocation86_spill] sm:$0xff] %v12264_v47  ;;  %v6927_v51 = vcombine.low %v4562_v42, %v4570_v57  ;;  %v6928_v58 = vcombine.high %v4562_v42, %v4570_v57  ;;  %7379 = vrot.lane.b32.xlu0 %v5784_v20, %s8244_s22  ;;  %v12282_v5 = vrot.slane %v15084_v35, %v8775_v49 }
 0x62b   :  { %7511 = vrot.lane.b32.xlu1 %v12275_v4, %s8247_s25  ;;  %v12297_v42 = vrot.slane %v6912_v63, %v8394_v38  ;;  %v6452_v57 = vcombine.high %v12179_v43, %v12189_v59  ;;  %v12316_v63 = vrot.slane %v7064_v0, %v8775_v49  ;;  %v12332_v43 = vrot.slane %v5140_v46, %v8775_v49 }
 0x62c   :  { %15085 = vst [vmem:[#allocation96_spill] sm:$0xff] %v12282_v5  ;;  %v12300_v20 = vrot.slane %v6927_v51, %v8394_v38  ;;  %v12303_v2 = vrot.slane %v6928_v58, %v8394_v38  ;;  %v12313_v35 = vpop.permute.xlu1 %4563  ;;  %v6943_v51 = vcombine.low %v12267_v32, %v12270_v61  ;;  %v4771_v59 = vcombine.low %v12226_v13, %v12247_v14  ;;  %v15111_v14 = vld [vmem:[#allocation69_spill] sm:$0xff] }
 0x62d   :  { %15086 = vst [vmem:[#allocation97_spill] sm:$0xff] %v12297_v42  ;;  %v12311_v48 = vpop.permute.xlu0 %4367  ;;  %15089 = vst [vmem:[#allocation14_spill] sm:$0xff] %v12313_v35  ;;  %v5785_v0 = vcombine.low %v5734_v34, %v12294_v21  ;;  %v12348_v12 = vrot.slane %v6452_v57, %v8775_v49  ;;  %v15096_v46 = vcombine.high %v11579_v31, %v11588_v16 }
 0x62e   :  { %15087 = vst [vmem:[#allocation17_spill] sm:$0xff] %v12303_v2  ;;  %15088 = vst [vmem:[#allocation16_spill] sm:$0xff] %v12311_v48  ;;  %v6975_v58 = vcombine.low %v12287_v17, %v12300_v20  ;;  %v6992_v7 = vcombine.high %v12297_v42, %v12303_v2  ;;  %7099 = vrot.lane.b32.xlu0 %v5172_v19, %s8244_s22  ;;  %v15099_v57 = vcombine.high %v11659_v62, %v11662_v26  ;;  %v15117_v62 = vld [vmem:[#allocation104_spill] sm:$0xff] }
 0x62f   :  { %15090 = vst [vmem:[#allocation28_spill] sm:$0xff] %v12316_v63  ;;  %7591 = vrot.lane.b32.xlu1 %v12316_v63, %s8249_s27  ;;  %15095 = vst [vmem:[#allocation19_spill] sm:$0xff] %v12348_v12  ;;  %v12354_v30 = vrot.slane %v15096_v46, %v8775_v49  ;;  %v12378_v9 = vrot.slane %v4771_v59, %v8394_v38  ;;  %v6283_v63 = vcombine.low %v11736_v11, %v11742_v53  ;;  %v15103_v11 = vld [vmem:[#allocation34_spill] sm:$0xff] }
 0x630   :  { %v12338_v52 = vrot.slane %v6975_v58, %v8775_v49  ;;  %v12341_v19 = vrot.slane %v6992_v7, %v8775_v49  ;;  %v12345_v1 = vpop.permute.xlu1 %4317  ;;  %v12360_v58 = vrot.slane %v6943_v51, %v8775_v49  ;;  %v12369_v23 = vrot.slane %v15099_v57, %v8775_v49  ;;  %v15104_v53 = vld [vmem:[#allocation54_spill] sm:$0xff] }
 0x631   :  { %v12343_v41 = vpop.permute.xlu0 %4375  ;;  %v5173_v31 = vcombine.low %v12354_v30, %v12332_v43  ;;  %v6267_v57 = vcombine.low %v11720_v8, %v11726_v25  ;;  %v5243_v59 = vcombine.high %v12357_v18, %v14979_v33  ;;  %v6299_v46 = vcombine.low %v12272_v39, %v12313_v35  ;;  %v15114_v39 = vld [vmem:[#allocation70_spill] sm:$0xff] }
 0x632   :  { %15092 = vst [vmem:[#allocation51_spill] sm:$0xff] %v12338_v52  ;;  %15093 = vst [vmem:[#allocation30_spill] sm:$0xff] %v12341_v19  ;;  %v4787_v7 = vcombine.low %v12311_v48, %v12343_v41  ;;  %7419 = vrot.lane.b32.xlu0 %v5785_v0, %s8245_s23  ;;  %v5648_v8 = vcombine.high %v12012_v6, %v12003_v15  ;;  %v15105_v0 = vcombine.low %v15103_v11, %v15104_v53  ;;  %v15110_v6 = vld [vmem:[#allocation39_spill] sm:$0xff]  ;;  %v15113_v48 = vld [vmem:[#allocation106_spill] sm:$0xff] }
 0x633   :  { %15094 = vst [vmem:[#allocation67_spill] sm:$0xff] %v12343_v41  ;;  %15098 = vst [vmem:[#allocation103_spill] sm:$0xff] %v12360_v58  ;;  %7311 = vrot.lane.b32.xlu1 %v12348_v12, %s8249_s27 }
 0x634   :  { %15100 = vst [vmem:[#allocation49_spill] sm:$0xff] %v12369_v23  ;;  %v12381_v51 = vrot.slane %v4787_v7, %v8394_v38  ;;  %v4326_v16 = vpop.permute.xlu1 %4325  ;;  %v12410_v19 = vrot.slane %v15105_v0, %v8775_v49  ;;  %v12413_v23 = vrot.slane %v6267_v57, %v8394_v38  ;;  %v5704_v0 = vcombine.high %v15111_v14, %v15110_v6 }
 0x635   :  { %v12391_v12 = vpop.permute.xlu0 %4559  ;;  %v5786_v14 = vcombine.high %v5734_v34, %v12294_v21  ;;  %v5279_v35 = vcombine.low %v12345_v1, %v4326_v16 }
 0x636   :  { %15101 = vst [vmem:[#allocation109_spill] sm:$0xff] %v12391_v12  ;;  %v4835_v7 = vcombine.low %v12378_v9, %v12381_v51  ;;  %7139 = vrot.lane.b32.xlu0 %v5173_v31, %s8245_s23  ;;  %15106 = vst [vmem:[#allocation42_spill] sm:$0xff] %v12410_v19  ;;  %v12416_v31 = vrot.slane %v6283_v63, %v8394_v38  ;;  %v15112_v63 = vld [vmem:[#allocation24_spill] sm:$0xff] }
 0x637   :  { %7101 = vrot.lane.b32.xlu1 %v5243_v59, %s8244_s22  ;;  %v15107_v59 = vld [vmem:[#allocation116_spill] sm:$0xff]  ;;  %v5247_v41 = vcombine.low %v15113_v48, %v15112_v63 }
 0x638   :  { %v12404_v25 = vrot.slane %v4835_v7, %v8775_v49  ;;  %v7047_v18 = vcombine.low %v15107_v59, %v12100_v36  ;;  %v12422_v15 = vpop.permute.xlu1 %4445  ;;  %v5856_v7 = vcombine.high %v12137_v37, %v14979_v33  ;;  %v15115_v36 = vld [vmem:[#allocation108_spill] sm:$0xff]  ;;  %v12439_v37 = vrot.slane %v6299_v46, %v8394_v38 }
 0x639   :  { %v12420_v13 = vpop.permute.xlu0 %4567  ;;  %15109 = vst [vmem:[#allocation26_spill] sm:$0xff] %v12422_v15  ;;  %v5688_v59 = vcombine.high %v15115_v36, %v15114_v39  ;;  %v15119_v39 = vld [vmem:[#allocation47_spill] sm:$0xff]  ;;  %v6331_v46 = vcombine.low %v12413_v23, %v12416_v31 }
 0x63a   :  { %15102 = vst [vmem:[#allocation46_spill] sm:$0xff] %v12404_v25  ;;  %15108 = vst [vmem:[#allocation25_spill] sm:$0xff] %v12420_v13  ;;  %v6315_v57 = vcombine.low %v12391_v12, %v12420_v13  ;;  %7377 = vrot.lane.b32.xlu0 %v5648_v8, %s8244_s22  ;;  %v15116_v8 = vld [vmem:[#allocation27_spill] sm:$0xff]  ;;  %v12452_v36 = vrot.slane %v7047_v18, %v8775_v49  ;;  %v15123_v18 = vld [vmem:[#allocation88_spill] sm:$0xff]  ;;  %v5036_v12 = vcombine.high %v12171_v50, %v12155_v55 }
 0x63b   :  { %7461 = vrot.lane.b32.xlu1 %v5856_v7, %s8246_s24  ;;  %v5263_v26 = vcombine.low %v15117_v62, %v15116_v8  ;;  %v5244_v7 = vcombine.high %v15119_v39, %v14979_v33  ;;  %v12463_v62 = vrot.slane %v5247_v41, %v8394_v38  ;;  %v12466_v34 = vrot.slane %v5688_v59, %v8394_v38  ;;  %v15122_v8 = vld [vmem:[#allocation43_spill] sm:$0xff] }
 0x63c   :  { %v12442_v6 = vrot.slane %v6315_v57, %v8394_v38  ;;  %v12447_v63 = vpop.permute.xlu1 %4453  ;;  %15120 = vst [vmem:[#allocation110_spill] sm:$0xff] %v12452_v36  ;;  %v12457_v57 = vrot.slane %v5704_v0, %v8394_v38  ;;  %v5616_v39 = vcombine.high %v15123_v18, %v15122_v8  ;;  %v5280_v0 = vcombine.high %v12345_v1, %v4326_v16  ;;  %v15129_v18 = vld [vmem:[#allocation85_spill] sm:$0xff] }
 0x63d   :  { %v4322_v48 = vpop.permute.xlu0 %4321  ;;  %15118 = vst [vmem:[#allocation32_spill] sm:$0xff] %v12447_v63  ;;  %15121 = vst [vmem:[#allocation61_spill] sm:$0xff] %v12463_v62  ;;  %v12479_v41 = vrot.slane %v5263_v26, %v8394_v38  ;;  %v6435_v59 = vcombine.low %v12176_v3, %v12186_v24  ;;  %v12488_v1 = vrot.slane %v6331_v46, %v8775_v49  ;;  %v15130_v3 = vld [vmem:[#allocation77_spill] sm:$0xff]  ;;  %v15131_v24 = vld [vmem:[#allocation112_spill] sm:$0xff] }
 0x63e   :  { %v6363_v21 = vcombine.low %v12439_v37, %v12442_v6  ;;  %7459 = vrot.lane.b32.xlu0 %v5786_v14, %s8246_s24  ;;  %v5767_v16 = vcombine.low %v12466_v34, %v12457_v57  ;;  %v5092_v42 = vcombine.high %v15131_v24, %v15130_v3  ;;  %v12501_v46 = vrot.slane %v5616_v39, %v8775_v49  ;;  %v15141_v3 = vld [vmem:[#allocation68_spill] sm:$0xff] }
 0x63f   :  { %7181 = vrot.lane.b32.xlu1 %v5244_v7, %s8246_s24  ;;  %15125 = vst [vmem:[#allocation121_spill] sm:$0xff] %v12479_v41  ;;  %v7079_v7 = vcombine.high %v12452_v36, %v14979_v33  ;;  %15127 = vst [vmem:[#allocation81_spill] sm:$0xff] %v12488_v1  ;;  %v5174_v36 = vcombine.high %v12354_v30, %v12332_v43  ;;  %v15138_v30 = vld [vmem:[#allocation115_spill] sm:$0xff] }
 0x640   :  { %v12476_v14 = vrot.slane %v6363_v21, %v8775_v49  ;;  %v12483_v8 = vpop.permute.xlu1 %4493  ;;  %v15128_v21 = vld [vmem:[#allocation118_spill] sm:$0xff]  ;;  %v5857_v39 = vcombine.high %v15138_v30, %v14979_v33  ;;  %v12543_v30 = vrot.slane %v5767_v16, %v8775_v49 }
 0x641   :  { %v4330_v13 = vpop.permute.xlu0 %4329  ;;  %15126 = vst [vmem:[#allocation82_spill] sm:$0xff] %v12483_v8  ;;  %v5584_v55 = vcombine.high %v15129_v18, %v15128_v21  ;;  %v12506_v21 = vrot.slane %v5279_v35, %v8394_v38  ;;  %v12524_v18 = vrot.slane %v6435_v59, %v8775_v49  ;;  %v5311_v35 = vcombine.low %v12463_v62, %v12479_v41 }
 0x642   :  { %15124 = vst [vmem:[#allocation57_spill] sm:$0xff] %v12476_v14  ;;  %v5295_v26 = vcombine.low %v4322_v48, %v4330_v13  ;;  %v5296_v50 = vcombine.high %v4322_v48, %v4330_v13  ;;  %7097 = vrot.lane.b32.xlu0 %v5036_v12, %s8244_s22  ;;  %v12509_v13 = vrot.slane %v5280_v0, %v8394_v38  ;;  %v15140_v0 = vld [vmem:[#allocation41_spill] sm:$0xff] }
 0x643   :  { %7391 = vrot.lane.b32.xlu1 %v7079_v7, %s8244_s22  ;;  %15132 = vst [vmem:[#allocation87_spill] sm:$0xff] %v12506_v21  ;;  %15139 = vst [vmem:[#allocation24_spill] sm:$0xff] %v12524_v18  ;;  %v12536_v2 = vrot.slane %v5584_v55, %v8775_v49  ;;  %v12539_v59 = vrot.slane %v5092_v42, %v8394_v38  ;;  %v6467_v16 = vcombine.high %v12524_v18, %v14979_v33  ;;  %v15153_v18 = vld [vmem:[#allocation102_spill] sm:$0xff] }
 0x644   :  { %15133 = vst [vmem:[#allocation34_spill] sm:$0xff] %v12509_v13  ;;  %v12512_v12 = vrot.slane %v5295_v26, %v8394_v38  ;;  %v12515_v48 = vrot.slane %v5296_v50, %v8394_v38  ;;  %v12519_v43 = vpop.permute.xlu1 %4501  ;;  %v5076_v26 = vcombine.high %v15141_v3, %v15140_v0  ;;  %v15142_v0 = vld [vmem:[#allocation60_spill] sm:$0xff]  ;;  %v12568_v41 = vrot.slane %v5311_v35, %v8775_v49 }
 0x645   :  { %v12517_v7 = vpop.permute.xlu0 %4449  ;;  %15137 = vst [vmem:[#allocation69_spill] sm:$0xff] %v12519_v43  ;;  %v5004_v3 = vcombine.high %v15142_v0, %v12127_v60  ;;  %v5649_v62 = vcombine.low %v12536_v2, %v12501_v46  ;;  %v15154_v27 = vcombine.high %v15152_v45, %v15153_v18  ;;  %v15158_v45 = vld [vmem:[#allocation92_spill] sm:$0xff] }
 0x646   :  { %15134 = vst [vmem:[#allocation54_spill] sm:$0xff] %v12512_v12  ;;  %15135 = vst [vmem:[#allocation116_spill] sm:$0xff] %v12515_v48  ;;  %v5343_v50 = vcombine.low %v12506_v21, %v12512_v12  ;;  %v5360_v24 = vcombine.high %v12509_v13, %v12515_v48  ;;  %7179 = vrot.lane.b32.xlu0 %v5174_v36, %s8246_s24  ;;  %v15147_v48 = vld [vmem:[#allocation63_spill] sm:$0xff]  ;;  %v15151_v21 = vld [vmem:[#allocation6_spill] sm:$0xff]  ;;  %v5245_v18 = vcombine.high %v15158_v45, %v14979_v33 }
 0x647   :  { %15136 = vst [vmem:[#allocation39_spill] sm:$0xff] %v12517_v7  ;;  %7541 = vrot.lane.b32.xlu1 %v5857_v39, %s8248_s26  ;;  %v15146_v39 = vld [vmem:[#allocation65_spill] sm:$0xff]  ;;  %15149 = vst [vmem:[#allocation27_spill] sm:$0xff] %v12568_v41  ;;  %v12580_v4 = vrot.slane %v15154_v27, %v8775_v49  ;;  %v6743_v27 = vcombine.low %v12422_v15, %v12447_v63 }
 0x648   :  { %v12550_v13 = vrot.slane %v5343_v50, %v8775_v49  ;;  %v12553_v55 = vrot.slane %v5360_v24, %v8775_v49  ;;  %v12557_v42 = vpop.permute.xlu1 %4319  ;;  %v15148_v60 = vcombine.low %v15146_v39, %v15147_v48  ;;  %v12571_v50 = vrot.slane %v5076_v26, %v8394_v38  ;;  %v15150_v24 = vld [vmem:[#allocation120_spill] sm:$0xff]  ;;  %v15162_v63 = vld [vmem:[#allocation29_spill] sm:$0xff] }
 0x649   :  { %v12555_v36 = vpop.permute.xlu0 %4457  ;;  %15145 = vst [vmem:[#allocation108_spill] sm:$0xff] %v12557_v42  ;;  %v4972_v12 = vcombine.high %v15151_v21, %v15150_v24  ;;  %15155 = vst [vmem:[#allocation104_spill] sm:$0xff] %v12580_v4  ;;  %v12590_v21 = vrot.slane %v5004_v3, %v8775_v49 }
 0x64a   :  { %15143 = vst [vmem:[#allocation106_spill] sm:$0xff] %v12553_v55  ;;  %15144 = vst [vmem:[#allocation70_spill] sm:$0xff] %v12555_v36  ;;  %v12565_v0 = vrot.slane %v15148_v60, %v8775_v49  ;;  %7417 = vrot.lane.b32.xlu0 %v5649_v62, %s8245_s23  ;;  %v5155_v60 = vcombine.low %v12571_v50, %v12539_v59  ;;  %v6759_v26 = vcombine.low %v12517_v7, %v12555_v36  ;;  %v15163_v7 = vld [vmem:[#allocation53_spill] sm:$0xff] }
 0x64b   :  { %7111 = vrot.lane.b32.xlu1 %v6467_v16, %s8244_s22  ;;  %v12606_v3 = vrot.slane %v4972_v12, %v8775_v49  ;;  %v6775_v62 = vcombine.low %v12483_v8, %v12519_v43  ;;  %v7008_v12 = vcombine.high %v12360_v58, %v12338_v52  ;;  %v12636_v8 = vld [vmem:[#allocation2] sm:$0xff]  ;;  %v15166_v43 = vld [vmem:[#allocation99_spill] sm:$0xff]  ;;  %v15167_v52 = vld [vmem:[#allocation33_spill] sm:$0xff] }
 0x64c   :  { %v5787_v35 = vcombine.low %v12565_v0, %v12543_v30  ;;  %v12598_v16 = vpop.permute.xlu1 %4327  ;;  %v12616_v45 = vrot.slane %v5155_v60, %v8775_v49  ;;  %v15164_v60 = vcombine.low %v15162_v63, %v15163_v7  ;;  %15165 = vst [vmem:[#allocation77_spill] sm:$0xff] %v12636_v8  ;;  %v4635_v41 = vcombine.low %v12636_v8, %v15166_v43  ;;  %v15168_v58 = vld [vmem:[#allocation52_spill] sm:$0xff] }
 0x64d   :  { %v12596_v24 = vpop.permute.xlu0 %4497  ;;  %15157 = vst [vmem:[#allocation43_spill] sm:$0xff] %v12598_v16  ;;  %v5037_v55 = vcombine.low %v12606_v3, %v12590_v21  ;;  %v4683_v43 = vcombine.low %v12557_v42, %v12598_v16  ;;  %v15172_v42 = vld [vmem:[#allocation21_spill] sm:$0xff] }
 0x64e   :  { %15156 = vst [vmem:[#allocation47_spill] sm:$0xff] %v12596_v24  ;;  %7499 = vrot.lane.b32.xlu0 %v5787_v35, %s8247_s25  ;;  %v12634_v36 = vrot.slane %v15164_v60, %v8775_v49 }
 0x64f   :  { %7261 = vrot.lane.b32.xlu1 %v5245_v18, %s8248_s26  ;;  %v12625_v18 = vrot.slane %v6759_v26, %v8394_v38  ;;  %v4651_v26 = vcombine.low %v15168_v58, %v15167_v52  ;;  %v7080_v58 = vcombine.high %v12165_v28, %v14979_v33  ;;  %v5512_v28 = vcombine.high %v12264_v47, %v12282_v5 }
 0x650   :  { %v12620_v35 = vpop.permute.xlu1 %4447  ;;  %v5175_v60 = vcombine.low %v12634_v36, %v12616_v45 }
 0x651   :  { %v12618_v4 = vpop.permute.xlu0 %4505  ;;  %15160 = vst [vmem:[#allocation118_spill] sm:$0xff] %v12620_v35  ;;  %15161 = vst [vmem:[#allocation85_spill] sm:$0xff] %v12625_v18 }
 0x652   :  { %15159 = vst [vmem:[#allocation88_spill] sm:$0xff] %v12618_v4  ;;  %v6791_v15 = vcombine.low %v12596_v24, %v12618_v4  ;;  %7137 = vrot.lane.b32.xlu0 %v5037_v55, %s8245_s23  ;;  %v12644_v24 = vrot.slane %v6743_v27, %v8394_v38  ;;  %v12647_v55 = vrot.slane %v6775_v62, %v8394_v38 }
 0x653   :  { %7389 = vrot.lane.b32.xlu1 %v7008_v12, %s8244_s22  ;;  %v12668_v27 = vrot.slane %v4635_v41, %v8394_v38  ;;  %v12671_v12 = vrot.slane %v4651_v26, %v8394_v38 }
 0x654   :  { %15169 = vst [vmem:[#allocation112_spill] sm:$0xff] %v12644_v24  ;;  %v12650_v4 = vrot.slane %v6791_v15, %v8394_v38  ;;  %v12658_v52 = vpop.permute.xlu1 %4455  ;;  %v6807_v62 = vcombine.low %v12644_v24, %v12625_v18  ;;  %v12682_v18 = vrot.slane %v4683_v43, %v8394_v38  ;;  %v5650_v43 = vcombine.high %v12536_v2, %v12501_v46 }
 0x655   :  { %v12656_v8 = vpop.permute.xlu0 %4323  ;;  %15171 = vst [vmem:[#allocation41_spill] sm:$0xff] %v12658_v52  ;;  %v5788_v2 = vcombine.high %v12565_v0, %v12543_v30  ;;  %v6976_v46 = vcombine.high %v12287_v17, %v12300_v20  ;;  %v6944_v17 = vcombine.high %v12267_v32, %v12270_v61  ;;  %v4836_v0 = vcombine.high %v12378_v9, %v12381_v51  ;;  %v15187_v61 = vld [vmem:[#allocation62_spill] sm:$0xff] }
 0x656   :  { %15170 = vst [vmem:[#allocation115_spill] sm:$0xff] %v12656_v8  ;;  %v6839_v15 = vcombine.low %v12647_v55, %v12650_v4  ;;  %7219 = vrot.lane.b32.xlu0 %v5175_v60, %s8247_s25  ;;  %v4667_v16 = vcombine.low %v15172_v42, %v12656_v8  ;;  %v5858_v42 = vcombine.high %v12200_v56, %v14979_v33 }
 0x657   :  { %7471 = vrot.lane.b32.xlu1 %v7080_v58, %s8246_s24  ;;  %v12695_v58 = vrot.slane %v6807_v62, %v8775_v49  ;;  %v6396_v62 = vcombine.high %v12488_v1, %v12476_v14  ;;  %v12755_v32 = vrot.slane %v6976_v46, %v8775_v49  ;;  %v15191_v51 = vcombine.high %v15103_v11, %v15104_v53  ;;  %v15193_v46 = vld [vmem:[#allocation50_spill] sm:$0xff] }
 0x658   :  { %v12679_v24 = vrot.slane %v6839_v15, %v8775_v49  ;;  %v12685_v41 = vrot.slane %v4667_v16, %v8394_v38  ;;  %v12689_v26 = vpop.permute.xlu1 %4495  ;;  %v4699_v16 = vcombine.low %v12668_v27, %v12671_v12 }
 0x659   :  { %v12687_v60 = vpop.permute.xlu0 %4443  ;;  %15175 = vst [vmem:[#allocation65_spill] sm:$0xff] %v12689_v26  ;;  %15176 = vst [vmem:[#allocation63_spill] sm:$0xff] %v12695_v58 }
 0x65a   :  { %15173 = vst [vmem:[#allocation68_spill] sm:$0xff] %v12679_v24  ;;  %15174 = vst [vmem:[#allocation60_spill] sm:$0xff] %v12687_v60  ;;  %7375 = vrot.lane.b32.xlu0 %v5512_v28, %s8244_s22  ;;  %v4731_v15 = vcombine.low %v12685_v41, %v12682_v18 }
 0x65b   :  { %7621 = vrot.lane.b32.xlu1 %v5858_v42, %s8250_s28  ;;  %v12718_v42 = vrot.slane %v4699_v16, %v8775_v49  ;;  %v15183_v16 = vld [vmem:[#allocation117_spill] sm:$0xff] }
 0x65c   :  { %v12708_v28 = vpop.permute.xlu1 %4503  ;;  %v12713_v47 = vrot.slane %v4731_v15, %v8775_v49  ;;  %v6468_v15 = vcombine.high %v12216_v40, %v14979_v33  ;;  %v4900_v40 = vcombine.high %v12404_v25, %v12410_v19  ;;  %v15189_v19 = vld [vmem:[#allocation37_spill] sm:$0xff]  ;;  %v15190_v25 = vld [vmem:[#allocation48_spill] sm:$0xff] }
 0x65d   :  { %v12706_v56 = vpop.permute.xlu0 %4451  ;;  %15178 = vst [vmem:[#allocation6_spill] sm:$0xff] %v12708_v28  ;;  %15180 = vst [vmem:[#allocation29_spill] sm:$0xff] %v12718_v42  ;;  %v6179_v20 = vcombine.low %v12689_v26, %v12708_v28  ;;  %v5536_v26 = vcombine.high %v15190_v25, %v15189_v19  ;;  %v12780_v19 = vrot.slane %v6944_v17, %v8775_v49 }
 0x65e   :  { %15177 = vst [vmem:[#allocation120_spill] sm:$0xff] %v12706_v56  ;;  %15179 = vst [vmem:[#allocation92_spill] sm:$0xff] %v12713_v47  ;;  %7457 = vrot.lane.b32.xlu0 %v5650_v43, %s8246_s24  ;;  %v6131_v30 = vcombine.low %v12687_v60, %v12706_v56  ;;  %v15188_v43 = vld [vmem:[#allocation66_spill] sm:$0xff]  ;;  %v5448_v25 = vcombine.high %v12236_v29, %v12239_v10  ;;  %v12804_v10 = vrot.slane %v4836_v0, %v8775_v49  ;;  %v15203_v56 = vld [vmem:[#allocation55_spill] sm:$0xff] }
 0x65f   :  { %7109 = vrot.lane.b32.xlu1 %v6396_v62, %s8244_s22  ;;  %v15184_v62 = vld [vmem:[#allocation84_spill] sm:$0xff]  ;;  %v5552_v1 = vcombine.high %v15188_v43, %v15187_v61  ;;  %v12785_v11 = vrot.slane %v6179_v20, %v8394_v38  ;;  %v7009_v29 = vcombine.low %v12780_v19, %v12755_v32  ;;  %v15202_v60 = vld [vmem:[#allocation114_spill] sm:$0xff] }
 0x660   :  { %v12726_v8 = vpop.permute.xlu1 %4385  ;;  %v5568_v14 = vcombine.high %v15184_v62, %v15183_v16  ;;  %v12776_v43 = vrot.slane %v6131_v30, %v8394_v38  ;;  %v15195_v30 = vld [vmem:[#allocation59_spill] sm:$0xff]  ;;  %v15198_v20 = vld [vmem:[#allocation20_spill] sm:$0xff] }
 0x661   :  { %v12724_v5 = vpop.permute.xlu0 %4491  ;;  %15182 = vst [vmem:[#allocation99_spill] sm:$0xff] %v12726_v8 }
 0x662   :  { %15181 = vst [vmem:[#allocation53_spill] sm:$0xff] %v12724_v5  ;;  %7539 = vrot.lane.b32.xlu0 %v5788_v2, %s8248_s26  ;;  %v6147_v2 = vcombine.low %v12620_v35, %v12658_v52  ;;  %v12768_v35 = vrot.slane %v15191_v51, %v8775_v49  ;;  %v12773_v28 = vrot.slane %v5568_v14, %v8394_v38 }
 0x663   :  { %7191 = vrot.lane.b32.xlu1 %v6468_v15, %s8246_s24  ;;  %v5246_v15 = vcombine.high %v12250_v44, %v14979_v33  ;;  %v15192_v44 = vld [vmem:[#allocation74_spill] sm:$0xff]  ;;  %v5038_v14 = vcombine.high %v12606_v3, %v12590_v21  ;;  %v12809_v21 = vrot.slane %v5552_v1, %v8394_v38  ;;  %v12812_v3 = vrot.slane %v5536_v26, %v8394_v38 }
 0x664   :  { %v12750_v62 = vpop.permute.xlu1 %4393  ;;  %v5520_v52 = vcombine.high %v15193_v46, %v15192_v44  ;;  %v15200_v46 = vld [vmem:[#allocation40_spill] sm:$0xff] }
 0x665   :  { %v12748_v16 = vpop.permute.xlu0 %4499  ;;  %15186 = vst [vmem:[#allocation52_spill] sm:$0xff] %v12750_v62  ;;  %v5631_v26 = vcombine.low %v12809_v21, %v12773_v28 }
 0x666   :  { %15185 = vst [vmem:[#allocation33_spill] sm:$0xff] %v12748_v16  ;;  %v6163_v9 = vcombine.low %v12724_v5, %v12748_v16  ;;  %7095 = vrot.lane.b32.xlu0 %v4900_v40, %s8244_s22  ;;  %v15194_v40 = vld [vmem:[#allocation10_spill] sm:$0xff]  ;;  %v12820_v0 = vrot.slane %v5520_v52, %v8394_v38  ;;  %v12834_v52 = vrot.slane %v5448_v25, %v8775_v49 }
 0x667   :  { %7341 = vrot.lane.b32.xlu1 %v5246_v15, %s8250_s28  ;;  %v5019_v61 = vcombine.low %v15195_v30, %v15194_v40  ;;  %v12795_v15 = vrot.slane %v6147_v2, %v8394_v38  ;;  %v15201_v40 = vld [vmem:[#allocation23_spill] sm:$0xff]  ;;  %v15218_v5 = vld [vmem:[#allocation18_spill] sm:$0xff] }
 0x668   :  { %v12788_v53 = vrot.slane %v6163_v9, %v8394_v38  ;;  %v12799_v51 = vpop.permute.xlu1 %4383  ;;  %v15199_v9 = vld [vmem:[#allocation75_spill] sm:$0xff]  ;;  %v6655_v30 = vcombine.low %v15201_v40, %v15200_v46 }
 0x669   :  { %v12797_v17 = vpop.permute.xlu0 %4381  ;;  %15197 = vst [vmem:[#allocation84_spill] sm:$0xff] %v12799_v51  ;;  %v6639_v44 = vcombine.low %v15199_v9, %v15198_v20  ;;  %v4987_v20 = vcombine.low %v15203_v56, %v15202_v60  ;;  %v6195_v1 = vcombine.low %v12776_v43, %v12795_v15  ;;  %v5176_v9 = vcombine.high %v12634_v36, %v12616_v45 }
 0x66a   :  { %15196 = vst [vmem:[#allocation117_spill] sm:$0xff] %v12797_v17  ;;  %v6227_v2 = vcombine.low %v12788_v53, %v12785_v11  ;;  %7177 = vrot.lane.b32.xlu0 %v5038_v14, %s8246_s24  ;;  %v6623_v14 = vcombine.low %v12726_v8, %v12750_v62  ;;  %v5156_v60 = vcombine.high %v12571_v50, %v12539_v59 }
 0x66b   :  { %7429 = vrot.lane.b32.xlu1 %v7009_v29, %s8245_s23  ;;  %v4901_v29 = vcombine.low %v12804_v10, %v12768_v35  ;;  %v12845_v40 = vrot.slane %v5019_v61, %v8775_v49  ;;  %v12851_v36 = vrot.slane %v6639_v44, %v8394_v38  ;;  %v5599_v45 = vcombine.low %v12820_v0, %v12812_v3 }
 0x66c   :  { %v12840_v46 = vpop.permute.xlu1 %4391  ;;  %v12848_v8 = vrot.slane %v6227_v2, %v8775_v49  ;;  %v15208_v50 = vcombine.high %v11515_v22, %v11521_v54  ;;  %v12865_v61 = vrot.slane %v6655_v30, %v8394_v38  ;;  %v5768_v44 = vcombine.high %v12466_v34, %v12457_v57 }
 0x66d   :  { %v12838_v56 = vpop.permute.xlu0 %4389  ;;  %15205 = vst [vmem:[#allocation66_spill] sm:$0xff] %v12840_v46  ;;  %15207 = vst [vmem:[#allocation48_spill] sm:$0xff] %v12851_v36  ;;  %v12871_v2 = vrot.slane %v4987_v20, %v8775_v49  ;;  %v12874_v62 = vrot.slane %v6195_v1, %v8775_v49  ;;  %v12885_v30 = vrot.slane %v5631_v26, %v8775_v49 }
 0x66e   :  { %15204 = vst [vmem:[#allocation62_spill] sm:$0xff] %v12838_v56  ;;  %15206 = vst [vmem:[#allocation37_spill] sm:$0xff] %v12848_v8  ;;  %v6607_v59 = vcombine.low %v12797_v17, %v12838_v56  ;;  %7259 = vrot.lane.b32.xlu0 %v5176_v9, %s8248_s26  ;;  %v12862_v25 = vrot.slane %v15208_v50, %v8775_v49  ;;  %v12877_v9 = vrot.slane %v6623_v14, %v8394_v38  ;;  %v15216_v50 = vld [vmem:[#allocation45_spill] sm:$0xff]  ;;  %v15217_v56 = vld [vmem:[#allocation64_spill] sm:$0xff] }
 0x66f   :  { %15209 = vst [vmem:[#allocation74_spill] sm:$0xff] %v12865_v61  ;;  %7135 = vrot.lane.b32.xlu1 %v4901_v29, %s8245_s23  ;;  %15210 = vst [vmem:[#allocation50_spill] sm:$0xff] %v12874_v62  ;;  %v5039_v20 = vcombine.low %v12871_v2, %v12845_v40  ;;  %v12894_v1 = vrot.slane %v5156_v60, %v8775_v49  ;;  %v12902_v26 = vrot.slane %v5599_v45, %v8775_v49 }
 0x670   :  { %15211 = vst [vmem:[#allocation10_spill] sm:$0xff] %v12877_v9  ;;  %v12880_v22 = vrot.slane %v6607_v59, %v8394_v38  ;;  %v5513_v54 = vcombine.low %v12834_v52, %v12862_v25  ;;  %v12889_v34 = vpop.permute.xlu1 %4337  ;;  %v15215_v59 = vld [vmem:[#allocation111_spill] sm:$0xff]  ;;  %v6027_v16 = vcombine.low %v15218_v5, %v15217_v56  ;;  %v15219_v60 = vcombine.high %v15162_v63, %v15163_v7 }
 0x671   :  { %v12887_v57 = vpop.permute.xlu0 %4379  ;;  %15214 = vst [vmem:[#allocation75_spill] sm:$0xff] %v12889_v34  ;;  %v6043_v17 = vcombine.low %v15216_v50, %v15215_v59  ;;  %v6364_v45 = vcombine.high %v12439_v37, %v12442_v6  ;;  %v6011_v59 = vcombine.low %v12799_v51, %v12840_v46  ;;  %v5651_v5 = vcombine.low %v12902_v26, %v12885_v30 }
 0x672   :  { %15212 = vst [vmem:[#allocation59_spill] sm:$0xff] %v12880_v22  ;;  %15213 = vst [vmem:[#allocation20_spill] sm:$0xff] %v12887_v57  ;;  %v6671_v29 = vcombine.low %v12880_v22, %v12877_v9  ;;  %7415 = vrot.lane.b32.xlu0 %v5513_v54, %s8245_s23  ;;  %v12913_v14 = vrot.slane %v15219_v60, %v8775_v49  ;;  %v6703_v54 = vcombine.low %v12851_v36, %v12865_v61 }
 0x673   :  { %7217 = vrot.lane.b32.xlu1 %v5039_v20, %s8247_s25  ;;  %v12924_v56 = vrot.slane %v5768_v44, %v8775_v49  ;;  %v15223_v6 = vcombine.high %v15146_v39, %v15147_v48  ;;  %v6332_v60 = vcombine.high %v12413_v23, %v12416_v31  ;;  %v12947_v51 = vrot.slane %v6043_v17, %v8394_v38 }
 0x674   :  { %v12928_v63 = vpop.permute.xlu1 %4345  ;;  %v5177_v7 = vcombine.low %v12913_v14, %v12894_v1  ;;  %v12933_v50 = vrot.slane %v6671_v29, %v8775_v49  ;;  %v12950_v29 = vrot.slane %v6027_v16, %v8394_v38  ;;  %v12954_v46 = vrot.slane %v6703_v54, %v8775_v49 }
 0x675   :  { %v12926_v20 = vpop.permute.xlu0 %4387  ;;  %15221 = vst [vmem:[#allocation23_spill] sm:$0xff] %v12928_v63  ;;  %v12942_v44 = vrot.slane %v15223_v6, %v8775_v49  ;;  %v12965_v31 = vrot.slane %v6364_v45, %v8775_v49  ;;  %v6872_v17 = vcombine.high %v12695_v58, %v12679_v24  ;;  %v15229_v6 = vld [vmem:[#allocation80_spill] sm:$0xff]  ;;  %v12983_v22 = vrot.slane %v6332_v60, %v8775_v49 }
 0x676   :  { %15220 = vst [vmem:[#allocation40_spill] sm:$0xff] %v12926_v20  ;;  %15222 = vst [vmem:[#allocation114_spill] sm:$0xff] %v12933_v50  ;;  %v5995_v37 = vcombine.low %v12887_v57, %v12926_v20  ;;  %7497 = vrot.lane.b32.xlu0 %v5651_v5, %s8247_s25  ;;  %v12957_v5 = vrot.slane %v6011_v59, %v8394_v38  ;;  %v15227_v59 = vld [vmem:[#allocation31_spill] sm:$0xff]  ;;  %v6091_v24 = vcombine.low %v12950_v29, %v12947_v51  ;;  %v15239_v58 = vld [vmem:[#allocation36_spill] sm:$0xff] }
 0x677   :  { %7299 = vrot.lane.b32.xlu1 %v5177_v7, %s8249_s27  ;;  %15224 = vst [vmem:[#allocation55_spill] sm:$0xff] %v12954_v46  ;;  %v5789_v23 = vcombine.low %v12942_v44, %v12924_v56  ;;  %v15228_v7 = vld [vmem:[#allocation58_spill] sm:$0xff]  ;;  %v15230_v57 = vld [vmem:[#allocation35_spill] sm:$0xff]  ;;  %v6519_v54 = vcombine.low %v12889_v34, %v12928_v63 }
 0x678   :  { %v12960_v48 = vrot.slane %v5995_v37, %v8394_v38  ;;  %v12969_v16 = vpop.permute.xlu1 %4335  ;;  %v6487_v37 = vcombine.low %v15228_v7, %v15227_v59  ;;  %v6471_v20 = vcombine.low %v15230_v57, %v15229_v6  ;;  %v6397_v59 = vcombine.low %v12983_v22, %v12965_v31 }
 0x679   :  { %v12967_v39 = vpop.permute.xlu0 %4333  ;;  %15226 = vst [vmem:[#allocation45_spill] sm:$0xff] %v12969_v16  ;;  %v13012_v63 = vrot.slane %v6091_v24, %v8775_v49  ;;  %v15243_v24 = vld [vmem:[#allocation93_spill] sm:$0xff] }
 0x67a   :  { %15225 = vst [vmem:[#allocation111_spill] sm:$0xff] %v12967_v39  ;;  %v6059_v45 = vcombine.low %v12960_v48, %v12957_v5  ;;  %7579 = vrot.lane.b32.xlu0 %v5789_v23, %s8249_s27  ;;  %v7010_v23 = vcombine.high %v12780_v19, %v12755_v32  ;;  %v13005_v6 = vrot.slane %v6471_v20, %v8394_v38 }
 0x67b   :  { %7387 = vrot.lane.b32.xlu1 %v6872_v17, %s8244_s22  ;;  %v13002_v17 = vrot.slane %v6487_v37, %v8394_v38  ;;  %15236 = vst [vmem:[#allocation35_spill] sm:$0xff] %v13012_v63  ;;  %v13015_v32 = vrot.slane %v6519_v54, %v8394_v38  ;;  %v15237_v37 = vld [vmem:[#allocation27_spill] sm:$0xff]  ;;  %v7081_v54 = vcombine.high %v15243_v24, %v14979_v33 }
 0x67c   :  { %v12994_v7 = vpop.permute.xlu1 %4343  ;;  %v12999_v60 = vrot.slane %v6059_v45, %v8775_v49  ;;  %15235 = vst [vmem:[#allocation80_spill] sm:$0xff] %v13005_v6  ;;  %v5376_v20 = vcombine.high %v15237_v37, %v12550_v13  ;;  %v15238_v45 = vld [vmem:[#allocation83_spill] sm:$0xff] }
 0x67d   :  { %v12992_v57 = vpop.permute.xlu0 %4341  ;;  %15232 = vst [vmem:[#allocation18_spill] sm:$0xff] %v12994_v7  ;;  %15234 = vst [vmem:[#allocation58_spill] sm:$0xff] %v13002_v17  ;;  %v5875_v9 = vcombine.low %v15239_v58, %v15238_v45  ;;  %v6535_v58 = vcombine.low %v13005_v6, %v13002_v17  ;;  %v15276_v17 = vld [vmem:[#allocation12_spill] sm:$0xff] }
 0x67e   :  { %15231 = vst [vmem:[#allocation64_spill] sm:$0xff] %v12992_v57  ;;  %15233 = vst [vmem:[#allocation31_spill] sm:$0xff] %v12999_v60  ;;  %v6503_v34 = vcombine.low %v12967_v39, %v12992_v57  ;;  %7149 = vrot.lane.b32.xlu0 %v6397_v59, %s8245_s23  ;;  %v15240_v39 = vld [vmem:[#allocation95_spill] sm:$0xff]  ;;  %v15241_v57 = vld [vmem:[#allocation44_spill] sm:$0xff] }
 0x67f   :  { %7469 = vrot.lane.b32.xlu1 %v7010_v23, %s8246_s24  ;;  %v5859_v59 = vcombine.low %v15241_v57, %v15240_v39  ;;  %v5907_v39 = vcombine.low %v12969_v16, %v12994_v7  ;;  %v5514_v57 = vcombine.high %v12834_v52, %v12862_v25  ;;  %v13048_v24 = vrot.slane %v5875_v9, %v8394_v38 }
 0x680   :  { %v13018_v19 = vrot.slane %v6503_v34, %v8394_v38  ;;  %v13028_v23 = vpop.permute.xlu1 %7141  ;;  %v13063_v52 = vrot.slane %v6535_v58, %v8775_v49  ;;  %v5652_v9 = vcombine.high %v12902_v26, %v12885_v30  ;;  %v4902_v58 = vcombine.high %v12804_v10, %v12768_v35 }
 0x681   :  { %v13026_v36 = vpop.permute.xlu0 %4331  ;;  %15244 = vst [vmem:[#allocation83_spill] sm:$0xff] %v13048_v24  ;;  %v13051_v34 = vrot.slane %v5859_v59, %v8394_v38  ;;  %v13067_v25 = vrot.slane %v5907_v39, %v8394_v38  ;;  %v5790_v30 = vcombine.high %v12942_v44, %v12924_v56  ;;  %v5040_v10 = vcombine.high %v12871_v2, %v12845_v40  ;;  %v15252_v44 = vld [vmem:[#allocation90_spill] sm:$0xff]  ;;  %v15254_v2 = vld [vmem:[#allocation17_spill] sm:$0xff] }
 0x682   :  { %15242 = vst [vmem:[#allocation27_spill] sm:$0xff] %v13026_v36  ;;  %v6567_v61 = vcombine.low %v13018_v19, %v13015_v32  ;;  %7373 = vrot.lane.b32.xlu0 %v5376_v20, %s8244_s22  ;;  %v6260_v40 = vcombine.high %v12874_v62, %v12848_v8  ;;  %v15260_v8 = vld [vmem:[#allocation101_spill] sm:$0xff]  ;;  %v15261_v62 = vld [vmem:[#allocation38_spill] sm:$0xff] }
 0x683   :  { %7551 = vrot.lane.b32.xlu1 %v7081_v54, %s8248_s26  ;;  %15245 = vst [vmem:[#allocation36_spill] sm:$0xff] %v13051_v34  ;;  %v4764_v54 = vcombine.high %v12718_v42, %v12713_v47  ;;  %15247 = vst [vmem:[#allocation44_spill] sm:$0xff] %v13067_v25  ;;  %v15263_v47 = vld [vmem:[#allocation91_spill] sm:$0xff]  ;;  %v15275_v42 = vld [vmem:[#allocation89_spill] sm:$0xff] }
 0x684   :  { %v13045_v45 = vrot.slane %v6567_v61, %v8775_v49  ;;  %v13055_v6 = vpop.permute.xlu1 %7501 }
 0x685   :  { %v13053_v20 = vpop.permute.xlu0 %4339 }
 0x686   :  { %15246 = vst [vmem:[#allocation95_spill] sm:$0xff] %v13053_v20  ;;  %v5891_v16 = vcombine.low %v13026_v36, %v13053_v20  ;;  %7455 = vrot.lane.b32.xlu0 %v5514_v57, %s8246_s24  ;;  %v5923_v57 = vcombine.low %v13051_v34, %v13048_v24  ;;  %v15257_v36 = vld [vmem:[#allocation109_spill] sm:$0xff]  ;;  %v6959_v34 = vcombine.low %v15261_v62, %v15260_v8 }
 0x687   :  { %7093 = vrot.lane.b32.xlu1 %v4764_v54, %s8244_s22 }
 0x688   :  { %v13070_v61 = vrot.slane %v5891_v16, %v8394_v38  ;;  %v13076_v7 = vpop.permute.xlu1 %7221  ;;  %v6840_v16 = vcombine.high %v12647_v55, %v12650_v4  ;;  %v13098_v54 = vrot.slane %v5923_v57, %v8775_v49  ;;  %v15253_v4 = vld [vmem:[#allocation79_spill] sm:$0xff]  ;;  %v15255_v57 = vld [vmem:[#allocation97_spill] sm:$0xff] }
 0x689   :  { %v5400_v55 = vcombine.high %v15253_v4, %v15252_v44  ;;  %v15258_v44 = vld [vmem:[#allocation13_spill] sm:$0xff]  ;;  %v15259_v4 = vld [vmem:[#allocation119_spill] sm:$0xff] }
 0x68a   :  { %15248 = vst [vmem:[#allocation93_spill] sm:$0xff] %v13070_v61  ;;  %v5955_v39 = vcombine.low %v13070_v61, %v13067_v25  ;;  %7537 = vrot.lane.b32.xlu0 %v5652_v9, %s8248_s26  ;;  %v15250_v9 = vld [vmem:[#allocation85_spill] sm:$0xff]  ;;  %v5384_v56 = vcombine.high %v15259_v4, %v15258_v44  ;;  %v15262_v25 = vld [vmem:[#allocation14_spill] sm:$0xff]  ;;  %v15265_v44 = vld [vmem:[#allocation87_spill] sm:$0xff]  ;;  %v6398_v4 = vcombine.high %v12983_v22, %v12965_v31 }
 0x68b   :  { %7175 = vrot.lane.b32.xlu1 %v4902_v58, %s8246_s24  ;;  %v15251_v58 = vld [vmem:[#allocation112_spill] sm:$0xff]  ;;  %v13160_v22 = vrot.slane %v6959_v34, %v8775_v49  ;;  %v15268_v31 = vld [vmem:[#allocation121_spill] sm:$0xff] }
 0x68c   :  { %v13089_v26 = vrot.slane %v5955_v39, %v8775_v49  ;;  %v13093_v35 = vpop.permute.xlu1 %7431  ;;  %v6808_v59 = vcombine.high %v15251_v58, %v15250_v9  ;;  %v13108_v39 = vpop.permute.xlu0 %7421  ;;  %v13121_v58 = vrot.slane %v6840_v16, %v8775_v49  ;;  %v13135_v16 = vrot.slane %v5400_v55, %v8394_v38 }
 0x68d   :  { %15249 = vst [vmem:[#allocation122_spill] sm:$0xff] %v13093_v35  ;;  %v6991_v35 = vcombine.low %v15255_v57, %v15254_v2  ;;  %v8194_v2 = vld [vmem:[#allocation2 + $0x62] sm:$0xff]  ;;  %v8195_v57 = vld [vmem:[#allocation2 + $0x92] sm:$0xff] }
 0x68e   :  { %7619 = vrot.lane.b32.xlu0 %v5790_v30, %s8250_s28  ;;  %v15256_v30 = vld [vmem:[#allocation25_spill] sm:$0xff]  ;;  %v6268_v24 = vcombine.high %v8194_v2, %v8195_v57 }
 0x68f   :  { %7257 = vrot.lane.b32.xlu1 %v5040_v10, %s8248_s26  ;;  %v6316_v20 = vcombine.high %v15257_v36, %v15256_v30  ;;  %v5178_v10 = vcombine.high %v12913_v14, %v12894_v1  ;;  %v8196_v36 = vld [vmem:[#allocation2 + $0x7a] sm:$0xff]  ;;  %v8197_v30 = vld [vmem:[#allocation2 + $0xaa] sm:$0xff]  ;;  %v6300_v1 = vcombine.high %v15263_v47, %v15262_v25  ;;  %v13132_v14 = vrot.slane %v6808_v59, %v8775_v49 }
 0x690   :  { %v13116_v9 = vpop.permute.xlu1 %7581  ;;  %v6284_v61 = vcombine.high %v8196_v36, %v8197_v30  ;;  %v6228_v47 = vcombine.high %v12788_v53, %v12785_v11  ;;  %v13153_v55 = vrot.slane %v6991_v35, %v8775_v49  ;;  %v13165_v11 = vrot.slane %v6268_v24, %v8394_v38  ;;  %v15270_v30 = vld [vmem:[#allocation78_spill] sm:$0xff] }
 0x691   :  { %v13144_v2 = vrot.slane %v6316_v20, %v8394_v38  ;;  %v6873_v59 = vcombine.low %v13132_v14, %v13121_v58  ;;  %v15269_v20 = vld [vmem:[#allocation61_spill] sm:$0xff]  ;;  %v13171_v35 = vrot.slane %v6300_v1, %v8394_v38  ;;  %v6469_v24 = vcombine.high %v15270_v30, %v14979_v33 }
 0x692   :  { %7107 = vrot.lane.b32.xlu0 %v6260_v40, %s8244_s22  ;;  %v15264_v40 = vld [vmem:[#allocation54_spill] sm:$0xff]  ;;  %v5312_v57 = vcombine.high %v15269_v20, %v15268_v31  ;;  %v13168_v53 = vrot.slane %v6284_v61, %v8394_v38  ;;  %v15271_v31 = vld [vmem:[#allocation67_spill] sm:$0xff]  ;;  %v15272_v20 = vld [vmem:[#allocation16_spill] sm:$0xff] }
 0x693   :  { %7339 = vrot.lane.b32.xlu1 %v5178_v10, %s8250_s28  ;;  %v5344_v8 = vcombine.high %v15265_v44, %v15264_v40  ;;  %v13156_v10 = vrot.slane %v5384_v56, %v8394_v38  ;;  %v6196_v56 = vcombine.high %v12776_v43, %v12795_v15  ;;  %v6379_v61 = vcombine.low %v13171_v35, %v13144_v2 }
 0x694   :  { %v13139_v62 = vpop.permute.xlu0 %7231  ;;  %v13148_v25 = vpop.permute.xlu1 %7151  ;;  %v7011_v43 = vcombine.low %v13160_v22, %v13153_v55  ;;  %v13190_v15 = vrot.slane %v6228_v47, %v8775_v49  ;;  %v5326_v44 = vrot.slane %v5312_v57, %v8775_v49  ;;  %v4788_v30 = vcombine.high %v15272_v20, %v15271_v31  ;;  %v15278_v31 = vld [vmem:[#allocation72_spill] sm:$0xff] }
 0x695   :  { %15266 = vst [vmem:[#allocation85_spill] sm:$0xff] %v13139_v62  ;;  %15267 = vst [vmem:[#allocation112_spill] sm:$0xff] %v13148_v25  ;;  %v5463_v34 = vcombine.low %v13156_v10, %v13135_v16  ;;  %v5358_v40 = vrot.slane %v5344_v8, %v8775_v49  ;;  %v6347_v8 = vcombine.low %v13165_v11, %v13168_v53 }
 0x696   :  { %7189 = vrot.lane.b32.xlu0 %v6398_v4, %s8246_s24  ;;  %v6210_v4 = vrot.slane %v6196_v56, %v8775_v49  ;;  %v6387_v56 = vrot.slane %v6379_v61, %v8775_v49 }
 0x697   :  { %7427 = vrot.lane.b32.xlu1 %v6873_v59, %s8245_s23  ;;  %v5632_v59 = vcombine.high %v12809_v21, %v12773_v28  ;;  %v5377_v47 = vcombine.low %v5326_v44, %v5358_v40  ;;  %v4772_v28 = vcombine.high %v15276_v17, %v15275_v42  ;;  %v15277_v21 = vld [vmem:[#allocation76_spill] sm:$0xff] }
 0x698   :  { %v13178_v36 = vpop.permute.xlu0 %7381  ;;  %v13185_v1 = vpop.permute.xlu1 %7301  ;;  %v6261_v57 = vcombine.low %v6210_v4, %v13190_v15  ;;  %v15279_v20 = vcombine.low %v15277_v21, %v15278_v31 }
 0x699   :  { %v5646_v17 = vrot.slane %v5632_v59, %v8775_v49 }
 0x69a   :  { %7271 = vrot.lane.b32.xlu0 %v6469_v24, %s8248_s26  ;;  %v5471_v24 = vrot.slane %v5463_v34, %v8775_v49  ;;  %v6355_v34 = vrot.slane %v6347_v8, %v8775_v49 }
 0x69b   :  { %7509 = vrot.lane.b32.xlu1 %v7011_v43, %s8247_s25  ;;  %v5600_v43 = vcombine.high %v12820_v0, %v12812_v3  ;;  %v4732_v3 = vcombine.high %v12685_v41, %v12682_v18 }
 0x69c   :  { %v13202_v62 = vpop.permute.xlu0 %7379 }
 0x69d   :  { %15273 = vst [vmem:[#allocation90_spill] sm:$0xff] %v13202_v62  ;;  %v13205_v25 = vpop.permute.xlu1 %7511  ;;  %v5503_v62 = vrot.slane %v15279_v20, %v8775_v49  ;;  %v13231_v20 = vrot.slane %v4772_v28, %v8394_v38  ;;  %v5614_v8 = vrot.slane %v5600_v43, %v8775_v49 }
 0x69e   :  { %15274 = vst [vmem:[#allocation79_spill] sm:$0xff] %v13205_v25  ;;  %7413 = vrot.lane.b32.xlu0 %v5377_v47, %s8245_s23  ;;  %v13221_v25 = vrot.slane %v4788_v30, %v8394_v38  ;;  %v6399_v47 = vcombine.low %v6355_v34, %v6387_v56  ;;  %v4700_v30 = vcombine.high %v12668_v27, %v12671_v12 }
 0x69f   :  { %7147 = vrot.lane.b32.xlu1 %v6261_v57, %s8245_s23  ;;  %v5515_v42 = vcombine.low %v5471_v24, %v5503_v62  ;;  %v5653_v59 = vcombine.low %v5614_v8, %v5646_v17  ;;  %v13243_v57 = vrot.slane %v4732_v3, %v8775_v49 }
 0x6a0   :  { %v13225_v0 = vpop.permute.xlu0 %7099  ;;  %v4851_v18 = vcombine.low %v13231_v20, %v13221_v25  ;;  %v13249_v43 = vrot.slane %v4700_v30, %v8775_v49 }
 0x6a1   :  { %15280 = vst [vmem:[#allocation17_spill] sm:$0xff] %v13225_v0  ;;  %v13228_v61 = vpop.permute.xlu1 %7591 }
 0x6a2   :  { %15281 = vst [vmem:[#allocation97_spill] sm:$0xff] %v13228_v61  ;;  %7495 = vrot.lane.b32.xlu0 %v5515_v42, %s8247_s25  ;;  %v5378_v61 = vcombine.high %v5326_v44, %v5358_v40  ;;  %v4765_v12 = vcombine.low %v13249_v43, %v13243_v57  ;;  %v13257_v42 = vrot.slane %v4851_v18, %v8775_v49  ;;  %v15285_v40 = vld [vmem:[#allocation107_spill] sm:$0xff]  ;;  %v15286_v44 = vld [vmem:[#allocation105_spill] sm:$0xff] }
 0x6a3   :  { %7229 = vrot.lane.b32.xlu1 %v6399_v47, %s8247_s25  ;;  %v5516_v47 = vcombine.high %v5471_v24, %v5503_v62  ;;  %v15287_v30 = vcombine.low %v15285_v40, %v15286_v44 }
 0x6a4   :  { %v13240_v41 = vpop.permute.xlu0 %7419 }
 0x6a5   :  { %15282 = vst [vmem:[#allocation25_spill] sm:$0xff] %v13240_v41  ;;  %v13245_v28 = vpop.permute.xlu1 %7311  ;;  %v6400_v41 = vcombine.high %v6355_v34, %v6387_v56  ;;  %v15303_v56 = vld [vmem:[#allocation19_spill] sm:$0xff] }
 0x6a6   :  { %15283 = vst [vmem:[#allocation109_spill] sm:$0xff] %v13245_v28  ;;  %7577 = vrot.lane.b32.xlu0 %v5653_v59, %s8249_s27  ;;  %v13266_v59 = vrot.slane %v15287_v30, %v8775_v49  ;;  %v15291_v30 = vld [vmem:[#allocation7_spill] sm:$0xff]  ;;  %v6470_v34 = vcombine.high %v15303_v56, %v14979_v33  ;;  %v15310_v56 = vld [vmem:[#allocation118_spill] sm:$0xff] }
 0x6a7   :  { %7453 = vrot.lane.b32.xlu1 %v5378_v61, %s8246_s24 }
 0x6a8   :  { %v13252_v27 = vpop.permute.xlu0 %7139  ;;  %v4903_v28 = vcombine.low %v13257_v42, %v13266_v59 }
 0x6a9   :  { %15284 = vst [vmem:[#allocation13_spill] sm:$0xff] %v13252_v27  ;;  %v13259_v3 = vpop.permute.xlu1 %7101  ;;  %v5654_v27 = vcombine.high %v5614_v8, %v5646_v17  ;;  %v6736_v17 = vcombine.high %v12933_v50, %v12954_v46  ;;  %v15297_v46 = vld [vmem:[#allocation102_spill] sm:$0xff]  ;;  %v15301_v50 = vld [vmem:[#allocation53_spill] sm:$0xff] }
 0x6aa   :  { %7133 = vrot.lane.b32.xlu0 %v4765_v12, %s8245_s23  ;;  %v6124_v12 = vcombine.high %v12999_v60, %v13012_v63  ;;  %v15295_v63 = vld [vmem:[#allocation116_spill] sm:$0xff] }
 0x6ab   :  { %7535 = vrot.lane.b32.xlu1 %v5516_v47, %s8248_s26  ;;  %v15290_v47 = vld [vmem:[#allocation98_spill] sm:$0xff] }
 0x6ac   :  { %v13269_v61 = vpop.permute.xlu0 %7377 }
 0x6ad   :  { %15288 = vst [vmem:[#allocation119_spill] sm:$0xff] %v13269_v61  ;;  %v7462_v18 = vpop.permute.xlu1 %7461  ;;  %v15292_v61 = vcombine.low %v15290_v47, %v15291_v30 }
 0x6ae   :  { %7215 = vrot.lane.b32.xlu0 %v4903_v28, %s8247_s25  ;;  %v6262_v28 = vcombine.high %v6210_v4, %v13190_v15  ;;  %v15298_v15 = vld [vmem:[#allocation71_spill] sm:$0xff] }
 0x6af   :  { %7617 = vrot.lane.b32.xlu1 %v5654_v27, %s8250_s28  ;;  %v5327_v4 = vcombine.low %v15298_v15, %v15297_v46  ;;  %v15304_v46 = vld [vmem:[#allocation120_spill] sm:$0xff]  ;;  %v15307_v15 = vld [vmem:[#allocation65_spill] sm:$0xff] }
 0x6b0   :  { %v13275_v62 = vpop.permute.xlu0 %7459 }
 0x6b1   :  { %15289 = vst [vmem:[#allocation101_spill] sm:$0xff] %v13275_v62  ;;  %v13277_v24 = vpop.permute.xlu1 %7181 }
 0x6b2   :  { %7297 = vrot.lane.b32.xlu0 %v15292_v61, %s8249_s27  ;;  %v6874_v61 = vcombine.high %v13132_v14, %v13121_v58  ;;  %v7012_v58 = vcombine.high %v13160_v22, %v13153_v55  ;;  %v15300_v14 = vld [vmem:[#allocation33_spill] sm:$0xff]  ;;  %v15308_v22 = vld [vmem:[#allocation28_spill] sm:$0xff] }
 0x6b3   :  { %7105 = vrot.lane.b32.xlu1 %v6124_v12, %s8244_s22  ;;  %v15296_v12 = vld [vmem:[#allocation34_spill] sm:$0xff] }
 0x6b4   :  { %v13286_v0 = vpop.permute.xlu0 %7097  ;;  %v5359_v60 = vcombine.low %v15296_v12, %v15295_v63  ;;  %v6164_v63 = vcombine.high %v15301_v50, %v15300_v14  ;;  %v13327_v50 = vrot.slane %v5327_v4, %v8775_v49  ;;  %v7082_v14 = vcombine.high %v15308_v22, %v14979_v33  ;;  %v15314_v22 = vld [vmem:[#allocation47_spill] sm:$0xff] }
 0x6b5   :  { %v13290_v8 = vpop.permute.xlu1 %7391 }
 0x6b6   :  { %15293 = vst [vmem:[#allocation38_spill] sm:$0xff] %v13290_v8  ;;  %7385 = vrot.lane.b32.xlu0 %v6736_v17, %s8244_s22  ;;  %v5464_v17 = vcombine.high %v13156_v10, %v13135_v16  ;;  %v15305_v16 = vld [vmem:[#allocation60_spill] sm:$0xff] }
 0x6b7   :  { %7187 = vrot.lane.b32.xlu1 %v6262_v28, %s8246_s24  ;;  %v6132_v10 = vcombine.high %v15305_v16, %v15304_v46  ;;  %v13339_v46 = vrot.slane %v6164_v63, %v8394_v38 }
 0x6b8   :  { %v13295_v27 = vpop.permute.xlu0 %7179 }
 0x6b9   :  { %15294 = vst [vmem:[#allocation14_spill] sm:$0xff] %v13295_v27  ;;  %v7542_v62 = vpop.permute.xlu1 %7541  ;;  %v15321_v27 = vld [vmem:[#allocation32_spill] sm:$0xff] }
 0x6ba   :  { %7467 = vrot.lane.b32.xlu0 %v6874_v61, %s8246_s24  ;;  %v15306_v61 = vld [vmem:[#allocation6_spill] sm:$0xff] }
 0x6bb   :  { %7269 = vrot.lane.b32.xlu1 %v6400_v41, %s8248_s26  ;;  %v13318_v41 = vrot.slane %v5359_v60, %v8775_v49  ;;  %v6180_v8 = vcombine.high %v15307_v15, %v15306_v61  ;;  %v13334_v60 = vrot.slane %v5464_v17, %v8775_v49  ;;  %v15311_v61 = vld [vmem:[#allocation94_spill] sm:$0xff]  ;;  %v15312_v17 = vcombine.high %v15277_v21, %v15278_v31 }
 0x6bc   :  { %v13307_v28 = vpop.permute.xlu0 %7417  ;;  %v7717_v33 = vsel %vm3422_vm0, %v15311_v61, %v13178_v36  ;;  %v13358_v15 = vrot.slane %v6132_v10, %v8394_v38  ;;  %v15313_v36 = vld [vmem:[#allocation88_spill] sm:$0xff]  ;;  %v4766_v21 = vcombine.high %v13249_v43, %v13243_v57  ;;  %v15316_v61 = vld [vmem:[#allocation82_spill] sm:$0xff] }
 0x6bd   :  { %15299 = vst [vmem:[#allocation91_spill] sm:$0xff] %v13307_v28  ;;  %v13313_v12 = vpop.permute.xlu1 %7111  ;;  %v5379_v4 = vcombine.low %v13327_v50, %v13318_v41  ;;  %v13355_v63 = vrot.slane %v15312_v17, %v8775_v49  ;;  %v15317_v43 = vld [vmem:[#allocation70_spill] sm:$0xff]  ;;  %v15318_v17 = vld [vmem:[#allocation39_spill] sm:$0xff] }
 0x6be   :  { %15302 = vst [vmem:[#allocation54_spill] sm:$0xff] %v13313_v12  ;;  %7549 = vrot.lane.b32.xlu0 %v7012_v58, %s8248_s26  ;;  %v15309_v58 = vld [vmem:[#allocation41_spill] sm:$0xff] }
 0x6bf   :  { %7351 = vrot.lane.b32.xlu1 %v6470_v34, %s8250_s28  ;;  %v6148_v12 = vcombine.high %v15310_v56, %v15309_v58  ;;  %v6060_v34 = vcombine.high %v12960_v48, %v12957_v5  ;;  %v13361_v5 = vrot.slane %v6180_v8, %v8394_v38  ;;  %v6092_v48 = vcombine.high %v12950_v29, %v12947_v51 }
 0x6c0   :  { %v13329_v55 = vpop.permute.xlu0 %7499  ;;  %v5517_v31 = vcombine.low %v13334_v60, %v13355_v63  ;;  %v7727_v51 = vsel %vm3433_vm1, %v7717_v33, %v13108_v39  ;;  %v15320_v33 = vld [vmem:[#allocation48_spill] sm:$0xff] }
 0x6c1   :  { %v13343_v16 = vpop.permute.xlu1 %7261  ;;  %v13375_v10 = vrot.slane %v6148_v12, %v8394_v38  ;;  %v6243_v8 = vcombine.low %v13339_v46, %v13361_v5  ;;  %v13384_v56 = vrot.slane %v6060_v34, %v8775_v49  ;;  %v7737_v12 = vsel %vm3444_vm2, %v7727_v51, %v7462_v18  ;;  %v15319_v34 = vld [vmem:[#allocation74_spill] sm:$0xff]  ;;  %v15324_v51 = vld [vmem:[#allocation59_spill] sm:$0xff] }
 0x6c2   :  { %7631 = vrot.lane.b32.xlu0 %v7082_v14, %s8250_s28  ;;  %v6792_v14 = vcombine.high %v15314_v22, %v15313_v36  ;;  %v6760_v36 = vcombine.high %v15318_v17, %v15317_v43  ;;  %v13396_v39 = vrot.slane %v6092_v48, %v8775_v49  ;;  %v6704_v28 = vcombine.high %v15320_v33, %v15319_v34  ;;  %v15323_v18 = vld [vmem:[#allocation10_spill] sm:$0xff] }
 0x6c3   :  { %7493 = vrot.lane.b32.xlu1 %v5379_v4, %s8247_s25  ;;  %v15315_v4 = vld [vmem:[#allocation69_spill] sm:$0xff]  ;;  %v6211_v22 = vcombine.low %v13358_v15, %v13375_v10  ;;  %v6380_v48 = vcombine.high %v13171_v35, %v13144_v2  ;;  %v7747_v34 = vsel %vm3455_vm3, %v7737_v12, %v13055_v6  ;;  %v8198_v2 = vld [vmem:[#allocation2 + $0x30] sm:$0xff] }
 0x6c4   :  { %v13368_v58 = vpop.permute.xlu0 %7137  ;;  %v6776_v57 = vcombine.high %v15316_v61, %v15315_v4  ;;  %v15322_v4 = vld [vmem:[#allocation26_spill] sm:$0xff]  ;;  %v13403_v43 = vrot.slane %v6792_v14, %v8394_v38  ;;  %v13420_v14 = vrot.slane %v6243_v8, %v8775_v49  ;;  %v15327_v6 = vld [vmem:[#allocation77_spill] sm:$0xff] }
 0x6c5   :  { %v13381_v29 = vpop.permute.xlu1 %7389  ;;  %v6744_v61 = vcombine.high %v15322_v4, %v15321_v27  ;;  %v6125_v27 = vcombine.low %v13384_v56, %v13396_v39  ;;  %v4636_v35 = vcombine.high %v15327_v6, %v8198_v2  ;;  %v8200_v12 = vld [vmem:[#allocation2 + $0x48] sm:$0xff]  ;;  %v13433_v8 = vrot.slane %v6211_v22, %v8775_v49 }
 0x6c6   :  { %7173 = vrot.lane.b32.xlu0 %v4766_v21, %s8246_s24  ;;  %v6672_v21 = vcombine.high %v15324_v51, %v15323_v18  ;;  %v13423_v4 = vrot.slane %v6776_v57, %v8394_v38  ;;  %v13426_v18 = vrot.slane %v6760_v36, %v8394_v38  ;;  %v6348_v57 = vcombine.high %v13165_v11, %v13168_v53 }
 0x6c7   :  { %7575 = vrot.lane.b32.xlu1 %v5517_v31, %s8249_s27  ;;  %v4904_v31 = vcombine.high %v13257_v42, %v13266_v59  ;;  %v7757_v42 = vsel %vm3466_vm4, %v7747_v34, %v7542_v62  ;;  %v8199_v59 = vld [vmem:[#allocation2 + $0x18] sm:$0xff]  ;;  %v13438_v36 = vrot.slane %v6744_v61, %v8394_v38  ;;  %v15329_v34 = vld [vmem:[#allocation21_spill] sm:$0xff]  ;;  %v6263_v11 = vcombine.low %v13433_v8, %v13420_v14 }
 0x6c8   :  { %v13407_v17 = vpop.permute.xlu0 %7219  ;;  %v4652_v51 = vcombine.high %v8199_v59, %v8200_v12  ;;  %v6855_v62 = vcombine.low %v13423_v4, %v13403_v43  ;;  %v6686_v59 = vrot.slane %v6672_v21, %v8775_v49  ;;  %v7767_v22 = vsel %vm3477_vm5, %v7757_v42, %v13116_v9  ;;  %v15332_v21 = vld [vmem:[#allocation100_spill] sm:$0xff] }
 0x6c9   :  { %15325 = vst [vmem:[#allocation87_spill] sm:$0xff] %v13407_v17  ;;  %v13415_v33 = vpop.permute.xlu1 %7471  ;;  %v6718_v53 = vrot.slane %v6704_v28, %v8775_v49  ;;  %v13453_v61 = vrot.slane %v6380_v48, %v8775_v49  ;;  %v6823_v12 = vcombine.low %v13438_v36, %v13426_v18  ;;  %v7647_v17 = vsel %vm3422_vm0, %v15332_v21, %v13259_v3 }
 0x6ca   :  { %15326 = vst [vmem:[#allocation121_spill] sm:$0xff] %v13415_v33  ;;  %7255 = vrot.lane.b32.xlu0 %v4904_v31, %s8248_s26  ;;  %v15328_v31 = vld [vmem:[#allocation115_spill] sm:$0xff]  ;;  %v15333_v42 = vcombine.high %v15290_v47, %v15291_v30  ;;  %v13470_v28 = vrot.slane %v6348_v57, %v8775_v49  ;;  %v7657_v47 = vsel %vm3433_vm1, %v7647_v17, %v13028_v23 }
 0x6cb   :  { %7145 = vrot.lane.b32.xlu1 %v6125_v27, %s8245_s23  ;;  %v4668_v2 = vcombine.high %v15329_v34, %v15328_v31  ;;  %v15330_v31 = vld [vmem:[#allocation43_spill] sm:$0xff]  ;;  %v15331_v34 = vld [vmem:[#allocation108_spill] sm:$0xff]  ;;  %v6737_v3 = vcombine.low %v6686_v59, %v6718_v53  ;;  %v6738_v21 = vcombine.high %v6686_v59, %v6718_v53 }
 0x6cc   :  { %v13444_v6 = vpop.permute.xlu0 %7375  ;;  %v4684_v33 = vcombine.high %v15331_v34, %v15330_v31  ;;  %v6401_v57 = vcombine.low %v13470_v28, %v13453_v61 }
 0x6cd   :  { %v7622_v27 = vpop.permute.xlu1 %7621  ;;  %v13473_v48 = vrot.slane %v4668_v2, %v8394_v38 }
 0x6ce   :  { %v7777_v9 = vsel %vm3488_vm6, %v7767_v22, %v7622_v27  ;;  %7337 = vrot.lane.b32.xlu0 %v15333_v42, %s8250_s28  ;;  %v6863_v22 = vrot.slane %v6855_v62, %v8775_v49  ;;  %v13479_v27 = vrot.slane %v4636_v35, %v8394_v38  ;;  %v13491_v2 = vrot.slane %v4684_v33, %v8394_v38 }
 0x6cf   :  { %7227 = vrot.lane.b32.xlu1 %v6263_v11, %s8247_s25  ;;  %8040 = vmatprep.subr.msk.mxu0 %vm3574_vm7, %v7777_v9  ;;  %v13488_v11 = vrot.slane %v4652_v51, %v8394_v38  ;;  %v7667_v62 = vsel %vm3444_vm2, %v7657_v47, %v13277_v24  ;;  %v6831_v35 = vrot.slane %v6823_v12, %v8775_v49  ;;  %v15337_v47 = vld [vmem:[#allocation49_spill] sm:$0xff] }
 0x6d0   :  { %v13475_v31 = vpop.permute.xlu0 %7457  ;;  %15335 = vst [vmem:[#allocation78_spill] sm:$0xff] %v13479_v27  ;;  %v4747_v23 = vcombine.low %v13473_v48, %v13491_v2  ;;  %v7677_v51 = vsel %vm3455_vm3, %v7667_v62, %v13076_v7  ;;  %v4852_v9 = vcombine.high %v13231_v20, %v13221_v25 }
 0x6d1   :  { %15334 = vst [vmem:[#allocation61_spill] sm:$0xff] %v13475_v31  ;;  %v13483_v30 = vpop.permute.xlu1 %7109  ;;  %v6875_v34 = vcombine.low %v6831_v35, %v6863_v22  ;;  %v7687_v24 = vsel %vm3466_vm4, %v7677_v51, %v13343_v16  ;;  %v4715_v12 = vcombine.low %v13479_v27, %v13488_v11  ;;  %v6876_v53 = vcombine.high %v6831_v35, %v6863_v22  ;;  %v15340_v22 = vld [vmem:[#allocation62_spill] sm:$0xff]  ;;  %v15341_v35 = vld [vmem:[#allocation117_spill] sm:$0xff]  ;;  %v15342_v51 = vld [vmem:[#allocation103_spill] sm:$0xff] }
 0x6d2   :  { %7425 = vrot.lane.b32.xlu0 %v6737_v3, %s8245_s23  ;;  %v13515_v3 = vrot.slane %v4747_v23, %v8775_v49  ;;  %v7697_v7 = vsel %vm3477_vm5, %v7687_v24, %v13185_v1  ;;  %v13532_v20 = vrot.slane %v4852_v9, %v8775_v49  ;;  %v6608_v23 = vcombine.high %v15341_v35, %v15340_v22  ;;  %v15346_v35 = vld [vmem:[#allocation52_spill] sm:$0xff] }
 0x6d3   :  { %7309 = vrot.lane.b32.xlu1 %v6401_v57, %s8249_s27  ;;  %v15338_v57 = vld [vmem:[#allocation30_spill] sm:$0xff]  ;;  %v15345_v9 = vcombine.high %v15285_v40, %v15286_v44 }
 0x6d4   :  { %v13500_v17 = vpop.permute.xlu0 %7539  ;;  %v15339_v62 = vcombine.low %v15337_v47, %v15338_v57  ;;  %v15350_v40 = vld [vmem:[#allocation42_spill] sm:$0xff] }
 0x6d5   :  { %v13504_v33 = vpop.permute.xlu1 %7191  ;;  %v13549_v22 = vrot.slane %v15345_v9, %v8775_v49  ;;  %v15353_v9 = vld [vmem:[#allocation11_spill] sm:$0xff] }
 0x6d6   :  { %15336 = vst [vmem:[#allocation67_spill] sm:$0xff] %v13504_v33  ;;  %7507 = vrot.lane.b32.xlu0 %v6875_v34, %s8247_s25  ;;  %v13525_v34 = vrot.slane %v4715_v12, %v8775_v49  ;;  %v8204_v33 = vld [vmem:[#allocation2 + $0xb1] sm:$0xff] }
 0x6d7   :  { %7465 = vrot.lane.b32.xlu1 %v6738_v21, %s8246_s24  ;;  %v15343_v21 = vld [vmem:[#allocation51_spill] sm:$0xff] }
 0x6d8   :  { %v7096_v42 = vpop.permute.xlu0 %7095  ;;  %v4767_v1 = vcombine.low %v13525_v34, %v13515_v3  ;;  %v15344_v24 = vcombine.low %v15342_v51, %v15343_v21  ;;  %v15348_v21 = vcombine.high %v15337_v47, %v15338_v57 }
 0x6d9   :  { %v7342_v59 = vpop.permute.xlu1 %7341 }
 0x6da   :  { %v7707_v16 = vsel %vm3488_vm6, %v7697_v7, %v7342_v59  ;;  %7589 = vrot.lane.b32.xlu0 %v15339_v62, %s8249_s27  ;;  %v7721_v12 = vsel %vm3422_vm0, %v15344_v24, %v13381_v29  ;;  %v8201_v59 = vld [vmem:[#allocation2 + $0x69] sm:$0xff]  ;;  %v8203_v62 = vld [vmem:[#allocation2 + $0x81] sm:$0xff]  ;;  %v15347_v29 = vld [vmem:[#allocation99_spill] sm:$0xff]  ;;  %v4905_v24 = vcombine.low %v13532_v20, %v13549_v22 }
 0x6db   :  { %7547 = vrot.lane.b32.xlu1 %v6876_v53, %s8248_s26  ;;  %8041 = vmatpush1.msk.msra.mxu0 %vm3574_vm7, %v7707_v16  ;;  %v8202_v53 = vld [vmem:[#allocation2 + $0x99] sm:$0xff]  ;;  %v6656_v31 = vcombine.high %v8203_v62, %v8204_v33  ;;  %v6624_v51 = vcombine.high %v15347_v29, %v15346_v35 }
 0x6dc   :  { %v7178_v25 = vpop.permute.xlu0 %7177  ;;  %v6640_v16 = vcombine.high %v8201_v59, %v8202_v53  ;;  %v6126_v53 = vcombine.high %v13384_v56, %v13396_v39 }
 0x6dd   :  { %v7430_v7 = vpop.permute.xlu1 %7429  ;;  %v13574_v57 = vrot.slane %v6656_v31, %v8394_v38 }
 0x6de   :  { %v13542_v27 = vsel %vm3433_vm1, %v7721_v12, %v7430_v7  ;;  %7213 = vrot.lane.b32.xlu0 %v4767_v1, %s8247_s25  ;;  %v13562_v1 = vrot.slane %v6608_v23, %v8394_v38  ;;  %v15349_v12 = vld [vmem:[#allocation46_spill] sm:$0xff]  ;;  %v13571_v47 = vrot.slane %v6640_v16, %v8394_v38  ;;  %v13581_v23 = vrot.slane %v6624_v51, %v8394_v38  ;;  %v15355_v51 = vld [vmem:[#allocation40_spill] sm:$0xff] }
 0x6df   :  { %7629 = vrot.lane.b32.xlu1 %v15348_v21, %s8250_s28  ;;  %v15351_v44 = vcombine.low %v15349_v12, %v15350_v40  ;;  %v6600_v16 = vcombine.high %v13063_v52, %v13045_v45  ;;  %v15356_v21 = vld [vmem:[#allocation20_spill] sm:$0xff] }
 0x6e0   :  { %v13557_v33 = vpop.permute.xlu0 %7259  ;;  %v6687_v29 = vcombine.low %v13562_v1, %v13581_v23 }
 0x6e1   :  { %v7644_v7 = vsel %vm3422_vm0, %v15351_v44, %v7096_v42  ;;  %v7136_v59 = vpop.permute.xlu1 %7135  ;;  %v15352_v42 = vld [vmem:[#allocation22_spill] sm:$0xff] }
 0x6e2   :  { %v13577_v62 = vsel %vm3433_vm1, %v7644_v7, %v7136_v59  ;;  %7295 = vrot.lane.b32.xlu0 %v4905_v24, %s8249_s27  ;;  %v15354_v35 = vcombine.low %v15352_v42, %v15353_v9  ;;  %v5996_v24 = vcombine.high %v15356_v21, %v15355_v51  ;;  %v8205_v7 = vld [vmem:[#allocation2 + $0x79] sm:$0xff]  ;;  %v8206_v59 = vld [vmem:[#allocation2 + $0xa9] sm:$0xff]  ;;  %v8207_v42 = vld [vmem:[#allocation2 + $0x61] sm:$0xff] }
 0x6e3   :  { %7185 = vrot.lane.b32.xlu1 %v6126_v53, %s8246_s24  ;;  %v6044_v53 = vcombine.high %v8205_v7, %v8206_v59  ;;  %v8208_v9 = vld [vmem:[#allocation2 + $0x91] sm:$0xff] }
 0x6e4   :  { %v7645_v56 = vsel %vm3422_vm0, %v15354_v35, %v13286_v0  ;;  %v13591_v31 = vpop.permute.xlu0 %7415  ;;  %v6264_v0 = vcombine.high %v13433_v8, %v13420_v14  ;;  %v6028_v35 = vcombine.high %v8207_v42, %v8208_v9  ;;  %v5380_v8 = vcombine.high %v13327_v50, %v13318_v41  ;;  %v15362_v42 = vld [vmem:[#allocation81_spill] sm:$0xff] }
 0x6e5   :  { %v7655_v39 = vsel %vm3433_vm1, %v7645_v56, %v13368_v58  ;;  %v7218_v40 = vpop.permute.xlu1 %7217  ;;  %v6719_v58 = vcombine.low %v13571_v47, %v13574_v57  ;;  %v15357_v56 = vld [vmem:[#allocation66_spill] sm:$0xff]  ;;  %v13618_v51 = vrot.slane %v5996_v24, %v8394_v38  ;;  %v13632_v41 = vrot.slane %v6044_v53, %v8394_v38  ;;  %v15363_v9 = vld [vmem:[#allocation57_spill] sm:$0xff] }
 0x6e6   :  { %v7665_v12 = vsel %vm3444_vm2, %v7655_v39, %v7178_v25  ;;  %7383 = vrot.lane.b32.xlu0 %v6600_v16, %s8244_s22  ;;  %v15358_v25 = vld [vmem:[#allocation84_spill] sm:$0xff]  ;;  %v6856_v16 = vcombine.high %v13423_v4, %v13403_v43  ;;  %v13635_v50 = vrot.slane %v6028_v35, %v8394_v38  ;;  %v6824_v43 = vcombine.high %v13438_v36, %v13426_v18  ;;  %v15359_v18 = vld [vmem:[#allocation63_spill] sm:$0xff] }
 0x6e7   :  { %v13603_v44 = vsel %vm3455_vm3, %v7665_v12, %v7218_v40  ;;  %v6012_v39 = vcombine.high %v15358_v25, %v15357_v56  ;;  %7267 = vrot.lane.b32.xlu1 %v6264_v0, %s8248_s26  ;;  %v6402_v12 = vcombine.high %v13470_v28, %v13453_v61  ;;  %v13625_v40 = vrot.slane %v6687_v29, %v8775_v49  ;;  %v15360_v36 = vld [vmem:[#allocation68_spill] sm:$0xff] }
 0x6e8   :  { %v13611_v14 = vpop.permute.xlu0 %7497  ;;  %v13629_v0 = vrot.slane %v6719_v58, %v8775_v49  ;;  %v5518_v28 = vcombine.high %v13334_v60, %v13355_v63  ;;  %v13652_v7 = vrot.slane %v6856_v16, %v8775_v49  ;;  %v15361_v59 = vcombine.low %v15359_v18, %v15360_v36 }
 0x6e9   :  { %v13620_v21 = vpop.permute.xlu1 %7299  ;;  %v13640_v4 = vrot.slane %v6012_v39, %v8394_v38  ;;  %v13663_v60 = vrot.slane %v6824_v43, %v8775_v49  ;;  %v6107_v63 = vcombine.low %v13635_v50, %v13632_v41  ;;  %v15364_v35 = vcombine.low %v15362_v42, %v15363_v9 }
 0x6ea   :  { %7533 = vrot.lane.b32.xlu0 %v5380_v8, %s8248_s26  ;;  %v6739_v58 = vcombine.low %v13625_v40, %v13629_v0  ;;  %v5988_v39 = vcombine.high %v13098_v54, %v13089_v26  ;;  %v6244_v8 = vcombine.high %v13339_v46, %v13361_v5  ;;  %v6568_v5 = vcombine.high %v13018_v19, %v13015_v32  ;;  %v15366_v32 = vld [vmem:[#allocation58_spill] sm:$0xff]  ;;  %v15367_v19 = vld [vmem:[#allocation80_spill] sm:$0xff] }
 0x6eb   :  { %7349 = vrot.lane.b32.xlu1 %v6402_v12, %s8250_s28  ;;  %v6075_v29 = vcombine.low %v13618_v51, %v13640_v4  ;;  %v7651_v56 = vsel %vm3422_vm0, %v15364_v35, %v13483_v30  ;;  %v6877_v43 = vcombine.low %v13663_v60, %v13652_v7  ;;  %v13693_v46 = vrot.slane %v6107_v63, %v8775_v49 }
 0x6ec   :  { %v13643_v61 = vpop.permute.xlu0 %7579  ;;  %v4906_v35 = vcombine.high %v13532_v20, %v13549_v22  ;;  %v15374_v22 = vld [vmem:[#allocation90_spill] sm:$0xff] }
 0x6ed   :  { %v7388_v24 = vpop.permute.xlu1 %7387 }
 0x6ee   :  { %v13658_v53 = vsel %vm3422_vm0, %v15361_v59, %v7388_v24  ;;  %7615 = vrot.lane.b32.xlu0 %v5518_v28, %s8250_s28  ;;  %v13682_v28 = vrot.slane %v6075_v29, %v8775_v49  ;;  %v6212_v24 = vcombine.high %v13358_v15, %v13375_v10  ;;  %v4768_v29 = vcombine.high %v13525_v34, %v13515_v3  ;;  %v15368_v3 = vld [vmem:[#allocation86_spill] sm:$0xff]  ;;  %v15369_v34 = vld [vmem:[#allocation96_spill] sm:$0xff] }
 0x6ef   :  { %7505 = vrot.lane.b32.xlu1 %v6739_v58, %s8247_s25  ;;  %v13710_v10 = vrot.slane %v6244_v8, %v8775_v49  ;;  %v6536_v59 = vcombine.high %v15367_v19, %v15366_v32  ;;  %v15371_v8 = vld [vmem:[#allocation29_spill] sm:$0xff] }
 0x6f0   :  { %v7150_v25 = vpop.permute.xlu0 %7149  ;;  %v6127_v15 = vcombine.low %v13682_v28, %v13693_v46  ;;  %v13722_v63 = vrot.slane %v6212_v24, %v8775_v49  ;;  %v15380_v19 = vld [vmem:[#allocation25_spill] sm:$0xff] }
 0x6f1   :  { %v13677_v16 = vsel %vm3433_vm1, %v7651_v56, %v7150_v25  ;;  %v7470_v12 = vpop.permute.xlu1 %7469  ;;  %v13729_v56 = vrot.slane %v6568_v5, %v8775_v49  ;;  %v13744_v20 = vrot.slane %v6536_v59, %v8775_v49  ;;  %v15376_v5 = vld [vmem:[#allocation73_spill] sm:$0xff] }
 0x6f2   :  { %v13686_v30 = vsel %vm3444_vm2, %v13542_v27, %v7470_v12  ;;  %7103 = vrot.lane.b32.xlu0 %v5988_v39, %s8244_s22  ;;  %v15365_v27 = vcombine.low %v15237_v37, %v12550_v13  ;;  %v15370_v13 = vcombine.low %v15368_v3, %v15369_v34  ;;  %v15372_v12 = vld [vmem:[#allocation92_spill] sm:$0xff] }
 0x6f3   :  { %7587 = vrot.lane.b32.xlu1 %v6877_v43, %s8249_s27  ;;  %v15373_v43 = vcombine.low %v15371_v8, %v15372_v12  ;;  %v6601_v59 = vcombine.low %v13744_v20, %v13729_v56  ;;  %v15383_v8 = vld [vmem:[#allocation36_spill] sm:$0xff] }
 0x6f4   :  { %v7374_v58 = vpop.permute.xlu0 %7373  ;;  %v7714_v37 = vsel %vm3422_vm0, %v15370_v13, %v13444_v6  ;;  %v6265_v6 = vcombine.low %v13722_v63, %v13710_v10  ;;  %v15381_v13 = vld [vmem:[#allocation101_spill] sm:$0xff] }
 0x6f5   :  { %v13703_v18 = vsel %vm3422_vm0, %v15365_v27, %v7374_v58  ;;  %v13705_v36 = vpop.permute.xlu1 %7551  ;;  %v7724_v42 = vsel %vm3433_vm1, %v7714_v37, %v13591_v31  ;;  %v15375_v31 = vld [vmem:[#allocation56_spill] sm:$0xff] }
 0x6f6   :  { %7253 = vrot.lane.b32.xlu0 %v4768_v29, %s8248_s26  ;;  %v15377_v58 = vcombine.low %v15375_v31, %v15376_v5  ;;  %v15378_v27 = vld [vmem:[#allocation44_spill] sm:$0xff] }
 0x6f7   :  { %7225 = vrot.lane.b32.xlu1 %v6127_v15, %s8247_s25  ;;  %v15379_v15 = vld [vmem:[#allocation93_spill] sm:$0xff] }
 0x6f8   :  { %v7456_v9 = vpop.permute.xlu0 %7455  ;;  %v7716_v29 = vsel %vm3422_vm0, %v15377_v58, %v15374_v22  ;;  %v5956_v32 = vcombine.high %v15379_v15, %v15378_v27  ;;  %v15385_v22 = vld [vmem:[#allocation8_spill] sm:$0xff]  ;;  %v15388_v27 = vld [vmem:[#allocation13_spill] sm:$0xff] }
 0x6f9   :  { %v13732_v25 = vsel %vm3444_vm2, %v7724_v42, %v7456_v9  ;;  %v7094_v39 = vpop.permute.xlu1 %7093  ;;  %v7726_v3 = vsel %vm3433_vm1, %v7716_v29, %v15380_v19  ;;  %v6740_v9 = vcombine.high %v13625_v40, %v13629_v0  ;;  %v4748_v40 = vcombine.high %v13473_v48, %v13491_v2  ;;  %v15384_v0 = vld [vmem:[#allocation17_spill] sm:$0xff]  ;;  %v15389_v19 = vld [vmem:[#allocation14_spill] sm:$0xff] }
 0x6fa   :  { %v13740_v24 = vsel %vm3422_vm0, %v15373_v43, %v7094_v39  ;;  %7335 = vrot.lane.b32.xlu0 %v4906_v35, %s8250_s28  ;;  %v7736_v37 = vsel %vm3444_vm2, %v7726_v3, %v15381_v13  ;;  %v13786_v29 = vrot.slane %v5956_v32, %v8775_v49  ;;  %v6878_v2 = vcombine.high %v13663_v60, %v13652_v7 }
 0x6fb   :  { %7307 = vrot.lane.b32.xlu1 %v6265_v6, %s8249_s27  ;;  %v7746_v35 = vsel %vm3455_vm3, %v7736_v37, %v13329_v55  ;;  %v15382_v6 = vld [vmem:[#allocation83_spill] sm:$0xff]  ;;  %v15386_v55 = vld [vmem:[#allocation9_spill] sm:$0xff]  ;;  %v15393_v37 = vld [vmem:[#allocation78_spill] sm:$0xff] }
 0x6fc   :  { %v13756_v34 = vpop.permute.xlu0 %7537  ;;  %v5924_v12 = vcombine.high %v15383_v8, %v15382_v6  ;;  %v7756_v43 = vsel %vm3466_vm4, %v7746_v35, %v13500_v17  ;;  %v15387_v31 = vcombine.low %v15385_v22, %v15386_v55  ;;  %v13814_v8 = vrot.slane %v4748_v40, %v8775_v49 }
 0x6fd   :  { %v7176_v42 = vpop.permute.xlu1 %7175  ;;  %v7766_v5 = vsel %vm3477_vm5, %v7756_v43, %v13643_v61  ;;  %v15391_v61 = vld [vmem:[#allocation106_spill] sm:$0xff] }
 0x6fe   :  { %v13768_v39 = vsel %vm3444_vm2, %v13577_v62, %v7176_v42  ;;  %7423 = vrot.lane.b32.xlu0 %v6601_v59, %s8245_s23  ;;  %v7646_v62 = vsel %vm3422_vm0, %v15387_v31, %v15384_v0  ;;  %v15390_v59 = vld [vmem:[#allocation104_spill] sm:$0xff]  ;;  %v13802_v32 = vrot.slane %v5924_v12, %v8775_v49  ;;  %v4716_v42 = vcombine.high %v15393_v37, %v13488_v11  ;;  %v15395_v43 = vld [vmem:[#allocation50_spill] sm:$0xff]  ;;  %v15396_v0 = vld [vmem:[#allocation37_spill] sm:$0xff] }
 0x6ff   :  { %7545 = vrot.lane.b32.xlu1 %v6740_v9, %s8248_s26  ;;  %v7656_v17 = vsel %vm3433_vm1, %v7646_v62, %v15388_v27  ;;  %v15392_v13 = vcombine.low %v15390_v59, %v15391_v61  ;;  %v15394_v9 = vld [vmem:[#allocation87_spill] sm:$0xff]  ;;  %v6688_v12 = vcombine.high %v13562_v1, %v13581_v23  ;;  %v15397_v22 = vcombine.low %v15395_v43, %v15396_v0  ;;  %v8209_v37 = vld [vmem:[#allocation2 + $0x80] sm:$0xff]  ;;  %v8216_v0 = vld [vmem:[#allocation2 + $0x90] sm:$0xff] }
 0x700   :  { %v7620_v58 = vpop.permute.xlu0 %7619  ;;  %v7666_v3 = vsel %vm3444_vm2, %v7656_v17, %v15389_v19  ;;  %v5989_v6 = vcombine.low %v13802_v32, %v13786_v29  ;;  %v13829_v40 = vrot.slane %v4716_v42, %v8775_v49  ;;  %v6720_v1 = vcombine.high %v13571_v47, %v13574_v57  ;;  %v8210_v42 = vld [vmem:[#allocation2 + $0xb0] sm:$0xff]  ;;  %v8215_v43 = vld [vmem:[#allocation2 + $0x60] sm:$0xff] }
 0x701   :  { %v13790_v15 = vpop.permute.xlu1 %7257  ;;  %v7776_v48 = vsel %vm3488_vm6, %v7766_v5, %v7620_v58  ;;  %v7676_v35 = vsel %vm3455_vm3, %v7666_v3, %v15394_v9  ;;  %v6266_v58 = vcombine.high %v13722_v63, %v13710_v10  ;;  %v6702_v27 = vrot.slane %v6688_v12, %v8775_v49  ;;  %v15400_v63 = vld [vmem:[#allocation95_spill] sm:$0xff] }
 0x702   :  { %7573 = vrot.lane.b32.xlu0 %v15392_v13, %s8249_s27  ;;  %7817 = vmatprep.subr.mxu0 %v7776_v48  ;;  %v7686_v7 = vsel %vm3466_vm4, %v7676_v35, %v13557_v33  ;;  %v6128_v33 = vcombine.high %v13682_v28, %v13693_v46  ;;  %v6076_v28 = vcombine.high %v13618_v51, %v13640_v4  ;;  %v15398_v51 = vld [vmem:[#allocation64_spill] sm:$0xff]  ;;  %v15399_v4 = vld [vmem:[#allocation111_spill] sm:$0xff]  ;;  %v8211_v35 = vld [vmem:[#allocation2 + $0x68] sm:$0xff] }
 0x703   :  { %7627 = vrot.lane.b32.xlu1 %v6878_v2, %s8250_s28  ;;  %v7696_v11 = vsel %vm3477_vm5, %v7686_v7, %v13620_v21  ;;  %v4769_v21 = vcombine.low %v13829_v40, %v13814_v8  ;;  %v6734_v47 = vrot.slane %v6720_v1, %v8775_v49  ;;  %v6108_v57 = vcombine.high %v13635_v50, %v13632_v41  ;;  %v8212_v41 = vld [vmem:[#allocation2 + $0x98] sm:$0xff] }
 0x704   :  { %v7108_v60 = vpop.permute.xlu0 %7107  ;;  %v6602_v10 = vcombine.high %v13744_v20, %v13729_v56  ;;  %v6090_v13 = vrot.slane %v6076_v28, %v8775_v49  ;;  %v6488_v9 = vcombine.high %v8209_v37, %v8210_v42  ;;  %v6472_v50 = vcombine.high %v8211_v35, %v8212_v41  ;;  %v15402_v7 = vld [vmem:[#allocation23_spill] sm:$0xff]  ;;  %v8214_v20 = vld [vmem:[#allocation2 + $0xa8] sm:$0xff] }
 0x705   :  { %v7650_v55 = vsel %vm3422_vm0, %v15397_v22, %v7108_v60  ;;  %v7340_v31 = vpop.permute.xlu1 %7339  ;;  %v6741_v3 = vcombine.low %v6702_v27, %v6734_v47  ;;  %v15403_v60 = vld [vmem:[#allocation75_spill] sm:$0xff]  ;;  %v5860_v22 = vcombine.high %v8215_v43, %v8216_v0  ;;  %v6122_v1 = vrot.slane %v6108_v57, %v8775_v49 }
 0x706   :  { %v7706_v62 = vsel %vm3488_vm6, %v7696_v11, %v7340_v31  ;;  %7143 = vrot.lane.b32.xlu0 %v5989_v6, %s8245_s23  ;;  %v6520_v6 = vcombine.high %v15403_v60, %v15402_v7  ;;  %v8213_v56 = vld [vmem:[#allocation2 + $0x78] sm:$0xff]  ;;  %v15404_v31 = vld [vmem:[#allocation18_spill] sm:$0xff]  ;;  %v6742_v37 = vcombine.high %v6702_v27, %v6734_v47 }
 0x707   :  { %7265 = vrot.lane.b32.xlu1 %v6128_v33, %s8248_s26  ;;  %7818 = vmatpush1.msra.mxu0 %v7706_v62  ;;  %v5876_v11 = vcombine.high %v8213_v56, %v8214_v20  ;;  %v15405_v33 = vld [vmem:[#allocation45_spill] sm:$0xff]  ;;  %v6130_v27 = vcombine.high %v6090_v13, %v6122_v1  ;;  %v15411_v0 = vld [vmem:[#allocation91_spill] sm:$0xff] }
 0x708   :  { %v7190_v23 = vpop.permute.xlu0 %7189  ;;  %v5908_v62 = vcombine.high %v15405_v33, %v15404_v31 }
 0x709   :  { %v7671_v46 = vsel %vm3444_vm2, %v13677_v16, %v7190_v23  ;;  %v7428_v5 = vpop.permute.xlu1 %7427  ;;  %v6504_v16 = vcombine.high %v15399_v4, %v15398_v51  ;;  %v13879_v51 = vrot.slane %v6488_v9, %v8394_v38  ;;  %v13882_v4 = vrot.slane %v6472_v50, %v8394_v38 }
 0x70a   :  { %v13845_v17 = vsel %vm3433_vm1, %v13658_v53, %v7428_v5  ;;  %7293 = vrot.lane.b32.xlu0 %v4769_v21, %s8249_s27  ;;  %v15401_v53 = vld [vmem:[#allocation27_spill] sm:$0xff] }
 0x70b   :  { %7347 = vrot.lane.b32.xlu1 %v6266_v58, %s8250_s28  ;;  %v5892_v2 = vcombine.high %v15401_v53, %v15400_v63  ;;  %v13873_v23 = vrot.slane %v6504_v16, %v8394_v38  ;;  %v6129_v58 = vcombine.low %v6090_v13, %v6122_v1  ;;  %v15406_v16 = vcombine.high %v15390_v59, %v15391_v61  ;;  %v15412_v1 = vld [vmem:[#allocation61_spill] sm:$0xff] }
 0x70c   :  { %v13854_v48 = vpop.permute.xlu0 %7271  ;;  %v5874_v63 = vrot.slane %v5860_v22, %v8394_v38  ;;  %v5922_v53 = vrot.slane %v5908_v62, %v8394_v38 }
 0x70d   :  { %v7510_v19 = vpop.permute.xlu1 %7509  ;;  %v5906_v21 = vrot.slane %v5892_v2, %v8394_v38 }
 0x70e   :  { %v13865_v12 = vsel %vm3455_vm3, %v13686_v30, %v7510_v19  ;;  %7463 = vrot.lane.b32.xlu0 %v6602_v10, %s8246_s24  ;;  %v13885_v10 = vrot.slane %v6520_v6, %v8394_v38  ;;  %v15407_v6 = vld [vmem:[#allocation119_spill] sm:$0xff] }
 0x70f   :  { %7585 = vrot.lane.b32.xlu1 %v6741_v3, %s8249_s27  ;;  %v5972_v3 = vcombine.high %v5906_v21, %v5922_v53  ;;  %v5971_v35 = vcombine.low %v5906_v21, %v5922_v53 }
 0x710   :  { %v7414_v30 = vpop.permute.xlu0 %7413  ;;  %v6583_v2 = vcombine.low %v13873_v23, %v13885_v10 }
 0x711   :  { %v7723_v28 = vsel %vm3433_vm1, %v13703_v18, %v7414_v30  ;;  %v7148_v5 = vpop.permute.xlu1 %7147  ;;  %v5890_v18 = vrot.slane %v5876_v11, %v8394_v38  ;;  %v6551_v38 = vcombine.low %v13882_v4, %v13879_v51  ;;  %v5979_v43 = vrot.slane %v5971_v35, %v8775_v49 }
 0x712   :  { %v13888_v57 = vsel %vm3433_vm1, %v7650_v55, %v7148_v5  ;;  %7613 = vrot.lane.b32.xlu0 %v15406_v16, %s8250_s28  ;;  %v5990_v55 = vcombine.high %v13802_v32, %v13786_v29  ;;  %v4770_v29 = vcombine.high %v13829_v40, %v13814_v8  ;;  %v15408_v8 = vld [vmem:[#allocation113_spill] sm:$0xff]  ;;  %v15409_v40 = vld [vmem:[#allocation15_spill] sm:$0xff] }
 0x713   :  { %7305 = vrot.lane.b32.xlu1 %v6129_v58, %s8249_s27  ;;  %v5940_v9 = vcombine.high %v5874_v63, %v5890_v18  ;;  %v6559_v50 = vrot.slane %v6551_v38, %v8775_v49  ;;  %v5939_v7 = vcombine.low %v5874_v63, %v5890_v18  ;;  %v15410_v56 = vcombine.low %v15408_v8, %v15409_v40  ;;  %v15423_v8 = vld [vmem:[#allocation122_spill] sm:$0xff] }
 0x714   :  { %v7496_v19 = vpop.permute.xlu0 %7495  ;;  %v6552_v38 = vcombine.high %v13882_v4, %v13879_v51 }
 0x715   :  { %v7744_v59 = vsel %vm3455_vm3, %v13732_v25, %v7496_v19  ;;  %v7230_v61 = vpop.permute.xlu1 %7229  ;;  %v6591_v25 = vrot.slane %v6583_v2, %v8775_v49  ;;  %v5954_v60 = vrot.slane %v5940_v9, %v8775_v49  ;;  %v7715_v13 = vsel %vm3422_vm0, %v15410_v56, %v15407_v6 }
 0x716   :  { %v13905_v42 = vsel %vm3455_vm3, %v7671_v46, %v7230_v61  ;;  %7183 = vrot.lane.b32.xlu0 %v5990_v55, %s8246_s24  ;;  %v5986_v46 = vrot.slane %v5972_v3, %v8775_v49  ;;  %v7725_v22 = vsel %vm3433_vm1, %v7715_v13, %v15411_v0  ;;  %v15414_v61 = vld [vmem:[#allocation35_spill] sm:$0xff]  ;;  %v6566_v4 = vrot.slane %v6552_v38, %v8775_v49 }
 0x717   :  { %7625 = vrot.lane.b32.xlu1 %v6742_v37, %s8250_s28  ;;  %v6603_v11 = vcombine.low %v6559_v50, %v6591_v25  ;;  %v7735_v30 = vsel %vm3444_vm2, %v7725_v22, %v15412_v1  ;;  %v6604_v55 = vcombine.high %v6559_v50, %v6591_v25  ;;  %v15419_v25 = vld [vmem:[#allocation55_spill] sm:$0xff] }
 0x718   :  { %v7578_v41 = vpop.permute.xlu0 %7577  ;;  %v5993_v62 = vcombine.low %v5954_v60, %v5986_v46  ;;  %v7745_v5 = vsel %vm3455_vm3, %v7735_v30, %v13611_v14  ;;  %v5994_v2 = vcombine.high %v5954_v60, %v5986_v46  ;;  %v6584_v14 = vcombine.high %v13873_v23, %v13885_v10  ;;  %v15418_v10 = vld [vmem:[#allocation114_spill] sm:$0xff]  ;;  %v15422_v60 = vld [vmem:[#allocation24_spill] sm:$0xff] }
 0x719   :  { %v7454_v32 = vpop.permute.xlu1 %7453 }
 0x71a   :  { %v13916_v47 = vsel %vm3444_vm2, %v7723_v28, %v7454_v32  ;;  %7333 = vrot.lane.b32.xlu0 %v4770_v29, %s8250_s28  ;;  %v5947_v28 = vrot.slane %v5939_v7, %v8775_v49  ;;  %v15416_v29 = vld [vmem:[#allocation38_spill] sm:$0xff] }
 0x71b   :  { %7345 = vrot.lane.b32.xlu1 %v6130_v27, %s8250_s28  ;;  %v15417_v32 = vld [vmem:[#allocation110_spill] sm:$0xff]  ;;  %v15420_v27 = vcombine.low %v15418_v10, %v15419_v25 }
 0x71c   :  { %v7134_v20 = vpop.permute.xlu0 %7133  ;;  %v5991_v16 = vcombine.low %v5947_v28, %v5979_v43  ;;  %v5992_v35 = vcombine.high %v5947_v28, %v5979_v43  ;;  %v7722_v23 = vsel %vm3422_vm0, %v15417_v32, %v15416_v29  ;;  %v15421_v7 = vld [vmem:[#allocation54_spill] sm:$0xff]  ;;  %v15425_v43 = vld [vmem:[#allocation112_spill] sm:$0xff] }
 0x71d   :  { %v13932_v31 = vsel %vm3433_vm1, %v13740_v24, %v7134_v20  ;;  %v7536_v33 = vpop.permute.xlu1 %7535  ;;  %v7755_v24 = vsel %vm3466_vm4, %v7745_v5, %v13756_v34  ;;  %v7652_v6 = vsel %vm3422_vm0, %v15422_v60, %v15421_v7  ;;  %v7732_v40 = vsel %vm3433_vm1, %v7722_v23, %v15423_v8  ;;  %v15424_v20 = vld [vmem:[#allocation121_spill] sm:$0xff] }
 0x71e   :  { %v13937_v21 = vsel %vm3466_vm4, %v7744_v59, %v7536_v33  ;;  %7503 = vrot.lane.b32.xlu0 %v6603_v11, %s8247_s25  ;;  %v7765_v18 = vsel %vm3477_vm5, %v7755_v24, %v7578_v41  ;;  %v15413_v59 = vld [vmem:[#allocation31_spill] sm:$0xff]  ;;  %v6598_v41 = vrot.slane %v6584_v14, %v8775_v49  ;;  %v7742_v11 = vsel %vm3444_vm2, %v7732_v40, %v15424_v20  ;;  %v15428_v24 = vld [vmem:[#allocation85_spill] sm:$0xff] }
 0x71f   :  { %7303 = vrot.lane.b32.xlu1 %v5993_v62, %s8249_s27  ;;  %v15415_v37 = vcombine.low %v15413_v59, %v15414_v61  ;;  %v7662_v0 = vsel %vm3433_vm1, %v7652_v6, %v15425_v43  ;;  %v15426_v33 = vld [vmem:[#allocation67_spill] sm:$0xff]  ;;  %v15431_v40 = vcombine.low %v13063_v52, %v13045_v45 }
 0x720   :  { %v7216_v58 = vpop.permute.xlu0 %7215  ;;  %v6605_v13 = vcombine.low %v6566_v4, %v6598_v41  ;;  %v7672_v62 = vsel %vm3444_vm2, %v7662_v0, %v15426_v33  ;;  %v15427_v49 = vld [vmem:[#allocation79_spill] sm:$0xff]  ;;  %v6606_v28 = vcombine.high %v6566_v4, %v6598_v41 }
 0x721   :  { %v13949_v63 = vsel %vm3455_vm3, %v13768_v39, %v7216_v58  ;;  %v7618_v53 = vpop.permute.xlu1 %7617  ;;  %v7752_v1 = vsel %vm3455_vm3, %v7742_v11, %v15427_v49  ;;  %v7682_v58 = vsel %vm3455_vm3, %v7672_v62, %v15428_v24 }
 0x722   :  { %7223 = vrot.lane.b32.xlu0 %v5991_v16, %s8247_s25  ;;  %v7775_v19 = vsel %vm3488_vm6, %v7765_v18, %v7618_v53  ;;  %v7762_v5 = vsel %vm3466_vm4, %v7752_v1, %v13705_v36  ;;  %v15429_v53 = vld [vmem:[#allocation97_spill] sm:$0xff] }
 0x723   :  { %7343 = vrot.lane.b32.xlu1 %v5994_v2, %s8250_s28  ;;  %7819 = vmatprep.subr.mxu0 %v7775_v19  ;;  %v7772_v2 = vsel %vm3477_vm5, %v7762_v5, %v15429_v53  ;;  %v15430_v19 = vld [vmem:[#allocation109_spill] sm:$0xff] }
 0x724   :  { %v7298_v34 = vpop.permute.xlu0 %7297 }
 0x725   :  { %v7106_v3 = vpop.permute.xlu1 %7105 }
 0x726   :  { %v7649_v39 = vsel %vm3422_vm0, %v15415_v37, %v7106_v3  ;;  %7543 = vrot.lane.b32.xlu0 %v6604_v55, %s8248_s26 }
 0x728   :  { %v7386_v9 = vpop.permute.xlu0 %7385 }
 0x729   :  { %v7719_v46 = vsel %vm3422_vm0, %v15420_v27, %v7386_v9  ;;  %v7188_v50 = vpop.permute.xlu1 %7187 }
 0x72a   :  { %v13976_v51 = vsel %vm3444_vm2, %v13888_v57, %v7188_v50  ;;  %7263 = vrot.lane.b32.xlu0 %v5992_v35, %s8248_s26 }
 0x72c   :  { %v7468_v56 = vpop.permute.xlu0 %7467 }
 0x72d   :  { %v13988_v22 = vsel %vm3444_vm2, %v13845_v17, %v7468_v56  ;;  %v7270_v57 = vpop.permute.xlu1 %7269  ;;  %v7692_v17 = vsel %vm3466_vm4, %v7682_v58, %v13854_v48 }
 0x72e   :  { %7583 = vrot.lane.b32.xlu0 %v6605_v13, %s8249_s27  ;;  %v7702_v14 = vsel %vm3477_vm5, %v7692_v17, %v15430_v19 }
 0x730   :  { %v7550_v30 = vpop.permute.xlu0 %7549 }
 0x731   :  { %v7352_v16 = vpop.permute.xlu1 %7351  ;;  %v7761_v60 = vsel %vm3466_vm4, %v13865_v12, %v7550_v30  ;;  %v7691_v12 = vsel %vm3466_vm4, %v13905_v42, %v7270_v57 }
 0x732   :  { %7623 = vrot.lane.b32.xlu0 %v6606_v28, %s8250_s28  ;;  %v7712_v36 = vsel %vm3488_vm6, %v7702_v14, %v7352_v16 }
 0x734   :  { %v7632_v18 = vpop.permute.xlu0 %7631 }
 0x735   :  { %v7782_v55 = vsel %vm3488_vm6, %v7772_v2, %v7632_v18  ;;  %v7494_v3 = vpop.permute.xlu1 %7493 }
 0x736   :  { %v14010_v59 = vsel %vm3455_vm3, %v13916_v47, %v7494_v3  ;;  %8043 = vmatprep.subr.msk.mxu1 %vm3574_vm7, %v7782_v55  ;;  %v7685_v47 = vsel %vm3466_vm4, %v13603_v44, %v13790_v15 }
 0x737   :  { %8044 = vmatpush1.msk.msra.mxu1 %vm3574_vm7, %v7712_v36  ;;  %v7695_v41 = vsel %vm3477_vm5, %v7685_v47, %v7298_v34 }
 0x738   :  { %v7174_v48 = vpop.permute.xlu0 %7173 }
 0x739   :  { %v14016_v61 = vsel %vm3444_vm2, %v13932_v31, %v7174_v48  ;;  %v7576_v37 = vpop.permute.xlu1 %7575 }
 0x73a   :  { %v7764_v33 = vsel %vm3477_vm5, %v13937_v21, %v7576_v37 }
 0x73c   :  { %v7256_v38 = vpop.permute.xlu0 %7255 }
 0x73d   :  { %v7146_v9 = vpop.permute.xlu1 %7145  ;;  %v7684_v57 = vsel %vm3466_vm4, %v13949_v63, %v7256_v38 }
 0x73e   :  { %v14019_v35 = vsel %vm3433_vm1, %v7649_v39, %v7146_v9 }
 0x740   :  { %v7338_v29 = vpop.permute.xlu0 %7337 }
 0x741   :  { %v7705_v32 = vsel %vm3488_vm6, %v7695_v41, %v7338_v29  ;;  %v7228_v23 = vpop.permute.xlu1 %7227 }
 0x742   :  { %7820 = vmatpush1.msra.mxu0 %v7705_v32  ;;  %v7680_v3 = vsel %vm3455_vm3, %v13976_v51, %v7228_v23 }
 0x744   :  { %v7426_v10 = vpop.permute.xlu0 %7425 }
 0x745   :  { %v14027_v31 = vsel %vm3433_vm1, %v7719_v46, %v7426_v10  ;;  %v7310_v25 = vpop.permute.xlu1 %7309 }
 0x746   :  { %v7701_v11 = vsel %vm3477_vm5, %v7691_v12, %v7310_v25 }
 0x748   :  { %v7508_v27 = vpop.permute.xlu0 %7507 }
 0x749   :  { %v7466_v50 = vpop.permute.xlu1 %7465  ;;  %v7750_v17 = vsel %vm3455_vm3, %v13988_v22, %v7508_v27 }
 0x74a   :  { %v7739_v23 = vsel %vm3444_vm2, %v14027_v31, %v7466_v50 }
 0x74c   :  { %v7590_v39 = vpop.permute.xlu0 %7589 }
 0x74d   :  { %v7548_v7 = vpop.permute.xlu1 %7547  ;;  %v7771_v15 = vsel %vm3477_vm5, %v7761_v60, %v7590_v39 }
 0x74e   :  { %v7760_v18 = vsel %vm3466_vm4, %v7750_v17, %v7548_v7 }
 0x750   :  { %v14031_v44 = vpop.permute.xlu0 %7213 }
 0x751   :  { %v7630_v34 = vpop.permute.xlu1 %7629 }
 0x752   :  { %v7781_v6 = vsel %vm3488_vm6, %v7771_v15, %v7630_v34 }
 0x753   :  { %7894 = vmatprep.subr.mxu1 %v7781_v6 }
 0x754   :  { %v7296_v4 = vpop.permute.xlu0 %7295 }
 0x755   :  { %v7186_v8 = vpop.permute.xlu1 %7185  ;;  %v7694_v28 = vsel %vm3477_vm5, %v7684_v57, %v7296_v4 }
 0x756   :  { %v7669_v15 = vsel %vm3444_vm2, %v14019_v35, %v7186_v8 }
 0x758   :  { %v7384_v46 = vpop.permute.xlu0 %7383 }
 0x759   :  { %v14039_v56 = vsel %vm3422_vm0, %v15431_v40, %v7384_v46  ;;  %v7268_v13 = vpop.permute.xlu1 %7267  ;;  %v7783_v40 = vld [vmem:[%s14137_s5] sm:$0xf] }
 0x75a   :  { %v7690_v36 = vsel %vm3466_vm4, %v7680_v3, %v7268_v13 }
 0x75c   :  { %v7534_v20 = vpop.permute.xlu0 %7533 }
 0x75d   :  { %v7350_v43 = vpop.permute.xlu1 %7349  ;;  %v7753_v41 = vsel %vm3466_vm4, %v14010_v59, %v7534_v20  ;;  %v7673_v59 = vsel %vm3455_vm3, %v14016_v61, %v14031_v44 }
 0x75e   :  { %v7711_v0 = vsel %vm3488_vm6, %v7701_v11, %v7350_v43  ;;  %v15432_v11 = vcombine.low %v13098_v54, %v13089_v26 }
 0x75f   :  { %7895 = vmatpush1.msra.mxu1 %v7711_v0 }
 0x760   :  { %v7616_v62 = vpop.permute.xlu0 %7615 }
 0x761   :  { %v7506_v49 = vpop.permute.xlu1 %7505  ;;  %v7774_v45 = vsel %vm3488_vm6, %v7764_v33, %v7616_v62 }
 0x762   :  { %7821 = vmatprep.subr.mxu0 %v7774_v45  ;;  %v7749_v25 = vsel %vm3455_vm3, %v7739_v23, %v7506_v49 }
 0x764   :  { %v14048_v52 = vpop.permute.xlu0 %7103 }
 0x765   :  { %v7588_v1 = vpop.permute.xlu1 %7587  ;;  %v7648_v43 = vsel %vm3422_vm0, %v15432_v11, %v14048_v52 }
 0x766   :  { %v7770_v2 = vsel %vm3477_vm5, %v7760_v18, %v7588_v1 }
 0x768   :  { %v7254_v30 = vpop.permute.xlu0 %7253 }
 0x769   :  { %v7226_v42 = vpop.permute.xlu1 %7225  ;;  %v7683_v31 = vsel %vm3466_vm4, %v7673_v59, %v7254_v30  ;;  %v7967_v59 = vld [vmem:[%s14138_s6] sm:$0xf]  ;;  %s8253_s6 = smov [#allocation3]  }
 0x76a   :  { %v7679_v50 = vsel %vm3455_vm3, %v7669_v15, %v7226_v42 }
 0x76c   :  { %v7336_v5 = vpop.permute.xlu0 %7335 }
 0x76d   :  { %v7704_v24 = vsel %vm3488_vm6, %v7694_v28, %v7336_v5  ;;  %v7308_v58 = vpop.permute.xlu1 %7307 }
 0x76e   :  { %7822 = vmatpush1.msra.mxu0 %v7704_v24  ;;  %v7700_v37 = vsel %vm3477_vm5, %v7690_v36, %v7308_v58 }
 0x770   :  { %v7424_v21 = vpop.permute.xlu0 %7423 }
 0x771   :  { %v7546_v16 = vpop.permute.xlu1 %7545  ;;  %v7728_v1 = vsel %vm3433_vm1, %v14039_v56, %v7424_v21 }
 0x772   :  { %v7759_v27 = vsel %vm3466_vm4, %v7749_v25, %v7546_v16 }
 0x774   :  { %v7574_v53 = vpop.permute.xlu0 %7573 }
 0x775   :  { %v7628_v19 = vpop.permute.xlu1 %7627  ;;  %v7763_v29 = vsel %vm3477_vm5, %v7753_v41, %v7574_v53 }
 0x776   :  { %v7780_v63 = vsel %vm3488_vm6, %v7770_v2, %v7628_v19 }
 0x777   :  { %7896 = vmatprep.subr.mxu1 %v7780_v63 }
 0x778   :  { %v7144_v14 = vpop.permute.xlu0 %7143 }
 0x779   :  { %v7266_v55 = vpop.permute.xlu1 %7265  ;;  %v7658_v33 = vsel %vm3433_vm1, %v7648_v43, %v7144_v14 }
 0x77a   :  { %v7689_v6 = vsel %vm3466_vm4, %v7679_v50, %v7266_v55 }
 0x77c   :  { %v7294_v48 = vpop.permute.xlu0 %7293 }
 0x77d   :  { %v7348_v22 = vpop.permute.xlu1 %7347  ;;  %v7693_v4 = vsel %vm3477_vm5, %v7683_v31, %v7294_v48  ;;  %v7971_v31 = vld [vmem:[%s14139_s7] sm:$0xf]  ;;  %s8023_s7 = sshll.u32 %s8253_s6, 4  ;;  %s8024_s7 = int_to_ptr.vmem [resolvable:$true] %s8023_s7 }
 0x77e   :  { %v7710_v38 = vsel %vm3488_vm6, %v7700_v37, %v7348_v22  ;;  %p8222_p1 = scmp.lt.s32.totalorder %s8024_s7, %s8024_s7 }
 0x77f   :  { %7897 = vmatpush1.msra.mxu1 %v7710_v38 }
 0x780   :  { %v7464_v9 = vpop.permute.xlu0 %7463 }
 0x781   :  { %v7586_v47 = vpop.permute.xlu1 %7585  ;;  %v7738_v57 = vsel %vm3444_vm2, %v7728_v1, %v7464_v9 }
 0x782   :  { %v7769_v7 = vsel %vm3477_vm5, %v7759_v27, %v7586_v47 }
 0x784   :  { %v7614_v32 = vpop.permute.xlu0 %7613 }
 0x785   :  { %v7306_v10 = vpop.permute.xlu1 %7305  ;;  %v7773_v51 = vsel %vm3488_vm6, %v7763_v29, %v7614_v32 }
 0x786   :  { %7823 = vmatprep.subr.mxu0 %v7773_v51  ;;  %v7699_v61 = vsel %vm3477_vm5, %v7689_v6, %v7306_v10 }
 0x788   :  { %v7184_v39 = vpop.permute.xlu0 %7183 }
 0x789   :  { %v7626_v60 = vpop.permute.xlu1 %7625  ;;  %v7668_v62 = vsel %vm3444_vm2, %v7658_v33, %v7184_v39 }
 0x78a   :  { %v7779_v34 = vsel %vm3488_vm6, %v7769_v7, %v7626_v60 }
 0x78b   :  { %7898 = vmatprep.subr.mxu1 %v7779_v34 }
 0x78c   :  { %v7334_v46 = vpop.permute.xlu0 %7333 }
 0x78d   :  { %v7703_v35 = vsel %vm3488_vm6, %v7693_v4, %v7334_v46  ;;  %v7346_v44 = vpop.permute.xlu1 %7345  ;;  %v7992_v4 = vld [vmem:[%s14133_s1] sm:$0xff]  ;;  %v7993_v46 = vld [vmem:[%s14133_s1 + $0x8] sm:$0xff]  ;;  %s8217_s1 = scalar_lea.vmem %s8024_s7, 256 }
 0x78e   :  { %v7709_v8 = vsel %vm3488_vm6, %v7699_v61, %v7346_v44  ;;  %7824 = vmatpush1.msra.mxu0 %v7703_v35  ;;  %v7996_v61 = vcombine.high %v7992_v4, %v7992_v4  ;;  %v7997_v35 = vcombine.high %v7993_v46, %v7993_v46  ;;  %p8218_p0 = scmp.ne.s32.totalorder %s8024_s7, %s8217_s1  ;;  %p8223_p2 = scmp.lt.s32.totalorder %s8217_s1, %s8217_s1 }
 0x78f   :  { %7899 = vmatpush1.msra.mxu1 %v7709_v8  ;;  %8042 = vmatmul.mubr.msk.f32.vlgmr.msra.gmra.mxu0 %vm3570_vm8, %v7783_v40 }
 0x790   :  { %v7504_v13 = vpop.permute.xlu0 %7503  ;;  %p8224_p3 = por %p8223_p2, %p8222_p1 }
 0x791   :  { %v7304_v49 = vpop.permute.xlu1 %7303  ;;  %v7748_v26 = vsel %vm3455_vm3, %v7738_v57, %v7504_v13 }
 0x792   :  { %p8225_p4 = pnand %p8224_p3, %p8218_p0 }
 0x794   :  { %v7224_v12 = vpop.permute.xlu0 %7223 }
 0x795   :  { %v7678_v45 = vsel %vm3455_vm3, %v7668_v62, %v7224_v12  ;;  %v7344_v24 = vpop.permute.xlu1 %7343 }
 0x798   :  { %v7544_v20 = vpop.permute.xlu0 %7543 }
 0x799   :  { %v7758_v54 = vsel %vm3466_vm4, %v7748_v26, %v7544_v20 }
 0x79c   :  { %v7264_v0 = vpop.permute.xlu0 %7263 }
 0x79d   :  { %v7688_v30 = vsel %vm3466_vm4, %v7678_v45, %v7264_v0 }
 0x79e   :  { %v7698_v52 = vsel %vm3477_vm5, %v7688_v30, %v7304_v49 }
 0x79f   :  { %v7708_v56 = vsel %vm3488_vm6, %v7698_v52, %v7344_v24 }
 0x7a0   :  { %v7584_v42 = vpop.permute.xlu0 %7583 }
 0x7a1   :  { %v7768_v28 = vsel %vm3477_vm5, %v7758_v54, %v7584_v42 }
 0x7a4   :  { %v7624_v5 = vpop.permute.xlu0 %7623 }
 0x7a5   :  { %v7778_v58 = vsel %vm3488_vm6, %v7768_v28, %v7624_v5 }
 0x7a6   :  { %7900 = vmatprep.subr.mxu1 %v7778_v58 }
 0x7a7   :  { %7901 = vmatpush1.msra.mxu1 %v7708_v56 }
 0x7a8   :  { %8045 = vmatmul.mubr.msk.f32.vlgmr.msra.gmra.mxu1 %vm3570_vm8, %v7783_v40 }
 0x84f   :  { %v7859_v21 = vpop.f32.mrf.mxu0 }
 0x850   :  { %v7950_v17 = vmul.f32 %v7859_v21, %v7859_v21  ;;  %v7941_v53 = vsel %vm3574_vm7, %v7859_v21, 0.0 }
 0x851   :  { %v7861_v16 = vpop.f32.mrf.mxu0 }
 0x852   :  { %v7951_v18 = vmul.f32 %v7861_v16, %v7861_v16  ;;  %v7942_v2 = vsel %vm3574_vm7, %v7861_v16, 0.0  ;;  %v7954_v19 = vsel %vm3574_vm7, %v7950_v17, 0.0 }
 0x853   :  { %v7943_v14 = vadd.f32 %v7942_v2, %v7941_v53 }
 0x854   :  { %v7955_v63 = vsel %vm3574_vm7, %v7951_v18, 0.0 }
 0x855   :  { %v7956_v48 = vadd.f32 %v7955_v63, %v7954_v19 }
 0x868   :  { %v7936_v55 = vpop.f32.mrf.mxu1 }
 0x869   :  { %v7944_v3 = vsel %vm3574_vm7, %v7936_v55, 0.0  ;;  %v7952_v36 = vmul.f32 %v7936_v55, %v7936_v55 }
 0x86a   :  { %v7945_v37 = vadd.f32 %v7944_v3, %v7943_v14  ;;  %v7938_v22 = vpop.f32.mrf.mxu1 }
 0x86b   :  { %v7957_v38 = vsel %vm3574_vm7, %v7952_v36, 0.0  ;;  %v7946_v9 = vsel %vm3574_vm7, %v7938_v22, 0.0  ;;  %v7953_v47 = vmul.f32 %v7938_v22, %v7938_v22 }
 0x86c   :  { %v7947_v41 = vadd.f32 %v7946_v9, %v7945_v37  ;;  %v7958_v29 = vadd.f32 %v7957_v38, %v7956_v48 }
 0x86d   :  { %v7959_v32 = vsel %vm3574_vm7, %v7953_v47, 0.0 }
 0x86e   :  { %7948 = vadd.xlane.f32.xlu0 %v7947_v41  ;;  %v7960_v10 = vadd.f32 %v7959_v32, %v7958_v29 }
 0x870   :  { %7961 = vadd.xlane.f32.xlu1 %v7960_v10 }
 0x8f7   :  { %v7949_v51 = vpop.xlane.xlu0 %7948 }
 0x8f8   :  { %v7963_v23 = vmul.f32 0.001953125, %v7949_v51 }
 0x8f9   :  { %v7962_v25 = vpop.xlane.xlu1 %7961 }
 0x8fa   :  { %v7965_v27 = vmul.f32 %v7963_v23, %v7963_v23  ;;  %v7964_v39 = vmul.f32 0.001953125, %v7962_v25 }
 0x8fc   :  { %v7966_v7 = vsub.f32 %v7964_v39, %v7965_v27 }
 0x8fe   :  { %v7968_v60 = vadd.f32 1e-05, %v7966_v7 }
 0x900   :  { %8159 = vrsqrt.f32 %v7968_v60 }
 0x90d   :  { %v8160_v15 = vpop.eup %8159 }
 0x90e   :  { %v7970_v34 = vmul.f32 %v8160_v15, %v7967_v59 }
 0x910   :  { %7976 = vperm.xlu0 %8063, %v7970_v34   ;;  %v7972_v50 = vmul.f32 %v7970_v34, %v7963_v23 }
 0x912   :  { %v7973_v6 = vsub.f32 %v7971_v31, %v7972_v50 }
 0x914   :  { %7985 = vperm.xlu1 %8064, %v7973_v6  }
 0x98b   :  { %v7977_v40 = vpop.permute.xlu0 %7976 }
 0x98c   :  { %v7979_v44 = vmul.f32 %v7977_v40, %v7859_v21  ;;  %v7980_v8 = vmul.f32 %v7977_v40, %v7861_v16  ;;  %v7981_v13 = vmul.f32 %v7977_v40, %v7936_v55  ;;  %v7982_v12 = vmul.f32 %v7977_v40, %v7938_v22 }
 0x98f   :  { %v7986_v20 = vpop.permute.xlu1 %7985 }
 0x990   :  { %v7988_v11 = vadd.f32 %v7986_v20, %v7979_v44  ;;  %v7989_v43 = vadd.f32 %v7986_v20, %v7980_v8  ;;  %v7990_v0 = vadd.f32 %v7986_v20, %v7981_v13  ;;  %v7991_v33 = vadd.f32 %v7986_v20, %v7982_v12 }
 0x992   :  { %v8000_v62 = vadd.f32 %v7992_v4, %v7988_v11  ;;  %v8001_v49 = vadd.f32 %v7996_v61, %v7989_v43  ;;  %v8002_v45 = vadd.f32 %v7993_v46, %v7990_v0  ;;  %v8003_v1 = vadd.f32 %v7997_v35, %v7991_v33 }
 0x994   :  { %v8004_v30 = vmax.f32 %v8000_v62, 0.0  ;;  %v8005_v42 = vmax.f32 %v8001_v49, 0.0  ;;  %v8006_v57 = vmax.f32 %v8002_v45, 0.0  ;;  %v8007_v26 = vmax.f32 %v8003_v1, 0.0 }
 0x996   :  { %v8012_v54 = vcombine.low %v8004_v30, %v8005_v42  ;;  %v8013_v52 = vcombine.low %v8006_v57, %v8007_v26 }
 0x998   :  { %8016 = vst [vmem:[#allocation3] sm:$0xff] %v8012_v54  ;;  %8017 = vst [vmem:[#allocation3 + $0x8] sm:$0xff] %v8013_v52 }
 0x999   :  { %8228 = shalt.err (!%p8225_p4)
}
 0x99a   :  { %s8254_s28 = smov 128   ;;  %s8255_s10 = smov 8  }
 0x99b   :  { %8029 = dma.vmem_to_hbm [thread:$0]  %s8024_s7, 256, %s14140_s8, [#allocation4], %s8254_s28, %s8254_s28, %s8255_s10  }
 0x99c   :  { %8237 = dma.done.wait [#allocation4], 256  }
 0x99d   :  { %8238 = vsyncadd [#allocation4], 4294967040 }
 0x99e   :  { %8033 = vsyncpa [#allocation4], 1 }

</bundles_post_ra>
